<compile_context>
chip_gen: v7x
topology: tpu7x:2x2x1
jax: 0.10.0
libtpu: 0.0.40
codegen_flags: <defaults>
</compile_context>

<pallas_src>
import functools
import math

import jax
import jax.numpy as jnp
from jax.experimental import pallas as pl
from jax.experimental.pallas import tpu as pltpu


# ----------------------------------------------------------------------------
# Synthetic CLIP-vision config (small shapes)
# ----------------------------------------------------------------------------
BATCH = 2
IMG_CHANNELS = 3
IMG_HW = 32
PATCH = 8
GRID = IMG_HW // PATCH                    # 4
NUM_PATCHES = GRID * GRID                 # 16
SEQ = NUM_PATCHES + 1                     # 17 (class token + patches)
SEQ_PAD = 24                              # sublane-aligned token count / image
PATCH_DIM = IMG_CHANNELS * PATCH * PATCH  # 192
HIDDEN = 128                              # lane-dense
HEADS = 4
HEAD_DIM = HIDDEN // HEADS                # 32
MLP_DIM = 512
NUM_LAYERS = 2
LN_EPS = 1e-5
ATTN_SCALE = 1.0 / math.sqrt(HEAD_DIM)

_VMEM = pl.BlockSpec(memory_space=pltpu.MemorySpace.VMEM)


# ----------------------------------------------------------------------------
# In-kernel helpers (operate on VMEM-resident values)
# ----------------------------------------------------------------------------
def _layernorm(x, g, b):
    """Row-wise LayerNorm + affine, fp32."""
    mean = jnp.mean(x, axis=-1, keepdims=True)
    xc = x - mean
    var = jnp.mean(xc * xc, axis=-1, keepdims=True)
    return xc * jax.lax.rsqrt(var + LN_EPS) * g + b


def _mm(x_f32, w_bf16, bias_f32):
    """bf16-operand MXU matmul with fp32 accumulation and fused bias add."""
    y = jnp.dot(x_f32.astype(jnp.bfloat16), w_bf16,
                preferred_element_type=jnp.float32)
    return y + bias_f32


# ----------------------------------------------------------------------------
# The single fused kernel: whole CLIP vision forward in one pallas_call
# ----------------------------------------------------------------------------
def _fused_clip_kernel(patches_ref, patch_w_ref, tok_embed_ref,
                       pre_g_ref, pre_b_ref,
                       ln1_g_ref, ln1_b_ref,
                       qkv_w_ref, qkv_b_ref,
                       out_w_ref, out_b_ref,
                       ln2_g_ref, ln2_b_ref,
                       fc1_w_ref, fc1_b_ref,
                       fc2_w_ref, fc2_b_ref,
                       post_g_ref, post_b_ref,
                       last_ref, pooled_ref,
                       attn_scr, *, batch):
    # --- patch embedding (CLIP patch conv has no bias) + class/pos embed ---
    # patches_ref rows are already laid out in padded token order, with zero
    # rows at class-token / pad positions; tok_embed supplies cls + pos adds.
    pe = jnp.dot(patches_ref[...], patch_w_ref[...],
                 preferred_element_type=jnp.float32)          # (TOK, H) f32
    hid = pe + tok_embed_ref[...]
    hid = _layernorm(hid, pre_g_ref[...], pre_b_ref[...])      # pre-LN

    # key-padding bias: pad tokens (index >= SEQ) never contribute as keys
    key_ids = jax.lax.broadcasted_iota(jnp.int32, (1, SEQ_PAD), 1)
    key_bias = jnp.where(key_ids < SEQ,
                         jnp.float32(0.0), jnp.float32(-1e30))  # (1, SEQ_PAD)

    for layer in range(NUM_LAYERS):                # static unroll (2 layers)
        # ---------------- self-attention sub-block ----------------------
        hn = _layernorm(hid, ln1_g_ref[layer], ln1_b_ref[layer])
        qkv = _mm(hn, qkv_w_ref[layer], qkv_b_ref[layer])      # (TOK, 3H) f32

        for b in range(batch):                     # static loops: B*HEADS = 8
            r0 = b * SEQ_PAD
            for h in range(HEADS):
                c0 = h * HEAD_DIM
                q = qkv[r0:r0 + SEQ_PAD, c0:c0 + HEAD_DIM]
                k = qkv[r0:r0 + SEQ_PAD,
                        HIDDEN + c0:HIDDEN + c0 + HEAD_DIM]
                v = qkv[r0:r0 + SEQ_PAD,
                        2 * HIDDEN + c0:2 * HIDDEN + c0 + HEAD_DIM]
                # scores = q @ k^T (contraction on head_dim), fp32 accum
                s = jax.lax.dot_general(
                    q.astype(jnp.bfloat16), k.astype(jnp.bfloat16),
                    dimension_numbers=(((1,), (1,)), ((), ())),
                    preferred_element_type=jnp.float32) * ATTN_SCALE
                s = s + key_bias                    # mask pad keys
                m = jnp.max(s, axis=-1, keepdims=True)
                p = jnp.exp(s - m)
                p = p / jnp.sum(p, axis=-1, keepdims=True)   # exact softmax
                o = jnp.dot(p.astype(jnp.bfloat16), v.astype(jnp.bfloat16),
                            preferred_element_type=jnp.float32)
                # write this head's 32-lane slice straight into the scratch
                attn_scr[r0:r0 + SEQ_PAD, c0:c0 + HEAD_DIM] = o

        attn = attn_scr[...]                                   # (TOK, H) f32
        # out-projection with fused bias + residual add
        hid = _mm(attn, out_w_ref[layer], out_b_ref[layer]) + hid

        # ---------------- MLP sub-block ----------------------------------
        hn = _layernorm(hid, ln2_g_ref[layer], ln2_b_ref[layer])
        h1 = _mm(hn, fc1_w_ref[layer], fc1_b_ref[layer])
        h1 = h1 * jax.nn.sigmoid(1.702 * h1)        # quick-GELU, fp32, fused
        hid = _mm(h1, fc2_w_ref[layer], fc2_b_ref[layer]) + hid   # residual

    # --- outputs: lane-dense (TOK, 128) hidden states + pooled cls rows ----
    last_ref[...] = hid.astype(last_ref.dtype)
    pg = post_g_ref[...]
    pb = post_b_ref[...]
    for b in range(batch):
        r0 = b * SEQ_PAD                           # class-token row of image b
        cls = hid[r0:r0 + 1, :]
        pooled_ref[b:b + 1, :] = _layernorm(cls, pg, pb).astype(pooled_ref.dtype)


def fused_clip_forward(params, patches_padded, tok_embed, batch):
    tok = patches_padded.shape[0]
    kernel = functools.partial(_fused_clip_kernel, batch=batch)
    return pl.pallas_call(
        kernel,
        out_shape=(jax.ShapeDtypeStruct((tok, HIDDEN), jnp.float32),
                   jax.ShapeDtypeStruct((batch, HIDDEN), jnp.float32)),
        in_specs=[_VMEM] * 19,
        out_specs=(_VMEM, _VMEM),
        scratch_shapes=[pltpu.VMEM((tok, HIDDEN), jnp.float32)],
    )(patches_padded, params["patch_w"], tok_embed,
      params["pre_ln_g"], params["pre_ln_b"],
      params["ln1_g"], params["ln1_b"],
      params["qkv_w"], params["qkv_b"],
      params["out_w"], params["out_b"],
      params["ln2_g"], params["ln2_b"],
      params["fc1_w"], params["fc1_b"],
      params["fc2_w"], params["fc2_b"],
      params["post_ln_g"], params["post_ln_b"])


# ----------------------------------------------------------------------------
# Parameter construction (deterministic, in-script; stacked + pre-cast once)
# ----------------------------------------------------------------------------
def init_params(key):
    keys = jax.random.split(key, 8)
    std = 0.02
    L = NUM_LAYERS

    def nrm(k, shape):
        return std * jax.random.normal(k, shape, jnp.float32)

    params = {
        # patch-embedding conv as a (in, out) matmul weight, bf16 for the MXU
        "patch_w": nrm(keys[0], (PATCH_DIM, HIDDEN)).astype(jnp.bfloat16),
        "pre_ln_g": jnp.ones((1, HIDDEN), jnp.float32),
        "pre_ln_b": jnp.zeros((1, HIDDEN), jnp.float32),
        # per-layer weights stacked along a leading layer axis
        "ln1_g": jnp.ones((L, 1, HIDDEN), jnp.float32),
        "ln1_b": jnp.zeros((L, 1, HIDDEN), jnp.float32),
        "qkv_w": nrm(keys[1], (L, HIDDEN, 3 * HIDDEN)).astype(jnp.bfloat16),
        "qkv_b": jnp.zeros((L, 1, 3 * HIDDEN), jnp.float32),
        "out_w": nrm(keys[2], (L, HIDDEN, HIDDEN)).astype(jnp.bfloat16),
        "out_b": jnp.zeros((L, 1, HIDDEN), jnp.float32),
        "ln2_g": jnp.ones((L, 1, HIDDEN), jnp.float32),
        "ln2_b": jnp.zeros((L, 1, HIDDEN), jnp.float32),
        "fc1_w": nrm(keys[3], (L, HIDDEN, MLP_DIM)).astype(jnp.bfloat16),
        "fc1_b": jnp.zeros((L, 1, MLP_DIM), jnp.float32),
        "fc2_w": nrm(keys[4], (L, MLP_DIM, HIDDEN)).astype(jnp.bfloat16),
        "fc2_b": jnp.zeros((L, 1, HIDDEN), jnp.float32),
        "post_ln_g": jnp.ones((1, HIDDEN), jnp.float32),
        "post_ln_b": jnp.zeros((1, HIDDEN), jnp.float32),
    }

    class_embed = nrm(keys[5], (HIDDEN,))
    pos_embed = nrm(keys[6], (SEQ, HIDDEN))
    # Pre-folded per-token additive embedding, padded to SEQ_PAD rows:
    #   row 0            -> class_embed + pos_embed[0]
    #   rows 1..SEQ-1    -> pos_embed[1:]
    #   rows SEQ..PAD-1  -> 0 (dead pad rows)
    tok = jnp.zeros((SEQ_PAD, HIDDEN), jnp.float32)
    tok = tok.at[0].set(class_embed + pos_embed[0])
    tok = tok.at[1:SEQ].set(pos_embed[1:])
    params["tok_embed"] = tok
    return params


# ----------------------------------------------------------------------------
# Synthetic CLIP vision forward (the "safety_model")
# ----------------------------------------------------------------------------
def clip_vision_forward(params, clip_inputs):
    x = clip_inputs.astype(jnp.float32)                 # (B, 3, H, W) NCHW
    B = x.shape[0]

    # Non-overlapping patch extraction == pure layout plumbing, done once per
    # call on the tiny input; padded directly into token order (row 0 per
    # image reserved for the class token, trailing rows are dead pad rows).
    # TODO(synk): the conv2d patch embedding itself is expressed as a matmul
    # inside the fused kernel; only this layout reshuffle stays in XLA.
    patches = x.reshape(B, IMG_CHANNELS, GRID, PATCH, GRID, PATCH)
    patches = patches.transpose(0, 2, 4, 1, 3, 5).reshape(
        B, NUM_PATCHES, PATCH_DIM)
    patches_padded = jnp.zeros((B, SEQ_PAD, PATCH_DIM), jnp.float32)
    patches_padded = patches_padded.at[:, 1:1 + NUM_PATCHES].set(patches)
    patches_padded = patches_padded.reshape(
        B * SEQ_PAD, PATCH_DIM).astype(jnp.bfloat16)

    tok_embed = jnp.broadcast_to(
        params["tok_embed"][None], (B, SEQ_PAD, HIDDEN)
    ).reshape(B * SEQ_PAD, HIDDEN)

    last_flat, pooled = fused_clip_forward(params, patches_padded,
                                           tok_embed, B)
    last_hidden_state = last_flat.reshape(B, SEQ_PAD, HIDDEN)[:, :SEQ, :]
    # HF-style ModelOutput dict: values() order is preserved.
    return {"last_hidden_state": last_hidden_state, "pooler_output": pooled}


class SyntheticCLIPVisionSafetyModel:
    """Stand-in for the externally injected `safety_model` (CLIP vision tower)."""
    # TODO(synk): the real safety_model is an injected diffusers/transformers
    # module; this synthetic one mirrors its structure and dict output only.

    def __init__(self, params):
        self.params = params
        self._fwd = jax.jit(functools.partial(clip_vision_forward, params))

    def __call__(self, clip_inputs):
        return self._fwd(clip_inputs)


class NeuronSafetyModelWrap:
    """JAX analogue of the PyTorch NeuronSafetyModelWrap."""

    def __init__(self, safety_model):
        self.safety_model = safety_model

    def __call__(self, clip_inputs):
        return list(self.safety_model(clip_inputs).values())


# ----------------------------------------------------------------------------
# Main
# ----------------------------------------------------------------------------
if __name__ == "__main__":
    key = jax.random.PRNGKey(0)
    k_param, k_in = jax.random.split(key)

    params = init_params(k_param)
    model = NeuronSafetyModelWrap(SyntheticCLIPVisionSafetyModel(params))

    clip_inputs = jax.random.normal(
        k_in, (BATCH, IMG_CHANNELS, IMG_HW, IMG_HW), jnp.float32)

    outputs = model(clip_inputs)
    for o in outputs:
        jax.block_until_ready(o)

    last_hidden_state, pooler_output = outputs
    assert tuple(last_hidden_state.shape) == (BATCH, SEQ, HIDDEN)
    assert tuple(pooler_output.shape) == (BATCH, HIDDEN)
    assert bool(jnp.all(jnp.isfinite(last_hidden_state)))
    assert bool(jnp.all(jnp.isfinite(pooler_output)))

    print("KERNEL_OK")
</pallas_src>

<mosaic_0001>
module attributes {stable_mosaic.version = 11 : i64} {
  func.func @_fused_clip_kernel(%arg0: memref<48x192xbf16, #tpu.memory_space<vmem>>, %arg1: memref<192x128xbf16, #tpu.memory_space<vmem>>, %arg2: memref<48x128xf32, #tpu.memory_space<vmem>>, %arg3: memref<1x128xf32, #tpu.memory_space<vmem>>, %arg4: memref<1x128xf32, #tpu.memory_space<vmem>>, %arg5: memref<2x1x128xf32, #tpu.memory_space<vmem>>, %arg6: memref<2x1x128xf32, #tpu.memory_space<vmem>>, %arg7: memref<2x128x384xbf16, #tpu.memory_space<vmem>>, %arg8: memref<2x1x384xf32, #tpu.memory_space<vmem>>, %arg9: memref<2x128x128xbf16, #tpu.memory_space<vmem>>, %arg10: memref<2x1x128xf32, #tpu.memory_space<vmem>>, %arg11: memref<2x1x128xf32, #tpu.memory_space<vmem>>, %arg12: memref<2x1x128xf32, #tpu.memory_space<vmem>>, %arg13: memref<2x128x512xbf16, #tpu.memory_space<vmem>>, %arg14: memref<2x1x512xf32, #tpu.memory_space<vmem>>, %arg15: memref<2x512x128xbf16, #tpu.memory_space<vmem>>, %arg16: memref<2x1x128xf32, #tpu.memory_space<vmem>>, %arg17: memref<1x128xf32, #tpu.memory_space<vmem>>, %arg18: memref<1x128xf32, #tpu.memory_space<vmem>>, %arg19: memref<48x128xf32, #tpu.memory_space<vmem>>, %arg20: memref<2x128xf32, #tpu.memory_space<vmem>>, %arg21: memref<48x128xf32, #tpu.memory_space<vmem>>) attributes {dimension_semantics = [], scalar_prefetch = 0 : i64, scratch_operands = 1 : i64, tpu.core_type = #tpu.core_type<tc>} {
    %c0 = arith.constant 0 : index
    %c0_0 = arith.constant 0 : index
    %0 = vector.load %arg0[%c0, %c0_0] : memref<48x192xbf16, #tpu.memory_space<vmem>>, vector<48x192xbf16>
    %c0_1 = arith.constant 0 : index
    %c0_2 = arith.constant 0 : index
    %1 = vector.load %arg1[%c0_1, %c0_2] : memref<192x128xbf16, #tpu.memory_space<vmem>>, vector<192x128xbf16>
    %cst = arith.constant dense<0.000000e+00> : vector<48x128xf32>
    %2 = tpu.matmul %0, %1, %cst {dimension_numbers = #tpu.dot_dimension_numbers<[1], [0], [0], [1], [0, 0, 1, 1], [], []>} : vector<48x192xbf16>, vector<192x128xbf16>, vector<48x128xf32> -> vector<48x128xf32>
    %c0_3 = arith.constant 0 : index
    %c0_4 = arith.constant 0 : index
    %3 = vector.load %arg2[%c0_3, %c0_4] : memref<48x128xf32, #tpu.memory_space<vmem>>, vector<48x128xf32>
    %4 = arith.addf %2, %3 : vector<48x128xf32>
    %c0_5 = arith.constant 0 : index
    %c0_6 = arith.constant 0 : index
    %5 = vector.load %arg3[%c0_5, %c0_6] : memref<1x128xf32, #tpu.memory_space<vmem>>, vector<1x128xf32>
    %c0_7 = arith.constant 0 : index
    %c0_8 = arith.constant 0 : index
    %6 = vector.load %arg4[%c0_7, %c0_8] : memref<1x128xf32, #tpu.memory_space<vmem>>, vector<1x128xf32>
    %cst_9 = arith.constant dense<0.000000e+00> : vector<48xf32>
    %7 = vector.multi_reduction <add>, %4, %cst_9 [1] : vector<48x128xf32> to vector<48xf32>
    %8 = vector.shape_cast %7 : vector<48xf32> to vector<48x1xf32>
    %cst_10 = arith.constant 1.280000e+02 : f32
    %9 = vector.broadcast %cst_10 : f32 to vector<48x1xf32>
    %10 = arith.divf %8, %9 : vector<48x1xf32>
    %11 = vector.broadcast %10 : vector<48x1xf32> to vector<48x128xf32>
    %12 = arith.subf %4, %11 : vector<48x128xf32>
    %13 = arith.mulf %12, %12 : vector<48x128xf32>
    %cst_11 = arith.constant dense<0.000000e+00> : vector<48xf32>
    %14 = vector.multi_reduction <add>, %13, %cst_11 [1] : vector<48x128xf32> to vector<48xf32>
    %15 = vector.shape_cast %14 : vector<48xf32> to vector<48x1xf32>
    %cst_12 = arith.constant 1.280000e+02 : f32
    %16 = vector.broadcast %cst_12 : f32 to vector<48x1xf32>
    %17 = arith.divf %15, %16 : vector<48x1xf32>
    %cst_13 = arith.constant 9.99999974E-6 : f32
    %18 = vector.broadcast %cst_13 : f32 to vector<48x1xf32>
    %19 = arith.addf %17, %18 : vector<48x1xf32>
    %20 = math.rsqrt %19 : vector<48x1xf32>
    %21 = vector.broadcast %20 : vector<48x1xf32> to vector<48x128xf32>
    %22 = arith.mulf %12, %21 : vector<48x128xf32>
    %23 = vector.broadcast %5 : vector<1x128xf32> to vector<48x128xf32>
    %24 = arith.mulf %22, %23 : vector<48x128xf32>
    %25 = vector.broadcast %6 : vector<1x128xf32> to vector<48x128xf32>
    %26 = arith.addf %24, %25 : vector<48x128xf32>
    %27 = tpu.iota {dimensions = array<i32: 1>} : vector<1x24xi32>
    %c17_i32 = arith.constant 17 : i32
    %28 = vector.broadcast %c17_i32 : i32 to vector<1x24xi32>
    %29 = arith.cmpi slt, %27, %28 : vector<1x24xi32>
    %cst_14 = arith.constant 0.000000e+00 : f32
    %cst_15 = arith.constant -1.000000e+30 : f32
    %30 = vector.broadcast %cst_14 : f32 to vector<1x24xf32>
    %31 = vector.broadcast %cst_15 : f32 to vector<1x24xf32>
    %32 = arith.select %29, %30, %31 : vector<1x24xi1>, vector<1x24xf32>
    %c0_16 = arith.constant 0 : index
    %c0_17 = arith.constant 0 : index
    %c0_18 = arith.constant 0 : index
    %33 = vector.load %arg5[%c0_16, %c0_17, %c0_18] : memref<2x1x128xf32, #tpu.memory_space<vmem>>, vector<1x1x128xf32>
    %34 = vector.shape_cast %33 : vector<1x1x128xf32> to vector<1x128xf32>
    %c0_19 = arith.constant 0 : index
    %c0_20 = arith.constant 0 : index
    %c0_21 = arith.constant 0 : index
    %35 = vector.load %arg6[%c0_19, %c0_20, %c0_21] : memref<2x1x128xf32, #tpu.memory_space<vmem>>, vector<1x1x128xf32>
    %36 = vector.shape_cast %35 : vector<1x1x128xf32> to vector<1x128xf32>
    %cst_22 = arith.constant dense<0.000000e+00> : vector<48xf32>
    %37 = vector.multi_reduction <add>, %26, %cst_22 [1] : vector<48x128xf32> to vector<48xf32>
    %38 = vector.shape_cast %37 : vector<48xf32> to vector<48x1xf32>
    %cst_23 = arith.constant 1.280000e+02 : f32
    %39 = vector.broadcast %cst_23 : f32 to vector<48x1xf32>
    %40 = arith.divf %38, %39 : vector<48x1xf32>
    %41 = vector.broadcast %40 : vector<48x1xf32> to vector<48x128xf32>
    %42 = arith.subf %26, %41 : vector<48x128xf32>
    %43 = arith.mulf %42, %42 : vector<48x128xf32>
    %cst_24 = arith.constant dense<0.000000e+00> : vector<48xf32>
    %44 = vector.multi_reduction <add>, %43, %cst_24 [1] : vector<48x128xf32> to vector<48xf32>
    %45 = vector.shape_cast %44 : vector<48xf32> to vector<48x1xf32>
    %cst_25 = arith.constant 1.280000e+02 : f32
    %46 = vector.broadcast %cst_25 : f32 to vector<48x1xf32>
    %47 = arith.divf %45, %46 : vector<48x1xf32>
    %cst_26 = arith.constant 9.99999974E-6 : f32
    %48 = vector.broadcast %cst_26 : f32 to vector<48x1xf32>
    %49 = arith.addf %47, %48 : vector<48x1xf32>
    %50 = math.rsqrt %49 : vector<48x1xf32>
    %51 = vector.broadcast %50 : vector<48x1xf32> to vector<48x128xf32>
    %52 = arith.mulf %42, %51 : vector<48x128xf32>
    %53 = vector.broadcast %34 : vector<1x128xf32> to vector<48x128xf32>
    %54 = arith.mulf %52, %53 : vector<48x128xf32>
    %55 = vector.broadcast %36 : vector<1x128xf32> to vector<48x128xf32>
    %56 = arith.addf %54, %55 : vector<48x128xf32>
    %c0_27 = arith.constant 0 : index
    %c0_28 = arith.constant 0 : index
    %c0_29 = arith.constant 0 : index
    %57 = vector.load %arg7[%c0_27, %c0_28, %c0_29] : memref<2x128x384xbf16, #tpu.memory_space<vmem>>, vector<1x128x384xbf16>
    %58 = vector.shape_cast %57 : vector<1x128x384xbf16> to vector<128x384xbf16>
    %c0_30 = arith.constant 0 : index
    %c0_31 = arith.constant 0 : index
    %c0_32 = arith.constant 0 : index
    %59 = vector.load %arg8[%c0_30, %c0_31, %c0_32] : memref<2x1x384xf32, #tpu.memory_space<vmem>>, vector<1x1x384xf32>
    %60 = vector.shape_cast %59 : vector<1x1x384xf32> to vector<1x384xf32>
    %61 = arith.truncf %56 : vector<48x128xf32> to vector<48x128xbf16>
    %cst_33 = arith.constant dense<0.000000e+00> : vector<48x384xf32>
    %62 = tpu.matmul %61, %58, %cst_33 {dimension_numbers = #tpu.dot_dimension_numbers<[1], [0], [0], [1], [0, 0, 1, 1], [], []>} : vector<48x128xbf16>, vector<128x384xbf16>, vector<48x384xf32> -> vector<48x384xf32>
    %63 = vector.broadcast %60 : vector<1x384xf32> to vector<48x384xf32>
    %64 = arith.addf %62, %63 : vector<48x384xf32>
    %65 = vector.extract_strided_slice %64 {offsets = [0, 0], sizes = [24, 32], strides = [1, 1]} : vector<48x384xf32> to vector<24x32xf32>
    %66 = vector.extract_strided_slice %64 {offsets = [0, 128], sizes = [24, 32], strides = [1, 1]} : vector<48x384xf32> to vector<24x32xf32>
    %67 = vector.extract_strided_slice %64 {offsets = [0, 256], sizes = [24, 32], strides = [1, 1]} : vector<48x384xf32> to vector<24x32xf32>
    %68 = arith.truncf %65 : vector<24x32xf32> to vector<24x32xbf16>
    %69 = arith.truncf %66 : vector<24x32xf32> to vector<24x32xbf16>
    %cst_34 = arith.constant dense<0.000000e+00> : vector<24x24xf32>
    %70 = tpu.matmul %68, %69, %cst_34 {dimension_numbers = #tpu.dot_dimension_numbers<[1], [1], [0], [0], [0, 0, 1, 0], [], []>} : vector<24x32xbf16>, vector<24x32xbf16>, vector<24x24xf32> -> vector<24x24xf32>
    %cst_35 = arith.constant 0.176776692 : f32
    %71 = vector.broadcast %cst_35 : f32 to vector<24x24xf32>
    %72 = arith.mulf %70, %71 : vector<24x24xf32>
    %73 = vector.broadcast %32 : vector<1x24xf32> to vector<24x24xf32>
    %74 = arith.addf %72, %73 : vector<24x24xf32>
    %cst_36 = arith.constant dense<0xFF800000> : vector<24xf32>
    %75 = vector.multi_reduction <maximumf>, %74, %cst_36 [1] : vector<24x24xf32> to vector<24xf32>
    %76 = vector.shape_cast %75 : vector<24xf32> to vector<24x1xf32>
    %77 = vector.broadcast %76 : vector<24x1xf32> to vector<24x24xf32>
    %78 = arith.subf %74, %77 : vector<24x24xf32>
    %79 = math.exp %78 : vector<24x24xf32>
    %cst_37 = arith.constant dense<0.000000e+00> : vector<24xf32>
    %80 = vector.multi_reduction <add>, %79, %cst_37 [1] : vector<24x24xf32> to vector<24xf32>
    %81 = vector.shape_cast %80 : vector<24xf32> to vector<24x1xf32>
    %82 = vector.broadcast %81 : vector<24x1xf32> to vector<24x24xf32>
    %83 = arith.divf %79, %82 : vector<24x24xf32>
    %84 = arith.truncf %83 : vector<24x24xf32> to vector<24x24xbf16>
    %85 = arith.truncf %67 : vector<24x32xf32> to vector<24x32xbf16>
    %cst_38 = arith.constant dense<0.000000e+00> : vector<24x32xf32>
    %86 = tpu.matmul %84, %85, %cst_38 {dimension_numbers = #tpu.dot_dimension_numbers<[1], [0], [0], [1], [0, 0, 1, 1], [], []>} : vector<24x24xbf16>, vector<24x32xbf16>, vector<24x32xf32> -> vector<24x32xf32>
    %c0_39 = arith.constant 0 : index
    %c0_40 = arith.constant 0 : index
    %87 = vector.load %arg21[%c0_39, %c0_40] : memref<48x128xf32, #tpu.memory_space<vmem>>, vector<24x32xf32>
    tpu.vector_store %arg21[%c0_39, %c0_40], %86 {strides = array<i32>} : memref<48x128xf32, #tpu.memory_space<vmem>>, vector<24x32xf32>,
    %88 = vector.extract_strided_slice %64 {offsets = [0, 32], sizes = [24, 32], strides = [1, 1]} : vector<48x384xf32> to vector<24x32xf32>
    %89 = vector.extract_strided_slice %64 {offsets = [0, 160], sizes = [24, 32], strides = [1, 1]} : vector<48x384xf32> to vector<24x32xf32>
    %90 = vector.extract_strided_slice %64 {offsets = [0, 288], sizes = [24, 32], strides = [1, 1]} : vector<48x384xf32> to vector<24x32xf32>
    %91 = arith.truncf %88 : vector<24x32xf32> to vector<24x32xbf16>
    %92 = arith.truncf %89 : vector<24x32xf32> to vector<24x32xbf16>
    %cst_41 = arith.constant dense<0.000000e+00> : vector<24x24xf32>
    %93 = tpu.matmul %91, %92, %cst_41 {dimension_numbers = #tpu.dot_dimension_numbers<[1], [1], [0], [0], [0, 0, 1, 0], [], []>} : vector<24x32xbf16>, vector<24x32xbf16>, vector<24x24xf32> -> vector<24x24xf32>
    %cst_42 = arith.constant 0.176776692 : f32
    %94 = vector.broadcast %cst_42 : f32 to vector<24x24xf32>
    %95 = arith.mulf %93, %94 : vector<24x24xf32>
    %96 = vector.broadcast %32 : vector<1x24xf32> to vector<24x24xf32>
    %97 = arith.addf %95, %96 : vector<24x24xf32>
    %cst_43 = arith.constant dense<0xFF800000> : vector<24xf32>
    %98 = vector.multi_reduction <maximumf>, %97, %cst_43 [1] : vector<24x24xf32> to vector<24xf32>
    %99 = vector.shape_cast %98 : vector<24xf32> to vector<24x1xf32>
    %100 = vector.broadcast %99 : vector<24x1xf32> to vector<24x24xf32>
    %101 = arith.subf %97, %100 : vector<24x24xf32>
    %102 = math.exp %101 : vector<24x24xf32>
    %cst_44 = arith.constant dense<0.000000e+00> : vector<24xf32>
    %103 = vector.multi_reduction <add>, %102, %cst_44 [1] : vector<24x24xf32> to vector<24xf32>
    %104 = vector.shape_cast %103 : vector<24xf32> to vector<24x1xf32>
    %105 = vector.broadcast %104 : vector<24x1xf32> to vector<24x24xf32>
    %106 = arith.divf %102, %105 : vector<24x24xf32>
    %107 = arith.truncf %106 : vector<24x24xf32> to vector<24x24xbf16>
    %108 = arith.truncf %90 : vector<24x32xf32> to vector<24x32xbf16>
    %cst_45 = arith.constant dense<0.000000e+00> : vector<24x32xf32>
    %109 = tpu.matmul %107, %108, %cst_45 {dimension_numbers = #tpu.dot_dimension_numbers<[1], [0], [0], [1], [0, 0, 1, 1], [], []>} : vector<24x24xbf16>, vector<24x32xbf16>, vector<24x32xf32> -> vector<24x32xf32>
    %c0_46 = arith.constant 0 : index
    %c32 = arith.constant 32 : index
    %110 = vector.load %arg21[%c0_46, %c32] : memref<48x128xf32, #tpu.memory_space<vmem>>, vector<24x32xf32>
    tpu.vector_store %arg21[%c0_46, %c32], %109 {strides = array<i32>} : memref<48x128xf32, #tpu.memory_space<vmem>>, vector<24x32xf32>,
    %111 = vector.extract_strided_slice %64 {offsets = [0, 64], sizes = [24, 32], strides = [1, 1]} : vector<48x384xf32> to vector<24x32xf32>
    %112 = vector.extract_strided_slice %64 {offsets = [0, 192], sizes = [24, 32], strides = [1, 1]} : vector<48x384xf32> to vector<24x32xf32>
    %113 = vector.extract_strided_slice %64 {offsets = [0, 320], sizes = [24, 32], strides = [1, 1]} : vector<48x384xf32> to vector<24x32xf32>
    %114 = arith.truncf %111 : vector<24x32xf32> to vector<24x32xbf16>
    %115 = arith.truncf %112 : vector<24x32xf32> to vector<24x32xbf16>
    %cst_47 = arith.constant dense<0.000000e+00> : vector<24x24xf32>
    %116 = tpu.matmul %114, %115, %cst_47 {dimension_numbers = #tpu.dot_dimension_numbers<[1], [1], [0], [0], [0, 0, 1, 0], [], []>} : vector<24x32xbf16>, vector<24x32xbf16>, vector<24x24xf32> -> vector<24x24xf32>
    %cst_48 = arith.constant 0.176776692 : f32
    %117 = vector.broadcast %cst_48 : f32 to vector<24x24xf32>
    %118 = arith.mulf %116, %117 : vector<24x24xf32>
    %119 = vector.broadcast %32 : vector<1x24xf32> to vector<24x24xf32>
    %120 = arith.addf %118, %119 : vector<24x24xf32>
    %cst_49 = arith.constant dense<0xFF800000> : vector<24xf32>
    %121 = vector.multi_reduction <maximumf>, %120, %cst_49 [1] : vector<24x24xf32> to vector<24xf32>
    %122 = vector.shape_cast %121 : vector<24xf32> to vector<24x1xf32>
    %123 = vector.broadcast %122 : vector<24x1xf32> to vector<24x24xf32>
    %124 = arith.subf %120, %123 : vector<24x24xf32>
    %125 = math.exp %124 : vector<24x24xf32>
    %cst_50 = arith.constant dense<0.000000e+00> : vector<24xf32>
    %126 = vector.multi_reduction <add>, %125, %cst_50 [1] : vector<24x24xf32> to vector<24xf32>
    %127 = vector.shape_cast %126 : vector<24xf32> to vector<24x1xf32>
    %128 = vector.broadcast %127 : vector<24x1xf32> to vector<24x24xf32>
    %129 = arith.divf %125, %128 : vector<24x24xf32>
    %130 = arith.truncf %129 : vector<24x24xf32> to vector<24x24xbf16>
    %131 = arith.truncf %113 : vector<24x32xf32> to vector<24x32xbf16>
    %cst_51 = arith.constant dense<0.000000e+00> : vector<24x32xf32>
    %132 = tpu.matmul %130, %131, %cst_51 {dimension_numbers = #tpu.dot_dimension_numbers<[1], [0], [0], [1], [0, 0, 1, 1], [], []>} : vector<24x24xbf16>, vector<24x32xbf16>, vector<24x32xf32> -> vector<24x32xf32>
    %c0_52 = arith.constant 0 : index
    %c64 = arith.constant 64 : index
    %133 = vector.load %arg21[%c0_52, %c64] : memref<48x128xf32, #tpu.memory_space<vmem>>, vector<24x32xf32>
    tpu.vector_store %arg21[%c0_52, %c64], %132 {strides = array<i32>} : memref<48x128xf32, #tpu.memory_space<vmem>>, vector<24x32xf32>,
    %134 = vector.extract_strided_slice %64 {offsets = [0, 96], sizes = [24, 32], strides = [1, 1]} : vector<48x384xf32> to vector<24x32xf32>
    %135 = vector.extract_strided_slice %64 {offsets = [0, 224], sizes = [24, 32], strides = [1, 1]} : vector<48x384xf32> to vector<24x32xf32>
    %136 = vector.extract_strided_slice %64 {offsets = [0, 352], sizes = [24, 32], strides = [1, 1]} : vector<48x384xf32> to vector<24x32xf32>
    %137 = arith.truncf %134 : vector<24x32xf32> to vector<24x32xbf16>
    %138 = arith.truncf %135 : vector<24x32xf32> to vector<24x32xbf16>
    %cst_53 = arith.constant dense<0.000000e+00> : vector<24x24xf32>
    %139 = tpu.matmul %137, %138, %cst_53 {dimension_numbers = #tpu.dot_dimension_numbers<[1], [1], [0], [0], [0, 0, 1, 0], [], []>} : vector<24x32xbf16>, vector<24x32xbf16>, vector<24x24xf32> -> vector<24x24xf32>
    %cst_54 = arith.constant 0.176776692 : f32
    %140 = vector.broadcast %cst_54 : f32 to vector<24x24xf32>
    %141 = arith.mulf %139, %140 : vector<24x24xf32>
    %142 = vector.broadcast %32 : vector<1x24xf32> to vector<24x24xf32>
    %143 = arith.addf %141, %142 : vector<24x24xf32>
    %cst_55 = arith.constant dense<0xFF800000> : vector<24xf32>
    %144 = vector.multi_reduction <maximumf>, %143, %cst_55 [1] : vector<24x24xf32> to vector<24xf32>
    %145 = vector.shape_cast %144 : vector<24xf32> to vector<24x1xf32>
    %146 = vector.broadcast %145 : vector<24x1xf32> to vector<24x24xf32>
    %147 = arith.subf %143, %146 : vector<24x24xf32>
    %148 = math.exp %147 : vector<24x24xf32>
    %cst_56 = arith.constant dense<0.000000e+00> : vector<24xf32>
    %149 = vector.multi_reduction <add>, %148, %cst_56 [1] : vector<24x24xf32> to vector<24xf32>
    %150 = vector.shape_cast %149 : vector<24xf32> to vector<24x1xf32>
    %151 = vector.broadcast %150 : vector<24x1xf32> to vector<24x24xf32>
    %152 = arith.divf %148, %151 : vector<24x24xf32>
    %153 = arith.truncf %152 : vector<24x24xf32> to vector<24x24xbf16>
    %154 = arith.truncf %136 : vector<24x32xf32> to vector<24x32xbf16>
    %cst_57 = arith.constant dense<0.000000e+00> : vector<24x32xf32>
    %155 = tpu.matmul %153, %154, %cst_57 {dimension_numbers = #tpu.dot_dimension_numbers<[1], [0], [0], [1], [0, 0, 1, 1], [], []>} : vector<24x24xbf16>, vector<24x32xbf16>, vector<24x32xf32> -> vector<24x32xf32>
    %c0_58 = arith.constant 0 : index
    %c96 = arith.constant 96 : index
    %156 = vector.load %arg21[%c0_58, %c96] : memref<48x128xf32, #tpu.memory_space<vmem>>, vector<24x32xf32>
    tpu.vector_store %arg21[%c0_58, %c96], %155 {strides = array<i32>} : memref<48x128xf32, #tpu.memory_space<vmem>>, vector<24x32xf32>,
    %157 = vector.extract_strided_slice %64 {offsets = [24, 0], sizes = [24, 32], strides = [1, 1]} : vector<48x384xf32> to vector<24x32xf32>
    %158 = vector.extract_strided_slice %64 {offsets = [24, 128], sizes = [24, 32], strides = [1, 1]} : vector<48x384xf32> to vector<24x32xf32>
    %159 = vector.extract_strided_slice %64 {offsets = [24, 256], sizes = [24, 32], strides = [1, 1]} : vector<48x384xf32> to vector<24x32xf32>
    %160 = arith.truncf %157 : vector<24x32xf32> to vector<24x32xbf16>
    %161 = arith.truncf %158 : vector<24x32xf32> to vector<24x32xbf16>
    %cst_59 = arith.constant dense<0.000000e+00> : vector<24x24xf32>
    %162 = tpu.matmul %160, %161, %cst_59 {dimension_numbers = #tpu.dot_dimension_numbers<[1], [1], [0], [0], [0, 0, 1, 0], [], []>} : vector<24x32xbf16>, vector<24x32xbf16>, vector<24x24xf32> -> vector<24x24xf32>
    %cst_60 = arith.constant 0.176776692 : f32
    %163 = vector.broadcast %cst_60 : f32 to vector<24x24xf32>
    %164 = arith.mulf %162, %163 : vector<24x24xf32>
    %165 = vector.broadcast %32 : vector<1x24xf32> to vector<24x24xf32>
    %166 = arith.addf %164, %165 : vector<24x24xf32>
    %cst_61 = arith.constant dense<0xFF800000> : vector<24xf32>
    %167 = vector.multi_reduction <maximumf>, %166, %cst_61 [1] : vector<24x24xf32> to vector<24xf32>
    %168 = vector.shape_cast %167 : vector<24xf32> to vector<24x1xf32>
    %169 = vector.broadcast %168 : vector<24x1xf32> to vector<24x24xf32>
    %170 = arith.subf %166, %169 : vector<24x24xf32>
    %171 = math.exp %170 : vector<24x24xf32>
    %cst_62 = arith.constant dense<0.000000e+00> : vector<24xf32>
    %172 = vector.multi_reduction <add>, %171, %cst_62 [1] : vector<24x24xf32> to vector<24xf32>
    %173 = vector.shape_cast %172 : vector<24xf32> to vector<24x1xf32>
    %174 = vector.broadcast %173 : vector<24x1xf32> to vector<24x24xf32>
    %175 = arith.divf %171, %174 : vector<24x24xf32>
    %176 = arith.truncf %175 : vector<24x24xf32> to vector<24x24xbf16>
    %177 = arith.truncf %159 : vector<24x32xf32> to vector<24x32xbf16>
    %cst_63 = arith.constant dense<0.000000e+00> : vector<24x32xf32>
    %178 = tpu.matmul %176, %177, %cst_63 {dimension_numbers = #tpu.dot_dimension_numbers<[1], [0], [0], [1], [0, 0, 1, 1], [], []>} : vector<24x24xbf16>, vector<24x32xbf16>, vector<24x32xf32> -> vector<24x32xf32>
    %c24 = arith.constant 24 : index
    %c0_64 = arith.constant 0 : index
    %179 = vector.load %arg21[%c24, %c0_64] : memref<48x128xf32, #tpu.memory_space<vmem>>, vector<24x32xf32>
    tpu.vector_store %arg21[%c24, %c0_64], %178 {strides = array<i32>} : memref<48x128xf32, #tpu.memory_space<vmem>>, vector<24x32xf32>,
    %180 = vector.extract_strided_slice %64 {offsets = [24, 32], sizes = [24, 32], strides = [1, 1]} : vector<48x384xf32> to vector<24x32xf32>
    %181 = vector.extract_strided_slice %64 {offsets = [24, 160], sizes = [24, 32], strides = [1, 1]} : vector<48x384xf32> to vector<24x32xf32>
    %182 = vector.extract_strided_slice %64 {offsets = [24, 288], sizes = [24, 32], strides = [1, 1]} : vector<48x384xf32> to vector<24x32xf32>
    %183 = arith.truncf %180 : vector<24x32xf32> to vector<24x32xbf16>
    %184 = arith.truncf %181 : vector<24x32xf32> to vector<24x32xbf16>
    %cst_65 = arith.constant dense<0.000000e+00> : vector<24x24xf32>
    %185 = tpu.matmul %183, %184, %cst_65 {dimension_numbers = #tpu.dot_dimension_numbers<[1], [1], [0], [0], [0, 0, 1, 0], [], []>} : vector<24x32xbf16>, vector<24x32xbf16>, vector<24x24xf32> -> vector<24x24xf32>
    %cst_66 = arith.constant 0.176776692 : f32
    %186 = vector.broadcast %cst_66 : f32 to vector<24x24xf32>
    %187 = arith.mulf %185, %186 : vector<24x24xf32>
    %188 = vector.broadcast %32 : vector<1x24xf32> to vector<24x24xf32>
    %189 = arith.addf %187, %188 : vector<24x24xf32>
    %cst_67 = arith.constant dense<0xFF800000> : vector<24xf32>
    %190 = vector.multi_reduction <maximumf>, %189, %cst_67 [1] : vector<24x24xf32> to vector<24xf32>
    %191 = vector.shape_cast %190 : vector<24xf32> to vector<24x1xf32>
    %192 = vector.broadcast %191 : vector<24x1xf32> to vector<24x24xf32>
    %193 = arith.subf %189, %192 : vector<24x24xf32>
    %194 = math.exp %193 : vector<24x24xf32>
    %cst_68 = arith.constant dense<0.000000e+00> : vector<24xf32>
    %195 = vector.multi_reduction <add>, %194, %cst_68 [1] : vector<24x24xf32> to vector<24xf32>
    %196 = vector.shape_cast %195 : vector<24xf32> to vector<24x1xf32>
    %197 = vector.broadcast %196 : vector<24x1xf32> to vector<24x24xf32>
    %198 = arith.divf %194, %197 : vector<24x24xf32>
    %199 = arith.truncf %198 : vector<24x24xf32> to vector<24x24xbf16>
    %200 = arith.truncf %182 : vector<24x32xf32> to vector<24x32xbf16>
    %cst_69 = arith.constant dense<0.000000e+00> : vector<24x32xf32>
    %201 = tpu.matmul %199, %200, %cst_69 {dimension_numbers = #tpu.dot_dimension_numbers<[1], [0], [0], [1], [0, 0, 1, 1], [], []>} : vector<24x24xbf16>, vector<24x32xbf16>, vector<24x32xf32> -> vector<24x32xf32>
    %c24_70 = arith.constant 24 : index
    %c32_71 = arith.constant 32 : index
    %202 = vector.load %arg21[%c24_70, %c32_71] : memref<48x128xf32, #tpu.memory_space<vmem>>, vector<24x32xf32>
    tpu.vector_store %arg21[%c24_70, %c32_71], %201 {strides = array<i32>} : memref<48x128xf32, #tpu.memory_space<vmem>>, vector<24x32xf32>,
    %203 = vector.extract_strided_slice %64 {offsets = [24, 64], sizes = [24, 32], strides = [1, 1]} : vector<48x384xf32> to vector<24x32xf32>
    %204 = vector.extract_strided_slice %64 {offsets = [24, 192], sizes = [24, 32], strides = [1, 1]} : vector<48x384xf32> to vector<24x32xf32>
    %205 = vector.extract_strided_slice %64 {offsets = [24, 320], sizes = [24, 32], strides = [1, 1]} : vector<48x384xf32> to vector<24x32xf32>
    %206 = arith.truncf %203 : vector<24x32xf32> to vector<24x32xbf16>
    %207 = arith.truncf %204 : vector<24x32xf32> to vector<24x32xbf16>
    %cst_72 = arith.constant dense<0.000000e+00> : vector<24x24xf32>
    %208 = tpu.matmul %206, %207, %cst_72 {dimension_numbers = #tpu.dot_dimension_numbers<[1], [1], [0], [0], [0, 0, 1, 0], [], []>} : vector<24x32xbf16>, vector<24x32xbf16>, vector<24x24xf32> -> vector<24x24xf32>
    %cst_73 = arith.constant 0.176776692 : f32
    %209 = vector.broadcast %cst_73 : f32 to vector<24x24xf32>
    %210 = arith.mulf %208, %209 : vector<24x24xf32>
    %211 = vector.broadcast %32 : vector<1x24xf32> to vector<24x24xf32>
    %212 = arith.addf %210, %211 : vector<24x24xf32>
    %cst_74 = arith.constant dense<0xFF800000> : vector<24xf32>
    %213 = vector.multi_reduction <maximumf>, %212, %cst_74 [1] : vector<24x24xf32> to vector<24xf32>
    %214 = vector.shape_cast %213 : vector<24xf32> to vector<24x1xf32>
    %215 = vector.broadcast %214 : vector<24x1xf32> to vector<24x24xf32>
    %216 = arith.subf %212, %215 : vector<24x24xf32>
    %217 = math.exp %216 : vector<24x24xf32>
    %cst_75 = arith.constant dense<0.000000e+00> : vector<24xf32>
    %218 = vector.multi_reduction <add>, %217, %cst_75 [1] : vector<24x24xf32> to vector<24xf32>
    %219 = vector.shape_cast %218 : vector<24xf32> to vector<24x1xf32>
    %220 = vector.broadcast %219 : vector<24x1xf32> to vector<24x24xf32>
    %221 = arith.divf %217, %220 : vector<24x24xf32>
    %222 = arith.truncf %221 : vector<24x24xf32> to vector<24x24xbf16>
    %223 = arith.truncf %205 : vector<24x32xf32> to vector<24x32xbf16>
    %cst_76 = arith.constant dense<0.000000e+00> : vector<24x32xf32>
    %224 = tpu.matmul %222, %223, %cst_76 {dimension_numbers = #tpu.dot_dimension_numbers<[1], [0], [0], [1], [0, 0, 1, 1], [], []>} : vector<24x24xbf16>, vector<24x32xbf16>, vector<24x32xf32> -> vector<24x32xf32>
    %c24_77 = arith.constant 24 : index
    %c64_78 = arith.constant 64 : index
    %225 = vector.load %arg21[%c24_77, %c64_78] : memref<48x128xf32, #tpu.memory_space<vmem>>, vector<24x32xf32>
    tpu.vector_store %arg21[%c24_77, %c64_78], %224 {strides = array<i32>} : memref<48x128xf32, #tpu.memory_space<vmem>>, vector<24x32xf32>,
    %226 = vector.extract_strided_slice %64 {offsets = [24, 96], sizes = [24, 32], strides = [1, 1]} : vector<48x384xf32> to vector<24x32xf32>
    %227 = vector.extract_strided_slice %64 {offsets = [24, 224], sizes = [24, 32], strides = [1, 1]} : vector<48x384xf32> to vector<24x32xf32>
    %228 = vector.extract_strided_slice %64 {offsets = [24, 352], sizes = [24, 32], strides = [1, 1]} : vector<48x384xf32> to vector<24x32xf32>
    %229 = arith.truncf %226 : vector<24x32xf32> to vector<24x32xbf16>
    %230 = arith.truncf %227 : vector<24x32xf32> to vector<24x32xbf16>
    %cst_79 = arith.constant dense<0.000000e+00> : vector<24x24xf32>
    %231 = tpu.matmul %229, %230, %cst_79 {dimension_numbers = #tpu.dot_dimension_numbers<[1], [1], [0], [0], [0, 0, 1, 0], [], []>} : vector<24x32xbf16>, vector<24x32xbf16>, vector<24x24xf32> -> vector<24x24xf32>
    %cst_80 = arith.constant 0.176776692 : f32
    %232 = vector.broadcast %cst_80 : f32 to vector<24x24xf32>
    %233 = arith.mulf %231, %232 : vector<24x24xf32>
    %234 = vector.broadcast %32 : vector<1x24xf32> to vector<24x24xf32>
    %235 = arith.addf %233, %234 : vector<24x24xf32>
    %cst_81 = arith.constant dense<0xFF800000> : vector<24xf32>
    %236 = vector.multi_reduction <maximumf>, %235, %cst_81 [1] : vector<24x24xf32> to vector<24xf32>
    %237 = vector.shape_cast %236 : vector<24xf32> to vector<24x1xf32>
    %238 = vector.broadcast %237 : vector<24x1xf32> to vector<24x24xf32>
    %239 = arith.subf %235, %238 : vector<24x24xf32>
    %240 = math.exp %239 : vector<24x24xf32>
    %cst_82 = arith.constant dense<0.000000e+00> : vector<24xf32>
    %241 = vector.multi_reduction <add>, %240, %cst_82 [1] : vector<24x24xf32> to vector<24xf32>
    %242 = vector.shape_cast %241 : vector<24xf32> to vector<24x1xf32>
    %243 = vector.broadcast %242 : vector<24x1xf32> to vector<24x24xf32>
    %244 = arith.divf %240, %243 : vector<24x24xf32>
    %245 = arith.truncf %244 : vector<24x24xf32> to vector<24x24xbf16>
    %246 = arith.truncf %228 : vector<24x32xf32> to vector<24x32xbf16>
    %cst_83 = arith.constant dense<0.000000e+00> : vector<24x32xf32>
    %247 = tpu.matmul %245, %246, %cst_83 {dimension_numbers = #tpu.dot_dimension_numbers<[1], [0], [0], [1], [0, 0, 1, 1], [], []>} : vector<24x24xbf16>, vector<24x32xbf16>, vector<24x32xf32> -> vector<24x32xf32>
    %c24_84 = arith.constant 24 : index
    %c96_85 = arith.constant 96 : index
    %248 = vector.load %arg21[%c24_84, %c96_85] : memref<48x128xf32, #tpu.memory_space<vmem>>, vector<24x32xf32>
    tpu.vector_store %arg21[%c24_84, %c96_85], %247 {strides = array<i32>} : memref<48x128xf32, #tpu.memory_space<vmem>>, vector<24x32xf32>,
    %c0_86 = arith.constant 0 : index
    %c0_87 = arith.constant 0 : index
    %249 = vector.load %arg21[%c0_86, %c0_87] : memref<48x128xf32, #tpu.memory_space<vmem>>, vector<48x128xf32>
    %c0_88 = arith.constant 0 : index
    %c0_89 = arith.constant 0 : index
    %c0_90 = arith.constant 0 : index
    %250 = vector.load %arg9[%c0_88, %c0_89, %c0_90] : memref<2x128x128xbf16, #tpu.memory_space<vmem>>, vector<1x128x128xbf16>
    %251 = vector.shape_cast %250 : vector<1x128x128xbf16> to vector<128x128xbf16>
    %c0_91 = arith.constant 0 : index
    %c0_92 = arith.constant 0 : index
    %c0_93 = arith.constant 0 : index
    %252 = vector.load %arg10[%c0_91, %c0_92, %c0_93] : memref<2x1x128xf32, #tpu.memory_space<vmem>>, vector<1x1x128xf32>
    %253 = vector.shape_cast %252 : vector<1x1x128xf32> to vector<1x128xf32>
    %254 = arith.truncf %249 : vector<48x128xf32> to vector<48x128xbf16>
    %cst_94 = arith.constant dense<0.000000e+00> : vector<48x128xf32>
    %255 = tpu.matmul %254, %251, %cst_94 {dimension_numbers = #tpu.dot_dimension_numbers<[1], [0], [0], [1], [0, 0, 1, 1], [], []>} : vector<48x128xbf16>, vector<128x128xbf16>, vector<48x128xf32> -> vector<48x128xf32>
    %256 = vector.broadcast %253 : vector<1x128xf32> to vector<48x128xf32>
    %257 = arith.addf %255, %256 : vector<48x128xf32>
    %258 = arith.addf %257, %26 : vector<48x128xf32>
    %c0_95 = arith.constant 0 : index
    %c0_96 = arith.constant 0 : index
    %c0_97 = arith.constant 0 : index
    %259 = vector.load %arg11[%c0_95, %c0_96, %c0_97] : memref<2x1x128xf32, #tpu.memory_space<vmem>>, vector<1x1x128xf32>
    %260 = vector.shape_cast %259 : vector<1x1x128xf32> to vector<1x128xf32>
    %c0_98 = arith.constant 0 : index
    %c0_99 = arith.constant 0 : index
    %c0_100 = arith.constant 0 : index
    %261 = vector.load %arg12[%c0_98, %c0_99, %c0_100] : memref<2x1x128xf32, #tpu.memory_space<vmem>>, vector<1x1x128xf32>
    %262 = vector.shape_cast %261 : vector<1x1x128xf32> to vector<1x128xf32>
    %cst_101 = arith.constant dense<0.000000e+00> : vector<48xf32>
    %263 = vector.multi_reduction <add>, %258, %cst_101 [1] : vector<48x128xf32> to vector<48xf32>
    %264 = vector.shape_cast %263 : vector<48xf32> to vector<48x1xf32>
    %cst_102 = arith.constant 1.280000e+02 : f32
    %265 = vector.broadcast %cst_102 : f32 to vector<48x1xf32>
    %266 = arith.divf %264, %265 : vector<48x1xf32>
    %267 = vector.broadcast %266 : vector<48x1xf32> to vector<48x128xf32>
    %268 = arith.subf %258, %267 : vector<48x128xf32>
    %269 = arith.mulf %268, %268 : vector<48x128xf32>
    %cst_103 = arith.constant dense<0.000000e+00> : vector<48xf32>
    %270 = vector.multi_reduction <add>, %269, %cst_103 [1] : vector<48x128xf32> to vector<48xf32>
    %271 = vector.shape_cast %270 : vector<48xf32> to vector<48x1xf32>
    %cst_104 = arith.constant 1.280000e+02 : f32
    %272 = vector.broadcast %cst_104 : f32 to vector<48x1xf32>
    %273 = arith.divf %271, %272 : vector<48x1xf32>
    %cst_105 = arith.constant 9.99999974E-6 : f32
    %274 = vector.broadcast %cst_105 : f32 to vector<48x1xf32>
    %275 = arith.addf %273, %274 : vector<48x1xf32>
    %276 = math.rsqrt %275 : vector<48x1xf32>
    %277 = vector.broadcast %276 : vector<48x1xf32> to vector<48x128xf32>
    %278 = arith.mulf %268, %277 : vector<48x128xf32>
    %279 = vector.broadcast %260 : vector<1x128xf32> to vector<48x128xf32>
    %280 = arith.mulf %278, %279 : vector<48x128xf32>
    %281 = vector.broadcast %262 : vector<1x128xf32> to vector<48x128xf32>
    %282 = arith.addf %280, %281 : vector<48x128xf32>
    %c0_106 = arith.constant 0 : index
    %c0_107 = arith.constant 0 : index
    %c0_108 = arith.constant 0 : index
    %283 = vector.load %arg13[%c0_106, %c0_107, %c0_108] : memref<2x128x512xbf16, #tpu.memory_space<vmem>>, vector<1x128x512xbf16>
    %284 = vector.shape_cast %283 : vector<1x128x512xbf16> to vector<128x512xbf16>
    %c0_109 = arith.constant 0 : index
    %c0_110 = arith.constant 0 : index
    %c0_111 = arith.constant 0 : index
    %285 = vector.load %arg14[%c0_109, %c0_110, %c0_111] : memref<2x1x512xf32, #tpu.memory_space<vmem>>, vector<1x1x512xf32>
    %286 = vector.shape_cast %285 : vector<1x1x512xf32> to vector<1x512xf32>
    %287 = arith.truncf %282 : vector<48x128xf32> to vector<48x128xbf16>
    %cst_112 = arith.constant dense<0.000000e+00> : vector<48x512xf32>
    %288 = tpu.matmul %287, %284, %cst_112 {dimension_numbers = #tpu.dot_dimension_numbers<[1], [0], [0], [1], [0, 0, 1, 1], [], []>} : vector<48x128xbf16>, vector<128x512xbf16>, vector<48x512xf32> -> vector<48x512xf32>
    %289 = vector.broadcast %286 : vector<1x512xf32> to vector<48x512xf32>
    %290 = arith.addf %288, %289 : vector<48x512xf32>
    %cst_113 = arith.constant 1.702000e+00 : f32
    %291 = vector.broadcast %cst_113 : f32 to vector<48x512xf32>
    %292 = arith.mulf %291, %290 : vector<48x512xf32>
    %293 = arith.negf %292 : vector<48x512xf32>
    %294 = math.exp %293 : vector<48x512xf32>
    %cst_114 = arith.constant 1.000000e+00 : f32
    %295 = vector.broadcast %cst_114 : f32 to vector<48x512xf32>
    %296 = arith.addf %295, %294 : vector<48x512xf32>
    %297 = arith.divf %295, %296 : vector<48x512xf32>
    %298 = arith.mulf %290, %297 : vector<48x512xf32>
    %c0_115 = arith.constant 0 : index
    %c0_116 = arith.constant 0 : index
    %c0_117 = arith.constant 0 : index
    %299 = vector.load %arg15[%c0_115, %c0_116, %c0_117] : memref<2x512x128xbf16, #tpu.memory_space<vmem>>, vector<1x512x128xbf16>
    %300 = vector.shape_cast %299 : vector<1x512x128xbf16> to vector<512x128xbf16>
    %c0_118 = arith.constant 0 : index
    %c0_119 = arith.constant 0 : index
    %c0_120 = arith.constant 0 : index
    %301 = vector.load %arg16[%c0_118, %c0_119, %c0_120] : memref<2x1x128xf32, #tpu.memory_space<vmem>>, vector<1x1x128xf32>
    %302 = vector.shape_cast %301 : vector<1x1x128xf32> to vector<1x128xf32>
    %303 = arith.truncf %298 : vector<48x512xf32> to vector<48x512xbf16>
    %cst_121 = arith.constant dense<0.000000e+00> : vector<48x128xf32>
    %304 = tpu.matmul %303, %300, %cst_121 {dimension_numbers = #tpu.dot_dimension_numbers<[1], [0], [0], [1], [0, 0, 1, 1], [], []>} : vector<48x512xbf16>, vector<512x128xbf16>, vector<48x128xf32> -> vector<48x128xf32>
    %305 = vector.broadcast %302 : vector<1x128xf32> to vector<48x128xf32>
    %306 = arith.addf %304, %305 : vector<48x128xf32>
    %307 = arith.addf %306, %258 : vector<48x128xf32>
    %c1 = arith.constant 1 : index
    %c0_122 = arith.constant 0 : index
    %c0_123 = arith.constant 0 : index
    %308 = vector.load %arg5[%c1, %c0_122, %c0_123] : memref<2x1x128xf32, #tpu.memory_space<vmem>>, vector<1x1x128xf32>
    %309 = vector.shape_cast %308 : vector<1x1x128xf32> to vector<1x128xf32>
    %c1_124 = arith.constant 1 : index
    %c0_125 = arith.constant 0 : index
    %c0_126 = arith.constant 0 : index
    %310 = vector.load %arg6[%c1_124, %c0_125, %c0_126] : memref<2x1x128xf32, #tpu.memory_space<vmem>>, vector<1x1x128xf32>
    %311 = vector.shape_cast %310 : vector<1x1x128xf32> to vector<1x128xf32>
    %cst_127 = arith.constant dense<0.000000e+00> : vector<48xf32>
    %312 = vector.multi_reduction <add>, %307, %cst_127 [1] : vector<48x128xf32> to vector<48xf32>
    %313 = vector.shape_cast %312 : vector<48xf32> to vector<48x1xf32>
    %cst_128 = arith.constant 1.280000e+02 : f32
    %314 = vector.broadcast %cst_128 : f32 to vector<48x1xf32>
    %315 = arith.divf %313, %314 : vector<48x1xf32>
    %316 = vector.broadcast %315 : vector<48x1xf32> to vector<48x128xf32>
    %317 = arith.subf %307, %316 : vector<48x128xf32>
    %318 = arith.mulf %317, %317 : vector<48x128xf32>
    %cst_129 = arith.constant dense<0.000000e+00> : vector<48xf32>
    %319 = vector.multi_reduction <add>, %318, %cst_129 [1] : vector<48x128xf32> to vector<48xf32>
    %320 = vector.shape_cast %319 : vector<48xf32> to vector<48x1xf32>
    %cst_130 = arith.constant 1.280000e+02 : f32
    %321 = vector.broadcast %cst_130 : f32 to vector<48x1xf32>
    %322 = arith.divf %320, %321 : vector<48x1xf32>
    %cst_131 = arith.constant 9.99999974E-6 : f32
    %323 = vector.broadcast %cst_131 : f32 to vector<48x1xf32>
    %324 = arith.addf %322, %323 : vector<48x1xf32>
    %325 = math.rsqrt %324 : vector<48x1xf32>
    %326 = vector.broadcast %325 : vector<48x1xf32> to vector<48x128xf32>
    %327 = arith.mulf %317, %326 : vector<48x128xf32>
    %328 = vector.broadcast %309 : vector<1x128xf32> to vector<48x128xf32>
    %329 = arith.mulf %327, %328 : vector<48x128xf32>
    %330 = vector.broadcast %311 : vector<1x128xf32> to vector<48x128xf32>
    %331 = arith.addf %329, %330 : vector<48x128xf32>
    %c1_132 = arith.constant 1 : index
    %c0_133 = arith.constant 0 : index
    %c0_134 = arith.constant 0 : index
    %332 = vector.load %arg7[%c1_132, %c0_133, %c0_134] : memref<2x128x384xbf16, #tpu.memory_space<vmem>>, vector<1x128x384xbf16>
    %333 = vector.shape_cast %332 : vector<1x128x384xbf16> to vector<128x384xbf16>
    %c1_135 = arith.constant 1 : index
    %c0_136 = arith.constant 0 : index
    %c0_137 = arith.constant 0 : index
    %334 = vector.load %arg8[%c1_135, %c0_136, %c0_137] : memref<2x1x384xf32, #tpu.memory_space<vmem>>, vector<1x1x384xf32>
    %335 = vector.shape_cast %334 : vector<1x1x384xf32> to vector<1x384xf32>
    %336 = arith.truncf %331 : vector<48x128xf32> to vector<48x128xbf16>
    %cst_138 = arith.constant dense<0.000000e+00> : vector<48x384xf32>
    %337 = tpu.matmul %336, %333, %cst_138 {dimension_numbers = #tpu.dot_dimension_numbers<[1], [0], [0], [1], [0, 0, 1, 1], [], []>} : vector<48x128xbf16>, vector<128x384xbf16>, vector<48x384xf32> -> vector<48x384xf32>
    %338 = vector.broadcast %335 : vector<1x384xf32> to vector<48x384xf32>
    %339 = arith.addf %337, %338 : vector<48x384xf32>
    %340 = vector.extract_strided_slice %339 {offsets = [0, 0], sizes = [24, 32], strides = [1, 1]} : vector<48x384xf32> to vector<24x32xf32>
    %341 = vector.extract_strided_slice %339 {offsets = [0, 128], sizes = [24, 32], strides = [1, 1]} : vector<48x384xf32> to vector<24x32xf32>
    %342 = vector.extract_strided_slice %339 {offsets = [0, 256], sizes = [24, 32], strides = [1, 1]} : vector<48x384xf32> to vector<24x32xf32>
    %343 = arith.truncf %340 : vector<24x32xf32> to vector<24x32xbf16>
    %344 = arith.truncf %341 : vector<24x32xf32> to vector<24x32xbf16>
    %cst_139 = arith.constant dense<0.000000e+00> : vector<24x24xf32>
    %345 = tpu.matmul %343, %344, %cst_139 {dimension_numbers = #tpu.dot_dimension_numbers<[1], [1], [0], [0], [0, 0, 1, 0], [], []>} : vector<24x32xbf16>, vector<24x32xbf16>, vector<24x24xf32> -> vector<24x24xf32>
    %cst_140 = arith.constant 0.176776692 : f32
    %346 = vector.broadcast %cst_140 : f32 to vector<24x24xf32>
    %347 = arith.mulf %345, %346 : vector<24x24xf32>
    %348 = vector.broadcast %32 : vector<1x24xf32> to vector<24x24xf32>
    %349 = arith.addf %347, %348 : vector<24x24xf32>
    %cst_141 = arith.constant dense<0xFF800000> : vector<24xf32>
    %350 = vector.multi_reduction <maximumf>, %349, %cst_141 [1] : vector<24x24xf32> to vector<24xf32>
    %351 = vector.shape_cast %350 : vector<24xf32> to vector<24x1xf32>
    %352 = vector.broadcast %351 : vector<24x1xf32> to vector<24x24xf32>
    %353 = arith.subf %349, %352 : vector<24x24xf32>
    %354 = math.exp %353 : vector<24x24xf32>
    %cst_142 = arith.constant dense<0.000000e+00> : vector<24xf32>
    %355 = vector.multi_reduction <add>, %354, %cst_142 [1] : vector<24x24xf32> to vector<24xf32>
    %356 = vector.shape_cast %355 : vector<24xf32> to vector<24x1xf32>
    %357 = vector.broadcast %356 : vector<24x1xf32> to vector<24x24xf32>
    %358 = arith.divf %354, %357 : vector<24x24xf32>
    %359 = arith.truncf %358 : vector<24x24xf32> to vector<24x24xbf16>
    %360 = arith.truncf %342 : vector<24x32xf32> to vector<24x32xbf16>
    %cst_143 = arith.constant dense<0.000000e+00> : vector<24x32xf32>
    %361 = tpu.matmul %359, %360, %cst_143 {dimension_numbers = #tpu.dot_dimension_numbers<[1], [0], [0], [1], [0, 0, 1, 1], [], []>} : vector<24x24xbf16>, vector<24x32xbf16>, vector<24x32xf32> -> vector<24x32xf32>
    %c0_144 = arith.constant 0 : index
    %c0_145 = arith.constant 0 : index
    %362 = vector.load %arg21[%c0_144, %c0_145] : memref<48x128xf32, #tpu.memory_space<vmem>>, vector<24x32xf32>
    tpu.vector_store %arg21[%c0_144, %c0_145], %361 {strides = array<i32>} : memref<48x128xf32, #tpu.memory_space<vmem>>, vector<24x32xf32>,
    %363 = vector.extract_strided_slice %339 {offsets = [0, 32], sizes = [24, 32], strides = [1, 1]} : vector<48x384xf32> to vector<24x32xf32>
    %364 = vector.extract_strided_slice %339 {offsets = [0, 160], sizes = [24, 32], strides = [1, 1]} : vector<48x384xf32> to vector<24x32xf32>
    %365 = vector.extract_strided_slice %339 {offsets = [0, 288], sizes = [24, 32], strides = [1, 1]} : vector<48x384xf32> to vector<24x32xf32>
    %366 = arith.truncf %363 : vector<24x32xf32> to vector<24x32xbf16>
    %367 = arith.truncf %364 : vector<24x32xf32> to vector<24x32xbf16>
    %cst_146 = arith.constant dense<0.000000e+00> : vector<24x24xf32>
    %368 = tpu.matmul %366, %367, %cst_146 {dimension_numbers = #tpu.dot_dimension_numbers<[1], [1], [0], [0], [0, 0, 1, 0], [], []>} : vector<24x32xbf16>, vector<24x32xbf16>, vector<24x24xf32> -> vector<24x24xf32>
    %cst_147 = arith.constant 0.176776692 : f32
    %369 = vector.broadcast %cst_147 : f32 to vector<24x24xf32>
    %370 = arith.mulf %368, %369 : vector<24x24xf32>
    %371 = vector.broadcast %32 : vector<1x24xf32> to vector<24x24xf32>
    %372 = arith.addf %370, %371 : vector<24x24xf32>
    %cst_148 = arith.constant dense<0xFF800000> : vector<24xf32>
    %373 = vector.multi_reduction <maximumf>, %372, %cst_148 [1] : vector<24x24xf32> to vector<24xf32>
    %374 = vector.shape_cast %373 : vector<24xf32> to vector<24x1xf32>
    %375 = vector.broadcast %374 : vector<24x1xf32> to vector<24x24xf32>
    %376 = arith.subf %372, %375 : vector<24x24xf32>
    %377 = math.exp %376 : vector<24x24xf32>
    %cst_149 = arith.constant dense<0.000000e+00> : vector<24xf32>
    %378 = vector.multi_reduction <add>, %377, %cst_149 [1] : vector<24x24xf32> to vector<24xf32>
    %379 = vector.shape_cast %378 : vector<24xf32> to vector<24x1xf32>
    %380 = vector.broadcast %379 : vector<24x1xf32> to vector<24x24xf32>
    %381 = arith.divf %377, %380 : vector<24x24xf32>
    %382 = arith.truncf %381 : vector<24x24xf32> to vector<24x24xbf16>
    %383 = arith.truncf %365 : vector<24x32xf32> to vector<24x32xbf16>
    %cst_150 = arith.constant dense<0.000000e+00> : vector<24x32xf32>
    %384 = tpu.matmul %382, %383, %cst_150 {dimension_numbers = #tpu.dot_dimension_numbers<[1], [0], [0], [1], [0, 0, 1, 1], [], []>} : vector<24x24xbf16>, vector<24x32xbf16>, vector<24x32xf32> -> vector<24x32xf32>
    %c0_151 = arith.constant 0 : index
    %c32_152 = arith.constant 32 : index
    %385 = vector.load %arg21[%c0_151, %c32_152] : memref<48x128xf32, #tpu.memory_space<vmem>>, vector<24x32xf32>
    tpu.vector_store %arg21[%c0_151, %c32_152], %384 {strides = array<i32>} : memref<48x128xf32, #tpu.memory_space<vmem>>, vector<24x32xf32>,
    %386 = vector.extract_strided_slice %339 {offsets = [0, 64], sizes = [24, 32], strides = [1, 1]} : vector<48x384xf32> to vector<24x32xf32>
    %387 = vector.extract_strided_slice %339 {offsets = [0, 192], sizes = [24, 32], strides = [1, 1]} : vector<48x384xf32> to vector<24x32xf32>
    %388 = vector.extract_strided_slice %339 {offsets = [0, 320], sizes = [24, 32], strides = [1, 1]} : vector<48x384xf32> to vector<24x32xf32>
    %389 = arith.truncf %386 : vector<24x32xf32> to vector<24x32xbf16>
    %390 = arith.truncf %387 : vector<24x32xf32> to vector<24x32xbf16>
    %cst_153 = arith.constant dense<0.000000e+00> : vector<24x24xf32>
    %391 = tpu.matmul %389, %390, %cst_153 {dimension_numbers = #tpu.dot_dimension_numbers<[1], [1], [0], [0], [0, 0, 1, 0], [], []>} : vector<24x32xbf16>, vector<24x32xbf16>, vector<24x24xf32> -> vector<24x24xf32>
    %cst_154 = arith.constant 0.176776692 : f32
    %392 = vector.broadcast %cst_154 : f32 to vector<24x24xf32>
    %393 = arith.mulf %391, %392 : vector<24x24xf32>
    %394 = vector.broadcast %32 : vector<1x24xf32> to vector<24x24xf32>
    %395 = arith.addf %393, %394 : vector<24x24xf32>
    %cst_155 = arith.constant dense<0xFF800000> : vector<24xf32>
    %396 = vector.multi_reduction <maximumf>, %395, %cst_155 [1] : vector<24x24xf32> to vector<24xf32>
    %397 = vector.shape_cast %396 : vector<24xf32> to vector<24x1xf32>
    %398 = vector.broadcast %397 : vector<24x1xf32> to vector<24x24xf32>
    %399 = arith.subf %395, %398 : vector<24x24xf32>
    %400 = math.exp %399 : vector<24x24xf32>
    %cst_156 = arith.constant dense<0.000000e+00> : vector<24xf32>
    %401 = vector.multi_reduction <add>, %400, %cst_156 [1] : vector<24x24xf32> to vector<24xf32>
    %402 = vector.shape_cast %401 : vector<24xf32> to vector<24x1xf32>
    %403 = vector.broadcast %402 : vector<24x1xf32> to vector<24x24xf32>
    %404 = arith.divf %400, %403 : vector<24x24xf32>
    %405 = arith.truncf %404 : vector<24x24xf32> to vector<24x24xbf16>
    %406 = arith.truncf %388 : vector<24x32xf32> to vector<24x32xbf16>
    %cst_157 = arith.constant dense<0.000000e+00> : vector<24x32xf32>
    %407 = tpu.matmul %405, %406, %cst_157 {dimension_numbers = #tpu.dot_dimension_numbers<[1], [0], [0], [1], [0, 0, 1, 1], [], []>} : vector<24x24xbf16>, vector<24x32xbf16>, vector<24x32xf32> -> vector<24x32xf32>
    %c0_158 = arith.constant 0 : index
    %c64_159 = arith.constant 64 : index
    %408 = vector.load %arg21[%c0_158, %c64_159] : memref<48x128xf32, #tpu.memory_space<vmem>>, vector<24x32xf32>
    tpu.vector_store %arg21[%c0_158, %c64_159], %407 {strides = array<i32>} : memref<48x128xf32, #tpu.memory_space<vmem>>, vector<24x32xf32>,
    %409 = vector.extract_strided_slice %339 {offsets = [0, 96], sizes = [24, 32], strides = [1, 1]} : vector<48x384xf32> to vector<24x32xf32>
    %410 = vector.extract_strided_slice %339 {offsets = [0, 224], sizes = [24, 32], strides = [1, 1]} : vector<48x384xf32> to vector<24x32xf32>
    %411 = vector.extract_strided_slice %339 {offsets = [0, 352], sizes = [24, 32], strides = [1, 1]} : vector<48x384xf32> to vector<24x32xf32>
    %412 = arith.truncf %409 : vector<24x32xf32> to vector<24x32xbf16>
    %413 = arith.truncf %410 : vector<24x32xf32> to vector<24x32xbf16>
    %cst_160 = arith.constant dense<0.000000e+00> : vector<24x24xf32>
    %414 = tpu.matmul %412, %413, %cst_160 {dimension_numbers = #tpu.dot_dimension_numbers<[1], [1], [0], [0], [0, 0, 1, 0], [], []>} : vector<24x32xbf16>, vector<24x32xbf16>, vector<24x24xf32> -> vector<24x24xf32>
    %cst_161 = arith.constant 0.176776692 : f32
    %415 = vector.broadcast %cst_161 : f32 to vector<24x24xf32>
    %416 = arith.mulf %414, %415 : vector<24x24xf32>
    %417 = vector.broadcast %32 : vector<1x24xf32> to vector<24x24xf32>
    %418 = arith.addf %416, %417 : vector<24x24xf32>
    %cst_162 = arith.constant dense<0xFF800000> : vector<24xf32>
    %419 = vector.multi_reduction <maximumf>, %418, %cst_162 [1] : vector<24x24xf32> to vector<24xf32>
    %420 = vector.shape_cast %419 : vector<24xf32> to vector<24x1xf32>
    %421 = vector.broadcast %420 : vector<24x1xf32> to vector<24x24xf32>
    %422 = arith.subf %418, %421 : vector<24x24xf32>
    %423 = math.exp %422 : vector<24x24xf32>
    %cst_163 = arith.constant dense<0.000000e+00> : vector<24xf32>
    %424 = vector.multi_reduction <add>, %423, %cst_163 [1] : vector<24x24xf32> to vector<24xf32>
    %425 = vector.shape_cast %424 : vector<24xf32> to vector<24x1xf32>
    %426 = vector.broadcast %425 : vector<24x1xf32> to vector<24x24xf32>
    %427 = arith.divf %423, %426 : vector<24x24xf32>
    %428 = arith.truncf %427 : vector<24x24xf32> to vector<24x24xbf16>
    %429 = arith.truncf %411 : vector<24x32xf32> to vector<24x32xbf16>
    %cst_164 = arith.constant dense<0.000000e+00> : vector<24x32xf32>
    %430 = tpu.matmul %428, %429, %cst_164 {dimension_numbers = #tpu.dot_dimension_numbers<[1], [0], [0], [1], [0, 0, 1, 1], [], []>} : vector<24x24xbf16>, vector<24x32xbf16>, vector<24x32xf32> -> vector<24x32xf32>
    %c0_165 = arith.constant 0 : index
    %c96_166 = arith.constant 96 : index
    %431 = vector.load %arg21[%c0_165, %c96_166] : memref<48x128xf32, #tpu.memory_space<vmem>>, vector<24x32xf32>
    tpu.vector_store %arg21[%c0_165, %c96_166], %430 {strides = array<i32>} : memref<48x128xf32, #tpu.memory_space<vmem>>, vector<24x32xf32>,
    %432 = vector.extract_strided_slice %339 {offsets = [24, 0], sizes = [24, 32], strides = [1, 1]} : vector<48x384xf32> to vector<24x32xf32>
    %433 = vector.extract_strided_slice %339 {offsets = [24, 128], sizes = [24, 32], strides = [1, 1]} : vector<48x384xf32> to vector<24x32xf32>
    %434 = vector.extract_strided_slice %339 {offsets = [24, 256], sizes = [24, 32], strides = [1, 1]} : vector<48x384xf32> to vector<24x32xf32>
    %435 = arith.truncf %432 : vector<24x32xf32> to vector<24x32xbf16>
    %436 = arith.truncf %433 : vector<24x32xf32> to vector<24x32xbf16>
    %cst_167 = arith.constant dense<0.000000e+00> : vector<24x24xf32>
    %437 = tpu.matmul %435, %436, %cst_167 {dimension_numbers = #tpu.dot_dimension_numbers<[1], [1], [0], [0], [0, 0, 1, 0], [], []>} : vector<24x32xbf16>, vector<24x32xbf16>, vector<24x24xf32> -> vector<24x24xf32>
    %cst_168 = arith.constant 0.176776692 : f32
    %438 = vector.broadcast %cst_168 : f32 to vector<24x24xf32>
    %439 = arith.mulf %437, %438 : vector<24x24xf32>
    %440 = vector.broadcast %32 : vector<1x24xf32> to vector<24x24xf32>
    %441 = arith.addf %439, %440 : vector<24x24xf32>
    %cst_169 = arith.constant dense<0xFF800000> : vector<24xf32>
    %442 = vector.multi_reduction <maximumf>, %441, %cst_169 [1] : vector<24x24xf32> to vector<24xf32>
    %443 = vector.shape_cast %442 : vector<24xf32> to vector<24x1xf32>
    %444 = vector.broadcast %443 : vector<24x1xf32> to vector<24x24xf32>
    %445 = arith.subf %441, %444 : vector<24x24xf32>
    %446 = math.exp %445 : vector<24x24xf32>
    %cst_170 = arith.constant dense<0.000000e+00> : vector<24xf32>
    %447 = vector.multi_reduction <add>, %446, %cst_170 [1] : vector<24x24xf32> to vector<24xf32>
    %448 = vector.shape_cast %447 : vector<24xf32> to vector<24x1xf32>
    %449 = vector.broadcast %448 : vector<24x1xf32> to vector<24x24xf32>
    %450 = arith.divf %446, %449 : vector<24x24xf32>
    %451 = arith.truncf %450 : vector<24x24xf32> to vector<24x24xbf16>
    %452 = arith.truncf %434 : vector<24x32xf32> to vector<24x32xbf16>
    %cst_171 = arith.constant dense<0.000000e+00> : vector<24x32xf32>
    %453 = tpu.matmul %451, %452, %cst_171 {dimension_numbers = #tpu.dot_dimension_numbers<[1], [0], [0], [1], [0, 0, 1, 1], [], []>} : vector<24x24xbf16>, vector<24x32xbf16>, vector<24x32xf32> -> vector<24x32xf32>
    %c24_172 = arith.constant 24 : index
    %c0_173 = arith.constant 0 : index
    %454 = vector.load %arg21[%c24_172, %c0_173] : memref<48x128xf32, #tpu.memory_space<vmem>>, vector<24x32xf32>
    tpu.vector_store %arg21[%c24_172, %c0_173], %453 {strides = array<i32>} : memref<48x128xf32, #tpu.memory_space<vmem>>, vector<24x32xf32>,
    %455 = vector.extract_strided_slice %339 {offsets = [24, 32], sizes = [24, 32], strides = [1, 1]} : vector<48x384xf32> to vector<24x32xf32>
    %456 = vector.extract_strided_slice %339 {offsets = [24, 160], sizes = [24, 32], strides = [1, 1]} : vector<48x384xf32> to vector<24x32xf32>
    %457 = vector.extract_strided_slice %339 {offsets = [24, 288], sizes = [24, 32], strides = [1, 1]} : vector<48x384xf32> to vector<24x32xf32>
    %458 = arith.truncf %455 : vector<24x32xf32> to vector<24x32xbf16>
    %459 = arith.truncf %456 : vector<24x32xf32> to vector<24x32xbf16>
    %cst_174 = arith.constant dense<0.000000e+00> : vector<24x24xf32>
    %460 = tpu.matmul %458, %459, %cst_174 {dimension_numbers = #tpu.dot_dimension_numbers<[1], [1], [0], [0], [0, 0, 1, 0], [], []>} : vector<24x32xbf16>, vector<24x32xbf16>, vector<24x24xf32> -> vector<24x24xf32>
    %cst_175 = arith.constant 0.176776692 : f32
    %461 = vector.broadcast %cst_175 : f32 to vector<24x24xf32>
    %462 = arith.mulf %460, %461 : vector<24x24xf32>
    %463 = vector.broadcast %32 : vector<1x24xf32> to vector<24x24xf32>
    %464 = arith.addf %462, %463 : vector<24x24xf32>
    %cst_176 = arith.constant dense<0xFF800000> : vector<24xf32>
    %465 = vector.multi_reduction <maximumf>, %464, %cst_176 [1] : vector<24x24xf32> to vector<24xf32>
    %466 = vector.shape_cast %465 : vector<24xf32> to vector<24x1xf32>
    %467 = vector.broadcast %466 : vector<24x1xf32> to vector<24x24xf32>
    %468 = arith.subf %464, %467 : vector<24x24xf32>
    %469 = math.exp %468 : vector<24x24xf32>
    %cst_177 = arith.constant dense<0.000000e+00> : vector<24xf32>
    %470 = vector.multi_reduction <add>, %469, %cst_177 [1] : vector<24x24xf32> to vector<24xf32>
    %471 = vector.shape_cast %470 : vector<24xf32> to vector<24x1xf32>
    %472 = vector.broadcast %471 : vector<24x1xf32> to vector<24x24xf32>
    %473 = arith.divf %469, %472 : vector<24x24xf32>
    %474 = arith.truncf %473 : vector<24x24xf32> to vector<24x24xbf16>
    %475 = arith.truncf %457 : vector<24x32xf32> to vector<24x32xbf16>
    %cst_178 = arith.constant dense<0.000000e+00> : vector<24x32xf32>
    %476 = tpu.matmul %474, %475, %cst_178 {dimension_numbers = #tpu.dot_dimension_numbers<[1], [0], [0], [1], [0, 0, 1, 1], [], []>} : vector<24x24xbf16>, vector<24x32xbf16>, vector<24x32xf32> -> vector<24x32xf32>
    %c24_179 = arith.constant 24 : index
    %c32_180 = arith.constant 32 : index
    %477 = vector.load %arg21[%c24_179, %c32_180] : memref<48x128xf32, #tpu.memory_space<vmem>>, vector<24x32xf32>
    tpu.vector_store %arg21[%c24_179, %c32_180], %476 {strides = array<i32>} : memref<48x128xf32, #tpu.memory_space<vmem>>, vector<24x32xf32>,
    %478 = vector.extract_strided_slice %339 {offsets = [24, 64], sizes = [24, 32], strides = [1, 1]} : vector<48x384xf32> to vector<24x32xf32>
    %479 = vector.extract_strided_slice %339 {offsets = [24, 192], sizes = [24, 32], strides = [1, 1]} : vector<48x384xf32> to vector<24x32xf32>
    %480 = vector.extract_strided_slice %339 {offsets = [24, 320], sizes = [24, 32], strides = [1, 1]} : vector<48x384xf32> to vector<24x32xf32>
    %481 = arith.truncf %478 : vector<24x32xf32> to vector<24x32xbf16>
    %482 = arith.truncf %479 : vector<24x32xf32> to vector<24x32xbf16>
    %cst_181 = arith.constant dense<0.000000e+00> : vector<24x24xf32>
    %483 = tpu.matmul %481, %482, %cst_181 {dimension_numbers = #tpu.dot_dimension_numbers<[1], [1], [0], [0], [0, 0, 1, 0], [], []>} : vector<24x32xbf16>, vector<24x32xbf16>, vector<24x24xf32> -> vector<24x24xf32>
    %cst_182 = arith.constant 0.176776692 : f32
    %484 = vector.broadcast %cst_182 : f32 to vector<24x24xf32>
    %485 = arith.mulf %483, %484 : vector<24x24xf32>
    %486 = vector.broadcast %32 : vector<1x24xf32> to vector<24x24xf32>
    %487 = arith.addf %485, %486 : vector<24x24xf32>
    %cst_183 = arith.constant dense<0xFF800000> : vector<24xf32>
    %488 = vector.multi_reduction <maximumf>, %487, %cst_183 [1] : vector<24x24xf32> to vector<24xf32>
    %489 = vector.shape_cast %488 : vector<24xf32> to vector<24x1xf32>
    %490 = vector.broadcast %489 : vector<24x1xf32> to vector<24x24xf32>
    %491 = arith.subf %487, %490 : vector<24x24xf32>
    %492 = math.exp %491 : vector<24x24xf32>
    %cst_184 = arith.constant dense<0.000000e+00> : vector<24xf32>
    %493 = vector.multi_reduction <add>, %492, %cst_184 [1] : vector<24x24xf32> to vector<24xf32>
    %494 = vector.shape_cast %493 : vector<24xf32> to vector<24x1xf32>
    %495 = vector.broadcast %494 : vector<24x1xf32> to vector<24x24xf32>
    %496 = arith.divf %492, %495 : vector<24x24xf32>
    %497 = arith.truncf %496 : vector<24x24xf32> to vector<24x24xbf16>
    %498 = arith.truncf %480 : vector<24x32xf32> to vector<24x32xbf16>
    %cst_185 = arith.constant dense<0.000000e+00> : vector<24x32xf32>
    %499 = tpu.matmul %497, %498, %cst_185 {dimension_numbers = #tpu.dot_dimension_numbers<[1], [0], [0], [1], [0, 0, 1, 1], [], []>} : vector<24x24xbf16>, vector<24x32xbf16>, vector<24x32xf32> -> vector<24x32xf32>
    %c24_186 = arith.constant 24 : index
    %c64_187 = arith.constant 64 : index
    %500 = vector.load %arg21[%c24_186, %c64_187] : memref<48x128xf32, #tpu.memory_space<vmem>>, vector<24x32xf32>
    tpu.vector_store %arg21[%c24_186, %c64_187], %499 {strides = array<i32>} : memref<48x128xf32, #tpu.memory_space<vmem>>, vector<24x32xf32>,
    %501 = vector.extract_strided_slice %339 {offsets = [24, 96], sizes = [24, 32], strides = [1, 1]} : vector<48x384xf32> to vector<24x32xf32>
    %502 = vector.extract_strided_slice %339 {offsets = [24, 224], sizes = [24, 32], strides = [1, 1]} : vector<48x384xf32> to vector<24x32xf32>
    %503 = vector.extract_strided_slice %339 {offsets = [24, 352], sizes = [24, 32], strides = [1, 1]} : vector<48x384xf32> to vector<24x32xf32>
    %504 = arith.truncf %501 : vector<24x32xf32> to vector<24x32xbf16>
    %505 = arith.truncf %502 : vector<24x32xf32> to vector<24x32xbf16>
    %cst_188 = arith.constant dense<0.000000e+00> : vector<24x24xf32>
    %506 = tpu.matmul %504, %505, %cst_188 {dimension_numbers = #tpu.dot_dimension_numbers<[1], [1], [0], [0], [0, 0, 1, 0], [], []>} : vector<24x32xbf16>, vector<24x32xbf16>, vector<24x24xf32> -> vector<24x24xf32>
    %cst_189 = arith.constant 0.176776692 : f32
    %507 = vector.broadcast %cst_189 : f32 to vector<24x24xf32>
    %508 = arith.mulf %506, %507 : vector<24x24xf32>
    %509 = vector.broadcast %32 : vector<1x24xf32> to vector<24x24xf32>
    %510 = arith.addf %508, %509 : vector<24x24xf32>
    %cst_190 = arith.constant dense<0xFF800000> : vector<24xf32>
    %511 = vector.multi_reduction <maximumf>, %510, %cst_190 [1] : vector<24x24xf32> to vector<24xf32>
    %512 = vector.shape_cast %511 : vector<24xf32> to vector<24x1xf32>
    %513 = vector.broadcast %512 : vector<24x1xf32> to vector<24x24xf32>
    %514 = arith.subf %510, %513 : vector<24x24xf32>
    %515 = math.exp %514 : vector<24x24xf32>
    %cst_191 = arith.constant dense<0.000000e+00> : vector<24xf32>
    %516 = vector.multi_reduction <add>, %515, %cst_191 [1] : vector<24x24xf32> to vector<24xf32>
    %517 = vector.shape_cast %516 : vector<24xf32> to vector<24x1xf32>
    %518 = vector.broadcast %517 : vector<24x1xf32> to vector<24x24xf32>
    %519 = arith.divf %515, %518 : vector<24x24xf32>
    %520 = arith.truncf %519 : vector<24x24xf32> to vector<24x24xbf16>
    %521 = arith.truncf %503 : vector<24x32xf32> to vector<24x32xbf16>
    %cst_192 = arith.constant dense<0.000000e+00> : vector<24x32xf32>
    %522 = tpu.matmul %520, %521, %cst_192 {dimension_numbers = #tpu.dot_dimension_numbers<[1], [0], [0], [1], [0, 0, 1, 1], [], []>} : vector<24x24xbf16>, vector<24x32xbf16>, vector<24x32xf32> -> vector<24x32xf32>
    %c24_193 = arith.constant 24 : index
    %c96_194 = arith.constant 96 : index
    %523 = vector.load %arg21[%c24_193, %c96_194] : memref<48x128xf32, #tpu.memory_space<vmem>>, vector<24x32xf32>
    tpu.vector_store %arg21[%c24_193, %c96_194], %522 {strides = array<i32>} : memref<48x128xf32, #tpu.memory_space<vmem>>, vector<24x32xf32>,
    %c0_195 = arith.constant 0 : index
    %c0_196 = arith.constant 0 : index
    %524 = vector.load %arg21[%c0_195, %c0_196] : memref<48x128xf32, #tpu.memory_space<vmem>>, vector<48x128xf32>
    %c1_197 = arith.constant 1 : index
    %c0_198 = arith.constant 0 : index
    %c0_199 = arith.constant 0 : index
    %525 = vector.load %arg9[%c1_197, %c0_198, %c0_199] : memref<2x128x128xbf16, #tpu.memory_space<vmem>>, vector<1x128x128xbf16>
    %526 = vector.shape_cast %525 : vector<1x128x128xbf16> to vector<128x128xbf16>
    %c1_200 = arith.constant 1 : index
    %c0_201 = arith.constant 0 : index
    %c0_202 = arith.constant 0 : index
    %527 = vector.load %arg10[%c1_200, %c0_201, %c0_202] : memref<2x1x128xf32, #tpu.memory_space<vmem>>, vector<1x1x128xf32>
    %528 = vector.shape_cast %527 : vector<1x1x128xf32> to vector<1x128xf32>
    %529 = arith.truncf %524 : vector<48x128xf32> to vector<48x128xbf16>
    %cst_203 = arith.constant dense<0.000000e+00> : vector<48x128xf32>
    %530 = tpu.matmul %529, %526, %cst_203 {dimension_numbers = #tpu.dot_dimension_numbers<[1], [0], [0], [1], [0, 0, 1, 1], [], []>} : vector<48x128xbf16>, vector<128x128xbf16>, vector<48x128xf32> -> vector<48x128xf32>
    %531 = vector.broadcast %528 : vector<1x128xf32> to vector<48x128xf32>
    %532 = arith.addf %530, %531 : vector<48x128xf32>
    %533 = arith.addf %532, %307 : vector<48x128xf32>
    %c1_204 = arith.constant 1 : index
    %c0_205 = arith.constant 0 : index
    %c0_206 = arith.constant 0 : index
    %534 = vector.load %arg11[%c1_204, %c0_205, %c0_206] : memref<2x1x128xf32, #tpu.memory_space<vmem>>, vector<1x1x128xf32>
    %535 = vector.shape_cast %534 : vector<1x1x128xf32> to vector<1x128xf32>
    %c1_207 = arith.constant 1 : index
    %c0_208 = arith.constant 0 : index
    %c0_209 = arith.constant 0 : index
    %536 = vector.load %arg12[%c1_207, %c0_208, %c0_209] : memref<2x1x128xf32, #tpu.memory_space<vmem>>, vector<1x1x128xf32>
    %537 = vector.shape_cast %536 : vector<1x1x128xf32> to vector<1x128xf32>
    %cst_210 = arith.constant dense<0.000000e+00> : vector<48xf32>
    %538 = vector.multi_reduction <add>, %533, %cst_210 [1] : vector<48x128xf32> to vector<48xf32>
    %539 = vector.shape_cast %538 : vector<48xf32> to vector<48x1xf32>
    %cst_211 = arith.constant 1.280000e+02 : f32
    %540 = vector.broadcast %cst_211 : f32 to vector<48x1xf32>
    %541 = arith.divf %539, %540 : vector<48x1xf32>
    %542 = vector.broadcast %541 : vector<48x1xf32> to vector<48x128xf32>
    %543 = arith.subf %533, %542 : vector<48x128xf32>
    %544 = arith.mulf %543, %543 : vector<48x128xf32>
    %cst_212 = arith.constant dense<0.000000e+00> : vector<48xf32>
    %545 = vector.multi_reduction <add>, %544, %cst_212 [1] : vector<48x128xf32> to vector<48xf32>
    %546 = vector.shape_cast %545 : vector<48xf32> to vector<48x1xf32>
    %cst_213 = arith.constant 1.280000e+02 : f32
    %547 = vector.broadcast %cst_213 : f32 to vector<48x1xf32>
    %548 = arith.divf %546, %547 : vector<48x1xf32>
    %cst_214 = arith.constant 9.99999974E-6 : f32
    %549 = vector.broadcast %cst_214 : f32 to vector<48x1xf32>
    %550 = arith.addf %548, %549 : vector<48x1xf32>
    %551 = math.rsqrt %550 : vector<48x1xf32>
    %552 = vector.broadcast %551 : vector<48x1xf32> to vector<48x128xf32>
    %553 = arith.mulf %543, %552 : vector<48x128xf32>
    %554 = vector.broadcast %535 : vector<1x128xf32> to vector<48x128xf32>
    %555 = arith.mulf %553, %554 : vector<48x128xf32>
    %556 = vector.broadcast %537 : vector<1x128xf32> to vector<48x128xf32>
    %557 = arith.addf %555, %556 : vector<48x128xf32>
    %c1_215 = arith.constant 1 : index
    %c0_216 = arith.constant 0 : index
    %c0_217 = arith.constant 0 : index
    %558 = vector.load %arg13[%c1_215, %c0_216, %c0_217] : memref<2x128x512xbf16, #tpu.memory_space<vmem>>, vector<1x128x512xbf16>
    %559 = vector.shape_cast %558 : vector<1x128x512xbf16> to vector<128x512xbf16>
    %c1_218 = arith.constant 1 : index
    %c0_219 = arith.constant 0 : index
    %c0_220 = arith.constant 0 : index
    %560 = vector.load %arg14[%c1_218, %c0_219, %c0_220] : memref<2x1x512xf32, #tpu.memory_space<vmem>>, vector<1x1x512xf32>
    %561 = vector.shape_cast %560 : vector<1x1x512xf32> to vector<1x512xf32>
    %562 = arith.truncf %557 : vector<48x128xf32> to vector<48x128xbf16>
    %cst_221 = arith.constant dense<0.000000e+00> : vector<48x512xf32>
    %563 = tpu.matmul %562, %559, %cst_221 {dimension_numbers = #tpu.dot_dimension_numbers<[1], [0], [0], [1], [0, 0, 1, 1], [], []>} : vector<48x128xbf16>, vector<128x512xbf16>, vector<48x512xf32> -> vector<48x512xf32>
    %564 = vector.broadcast %561 : vector<1x512xf32> to vector<48x512xf32>
    %565 = arith.addf %563, %564 : vector<48x512xf32>
    %cst_222 = arith.constant 1.702000e+00 : f32
    %566 = vector.broadcast %cst_222 : f32 to vector<48x512xf32>
    %567 = arith.mulf %566, %565 : vector<48x512xf32>
    %568 = arith.negf %567 : vector<48x512xf32>
    %569 = math.exp %568 : vector<48x512xf32>
    %cst_223 = arith.constant 1.000000e+00 : f32
    %570 = vector.broadcast %cst_223 : f32 to vector<48x512xf32>
    %571 = arith.addf %570, %569 : vector<48x512xf32>
    %572 = arith.divf %570, %571 : vector<48x512xf32>
    %573 = arith.mulf %565, %572 : vector<48x512xf32>
    %c1_224 = arith.constant 1 : index
    %c0_225 = arith.constant 0 : index
    %c0_226 = arith.constant 0 : index
    %574 = vector.load %arg15[%c1_224, %c0_225, %c0_226] : memref<2x512x128xbf16, #tpu.memory_space<vmem>>, vector<1x512x128xbf16>
    %575 = vector.shape_cast %574 : vector<1x512x128xbf16> to vector<512x128xbf16>
    %c1_227 = arith.constant 1 : index
    %c0_228 = arith.constant 0 : index
    %c0_229 = arith.constant 0 : index
    %576 = vector.load %arg16[%c1_227, %c0_228, %c0_229] : memref<2x1x128xf32, #tpu.memory_space<vmem>>, vector<1x1x128xf32>
    %577 = vector.shape_cast %576 : vector<1x1x128xf32> to vector<1x128xf32>
    %578 = arith.truncf %573 : vector<48x512xf32> to vector<48x512xbf16>
    %cst_230 = arith.constant dense<0.000000e+00> : vector<48x128xf32>
    %579 = tpu.matmul %578, %575, %cst_230 {dimension_numbers = #tpu.dot_dimension_numbers<[1], [0], [0], [1], [0, 0, 1, 1], [], []>} : vector<48x512xbf16>, vector<512x128xbf16>, vector<48x128xf32> -> vector<48x128xf32>
    %580 = vector.broadcast %577 : vector<1x128xf32> to vector<48x128xf32>
    %581 = arith.addf %579, %580 : vector<48x128xf32>
    %582 = arith.addf %581, %533 : vector<48x128xf32>
    %c0_231 = arith.constant 0 : index
    %c0_232 = arith.constant 0 : index
    %583 = vector.load %arg19[%c0_231, %c0_232] : memref<48x128xf32, #tpu.memory_space<vmem>>, vector<48x128xf32>
    tpu.vector_store %arg19[%c0_231, %c0_232], %582 {strides = array<i32>} : memref<48x128xf32, #tpu.memory_space<vmem>>, vector<48x128xf32>,
    %c0_233 = arith.constant 0 : index
    %c0_234 = arith.constant 0 : index
    %584 = vector.load %arg17[%c0_233, %c0_234] : memref<1x128xf32, #tpu.memory_space<vmem>>, vector<1x128xf32>
    %c0_235 = arith.constant 0 : index
    %c0_236 = arith.constant 0 : index
    %585 = vector.load %arg18[%c0_235, %c0_236] : memref<1x128xf32, #tpu.memory_space<vmem>>, vector<1x128xf32>
    %586 = vector.extract_strided_slice %582 {offsets = [0, 0], sizes = [1, 128], strides = [1, 1]} : vector<48x128xf32> to vector<1x128xf32>
    %cst_237 = arith.constant dense<0.000000e+00> : vector<1xf32>
    %587 = vector.multi_reduction <add>, %586, %cst_237 [1] : vector<1x128xf32> to vector<1xf32>
    %588 = vector.shape_cast %587 : vector<1xf32> to vector<1x1xf32>
    %cst_238 = arith.constant 1.280000e+02 : f32
    %589 = vector.broadcast %cst_238 : f32 to vector<1x1xf32>
    %590 = arith.divf %588, %589 : vector<1x1xf32>
    %591 = vector.broadcast %590 : vector<1x1xf32> to vector<1x128xf32>
    %592 = arith.subf %586, %591 : vector<1x128xf32>
    %593 = arith.mulf %592, %592 : vector<1x128xf32>
    %cst_239 = arith.constant dense<0.000000e+00> : vector<1xf32>
    %594 = vector.multi_reduction <add>, %593, %cst_239 [1] : vector<1x128xf32> to vector<1xf32>
    %595 = vector.shape_cast %594 : vector<1xf32> to vector<1x1xf32>
    %cst_240 = arith.constant 1.280000e+02 : f32
    %596 = vector.broadcast %cst_240 : f32 to vector<1x1xf32>
    %597 = arith.divf %595, %596 : vector<1x1xf32>
    %cst_241 = arith.constant 9.99999974E-6 : f32
    %598 = vector.broadcast %cst_241 : f32 to vector<1x1xf32>
    %599 = arith.addf %597, %598 : vector<1x1xf32>
    %600 = math.rsqrt %599 : vector<1x1xf32>
    %601 = vector.broadcast %600 : vector<1x1xf32> to vector<1x128xf32>
    %602 = arith.mulf %592, %601 : vector<1x128xf32>
    %603 = arith.mulf %602, %584 : vector<1x128xf32>
    %604 = arith.addf %603, %585 : vector<1x128xf32>
    %c0_242 = arith.constant 0 : index
    %c0_243 = arith.constant 0 : index
    %605 = vector.load %arg20[%c0_242, %c0_243] : memref<2x128xf32, #tpu.memory_space<vmem>>, vector<1x128xf32>
    tpu.vector_store %arg20[%c0_242, %c0_243], %604 {strides = array<i32>} : memref<2x128xf32, #tpu.memory_space<vmem>>, vector<1x128xf32>,
    %606 = vector.extract_strided_slice %582 {offsets = [24, 0], sizes = [1, 128], strides = [1, 1]} : vector<48x128xf32> to vector<1x128xf32>
    %cst_244 = arith.constant dense<0.000000e+00> : vector<1xf32>
    %607 = vector.multi_reduction <add>, %606, %cst_244 [1] : vector<1x128xf32> to vector<1xf32>
    %608 = vector.shape_cast %607 : vector<1xf32> to vector<1x1xf32>
    %cst_245 = arith.constant 1.280000e+02 : f32
    %609 = vector.broadcast %cst_245 : f32 to vector<1x1xf32>
    %610 = arith.divf %608, %609 : vector<1x1xf32>
    %611 = vector.broadcast %610 : vector<1x1xf32> to vector<1x128xf32>
    %612 = arith.subf %606, %611 : vector<1x128xf32>
    %613 = arith.mulf %612, %612 : vector<1x128xf32>
    %cst_246 = arith.constant dense<0.000000e+00> : vector<1xf32>
    %614 = vector.multi_reduction <add>, %613, %cst_246 [1] : vector<1x128xf32> to vector<1xf32>
    %615 = vector.shape_cast %614 : vector<1xf32> to vector<1x1xf32>
    %cst_247 = arith.constant 1.280000e+02 : f32
    %616 = vector.broadcast %cst_247 : f32 to vector<1x1xf32>
    %617 = arith.divf %615, %616 : vector<1x1xf32>
    %cst_248 = arith.constant 9.99999974E-6 : f32
    %618 = vector.broadcast %cst_248 : f32 to vector<1x1xf32>
    %619 = arith.addf %617, %618 : vector<1x1xf32>
    %620 = math.rsqrt %619 : vector<1x1xf32>
    %621 = vector.broadcast %620 : vector<1x1xf32> to vector<1x128xf32>
    %622 = arith.mulf %612, %621 : vector<1x128xf32>
    %623 = arith.mulf %622, %584 : vector<1x128xf32>
    %624 = arith.addf %623, %585 : vector<1x128xf32>
    %c1_249 = arith.constant 1 : index
    %c0_250 = arith.constant 0 : index
    %625 = vector.load %arg20[%c1_249, %c0_250] : memref<2x128xf32, #tpu.memory_space<vmem>>, vector<1x128xf32>
    tpu.vector_store %arg20[%c1_249, %c0_250], %624 {strides = array<i32>} : memref<2x128xf32, #tpu.memory_space<vmem>>, vector<1x128xf32>,
    return
  }
}

</mosaic_0001>

<bundles_post_ra>
// kernel: clip_vision_forward.1
= control target key start
LH: loop header
LB: loop body
LE: loop exit
PB: predicated region body
PF: predicated region fallthrough
CT: control target
= control target key end

     0   :  { %s10716_s0 = inlined_call_operand.vmem [shape: bf16[48,192], index: 0, kind: input, shape index: {}]   ;;  %s10717_s1 = inlined_call_operand.vmem [shape: bf16[192,128], index: 1, kind: input, shape index: {}]   ;;  %s10718_s2 = inlined_call_operand.vmem [shape: f32[48,128], index: 2, kind: input, shape index: {}]   ;;  %s10719_s3 = inlined_call_operand.vmem [shape: f32[1,128], index: 3, kind: input, shape index: {}, may-alias: {3,17}]   ;;  %s10720_s4 = inlined_call_operand.vmem [shape: f32[1,128], index: 4, kind: input, shape index: {}, may-alias: {4,18}]   ;;  %s10721_s5 = inlined_call_operand.vmem [shape: f32[2,1,128], index: 5, kind: input, shape index: {}, may-alias: {5,11}]   ;;  %s10722_s6 = inlined_call_operand.vmem [shape: f32[2,1,128], index: 6, kind: input, shape index: {}, may-alias: {6,10,12,16}]   ;;  %s10723_s7 = inlined_call_operand.vmem [shape: bf16[2,128,384], index: 7, kind: input, shape index: {}]   ;;  %s10724_s8 = inlined_call_operand.vmem [shape: f32[2,1,384], index: 8, kind: input, shape index: {}]   ;;  %s10725_s9 = inlined_call_operand.vmem [shape: bf16[2,128,128], index: 9, kind: input, shape index: {}]   ;;  %s10726_s10 = inlined_call_operand.vmem [shape: f32[2,1,128], index: 10, kind: input, shape index: {}, may-alias: {6,10,12,16}]   ;;  %s10727_s11 = inlined_call_operand.vmem [shape: f32[2,1,128], index: 11, kind: input, shape index: {}, may-alias: {5,11}]   ;;  %s10728_s12 = inlined_call_operand.vmem [shape: f32[2,1,128], index: 12, kind: input, shape index: {}, may-alias: {6,10,12,16}]   ;;  %s10729_s13 = inlined_call_operand.vmem [shape: bf16[2,128,512], index: 13, kind: input, shape index: {}]   ;;  %s10730_s14 = inlined_call_operand.vmem [shape: f32[2,1,512], index: 14, kind: input, shape index: {}]   ;;  %s10731_s15 = inlined_call_operand.vmem [shape: bf16[2,512,128], index: 15, kind: input, shape index: {}]   ;;  %s10732_s16 = inlined_call_operand.vmem [shape: f32[2,1,128], index: 16, kind: input, shape index: {}, may-alias: {6,10,12,16}]   ;;  %s10733_s17 = inlined_call_operand.vmem [shape: f32[1,128], index: 17, kind: input, shape index: {}, may-alias: {3,17}]   ;;  %s10734_s18 = inlined_call_operand.vmem [shape: f32[1,128], index: 18, kind: input, shape index: {}, may-alias: {4,18}]   ;;  %s10735_s19 = inlined_call_operand.vmem [shape: f32[48,128], index: 19, kind: output, shape index: {0}]   ;;  %s10736_s20 = inlined_call_operand.hbm [shape: f32[2,128], index: 20, kind: output, shape index: {1}]  }
   0x1   :  { %10740 = sst [smem:[#allocation6_spill]] %s10716_s0 }
   0x2   :  { %10741 = sst [smem:[#allocation7_spill]] %s10717_s1 }
   0x3   :  { %10742 = sst [smem:[#allocation8_spill]] %s10718_s2 }
   0x4   :  { %10743 = sst [smem:[#allocation9_spill]] %s10719_s3 }
   0x5   :  { %10744 = sst [smem:[#allocation10_spill]] %s10720_s4 }
   0x6   :  { %s10745_s23 = sld [smem:[#allocation7_spill]]  ;;  %v8436_v1 = vmov 0   ;;  %vm201_vm0 = vcmask 523264   ;;  %s10746_s29 = sld [smem:[#allocation6_spill]] }
   0x7   :  { %211 = vmatprep.subr.bf16.mxu0 %v8436_v1  ;;  %669 = vmatprep.mubr.bf16.mxu1 %v8436_v1 }
   0xc   :  { %v7703_v0 = vld [vmem:[%s10745_s23] sm:$0xff]   ;;  %v7704_v2 = vld [vmem:[%s10745_s23 + $0x8] sm:$0xff]   ;;  %v7705_v3 = vld [vmem:[%s10745_s23 + $0x10] sm:$0xff]  }
   0xd   :  { %212 = vmatpush1.bf16.msra.mxu0 %v7703_v0  ;;  %v7706_v4 = vld [vmem:[%s10745_s23 + $0x18] sm:$0xff]   ;;  %v7717_v5 = vld [vmem:[%s10746_s29 + $0x4] ss:$8 sps:$4 sm:$0xff]   ;;  %v7709_v8 = vld [vmem:[%s10745_s23 + $0x30] sm:$0xff]  }
   0xe   :  { %213 = vmatprep.subr.bf16.mxu0 %v8436_v1  ;;  %v7707_v6 = vld [vmem:[%s10745_s23 + $0x20] sm:$0xff]   ;;  %6498 = vmatprep.mubr.msk.bf16.mxu0 %vm201_vm0, %v7717_v5  ;;  %v7708_v7 = vld [vmem:[%s10745_s23 + $0x28] sm:$0xff]   ;;  %v7710_v9 = vld [vmem:[%s10745_s23 + $0x38] sm:$0xff]  }
   0xf   :  { %v7711_v10 = vld [vmem:[%s10745_s23 + $0x40] sm:$0xff]   ;;  %v7712_v11 = vld [vmem:[%s10745_s23 + $0x48] sm:$0xff]   ;;  %v7713_v12 = vld [vmem:[%s10745_s23 + $0x50] sm:$0xff]  }
  0x10   :  { %v7714_v13 = vld [vmem:[%s10745_s23 + $0x58] sm:$0xff]   ;;  %v7715_v14 = vld [vmem:[%s10746_s29] ss:$8 sps:$4 sm:$0xff]  }
  0x11   :  { %214 = vmatpush1.bf16.msra.mxu0 %v7704_v2  ;;  %v7718_v15 = vld [vmem:[%s10746_s29 + $0x14] ss:$8 sps:$4 sm:$0xff]   ;;  %v7720_v16 = vld [vmem:[%s10746_s29 + $0x10] ss:$8 sps:$4 sm:$0xff]  }
  0x12   :  { %215 = vmatprep.subr.bf16.mxu0 %v8436_v1 }
  0x15   :  { %216 = vmatpush1.bf16.msra.mxu0 %v7705_v3 }
  0x16   :  { %217 = vmatprep.subr.bf16.mxu0 %v8436_v1 }
  0x19   :  { %218 = vmatpush1.bf16.msra.mxu0 %v7706_v4 }
  0x1a   :  { %219 = vmatprep.subr.bf16.mxu0 %v8436_v1 }
  0x1d   :  { %220 = vmatpush1.bf16.msra.mxu0 %v7707_v6 }
  0x1e   :  { %221 = vmatprep.subr.bf16.mxu0 %v8436_v1 }
  0x21   :  { %222 = vmatpush1.bf16.msra.mxu0 %v7708_v7 }
  0x22   :  { %223 = vmatprep.subr.bf16.mxu0 %v8436_v1 }
  0x25   :  { %224 = vmatpush1.bf16.msra.mxu0 %v7709_v8 }
  0x26   :  { %225 = vmatprep.subr.bf16.mxu0 %v8436_v1 }
  0x29   :  { %226 = vmatpush1.bf16.msra.mxu0 %v7710_v9 }
  0x2a   :  { %227 = vmatprep.subr.bf16.mxu0 %v8436_v1 }
  0x2d   :  { %228 = vmatpush1.bf16.msra.mxu0 %v7711_v10 }
  0x2e   :  { %229 = vmatprep.subr.bf16.mxu0 %v8436_v1 }
  0x31   :  { %230 = vmatpush1.bf16.msra.mxu0 %v7712_v11 }
  0x32   :  { %231 = vmatprep.subr.bf16.mxu0 %v8436_v1 }
  0x35   :  { %232 = vmatpush1.bf16.msra.mxu0 %v7713_v12 }
  0x36   :  { %233 = vmatprep.subr.bf16.mxu0 %v8436_v1 }
  0x39   :  { %234 = vmatpush1.bf16.msra.mxu0 %v7714_v13 }
  0x3c   :  { %244 = vmatmul.mubr.bf16.vlgmr.msra.gmra.mrb[0].mxu0 %v7715_v14 }
  0x3d   :  { %6499 = vmatprep.mubr.msk.bf16.mxu0 %vm201_vm0, %v7718_v15 }
  0x44   :  { %252 = vmatmul.mubr.bf16.gmra.mrb[4].mxu0 %v7720_v16 }
  0x45   :  { %26 = vsyncpa [#allocation4], 0  ;;  %s10747_s27 = sld [smem:[#allocation8_spill]]  ;;  %v7721_v33 = vld [vmem:[%s10746_s29 + $0x24] ss:$8 sps:$4 sm:$0xff]   ;;  %s10748_s23 = sld [smem:[#allocation9_spill]] }
  0x46   :  { %v7723_v34 = vld [vmem:[%s10746_s29 + $0x20] ss:$8 sps:$4 sm:$0xff]   ;;  %6500 = vmatprep.mubr.msk.bf16.mxu0 %vm201_vm0, %v7721_v33  ;;  %s10749_s4 = sld [smem:[#allocation10_spill]]  ;;  %vm761_vm1 = vcmask 261120   ;;  %vm828_vm3 = vcmask 195584   ;;  %vm8440_vm4 = vmmov 0  }
  0x47   :  { %vm872_vm5 = vcmask 1043456   ;;  %s8441_s30 = smov 64   ;;  %s8442_s0 = smov 32   ;;  %vm1116_vm6 = vcmask 523520   ;;  %vm1303_vm7 = vcmask 785920   ;;  %vm1490_vm8 = vcmask 1048320  }
  0x48   :  { %vm6429_vm9 = vcmask 1040384  }
  0x4b   :  { %v96_v17 = vld [vmem:[%s10747_s27] sm:$0xff]  ;;  %v97_v21 = vld [vmem:[%s10747_s27 + $0x8] sm:$0xff]  ;;  %v98_v25 = vld [vmem:[%s10747_s27 + $0x10] sm:$0xff] }
  0x4c   :  { %v99_v29 = vld [vmem:[%s10747_s27 + $0x18] sm:$0xff]  ;;  %260 = vmatmul.mubr.bf16.gmra.mrb[8].mxu0 %v7723_v34  ;;  %v8634_v0 = vld [vmem:[%s10748_s23] ss:$0 sm:$0xff] }
  0x4d   :  { %v8639_v3 = vld [vmem:[%s10749_s4] ss:$0 sm:$0xff]  ;;  %s8438_s4 = smov 96  }
 0x10f   :  { %v245_v18 = vpop.f32.mrb[0].mxu0 }
 0x110   :  { %v246_v19 = vadd.f32 %v245_v18, %v96_v17  ;;  %v247_v20 = vpop.f32.mrb[1].mxu0 }
 0x111   :  { %v248_v22 = vpop.f32.mrb[2].mxu0 }
 0x112   :  { %v250_v23 = vpop.f32.mrb[3].mxu0  ;;  %270 = vadd.xlane.f32.xlu0 %v246_v19  ;;  %v249_v24 = vadd.f32 %v248_v22, %v97_v21  ;;  %v7724_v22 = vld [vmem:[%s10723_s7 + $0x4] ss:$12 sps:$4 sm:$0xff]  }
 0x113   :  { %v7726_v23 = vld [vmem:[%s10723_s7] ss:$12 sps:$4 sm:$0xff]   ;;  %637 = vmatprep.subr.bf16.mxu1 %v7724_v22 }
 0x114   :  { %638 = vmatpush1.bf16.msra.mxu1 %v7726_v23 }
 0x116   :  { %272 = vadd.xlane.f32.xlu0 %v249_v24 }
 0x117   :  { %v253_v26 = vpop.f32.mrb[4].mxu0 }
 0x118   :  { %v254_v27 = vadd.f32 %v253_v26, %v98_v25  ;;  %v255_v28 = vpop.f32.mrb[5].mxu0 }
 0x119   :  { %v256_v30 = vpop.f32.mrb[6].mxu0 }
 0x11a   :  { %v258_v31 = vpop.f32.mrb[7].mxu0  ;;  %274 = vadd.xlane.f32.xlu1 %v254_v27  ;;  %v257_v32 = vadd.f32 %v256_v30, %v99_v29 }
 0x11e   :  { %276 = vadd.xlane.f32.xlu1 %v257_v32 }
 0x11f   :  { %v261_v18 = vpop.f32.mrb[8].mxu0 }
 0x19f   :  { %v271_v35 = vpop.xlane.xlu0 %270 }
 0x1a0   :  { %v283_v36 = vmul.f32 0.0078125, %v271_v35 }
 0x1a2   :  { %v289_v37 = vsub.f32 %v246_v19, %v283_v36  ;;  %v263_v19 = vpop.f32.mrb[9].mxu0 }
 0x1a3   :  { %v273_v38 = vpop.xlane.xlu0 %272  ;;  %v264_v20 = vpop.f32.mrb[10].mxu0 }
 0x1a4   :  { %v284_v39 = vmul.f32 0.0078125, %v273_v38  ;;  %v295_v40 = vmul.f32 %v289_v37, %v289_v37  ;;  %v266_v21 = vpop.f32.mrb[11].mxu0 }
 0x1a5   :  { %v8739_v21 = vld [vmem:[%s10721_s5] ss:$0 sm:$0xff] }
 0x1a6   :  { %301 = vadd.xlane.f32.xlu0 %v295_v40  ;;  %v290_v41 = vsub.f32 %v249_v24, %v284_v39  ;;  %v7727_v24 = vld [vmem:[%s10723_s7 + $0x1c] ss:$12 sps:$4 sm:$0xff]  }
 0x1a7   :  { %v275_v42 = vpop.xlane.xlu1 %274  ;;  %639 = vmatprep.subr.bf16.mxu1 %v7727_v24 }
 0x1a8   :  { %v285_v43 = vmul.f32 0.0078125, %v275_v42  ;;  %v296_v44 = vmul.f32 %v290_v41, %v290_v41 }
 0x1aa   :  { %303 = vadd.xlane.f32.xlu1 %v296_v44  ;;  %v291_v45 = vsub.f32 %v254_v27, %v285_v43  ;;  %v101_v43 = vld [vmem:[%s10747_s27 + $0x28] sm:$0xff]  ;;  %v7729_v44 = vld [vmem:[%s10723_s7 + $0x18] ss:$12 sps:$4 sm:$0xff]  }
 0x1ab   :  { %v277_v46 = vpop.xlane.xlu1 %276  ;;  %640 = vmatpush1.bf16.msra.mxu1 %v7729_v44 }
 0x1ac   :  { %v286_v47 = vmul.f32 0.0078125, %v277_v46  ;;  %v297_v48 = vmul.f32 %v291_v45, %v291_v45  ;;  %v7730_v46 = vld [vmem:[%s10723_s7 + $0x34] ss:$12 sps:$4 sm:$0xff]  }
 0x1ad   :  { %641 = vmatprep.subr.bf16.mxu1 %v7730_v46 }
 0x1ae   :  { %305 = vadd.xlane.f32.xlu0 %v297_v48  ;;  %v292_v49 = vsub.f32 %v257_v32, %v286_v47  ;;  %v7732_v47 = vld [vmem:[%s10723_s7 + $0x30] ss:$12 sps:$4 sm:$0xff]   ;;  %v7733_v48 = vld [vmem:[%s10723_s7 + $0x4c] ss:$12 sps:$4 sm:$0xff]  }
 0x1af   :  { %642 = vmatpush1.bf16.msra.mxu1 %v7732_v47 }
 0x1b0   :  { %v298_v50 = vmul.f32 %v292_v49, %v292_v49  ;;  %643 = vmatprep.subr.bf16.mxu1 %v7733_v48 }
 0x1b2   :  { %307 = vadd.xlane.f32.xlu1 %v298_v50  ;;  %v7736_v50 = vld [vmem:[%s10723_s7 + $0x64] ss:$12 sps:$4 sm:$0xff]  }
 0x233   :  { %v302_v51 = vpop.xlane.xlu0 %301 }
 0x234   :  { %v313_v52 = vmul.f32 0.0078125, %v302_v51  ;;  %v7738_v51 = vld [vmem:[%s10723_s7 + $0x60] ss:$12 sps:$4 sm:$0xff]  }
 0x236   :  { %v319_v53 = vadd.f32 1e-05, %v313_v52  ;;  %v7739_v52 = vld [vmem:[%s10723_s7 + $0x7c] ss:$12 sps:$4 sm:$0xff]  }
 0x237   :  { %v304_v54 = vpop.xlane.xlu1 %303 }
 0x238   :  { %7964 = vrsqrt.f32 %v319_v53  ;;  %v314_v55 = vmul.f32 0.0078125, %v304_v54  ;;  %v7741_v53 = vld [vmem:[%s10723_s7 + $0x78] ss:$12 sps:$4 sm:$0xff]   ;;  %v7742_v54 = vld [vmem:[%s10723_s7 + $0x94] ss:$12 sps:$4 sm:$0xff]  }
 0x23a   :  { %v320_v56 = vadd.f32 1e-05, %v314_v55  ;;  %v7744_v55 = vld [vmem:[%s10723_s7 + $0x90] ss:$12 sps:$4 sm:$0xff]  }
 0x23b   :  { %v306_v57 = vpop.xlane.xlu0 %305 }
 0x23c   :  { %7966 = vrsqrt.f32 %v320_v56  ;;  %v315_v58 = vmul.f32 0.0078125, %v306_v57  ;;  %v7745_v56 = vld [vmem:[%s10723_s7 + $0xac] ss:$12 sps:$4 sm:$0xff]   ;;  %v7747_v57 = vld [vmem:[%s10723_s7 + $0xa8] ss:$12 sps:$4 sm:$0xff]  }
 0x23e   :  { %v321_v59 = vadd.f32 1e-05, %v315_v58 }
 0x23f   :  { %v308_v60 = vpop.xlane.xlu1 %307 }
 0x240   :  { %7968 = vrsqrt.f32 %v321_v59  ;;  %v316_v61 = vmul.f32 0.0078125, %v308_v60 }
 0x242   :  { %v7965_v62 = vpop.eup %7964  ;;  %v322_v63 = vadd.f32 1e-05, %v316_v61 }
 0x243   :  { %v331_v2 = vmul.f32 %v7965_v62, %v289_v37  ;;  %v100_v37 = vld [vmem:[%s10747_s27 + $0x20] sm:$0xff] }
 0x244   :  { %7970 = vrsqrt.f32 %v322_v63  ;;  %v262_v40 = vadd.f32 %v261_v18, %v100_v37 }
 0x245   :  { %v343_v4 = vmul.f32 %v8634_v0, %v331_v2 }
 0x246   :  { %v7967_v5 = vpop.eup %7966 }
 0x247   :  { %v8643_v6 = vadd.f32 %v8639_v3, %v343_v4  ;;  %v332_v7 = vmul.f32 %v7967_v5, %v290_v41 }
 0x249   :  { %367 = vadd.xlane.f32.xlu0 %v8643_v6  ;;  %v344_v8 = vmul.f32 %v8634_v0, %v332_v7 }
 0x24a   :  { %v7969_v9 = vpop.eup %7968 }
 0x24b   :  { %v8648_v10 = vadd.f32 %v8639_v3, %v344_v8  ;;  %v333_v11 = vmul.f32 %v7969_v9, %v291_v45  ;;  %v265_v45 = vadd.f32 %v264_v20, %v101_v43 }
 0x24d   :  { %369 = vadd.xlane.f32.xlu1 %v8648_v10  ;;  %v345_v12 = vmul.f32 %v8634_v0, %v333_v11 }
 0x24e   :  { %v7971_v13 = vpop.eup %7970 }
 0x24f   :  { %v8653_v14 = vadd.f32 %v8639_v3, %v345_v12  ;;  %v334_v15 = vmul.f32 %v7971_v13, %v292_v49  ;;  %v7735_v49 = vld [vmem:[%s10723_s7 + $0x48] ss:$12 sps:$4 sm:$0xff]  }
 0x250   :  { %644 = vmatpush1.bf16.msra.mxu1 %v7735_v49 }
 0x251   :  { %371 = vadd.xlane.f32.xlu0 %v8653_v14  ;;  %v346_v16 = vmul.f32 %v8634_v0, %v334_v15  ;;  %645 = vmatprep.subr.bf16.mxu1 %v7736_v50 }
 0x253   :  { %v8658_v17 = vadd.f32 %v8639_v3, %v346_v16 }
 0x254   :  { %646 = vmatpush1.bf16.msra.mxu1 %v7738_v51 }
 0x255   :  { %373 = vadd.xlane.f32.xlu1 %v8658_v17  ;;  %647 = vmatprep.subr.bf16.mxu1 %v7739_v52 }
 0x258   :  { %648 = vmatpush1.bf16.msra.mxu1 %v7741_v53 }
 0x259   :  { %649 = vmatprep.subr.bf16.mxu1 %v7742_v54 }
 0x25c   :  { %650 = vmatpush1.bf16.msra.mxu1 %v7744_v55  ;;  %v361_v55 = vlaneseq }
 0x25d   :  { %651 = vmatprep.subr.bf16.mxu1 %v7745_v56 }
 0x25e   :  { %v8776_v56 = vshrl.u32 %v361_v55, 7 }
 0x260   :  { %652 = vmatpush1.bf16.msra.mxu1 %v7747_v57  ;;  %v7748_v57 = vld [vmem:[%s10723_s7 + $0x8] ss:$12 sps:$4 sm:$0xff]  }
 0x2d6   :  { %v368_v25 = vpop.xlane.xlu0 %367 }
 0x2d7   :  { %v379_v26 = vmul.f32 0.0078125, %v368_v25 }
 0x2d9   :  { %v8671_v27 = vsub.f32 %v8643_v6, %v379_v26 }
 0x2da   :  { %v370_v28 = vpop.xlane.xlu1 %369 }
 0x2db   :  { %v380_v29 = vmul.f32 0.0078125, %v370_v28  ;;  %v391_v30 = vmul.f32 %v8671_v27, %v8671_v27 }
 0x2dd   :  { %397 = vadd.xlane.f32.xlu0 %v391_v30  ;;  %v8676_v31 = vsub.f32 %v8648_v10, %v380_v29 }
 0x2de   :  { %v372_v32 = vpop.xlane.xlu0 %371 }
 0x2df   :  { %v381_v33 = vmul.f32 0.0078125, %v372_v32  ;;  %v392_v34 = vmul.f32 %v8676_v31, %v8676_v31 }
 0x2e1   :  { %399 = vadd.xlane.f32.xlu1 %v392_v34  ;;  %v8681_v35 = vsub.f32 %v8653_v14, %v381_v33 }
 0x2e2   :  { %v374_v36 = vpop.xlane.xlu1 %373 }
 0x2e3   :  { %v382_v38 = vmul.f32 0.0078125, %v374_v36  ;;  %v393_v39 = vmul.f32 %v8681_v35, %v8681_v35 }
 0x2e5   :  { %401 = vadd.xlane.f32.xlu0 %v393_v39  ;;  %v8689_v41 = vsub.f32 %v8658_v17, %v382_v38 }
 0x2e7   :  { %v394_v42 = vmul.f32 %v8689_v41, %v8689_v41 }
 0x2e9   :  { %403 = vadd.xlane.f32.xlu1 %v394_v42  ;;  %278 = vadd.xlane.f32.xlu0 %v262_v40 }
 0x2ed   :  { %280 = vadd.xlane.f32.xlu1 %v265_v45 }
 0x36a   :  { %v398_v58 = vpop.xlane.xlu0 %397 }
 0x36b   :  { %v409_v59 = vmul.f32 0.0078125, %v398_v58  ;;  %v8437_v58 = vmov 0.0  }
 0x36c   :  { %7279 = vmatprep.subr.bf16.mxu1 %v8437_v58 }
 0x36d   :  { %v415_v60 = vadd.f32 1e-05, %v409_v59  ;;  %v8792_v59 = vld [vmem:[%s10724_s8] sm:$0x7] }
 0x36e   :  { %v400_v61 = vpop.xlane.xlu1 %399 }
 0x36f   :  { %7972 = vrsqrt.f32 %v415_v60  ;;  %v410_v62 = vmul.f32 0.0078125, %v400_v61  ;;  %v8795_v60 = vsub.s32 1, %v8776_v56  ;;  %v7750_v61 = vld [vmem:[%s10723_s7 + $0x38] ss:$12 sps:$4 sm:$0xff]  }
 0x371   :  { %v416_v63 = vadd.f32 1e-05, %v410_v62 }
 0x372   :  { %v402_v2 = vpop.xlane.xlu0 %401 }
 0x373   :  { %7974 = vrsqrt.f32 %v416_v63  ;;  %v411_v4 = vmul.f32 0.0078125, %v402_v2  ;;  %v8807_v2 = vrot.slane %v8792_v59, %v8795_v60 }
 0x375   :  { %v417_v5 = vadd.f32 1e-05, %v411_v4 }
 0x376   :  { %v404_v7 = vpop.xlane.xlu1 %403  ;;  %v279_v8 = vpop.xlane.xlu0 %278 }
 0x377   :  { %7976 = vrsqrt.f32 %v417_v5  ;;  %v412_v9 = vmul.f32 0.0078125, %v404_v7  ;;  %v287_v11 = vmul.f32 0.0078125, %v279_v8  ;;  %v7751_v7 = vld [vmem:[%s10723_s7 + $0x50] ss:$12 sps:$4 sm:$0xff]  }
 0x379   :  { %v7973_v12 = vpop.eup %7972  ;;  %v418_v13 = vadd.f32 1e-05, %v412_v9  ;;  %v293_v15 = vsub.f32 %v262_v40, %v287_v11 }
 0x37a   :  { %v281_v16 = vpop.xlane.xlu1 %280  ;;  %v427_v18 = vmul.f32 %v7973_v12, %v8671_v27  ;;  %v8746_v27 = vld [vmem:[%s10722_s6] ss:$0 sm:$0xff] }
 0x37b   :  { %7978 = vrsqrt.f32 %v418_v13  ;;  %v288_v19 = vmul.f32 0.0078125, %v281_v16  ;;  %v299_v20 = vmul.f32 %v293_v15, %v293_v15 }
 0x37c   :  { %v439_v25 = vmul.f32 %v8739_v21, %v427_v18  ;;  %v7752_v18 = vld [vmem:[%s10723_s7 + $0x68] ss:$12 sps:$4 sm:$0xff]  }
 0x37d   :  { %v7975_v22 = vpop.eup %7974  ;;  %309 = vadd.xlane.f32.xlu0 %v299_v20  ;;  %v294_v23 = vsub.f32 %v265_v45, %v288_v19 }
 0x37e   :  { %v428_v24 = vmul.f32 %v7975_v22, %v8676_v31  ;;  %v451_v30 = vadd.f32 %v8746_v27, %v439_v25  ;;  %v7753_v25 = vld [vmem:[%s10723_s7 + $0x80] ss:$12 sps:$4 sm:$0xff]  }
 0x37f   :  { %v300_v26 = vmul.f32 %v294_v23, %v294_v23 }
 0x380   :  { %v440_v28 = vmul.f32 %v8739_v21, %v428_v24 }
 0x381   :  { %v7977_v29 = vpop.eup %7976  ;;  %311 = vadd.xlane.f32.xlu1 %v300_v26 }
 0x382   :  { %v452_v32 = vadd.f32 %v8746_v27, %v440_v28  ;;  %v429_v33 = vmul.f32 %v7977_v29, %v8681_v35  ;;  %v7754_v29 = vld [vmem:[%s10723_s7 + $0x98] ss:$12 sps:$4 sm:$0xff]  }
 0x384   :  { %v8752_v34 = vpack.c.bf16 %v452_v32, %v451_v30  ;;  %v441_v37 = vmul.f32 %v8739_v21, %v429_v33 }
 0x385   :  { %v7979_v31 = vpop.eup %7978 }
 0x386   :  { %670 = vmatmul.mubr.bf16.vlgmr.msra.gmra.mrb[0].mxu1 %v8752_v34  ;;  %v430_v36 = vmul.f32 %v7979_v31, %v8689_v41  ;;  %v453_v39 = vadd.f32 %v8746_v27, %v441_v37 }
 0x387   :  { %679 = vmatprep.mubr.bf16.mxu1 %v8436_v1  ;;  %7280 = vmatpush3.bf16.msra.mxu1 %v7748_v57 }
 0x388   :  { %v442_v38 = vmul.f32 %v8739_v21, %v430_v36  ;;  %7281 = vmatprep.subr.bf16.mxu1 %v8437_v58 }
 0x38a   :  { %v454_v40 = vadd.f32 %v8746_v27, %v442_v38 }
 0x38c   :  { %v8761_v42 = vpack.c.bf16 %v454_v40, %v453_v39 }
 0x38e   :  { %680 = vmatmul.mubr.bf16.gmra.mrb[4].mxu1 %v8761_v42 }
 0x38f   :  { %689 = vmatprep.mubr.bf16.mxu1 %v8436_v1 }
 0x40a   :  { %v310_v35 = vpop.xlane.xlu0 %309 }
 0x40b   :  { %v317_v43 = vmul.f32 0.0078125, %v310_v35 }
 0x40d   :  { %v323_v44 = vadd.f32 1e-05, %v317_v43 }
 0x40e   :  { %v312_v41 = vpop.xlane.xlu1 %311 }
 0x40f   :  { %7980 = vrsqrt.f32 %v323_v44  ;;  %v318_v45 = vmul.f32 0.0078125, %v312_v41  ;;  %v7755_v44 = vld [vmem:[%s10723_s7 + $0xb0] ss:$12 sps:$4 sm:$0xff]   ;;  %v362_v41 = vand.u32 127, %v361_v55 }
 0x411   :  { %v324_v46 = vadd.f32 1e-05, %v318_v45  ;;  %vm363_vm2 = vcmp.lt.s32.totalorder %v362_v41, 17 }
 0x413   :  { %7982 = vrsqrt.f32 %v324_v46 }
 0x419   :  { %v7981_v47 = vpop.eup %7980 }
 0x41a   :  { %v335_v48 = vmul.f32 %v7981_v47, %v293_v15 }
 0x41c   :  { %v347_v49 = vmul.f32 %v8634_v0, %v335_v48 }
 0x41d   :  { %v7983_v50 = vpop.eup %7982 }
 0x41e   :  { %v8767_v51 = vadd.f32 %v8639_v3, %v347_v49  ;;  %v336_v52 = vmul.f32 %v7983_v50, %v294_v23  ;;  %v8439_v49 = vmov -1e+30  }
 0x41f   :  { %v8870_v50 = vsel %vm363_vm2, 0.0, %v8439_v49 }
 0x420   :  { %375 = vadd.xlane.f32.xlu0 %v8767_v51  ;;  %v348_v53 = vmul.f32 %v8634_v0, %v336_v52  ;;  %v7749_v0 = vld [vmem:[%s10723_s7 + $0x20] ss:$12 sps:$4 sm:$0xff]  }
 0x421   :  { %7282 = vmatpush3.bf16.msra.mxu1 %v7749_v0 }
 0x422   :  { %v8772_v54 = vadd.f32 %v8639_v3, %v348_v53  ;;  %v8786_v3 = vsub.s32 0, %v8776_v56  ;;  %7283 = vmatprep.subr.bf16.mxu1 %v8437_v58 }
 0x424   :  { %377 = vadd.xlane.f32.xlu1 %v8772_v54  ;;  %v8802_v62 = vrot.slane %v8792_v59, %v8786_v3 }
 0x425   :  { %7284 = vmatpush3.bf16.msra.mxu1 %v7750_v61 }
 0x426   :  { %7285 = vmatprep.subr.bf16.mxu1 %v8437_v58 }
 0x429   :  { %7286 = vmatpush3.bf16.msra.mxu1 %v7751_v7 }
 0x42a   :  { %7287 = vmatprep.subr.bf16.mxu1 %v8437_v58 }
 0x42d   :  { %7288 = vmatpush3.bf16.msra.mxu1 %v7752_v18 }
 0x42e   :  { %7289 = vmatprep.subr.bf16.mxu1 %v8437_v58 }
 0x431   :  { %7290 = vmatpush3.bf16.msra.mxu1 %v7753_v25 }
 0x432   :  { %7291 = vmatprep.subr.bf16.mxu1 %v8437_v58 }
 0x435   :  { %7292 = vmatpush3.bf16.msra.mxu1 %v7754_v29 }
 0x436   :  { %7293 = vmatprep.subr.bf16.mxu1 %v8437_v58 }
 0x439   :  { %7294 = vmatpush3.bf16.msra.mxu1 %v7755_v44 }
 0x459   :  { %v671_v63 = vpop.f32.mrb[0].mxu1 }
 0x45a   :  { %v673_v4 = vpop.f32.mrb[1].mxu1  ;;  %v672_v8 = vadd.f32 %v671_v63, %v8802_v62 }
 0x45b   :  { %v675_v5 = vpop.f32.mrb[2].mxu1  ;;  %v674_v12 = vadd.f32 %v673_v4, %v8807_v2 }
 0x45c   :  { %v676_v9 = vadd.f32 %v675_v5, %v8802_v62  ;;  %v677_v11 = vpop.f32.mrb[3].mxu1 }
 0x45d   :  { %v678_v13 = vadd.f32 %v677_v11, %v8807_v2 }
 0x45e   :  { %v8817_v15 = vpack.c.bf16 %v676_v9, %v672_v8 }
 0x45f   :  { %v8819_v16 = vpack.c.bf16 %v678_v13, %v674_v12 }
 0x460   :  { %7311 = vmatprep.mubr.msk.bf16.mxu0 %vm761_vm1, %v8817_v15 }
 0x461   :  { %v681_v19 = vpop.f32.mrb[4].mxu1  ;;  %7647 = vmatprep.subr.msk.bf16.mxu0 %vm761_vm1, %v8819_v16  ;;  %v769_v20 = vsel %vm761_vm1, %v8819_v16, 0 }
 0x462   :  { %v683_v22 = vpop.f32.mrb[5].mxu1  ;;  %7308 = vmatpush3.bf16.xpose.msra.mxu0 %v769_v20  ;;  %v682_v32 = vadd.f32 %v681_v19, %v8802_v62 }
 0x463   :  { %v684_v23 = vadd.f32 %v683_v22, %v8807_v2  ;;  %v8832_v24 = vpop.f32.mrb[6].mxu1 }
 0x464   :  { %v8837_v26 = vpop.f32.mrb[7].mxu1  ;;  %v8852_v33 = vpack.c.bf16 %v682_v32, %v682_v32 }
 0x465   :  { %v8840_v28 = vpack.c.bf16 %v684_v23, %v684_v23 }
 0x467   :  { %7648 = vmatprep.subr.msk.bf16.mxu0 %vm761_vm1, %v8840_v28  ;;  %v772_v30 = vsel %vm761_vm1, %v8840_v28, 0 }
 0x46a   :  { %7310 = vmatpush3.bf16.xpose.msra.mxu0 %v772_v30 }
 0x471   :  { %7312 = vmatmul.mubr.msk.bf16.vlgmr.msra.gmra.mrb[12].mxu0 %vm761_vm1, %v8852_v33 }
 0x4ad   :  { %v376_v31 = vpop.xlane.xlu0 %375 }
 0x4ae   :  { %v383_v36 = vmul.f32 0.0078125, %v376_v31 }
 0x4b0   :  { %v389_v37 = vsub.f32 %v8767_v51, %v383_v36 }
 0x4b1   :  { %v378_v38 = vpop.xlane.xlu1 %377 }
 0x4b2   :  { %v384_v39 = vmul.f32 0.0078125, %v378_v38  ;;  %v395_v40 = vmul.f32 %v389_v37, %v389_v37 }
 0x4b4   :  { %405 = vadd.xlane.f32.xlu0 %v395_v40  ;;  %v390_v35 = vsub.f32 %v8772_v54, %v384_v39  ;;  %v686_v39 = vadd.f32 %v8832_v24, %v8802_v62 }
 0x4b6   :  { %v396_v43 = vmul.f32 %v390_v35, %v390_v35 }
 0x4b8   :  { %407 = vadd.xlane.f32.xlu1 %v396_v43 }
 0x4c9   :  { %937 = vrot.lane.b32.xlu1 %v8840_v28, %s8438_s4 }
 0x4ca   :  { %935 = vrot.lane.b32.xlu0 %v8819_v16, %s8438_s4 }
 0x4cd   :  { %929 = vrot.lane.b32.xlu1 %v8817_v15, %s8438_s4 }
 0x4d1   :  { %931 = vrot.lane.b32.xlu1 %v8852_v33, %s8438_s4 }
 0x541   :  { %v406_v45 = vpop.xlane.xlu0 %405 }
 0x542   :  { %v413_v46 = vmul.f32 0.0078125, %v406_v45 }
 0x544   :  { %v419_v47 = vadd.f32 1e-05, %v413_v46  ;;  %v7313_v48 = vpop.f32.mrb[12].mxu0  ;;  %v8918_v46 = vsub.s32 2, %v8776_v56 }
 0x545   :  { %v408_v52 = vpop.xlane.xlu1 %407  ;;  %v808_v53 = vpop.f32.mrb[13].mxu0  ;;  %v824_v57 = vmul.f32 0.17677669, %v7313_v48 }
 0x546   :  { %7984 = vrsqrt.f32 %v419_v47  ;;  %v414_v0 = vmul.f32 0.0078125, %v408_v52  ;;  %v822_v61 = vmul.f32 0.17677669, %v808_v53  ;;  %v936_v63 = vpop.permute.xlu0 %935  ;;  %v7314_v4 = vpop.f32.mrb[14].mxu0  ;;  %v505_v24 = vrot.slane %v8792_v59, %v8918_v46 }
 0x547   :  { %7650 = vmatprep.subr.msk.bf16.mxu1 %vm761_vm1, %v936_v63  ;;  %v811_v5 = vpop.f32.mrb[15].mxu0  ;;  %v8882_v12 = vadd.f32 %v824_v57, %v8870_v50  ;;  %v946_v36 = vsel %vm761_vm1, %v936_v63, 0 }
 0x548   :  { %v420_v55 = vadd.f32 1e-05, %v414_v0  ;;  %v823_v7 = vmul.f32 0.17677669, %v811_v5  ;;  %v8874_v8 = vadd.f32 %v822_v61, %v8870_v50 }
 0x549   :  { %v835_v18 = vsel %vm828_vm3, %v8882_v12, -inf }
 0x54a   :  { %7986 = vrsqrt.f32 %v420_v55  ;;  %v829_v9 = vsel %vm828_vm3, %v8874_v8, -inf  ;;  %v8879_v11 = vadd.f32 %v823_v7, %v8870_v50 }
 0x54b   :  { %830 = vmax.xlane.f32.xlu0 %v829_v9 }
 0x54c   :  { %v832_v13 = vsel %vm828_vm3, %v8879_v11, -inf }
 0x54d   :  { %833 = vmax.xlane.f32.xlu1 %v832_v13 }
 0x54f   :  { %836 = vmax.xlane.f32.xlu0 %v835_v18 }
 0x550   :  { %v7985_v19 = vpop.eup %7984 }
 0x551   :  { %v431_v20 = vmul.f32 %v7985_v19, %v389_v37  ;;  %v938_v37 = vpop.permute.xlu1 %937 }
 0x553   :  { %v443_v25 = vmul.f32 %v8739_v21, %v431_v20 }
 0x554   :  { %v7987_v22 = vpop.eup %7986 }
 0x555   :  { %v432_v23 = vmul.f32 %v7987_v22, %v390_v35  ;;  %v455_v30 = vadd.f32 %v8746_v27, %v443_v25  ;;  %v688_v35 = vadd.f32 %v8837_v26, %v8807_v2 }
 0x557   :  { %v444_v29 = vmul.f32 %v8739_v21, %v432_v23  ;;  %v949_v21 = vsel %vm761_vm1, %v938_v37, 0 }
 0x559   :  { %v456_v32 = vadd.f32 %v8746_v27, %v444_v29  ;;  %v930_v27 = vpop.permute.xlu1 %929 }
 0x55b   :  { %v492_v31 = vpack.c.bf16 %v456_v32, %v455_v30 }
 0x55d   :  { %690 = vmatmul.mubr.bf16.gmra.mrb[8].mxu1 %v492_v31 }
 0x55e   :  { %7295 = vmatprep.mubr.msk.bf16.mxu1 %vm8440_vm4, %v8437_v58 }
 0x565   :  { %7296 = vmatmul.mubr.bf16.vlgmr.msra.gmra.mrb[12].mxu1 %v8752_v34  ;;  %v932_v34 = vpop.permute.xlu1 %931 }
 0x566   :  { %7324 = vmatpush3.bf16.xpose.msra.mxu1 %v946_v36  ;;  %7299 = vmatprep.mubr.msk.bf16.mxu1 %vm8440_vm4, %v8437_v58 }
 0x567   :  { %7651 = vmatprep.subr.msk.bf16.mxu1 %vm761_vm1, %v938_v37 }
 0x56d   :  { %7300 = vmatmul.mubr.bf16.gmra.mrb[16].mxu1 %v8761_v42 }
 0x56e   :  { %7326 = vmatpush3.bf16.xpose.msra.mxu1 %v949_v21  ;;  %7303 = vmatprep.mubr.msk.bf16.mxu1 %vm8440_vm4, %v8437_v58 }
 0x575   :  { %7304 = vmatmul.mubr.bf16.gmra.mrb[20].mxu1 %v492_v31 }
 0x576   :  { %7327 = vmatprep.mubr.msk.bf16.mxu1 %vm761_vm1, %v930_v27 }
 0x57d   :  { %7328 = vmatmul.mubr.msk.bf16.vlgmr.msra.gmra.mrb[24].mxu1 %vm761_vm1, %v932_v34 }
 0x5d8   :  { %v831_v61 = vpop.xlane.xlu0 %830 }
 0x5d9   :  { %v838_v37 = vsub.f32 %v8874_v8, %v831_v61 }
 0x5da   :  { %v834_v4 = vpop.xlane.xlu1 %833 }
 0x5db   :  { %v839_v18 = vsub.f32 %v8879_v11, %v834_v4  ;;  %v841_v34 = vmul.f32 1.442695, %v838_v37 }
 0x5dc   :  { %v837_v20 = vpop.xlane.xlu0 %836 }
 0x5dd   :  { %v843_v22 = vmul.f32 1.442695, %v839_v18  ;;  %v840_v25 = vsub.f32 %v8882_v12, %v837_v20 }
 0x5df   :  { %7988 = vpow2.f32 %v843_v22  ;;  %v845_v21 = vmul.f32 1.442695, %v840_v25 }
 0x5e1   :  { %7990 = vpow2.f32 %v845_v21 }
 0x5e2   :  { %7992 = vpow2.f32 %v841_v34 }
 0x630   :  { %v691_v38 = vpop.f32.mrb[8].mxu1 }
 0x631   :  { %v692_v40 = vadd.f32 %v691_v38, %v8802_v62  ;;  %v693_v42 = vpop.f32.mrb[9].mxu1 }
 0x632   :  { %v694_v43 = vadd.f32 %v693_v42, %v8807_v2  ;;  %v8911_v44 = vpop.f32.mrb[10].mxu1 }
 0x633   :  { %v8913_v41 = vpack.c.bf16 %v692_v40, %v686_v39  ;;  %v8915_v45 = vpop.f32.mrb[11].mxu1 }
 0x634   :  { %v8920_v47 = vpack.c.bf16 %v694_v43, %v688_v35 }
 0x638   :  { %v734_v48 = vpop.f32.mrb[12].mxu1 }
 0x639   :  { %v7297_v49 = vpop.f32.mrb[13].mxu1  ;;  %v735_v26 = vadd.f32 %v734_v48, %v505_v24 }
 0x63a   :  { %v737_v52 = vpop.f32.mrb[14].mxu1  ;;  %v7989_v49 = vpop.eup %7988 }
 0x63b   :  { %v738_v53 = vadd.f32 %v737_v52, %v505_v24  ;;  %v7298_v57 = vpop.f32.mrb[15].mxu1 }
 0x63c   :  { %v7991_v57 = vpop.eup %7990 }
 0x63d   :  { %v8924_v0 = vpack.c.bf16 %v738_v53, %v735_v26  ;;  %v850_v26 = vsel %vm828_vm3, %v7989_v49, 0.0  ;;  %v853_v61 = vsel %vm828_vm3, %v7991_v57, 0.0 }
 0x63f   :  { %7315 = vmatprep.subr.bf16.mxu0 %v8924_v0 }
 0x640   :  { %v742_v63 = vpop.f32.mrb[16].mxu1  ;;  %7316 = vmatpush3.bf16.msra.mxu0 %v8924_v0 }
 0x641   :  { %v743_v5 = vadd.f32 %v742_v63, %v505_v24  ;;  %v7301_v55 = vpop.f32.mrb[17].mxu1  ;;  %v7993_v63 = vpop.eup %7992 }
 0x642   :  { %v745_v7 = vpop.f32.mrb[18].mxu1  ;;  %v847_v4 = vsel %vm828_vm3, %v7993_v63, 0.0 }
 0x643   :  { %v8928_v59 = vpack.c.bf16 %v743_v5, %v743_v5  ;;  %v746_v9 = vadd.f32 %v745_v7, %v505_v24  ;;  %v7302_v13 = vpop.f32.mrb[19].mxu1 }
 0x645   :  { %7649 = vmatprep.subr.msk.bf16.mxu0 %vm872_vm5, %v8928_v59  ;;  %v874_v19 = vsel %vm872_vm5, %v8928_v59, 0 }
 0x646   :  { %7318 = vmatpush3.bf16.msra.mxu0 %v874_v19 }
 0x648   :  { %v750_v23 = vpop.f32.mrb[20].mxu1 }
 0x649   :  { %v751_v29 = vadd.f32 %v750_v23, %v505_v24  ;;  %v7305_v30 = vpop.f32.mrb[21].mxu1 }
 0x64a   :  { %v753_v32 = vpop.f32.mrb[22].mxu1 }
 0x64b   :  { %v8936_v31 = vpack.c.bf16 %v751_v29, %v746_v9  ;;  %v8938_v36 = vadd.f32 %v753_v32, %v505_v24  ;;  %v7306_v11 = vpop.f32.mrb[23].mxu1 }
 0x650   :  { %v7329_v27 = vpop.f32.mrb[24].mxu1 }
 0x651   :  { %v1001_v38 = vmul.f32 0.17677669, %v7329_v27  ;;  %v985_v39 = vpop.f32.mrb[25].mxu1 }
 0x652   :  { %v999_v40 = vmul.f32 0.17677669, %v985_v39  ;;  %v7330_v42 = vpop.f32.mrb[26].mxu1 }
 0x653   :  { %v988_v12 = vpop.f32.mrb[27].mxu1  ;;  %v1004_v35 = vadd.f32 %v1001_v38, %v8870_v50 }
 0x654   :  { %v1000_v43 = vmul.f32 0.17677669, %v988_v12  ;;  %v1002_v48 = vadd.f32 %v999_v40, %v8870_v50 }
 0x655   :  { %v1011_v24 = vsel %vm828_vm3, %v1004_v35, -inf }
 0x656   :  { %1012 = vmax.xlane.f32.xlu1 %v1011_v24  ;;  %v1005_v8 = vsel %vm828_vm3, %v1002_v48, -inf  ;;  %v1003_v52 = vadd.f32 %v1000_v43, %v8870_v50 }
 0x657   :  { %1006 = vmax.xlane.f32.xlu0 %v1005_v8 }
 0x658   :  { %v1008_v53 = vsel %vm828_vm3, %v1003_v52, -inf }
 0x65a   :  { %851 = vadd.xlane.f32.xlu1 %v850_v26 }
 0x65b   :  { %1009 = vmax.xlane.f32.xlu0 %v1008_v53 }
 0x65f   :  { %854 = vadd.xlane.f32.xlu0 %v853_v61 }
 0x663   :  { %848 = vadd.xlane.f32.xlu0 %v847_v4 }
 0x6e3   :  { %v1013_v5 = vpop.xlane.xlu1 %1012 }
 0x6e4   :  { %v1016_v55 = vsub.f32 %v1004_v35, %v1013_v5  ;;  %v1007_v7 = vpop.xlane.xlu0 %1006 }
 0x6e5   :  { %v1014_v9 = vsub.f32 %v1002_v48, %v1007_v7 }
 0x6e6   :  { %v1021_v13 = vmul.f32 1.442695, %v1016_v55 }
 0x6e7   :  { %v1017_v18 = vmul.f32 1.442695, %v1014_v9  ;;  %v852_v23 = vpop.xlane.xlu1 %851 }
 0x6e8   :  { %7994 = vpow2.f32 %v1021_v13  ;;  %v1010_v19 = vpop.xlane.xlu0 %1009 }
 0x6e9   :  { %v1015_v20 = vsub.f32 %v1003_v52, %v1010_v19  ;;  %7996 = vpow2.f32 %v1017_v18 }
 0x6eb   :  { %v1019_v22 = vmul.f32 1.442695, %v1015_v20 }
 0x6ec   :  { %v855_v25 = vpop.xlane.xlu0 %854 }
 0x6ed   :  { %7998 = vpow2.f32 %v1019_v22 }
 0x6ee   :  { %8000 = vrcp.f32 %v855_v25 }
 0x6ef   :  { %8002 = vrcp.f32 %v852_v23 }
 0x6f0   :  { %v849_v29 = vpop.xlane.xlu0 %848 }
 0x6f1   :  { %8004 = vrcp.f32 %v849_v29 }
 0x6f2   :  { %v7995_v30 = vpop.eup %7994 }
 0x6f3   :  { %v1029_v32 = vsel %vm828_vm3, %v7995_v30, 0.0  ;;  %v7997_v11 = vpop.eup %7996 }
 0x6f4   :  { %1030 = vadd.xlane.f32.xlu1 %v1029_v32  ;;  %v1023_v21 = vsel %vm828_vm3, %v7997_v11, 0.0 }
 0x6f7   :  { %v7999_v37 = vpop.eup %7998 }
 0x6f8   :  { %v8001_v27 = vpop.eup %8000  ;;  %1024 = vadd.xlane.f32.xlu1 %v1023_v21  ;;  %v1026_v34 = vsel %vm828_vm3, %v7999_v37, 0.0 }
 0x6f9   :  { %v8003_v38 = vpop.eup %8002  ;;  %1027 = vadd.xlane.f32.xlu0 %v1026_v34  ;;  %v861_v40 = vmul.f32 %v8001_v27, %v7991_v57 }
 0x6fa   :  { %v859_v12 = vmul.f32 %v8003_v38, %v7989_v49 }
 0x6fb   :  { %v8005_v39 = vpop.eup %8004  ;;  %v863_v43 = vpack.c.bf16 %v861_v40, %v861_v40 }
 0x6fc   :  { %v857_v42 = vmul.f32 %v8005_v39, %v7993_v63 }
 0x6fe   :  { %v862_v35 = vpack.c.bf16 %v859_v12, %v857_v42 }
 0x700   :  { %7319 = vmatprep.mubr.msk.bf16.mxu0 %vm828_vm3, %v862_v35 }
 0x701   :  { %7320 = vmatmul.mubr.msk.bf16.vlgmr.msra.gmra.mrb[16].mxu0 %vm828_vm3, %v863_v43 }
 0x709   :  { %1044 = vrot.lane.b32.xlu1 %v8928_v59, %s8438_s4 }
 0x70d   :  { %1124 = vrot.lane.b32.xlu1 %v8819_v16, %s8441_s30 }
 0x70f   :  { %1042 = vrot.lane.b32.xlu0 %v8924_v0, %s8438_s4 }
 0x711   :  { %1126 = vrot.lane.b32.xlu1 %v8840_v28, %s8441_s30 }
 0x713   :  { %1120 = vrot.lane.b32.xlu0 %v8817_v15, %s8441_s30 }
 0x715   :  { %1122 = vrot.lane.b32.xlu1 %v8852_v33, %s8441_s30 }
 0x781   :  { %v1031_v48 = vpop.xlane.xlu1 %1030 }
 0x782   :  { %8006 = vrcp.f32 %v1031_v48 }
 0x785   :  { %v1025_v24 = vpop.xlane.xlu1 %1024 }
 0x786   :  { %8008 = vrcp.f32 %v1025_v24  ;;  %v1028_v49 = vpop.xlane.xlu0 %1027 }
 0x787   :  { %8010 = vrcp.f32 %v1028_v49 }
 0x789   :  { %v1045_v8 = vpop.permute.xlu1 %1044 }
 0x78a   :  { %v1043_v52 = vpop.permute.xlu0 %1042  ;;  %v1054_v53 = vsel %vm872_vm5, %v1045_v8, 0 }
 0x78b   :  { %7331 = vmatprep.subr.bf16.mxu0 %v1043_v52 }
 0x78c   :  { %7332 = vmatpush3.bf16.msra.mxu0 %v1043_v52  ;;  %v8007_v26 = vpop.eup %8006 }
 0x78d   :  { %7652 = vmatprep.subr.msk.bf16.mxu0 %vm872_vm5, %v1045_v8  ;;  %v1125_v61 = vpop.permute.xlu1 %1124  ;;  %v1037_v5 = vmul.f32 %v8007_v26, %v7995_v30 }
 0x78e   :  { %v1121_v13 = vpop.permute.xlu0 %1120  ;;  %v1135_v18 = vsel %vm761_vm1, %v1125_v61, 0 }
 0x78f   :  { %v1039_v9 = vpack.c.bf16 %v1037_v5, %v1037_v5 }
 0x790   :  { %v8009_v57 = vpop.eup %8008  ;;  %7334 = vmatpush3.bf16.msra.mxu0 %v1054_v53 }
 0x791   :  { %v8011_v63 = vpop.eup %8010  ;;  %7653 = vmatprep.subr.msk.bf16.mxu0 %vm761_vm1, %v1125_v61  ;;  %v1033_v4 = vmul.f32 %v8009_v57, %v7997_v11  ;;  %v1127_v19 = vpop.permute.xlu1 %1126 }
 0x792   :  { %v1035_v55 = vmul.f32 %v8011_v63, %v7999_v37  ;;  %v1138_v20 = vsel %vm761_vm1, %v1127_v19, 0 }
 0x794   :  { %v1038_v7 = vpack.c.bf16 %v1035_v55, %v1033_v4 }
 0x795   :  { %v1123_v22 = vpop.permute.xlu1 %1122 }
 0x796   :  { %7335 = vmatprep.mubr.msk.bf16.mxu0 %vm828_vm3, %v1038_v7 }
 0x797   :  { %7336 = vmatmul.mubr.msk.bf16.vlgmr.msra.gmra.mrb[20].mxu0 %vm828_vm3, %v1039_v9 }
 0x798   :  { %7343 = vmatprep.mubr.msk.bf16.mxu0 %vm761_vm1, %v1121_v13 }
 0x799   :  { %7340 = vmatpush3.bf16.xpose.msra.mxu0 %v1135_v18 }
 0x79a   :  { %7654 = vmatprep.subr.msk.bf16.mxu0 %vm761_vm1, %v1127_v19 }
 0x7a1   :  { %7342 = vmatpush3.bf16.xpose.msra.mxu0 %v1138_v20 }
 0x7a8   :  { %7344 = vmatmul.mubr.msk.bf16.vlgmr.msra.gmra.mrb[24].mxu0 %vm761_vm1, %v1123_v22 }
 0x7d4   :  { %v7321_v23 = vpop.f32.mrb[16].mxu0 }
 0x7d5   :  { %926 = vst.msk [vmem:[#allocation2 + $0x10] sm:$0xff] %vm761_vm1, %v7321_v23  ;;  %v910_v25 = vpop.f32.mrb[17].mxu0 }
 0x7d6   :  { %924 = vst.msk [vmem:[#allocation2] sm:$0xff] %vm761_vm1, %v910_v25  ;;  %v7322_v29 = vpop.f32.mrb[18].mxu0 }
 0x7d7   :  { %v913_v30 = vpop.f32.mrb[19].mxu0 }
 0x7d8   :  { %925 = vst.msk [vmem:[#allocation2 + $0x8] sm:$0xff] %vm761_vm1, %v913_v30 }
 0x86a   :  { %v8980_v32 = vpop.f32.mrb[20].mxu0 }
 0x86b   :  { %v8982_v11 = vpop.f32.mrb[21].mxu0 }
 0x86c   :  { %v7338_v37 = vpop.f32.mrb[22].mxu0 }
 0x86d   :  { %v8984_v21 = vpop.f32.mrb[23].mxu0 }
 0x87b   :  { %v7345_v27 = vpop.f32.mrb[24].mxu0 }
 0x87c   :  { %v1174_v34 = vpop.f32.mrb[25].mxu0  ;;  %v1190_v38 = vmul.f32 0.17677669, %v7345_v27 }
 0x87d   :  { %v1188_v39 = vmul.f32 0.17677669, %v1174_v34  ;;  %v7346_v40 = vpop.f32.mrb[26].mxu0 }
 0x87e   :  { %v1177_v42 = vpop.f32.mrb[27].mxu0  ;;  %v1193_v24 = vadd.f32 %v1190_v38, %v8870_v50 }
 0x87f   :  { %v1189_v12 = vmul.f32 0.17677669, %v1177_v42  ;;  %v1191_v35 = vadd.f32 %v1188_v39, %v8870_v50 }
 0x880   :  { %v1200_v8 = vsel %vm828_vm3, %v1193_v24, -inf }
 0x881   :  { %v1194_v43 = vsel %vm828_vm3, %v1191_v35, -inf  ;;  %v1192_v48 = vadd.f32 %v1189_v12, %v8870_v50 }
 0x882   :  { %1195 = vmax.xlane.f32.xlu0 %v1194_v43 }
 0x883   :  { %v1197_v49 = vsel %vm828_vm3, %v1192_v48, -inf }
 0x884   :  { %1198 = vmax.xlane.f32.xlu1 %v1197_v49 }
 0x886   :  { %1201 = vmax.xlane.f32.xlu0 %v1200_v8 }
 0x90f   :  { %v1196_v52 = vpop.xlane.xlu0 %1195 }
 0x910   :  { %v1203_v26 = vsub.f32 %v1191_v35, %v1196_v52 }
 0x911   :  { %v1199_v53 = vpop.xlane.xlu1 %1198 }
 0x912   :  { %v1206_v57 = vmul.f32 1.442695, %v1203_v26  ;;  %v1204_v61 = vsub.f32 %v1192_v48, %v1199_v53 }
 0x913   :  { %v1202_v63 = vpop.xlane.xlu0 %1201 }
 0x914   :  { %8012 = vpow2.f32 %v1206_v57  ;;  %v1208_v4 = vmul.f32 1.442695, %v1204_v61  ;;  %v1205_v5 = vsub.f32 %v1193_v24, %v1202_v63  ;;  %v9019_v24 = vpack.c.bf16 %v8938_v36, %v8938_v36 }
 0x916   :  { %8014 = vpow2.f32 %v1208_v4  ;;  %v1210_v55 = vmul.f32 1.442695, %v1205_v5  ;;  %v1608_v49 = vsel %vm872_vm5, %v9019_v24, 0 }
 0x918   :  { %8016 = vpow2.f32 %v1210_v55 }
 0x91e   :  { %v8013_v7 = vpop.eup %8012 }
 0x91f   :  { %v1212_v9 = vsel %vm828_vm3, %v8013_v7, 0.0 }
 0x920   :  { %v8015_v13 = vpop.eup %8014  ;;  %1213 = vadd.xlane.f32.xlu0 %v1212_v9 }
 0x921   :  { %v1215_v20 = vsel %vm828_vm3, %v8015_v13, 0.0 }
 0x922   :  { %v8017_v18 = vpop.eup %8016 }
 0x923   :  { %v1218_v19 = vsel %vm828_vm3, %v8017_v18, 0.0 }
 0x924   :  { %1219 = vadd.xlane.f32.xlu1 %v1218_v19  ;;  %1216 = vadd.xlane.f32.xlu0 %v1215_v20 }
 0x935   :  { %1231 = vrot.lane.b32.xlu1 %v8928_v59, %s8441_s30 }
 0x939   :  { %1311 = vrot.lane.b32.xlu1 %v8819_v16, %s8442_s0 }
 0x93a   :  { %1229 = vrot.lane.b32.xlu0 %v8924_v0, %s8441_s30 }
 0x93d   :  { %1313 = vrot.lane.b32.xlu1 %v8840_v28, %s8442_s0 }
 0x93e   :  { %1307 = vrot.lane.b32.xlu0 %v8817_v15, %s8442_s0 }
 0x941   :  { %1309 = vrot.lane.b32.xlu1 %v8852_v33, %s8442_s0 }
 0x9ad   :  { %v1214_v22 = vpop.xlane.xlu0 %1213 }
 0x9ae   :  { %8018 = vrcp.f32 %v1214_v22 }
 0x9b1   :  { %v1217_v23 = vpop.xlane.xlu0 %1216  ;;  %v1220_v25 = vpop.xlane.xlu1 %1219 }
 0x9b2   :  { %8020 = vrcp.f32 %v1217_v23 }
 0x9b3   :  { %8022 = vrcp.f32 %v1220_v25 }
 0x9b5   :  { %v1230_v29 = vpop.permute.xlu0 %1229  ;;  %v1232_v16 = vpop.permute.xlu1 %1231 }
 0x9b6   :  { %7347 = vmatprep.subr.bf16.mxu1 %v1230_v29  ;;  %v1241_v28 = vsel %vm872_vm5, %v1232_v16, 0 }
 0x9b7   :  { %7348 = vmatpush3.bf16.msra.mxu1 %v1230_v29 }
 0x9b8   :  { %7655 = vmatprep.subr.msk.bf16.mxu1 %vm872_vm5, %v1232_v16  ;;  %v8019_v30 = vpop.eup %8018 }
 0x9b9   :  { %v1312_v37 = vpop.permute.xlu1 %1311  ;;  %v1222_v27 = vmul.f32 %v8019_v30, %v8013_v7  ;;  %v1308_v42 = vpop.permute.xlu0 %1307 }
 0x9ba   :  { %v1322_v12 = vsel %vm761_vm1, %v1312_v37, 0 }
 0x9bb   :  { %7350 = vmatpush3.bf16.msra.mxu1 %v1241_v28 }
 0x9bc   :  { %v8021_v15 = vpop.eup %8020  ;;  %7656 = vmatprep.subr.msk.bf16.mxu1 %vm761_vm1, %v1312_v37 }
 0x9bd   :  { %v8023_v33 = vpop.eup %8022  ;;  %v1224_v34 = vmul.f32 %v8021_v15, %v8015_v13  ;;  %v1314_v35 = vpop.permute.xlu1 %1313 }
 0x9be   :  { %v1226_v38 = vmul.f32 %v8023_v33, %v8017_v18  ;;  %v1325_v43 = vsel %vm761_vm1, %v1314_v35, 0 }
 0x9bf   :  { %v1227_v39 = vpack.c.bf16 %v1224_v34, %v1222_v27 }
 0x9c0   :  { %v1228_v40 = vpack.c.bf16 %v1226_v38, %v1226_v38 }
 0x9c1   :  { %7351 = vmatprep.mubr.msk.bf16.mxu1 %vm828_vm3, %v1227_v39  ;;  %v1310_v48 = vpop.permute.xlu1 %1309 }
 0x9c2   :  { %7352 = vmatmul.mubr.msk.bf16.vlgmr.msra.gmra.mrb[28].mxu1 %vm828_vm3, %v1228_v40 }
 0x9c3   :  { %7359 = vmatprep.mubr.msk.bf16.mxu1 %vm761_vm1, %v1308_v42 }
 0x9c4   :  { %7356 = vmatpush3.bf16.xpose.msra.mxu1 %v1322_v12 }
 0x9c5   :  { %7657 = vmatprep.subr.msk.bf16.mxu1 %vm761_vm1, %v1314_v35 }
 0x9cc   :  { %7358 = vmatpush3.bf16.xpose.msra.mxu1 %v1325_v43 }
 0x9cd   :  { %7379 = vmatprep.subr.bf16.mxu1 %v8936_v31 }
 0x9d3   :  { %7360 = vmatmul.mubr.msk.bf16.vlgmr.msra.gmra.mrb[32].mxu1 %vm761_vm1, %v1310_v48 }
 0x9d4   :  { %7380 = vmatpush3.bf16.msra.mxu1 %v8936_v31 }
 0x9d5   :  { %7661 = vmatprep.subr.msk.bf16.mxu1 %vm872_vm5, %v9019_v24 }
 0x9d8   :  { %7382 = vmatpush3.bf16.msra.mxu1 %v1608_v49 }
 0xa95   :  { %v9027_v8 = vpop.f32.mrb[28].mxu1 }
 0xa96   :  { %v9029_v52 = vpop.f32.mrb[29].mxu1 }
 0xa97   :  { %v7354_v26 = vpop.f32.mrb[30].mxu1 }
 0xa98   :  { %v9031_v53 = vpop.f32.mrb[31].mxu1 }
 0xaa6   :  { %v7361_v36 = vpop.f32.mrb[32].mxu1 }
 0xaa7   :  { %v1361_v57 = vpop.f32.mrb[33].mxu1  ;;  %v1377_v61 = vmul.f32 0.17677669, %v7361_v36 }
 0xaa8   :  { %v1375_v63 = vmul.f32 0.17677669, %v1361_v57  ;;  %v7362_v4 = vpop.f32.mrb[34].mxu1 }
 0xaa9   :  { %v1364_v5 = vpop.f32.mrb[35].mxu1  ;;  %v1380_v18 = vadd.f32 %v1377_v61, %v8870_v50 }
 0xaaa   :  { %v1376_v55 = vmul.f32 0.17677669, %v1364_v5  ;;  %v1378_v7 = vadd.f32 %v1375_v63, %v8870_v50  ;;  %v698_v63 = vadd.f32 %v8915_v45, %v8807_v2  ;;  %v696_v45 = vadd.f32 %v8911_v44, %v8802_v62 }
 0xaab   :  { %v1387_v20 = vsel %vm828_vm3, %v1380_v18, -inf }
 0xaac   :  { %v1381_v9 = vsel %vm828_vm3, %v1378_v7, -inf  ;;  %v1379_v13 = vadd.f32 %v1376_v55, %v8870_v50  ;;  %v9054_v55 = vpack.c.bf16 %v698_v63, %v698_v63 }
 0xaad   :  { %1382 = vmax.xlane.f32.xlu0 %v1381_v9  ;;  %v9066_v9 = vpack.c.bf16 %v696_v45, %v696_v45 }
 0xaae   :  { %v1384_v19 = vsel %vm828_vm3, %v1379_v13, -inf  ;;  %v1508_v2 = vsel %vm761_vm1, %v9054_v55, 0 }
 0xaaf   :  { %1385 = vmax.xlane.f32.xlu1 %v1384_v19 }
 0xab1   :  { %1388 = vmax.xlane.f32.xlu0 %v1387_v20 }
 0xb3a   :  { %v1383_v22 = vpop.xlane.xlu0 %1382 }
 0xb3b   :  { %v1390_v23 = vsub.f32 %v1378_v7, %v1383_v22  ;;  %v1505_v7 = vsel %vm761_vm1, %v8920_v47, 0 }
 0xb3c   :  { %v1386_v25 = vpop.xlane.xlu1 %1385 }
 0xb3d   :  { %v1393_v29 = vmul.f32 1.442695, %v1390_v23  ;;  %v1391_v16 = vsub.f32 %v1379_v13, %v1386_v25 }
 0xb3e   :  { %v1389_v30 = vpop.xlane.xlu0 %1388 }
 0xb3f   :  { %8024 = vpow2.f32 %v1393_v29  ;;  %v1395_v28 = vmul.f32 1.442695, %v1391_v16  ;;  %v1392_v37 = vsub.f32 %v1380_v18, %v1389_v30 }
 0xb41   :  { %8026 = vpow2.f32 %v1395_v28  ;;  %v1397_v15 = vmul.f32 1.442695, %v1392_v37 }
 0xb43   :  { %8028 = vpow2.f32 %v1397_v15 }
 0xb49   :  { %v8025_v33 = vpop.eup %8024 }
 0xb4a   :  { %v1399_v27 = vsel %vm828_vm3, %v8025_v33, 0.0 }
 0xb4b   :  { %v8027_v34 = vpop.eup %8026  ;;  %1400 = vadd.xlane.f32.xlu0 %v1399_v27 }
 0xb4c   :  { %v1402_v40 = vsel %vm828_vm3, %v8027_v34, 0.0 }
 0xb4d   :  { %v8029_v38 = vpop.eup %8028 }
 0xb4e   :  { %v1405_v39 = vsel %vm828_vm3, %v8029_v38, 0.0 }
 0xb4f   :  { %1406 = vadd.xlane.f32.xlu1 %v1405_v39  ;;  %1403 = vadd.xlane.f32.xlu0 %v1402_v40 }
 0xb60   :  { %1418 = vrot.lane.b32.xlu1 %v8928_v59, %s8442_s0 }
 0xb65   :  { %1416 = vrot.lane.b32.xlu0 %v8924_v0, %s8442_s0 }
 0xbd8   :  { %v1401_v42 = vpop.xlane.xlu0 %1400 }
 0xbd9   :  { %8030 = vrcp.f32 %v1401_v42 }
 0xbdc   :  { %v1404_v12 = vpop.xlane.xlu0 %1403  ;;  %v1407_v35 = vpop.xlane.xlu1 %1406 }
 0xbdd   :  { %8032 = vrcp.f32 %v1404_v12 }
 0xbde   :  { %8034 = vrcp.f32 %v1407_v35 }
 0xbe0   :  { %v1417_v43 = vpop.permute.xlu0 %1416  ;;  %v1419_v48 = vpop.permute.xlu1 %1418 }
 0xbe1   :  { %7363 = vmatprep.subr.bf16.mxu0 %v1417_v43  ;;  %v1428_v26 = vsel %vm872_vm5, %v1419_v48, 0 }
 0xbe2   :  { %7364 = vmatpush3.bf16.msra.mxu0 %v1417_v43 }
 0xbe3   :  { %7658 = vmatprep.subr.msk.bf16.mxu0 %vm872_vm5, %v1419_v48  ;;  %v8031_v49 = vpop.eup %8030 }
 0xbe4   :  { %v1409_v36 = vmul.f32 %v8031_v49, %v8025_v33 }
 0xbe6   :  { %7366 = vmatpush3.bf16.msra.mxu0 %v1428_v26 }
 0xbe7   :  { %v8033_v59 = vpop.eup %8032  ;;  %7659 = vmatprep.subr.msk.bf16.mxu0 %vm761_vm1, %v8920_v47 }
 0xbe8   :  { %v8035_v0 = vpop.eup %8034  ;;  %v1411_v57 = vmul.f32 %v8033_v59, %v8027_v34 }
 0xbe9   :  { %v1413_v61 = vmul.f32 %v8035_v0, %v8029_v38 }
 0xbea   :  { %v1414_v4 = vpack.c.bf16 %v1411_v57, %v1409_v36 }
 0xbeb   :  { %v1415_v5 = vpack.c.bf16 %v1413_v61, %v1413_v61 }
 0xbec   :  { %7367 = vmatprep.mubr.msk.bf16.mxu0 %vm828_vm3, %v1414_v4 }
 0xbed   :  { %7368 = vmatmul.mubr.msk.bf16.vlgmr.msra.gmra.mrb[28].mxu0 %vm828_vm3, %v1415_v5 }
 0xbee   :  { %7375 = vmatprep.mubr.msk.bf16.mxu0 %vm761_vm1, %v8913_v41 }
 0xbef   :  { %7372 = vmatpush3.bf16.xpose.msra.mxu0 %v1505_v7 }
 0xbf0   :  { %7660 = vmatprep.subr.msk.bf16.mxu0 %vm761_vm1, %v9054_v55 }
 0xbf7   :  { %7374 = vmatpush3.bf16.xpose.msra.mxu0 %v1508_v2 }
 0xbfe   :  { %7376 = vmatmul.mubr.msk.bf16.vlgmr.msra.gmra.mrb[32].mxu0 %vm761_vm1, %v9066_v9 }
 0xcc0   :  { %v9070_v13 = vpop.f32.mrb[28].mxu0 }
 0xcc1   :  { %v9072_v18 = vpop.f32.mrb[29].mxu0 }
 0xcc2   :  { %v7370_v19 = vpop.f32.mrb[30].mxu0 }
 0xcc3   :  { %v9074_v20 = vpop.f32.mrb[31].mxu0 }
 0xcd1   :  { %v7377_v22 = vpop.f32.mrb[32].mxu0 }
 0xcd2   :  { %v1544_v23 = vpop.f32.mrb[33].mxu0  ;;  %v1560_v30 = vmul.f32 0.17677669, %v7377_v22 }
 0xcd3   :  { %v1558_v25 = vmul.f32 0.17677669, %v1544_v23  ;;  %v7378_v29 = vpop.f32.mrb[34].mxu0 }
 0xcd4   :  { %v1547_v16 = vpop.f32.mrb[35].mxu0  ;;  %v1563_v33 = vadd.f32 %v1560_v30, %v8870_v50 }
 0xcd5   :  { %v1559_v28 = vmul.f32 0.17677669, %v1547_v16  ;;  %v1561_v62 = vadd.f32 %v1558_v25, %v8870_v50 }
 0xcd6   :  { %v1570_v27 = vsel %vm828_vm3, %v1563_v33, -inf }
 0xcd7   :  { %v1564_v44 = vsel %vm828_vm3, %v1561_v62, -inf  ;;  %v1562_v37 = vadd.f32 %v1559_v28, %v8870_v50 }
 0xcd8   :  { %1565 = vmax.xlane.f32.xlu1 %v1564_v44 }
 0xcd9   :  { %v1567_v15 = vsel %vm828_vm3, %v1562_v37, -inf }
 0xcda   :  { %1568 = vmax.xlane.f32.xlu0 %v1567_v15 }
 0xcde   :  { %1571 = vmax.xlane.f32.xlu0 %v1570_v27 }
 0xd65   :  { %v1566_v34 = vpop.xlane.xlu1 %1565 }
 0xd66   :  { %v1573_v38 = vsub.f32 %v1561_v62, %v1566_v34 }
 0xd67   :  { %v1569_v39 = vpop.xlane.xlu0 %1568 }
 0xd68   :  { %v1576_v40 = vmul.f32 1.442695, %v1573_v38  ;;  %v1574_v42 = vsub.f32 %v1562_v37, %v1569_v39 }
 0xd6a   :  { %8036 = vpow2.f32 %v1576_v40  ;;  %v1578_v12 = vmul.f32 1.442695, %v1574_v42 }
 0xd6b   :  { %v1572_v35 = vpop.xlane.xlu0 %1571 }
 0xd6c   :  { %8038 = vpow2.f32 %v1578_v12  ;;  %v1575_v43 = vsub.f32 %v1563_v33, %v1572_v35 }
 0xd6e   :  { %v1580_v48 = vmul.f32 1.442695, %v1575_v43 }
 0xd70   :  { %8040 = vpow2.f32 %v1580_v48 }
 0xd74   :  { %v8037_v49 = vpop.eup %8036 }
 0xd75   :  { %v1582_v26 = vsel %vm828_vm3, %v8037_v49, 0.0 }
 0xd76   :  { %v8039_v59 = vpop.eup %8038  ;;  %1583 = vadd.xlane.f32.xlu1 %v1582_v26 }
 0xd77   :  { %v1585_v0 = vsel %vm828_vm3, %v8039_v59, 0.0 }
 0xd78   :  { %1586 = vadd.xlane.f32.xlu0 %v1585_v0 }
 0xd7a   :  { %v8041_v36 = vpop.eup %8040 }
 0xd7b   :  { %v1588_v57 = vsel %vm828_vm3, %v8041_v36, 0.0 }
 0xd7c   :  { %1589 = vadd.xlane.f32.xlu1 %v1588_v57 }
 0xd8d   :  { %1671 = vrot.lane.b32.xlu1 %v9054_v55, %s8438_s4 }
 0xd8e   :  { %1669 = vrot.lane.b32.xlu0 %v8920_v47, %s8438_s4 }
 0xd91   :  { %1663 = vrot.lane.b32.xlu1 %v8913_v41, %s8438_s4 }
 0xd95   :  { %1665 = vrot.lane.b32.xlu1 %v9066_v9, %s8438_s4 }
 0xe03   :  { %v1584_v61 = vpop.xlane.xlu1 %1583 }
 0xe04   :  { %8042 = vrcp.f32 %v1584_v61 }
 0xe05   :  { %v1587_v63 = vpop.xlane.xlu0 %1586 }
 0xe06   :  { %8044 = vrcp.f32 %v1587_v63 }
 0xe09   :  { %v1590_v4 = vpop.xlane.xlu1 %1589  ;;  %v1670_v5 = vpop.permute.xlu0 %1669 }
 0xe0a   :  { %8046 = vrcp.f32 %v1590_v4  ;;  %7662 = vmatprep.subr.msk.bf16.mxu1 %vm761_vm1, %v1670_v5  ;;  %v1680_v28 = vsel %vm761_vm1, %v1670_v5, 0 }
 0xe0d   :  { %v1672_v22 = vpop.permute.xlu1 %1671 }
 0xe0e   :  { %v8043_v7 = vpop.eup %8042  ;;  %v1683_v62 = vsel %vm761_vm1, %v1672_v22, 0 }
 0xe0f   :  { %v1592_v45 = vmul.f32 %v8043_v7, %v8037_v49 }
 0xe10   :  { %v8045_v2 = vpop.eup %8044 }
 0xe11   :  { %v1594_v19 = vmul.f32 %v8045_v2, %v8039_v59  ;;  %v1664_v30 = vpop.permute.xlu1 %1663 }
 0xe13   :  { %v1597_v23 = vpack.c.bf16 %v1594_v19, %v1592_v45 }
 0xe14   :  { %v8047_v25 = vpop.eup %8046 }
 0xe15   :  { %7383 = vmatprep.mubr.msk.bf16.mxu1 %vm828_vm3, %v1597_v23  ;;  %v1596_v29 = vmul.f32 %v8047_v25, %v8041_v36  ;;  %v1666_v44 = vpop.permute.xlu1 %1665 }
 0xe17   :  { %v1598_v16 = vpack.c.bf16 %v1596_v29, %v1596_v29 }
 0xe19   :  { %7384 = vmatmul.mubr.msk.bf16.vlgmr.msra.gmra.mrb[36].mxu1 %vm828_vm3, %v1598_v16 }
 0xe1a   :  { %7388 = vmatpush3.bf16.xpose.msra.mxu1 %v1680_v28  ;;  %7391 = vmatprep.mubr.msk.bf16.mxu1 %vm761_vm1, %v1664_v30 }
 0xe1b   :  { %7663 = vmatprep.subr.msk.bf16.mxu1 %vm761_vm1, %v1672_v22 }
 0xe22   :  { %7390 = vmatpush3.bf16.xpose.msra.mxu1 %v1683_v62 }
 0xe29   :  { %7392 = vmatmul.mubr.msk.bf16.vlgmr.msra.gmra.mrb[40].mxu1 %vm761_vm1, %v1666_v44 }
 0xeec   :  { %v7385_v37 = vpop.f32.mrb[36].mxu1 }
 0xeed   :  { %1660 = vst.msk [vmem:[#allocation2 + $0x28] sm:$0xff] %vm761_vm1, %v7385_v37  ;;  %v1644_v15 = vpop.f32.mrb[37].mxu1 }
 0xeee   :  { %1658 = vst.msk [vmem:[#allocation2 + $0x18] sm:$0xff] %vm761_vm1, %v1644_v15  ;;  %v7386_v33 = vpop.f32.mrb[38].mxu1 }
 0xeef   :  { %v1647_v27 = vpop.f32.mrb[39].mxu1 }
 0xef0   :  { %1659 = vst.msk [vmem:[#allocation2 + $0x20] sm:$0xff] %vm761_vm1, %v1647_v27 }
 0xefc   :  { %v7393_v34 = vpop.f32.mrb[40].mxu1 }
 0xefd   :  { %v1719_v38 = vpop.f32.mrb[41].mxu1  ;;  %v1735_v39 = vmul.f32 0.17677669, %v7393_v34 }
 0xefe   :  { %v1733_v40 = vmul.f32 0.17677669, %v1719_v38  ;;  %v7394_v42 = vpop.f32.mrb[42].mxu1 }
 0xeff   :  { %v1722_v12 = vpop.f32.mrb[43].mxu1  ;;  %v1738_v26 = vadd.f32 %v1735_v39, %v8870_v50 }
 0xf00   :  { %v1734_v35 = vmul.f32 0.17677669, %v1722_v12  ;;  %v1736_v43 = vadd.f32 %v1733_v40, %v8870_v50 }
 0xf01   :  { %v1745_v0 = vsel %vm828_vm3, %v1738_v26, -inf }
 0xf02   :  { %v1739_v48 = vsel %vm828_vm3, %v1736_v43, -inf  ;;  %v1737_v49 = vadd.f32 %v1734_v35, %v8870_v50 }
 0xf03   :  { %1740 = vmax.xlane.f32.xlu0 %v1739_v48 }
 0xf04   :  { %v1742_v59 = vsel %vm828_vm3, %v1737_v49, -inf }
 0xf05   :  { %1743 = vmax.xlane.f32.xlu1 %v1742_v59 }
 0xf07   :  { %1746 = vmax.xlane.f32.xlu0 %v1745_v0 }
 0xf90   :  { %v1741_v36 = vpop.xlane.xlu0 %1740 }
 0xf91   :  { %v1748_v57 = vsub.f32 %v1736_v43, %v1741_v36 }
 0xf92   :  { %v1744_v61 = vpop.xlane.xlu1 %1743 }
 0xf93   :  { %v1751_v63 = vmul.f32 1.442695, %v1748_v57  ;;  %v1749_v4 = vsub.f32 %v1737_v49, %v1744_v61 }
 0xf94   :  { %v1747_v5 = vpop.xlane.xlu0 %1746 }
 0xf95   :  { %8048 = vpow2.f32 %v1751_v63  ;;  %v1753_v7 = vmul.f32 1.442695, %v1749_v4  ;;  %v1750_v2 = vsub.f32 %v1738_v26, %v1747_v5 }
 0xf97   :  { %8050 = vpow2.f32 %v1753_v7  ;;  %v1755_v45 = vmul.f32 1.442695, %v1750_v2 }
 0xf99   :  { %8052 = vpow2.f32 %v1755_v45 }
 0xf9f   :  { %v8049_v19 = vpop.eup %8048 }
 0xfa0   :  { %v1757_v22 = vsel %vm828_vm3, %v8049_v19, 0.0 }
 0xfa1   :  { %v8051_v23 = vpop.eup %8050  ;;  %1758 = vadd.xlane.f32.xlu0 %v1757_v22 }
 0xfa2   :  { %v1760_v16 = vsel %vm828_vm3, %v8051_v23, 0.0 }
 0xfa3   :  { %v8053_v25 = vpop.eup %8052 }
 0xfa4   :  { %v1763_v29 = vsel %vm828_vm3, %v8053_v25, 0.0 }
 0xfa5   :  { %1764 = vadd.xlane.f32.xlu1 %v1763_v29  ;;  %1761 = vadd.xlane.f32.xlu0 %v1760_v16 }
 0xfb6   :  { %1778 = vrot.lane.b32.xlu1 %v9019_v24, %s8438_s4 }
 0xfba   :  { %1857 = vrot.lane.b32.xlu1 %v8920_v47, %s8441_s30 }
 0xfbb   :  { %1776 = vrot.lane.b32.xlu0 %v8936_v31, %s8438_s4 }
 0xfbe   :  { %1859 = vrot.lane.b32.xlu1 %v9054_v55, %s8441_s30 }
 0xfbf   :  { %1853 = vrot.lane.b32.xlu0 %v8913_v41, %s8441_s30 }
 0xfc2   :  { %1855 = vrot.lane.b32.xlu1 %v9066_v9, %s8441_s30 }
0x102e   :  { %v1759_v30 = vpop.xlane.xlu0 %1758 }
0x102f   :  { %8054 = vrcp.f32 %v1759_v30 }
0x1032   :  { %v1762_v28 = vpop.xlane.xlu0 %1761  ;;  %v1765_v62 = vpop.xlane.xlu1 %1764 }
0x1033   :  { %8056 = vrcp.f32 %v1762_v28 }
0x1034   :  { %8058 = vrcp.f32 %v1765_v62 }
0x1036   :  { %v1777_v44 = vpop.permute.xlu0 %1776  ;;  %v1779_v37 = vpop.permute.xlu1 %1778 }
0x1037   :  { %7395 = vmatprep.subr.bf16.mxu0 %v1777_v44  ;;  %v1788_v33 = vsel %vm872_vm5, %v1779_v37, 0 }
0x1038   :  { %7396 = vmatpush3.bf16.msra.mxu0 %v1777_v44 }
0x1039   :  { %7664 = vmatprep.subr.msk.bf16.mxu0 %vm872_vm5, %v1779_v37  ;;  %v8055_v15 = vpop.eup %8054 }
0x103a   :  { %v1858_v27 = vpop.permute.xlu1 %1857  ;;  %v1767_v39 = vmul.f32 %v8055_v15, %v8049_v19  ;;  %v1854_v43 = vpop.permute.xlu0 %1853 }
0x103b   :  { %v1868_v48 = vsel %vm761_vm1, %v1858_v27, 0 }
0x103c   :  { %7398 = vmatpush3.bf16.msra.mxu0 %v1788_v33 }
0x103d   :  { %v8057_v34 = vpop.eup %8056  ;;  %7665 = vmatprep.subr.msk.bf16.mxu0 %vm761_vm1, %v1858_v27 }
0x103e   :  { %v8059_v38 = vpop.eup %8058  ;;  %v1769_v40 = vmul.f32 %v8057_v34, %v8051_v23  ;;  %v1860_v49 = vpop.permute.xlu1 %1859 }
0x103f   :  { %v1771_v42 = vmul.f32 %v8059_v38, %v8053_v25  ;;  %v1871_v26 = vsel %vm761_vm1, %v1860_v49, 0 }
0x1040   :  { %v1772_v12 = vpack.c.bf16 %v1769_v40, %v1767_v39 }
0x1041   :  { %v1773_v35 = vpack.c.bf16 %v1771_v42, %v1771_v42 }
0x1042   :  { %7399 = vmatprep.mubr.msk.bf16.mxu0 %vm828_vm3, %v1772_v12  ;;  %v1856_v59 = vpop.permute.xlu1 %1855 }
0x1043   :  { %7400 = vmatmul.mubr.msk.bf16.vlgmr.msra.gmra.mrb[36].mxu0 %vm828_vm3, %v1773_v35 }
0x1044   :  { %7407 = vmatprep.mubr.msk.bf16.mxu0 %vm761_vm1, %v1854_v43 }
0x1045   :  { %7404 = vmatpush3.bf16.xpose.msra.mxu0 %v1868_v48 }
0x1046   :  { %7666 = vmatprep.subr.msk.bf16.mxu0 %vm761_vm1, %v1860_v49 }
0x104d   :  { %7406 = vmatpush3.bf16.xpose.msra.mxu0 %v1871_v26 }
0x1054   :  { %7408 = vmatmul.mubr.msk.bf16.vlgmr.msra.gmra.mrb[40].mxu0 %vm761_vm1, %v1856_v59 }
0x1116   :  { %v9135_v0 = vpop.f32.mrb[36].mxu0 }
0x1117   :  { %v9137_v36 = vpop.f32.mrb[37].mxu0 }
0x1118   :  { %v7402_v57 = vpop.f32.mrb[38].mxu0 }
0x1119   :  { %v9139_v61 = vpop.f32.mrb[39].mxu0 }
0x1127   :  { %v7409_v63 = vpop.f32.mrb[40].mxu0 }
0x1128   :  { %v1907_v4 = vpop.f32.mrb[41].mxu0  ;;  %v1923_v5 = vmul.f32 0.17677669, %v7409_v63 }
0x1129   :  { %v1921_v7 = vmul.f32 0.17677669, %v1907_v4  ;;  %v7410_v2 = vpop.f32.mrb[42].mxu0 }
0x112a   :  { %v1910_v45 = vpop.f32.mrb[43].mxu0  ;;  %v1926_v29 = vadd.f32 %v1923_v5, %v8870_v50 }
0x112b   :  { %v1922_v19 = vmul.f32 0.17677669, %v1910_v45  ;;  %v1924_v22 = vadd.f32 %v1921_v7, %v8870_v50 }
0x112c   :  { %v1933_v30 = vsel %vm828_vm3, %v1926_v29, -inf }
0x112d   :  { %v1927_v23 = vsel %vm828_vm3, %v1924_v22, -inf  ;;  %v1925_v25 = vadd.f32 %v1922_v19, %v8870_v50 }
0x112e   :  { %1928 = vmax.xlane.f32.xlu0 %v1927_v23 }
0x112f   :  { %v1930_v16 = vsel %vm828_vm3, %v1925_v25, -inf }
0x1130   :  { %1931 = vmax.xlane.f32.xlu1 %v1930_v16 }
0x1132   :  { %1934 = vmax.xlane.f32.xlu0 %v1933_v30 }
0x11bb   :  { %v1929_v28 = vpop.xlane.xlu0 %1928 }
0x11bc   :  { %v1936_v62 = vsub.f32 %v1924_v22, %v1929_v28 }
0x11bd   :  { %v1932_v44 = vpop.xlane.xlu1 %1931 }
0x11be   :  { %v1939_v37 = vmul.f32 1.442695, %v1936_v62  ;;  %v1937_v15 = vsub.f32 %v1925_v25, %v1932_v44 }
0x11bf   :  { %v1935_v33 = vpop.xlane.xlu0 %1934 }
0x11c0   :  { %8060 = vpow2.f32 %v1939_v37  ;;  %v1941_v27 = vmul.f32 1.442695, %v1937_v15  ;;  %v1938_v34 = vsub.f32 %v1926_v29, %v1935_v33 }
0x11c2   :  { %8062 = vpow2.f32 %v1941_v27  ;;  %v1943_v38 = vmul.f32 1.442695, %v1938_v34 }
0x11c4   :  { %8064 = vpow2.f32 %v1943_v38 }
0x11ca   :  { %v8061_v39 = vpop.eup %8060 }
0x11cb   :  { %v1945_v40 = vsel %vm828_vm3, %v8061_v39, 0.0 }
0x11cc   :  { %v8063_v42 = vpop.eup %8062  ;;  %1946 = vadd.xlane.f32.xlu0 %v1945_v40 }
0x11cd   :  { %v1948_v43 = vsel %vm828_vm3, %v8063_v42, 0.0 }
0x11ce   :  { %v8065_v12 = vpop.eup %8064 }
0x11cf   :  { %v1951_v35 = vsel %vm828_vm3, %v8065_v12, 0.0 }
0x11d0   :  { %1952 = vadd.xlane.f32.xlu1 %v1951_v35  ;;  %1949 = vadd.xlane.f32.xlu0 %v1948_v43 }
0x11e1   :  { %1964 = vrot.lane.b32.xlu1 %v9019_v24, %s8441_s30 }
0x11e5   :  { %2043 = vrot.lane.b32.xlu1 %v8920_v47, %s8442_s0 }
0x11e6   :  { %1962 = vrot.lane.b32.xlu0 %v8936_v31, %s8441_s30 }
0x11e9   :  { %2045 = vrot.lane.b32.xlu1 %v9054_v55, %s8442_s0 }
0x11ea   :  { %2039 = vrot.lane.b32.xlu0 %v8913_v41, %s8442_s0 }
0x11ed   :  { %2041 = vrot.lane.b32.xlu1 %v9066_v9, %s8442_s0 }
0x1259   :  { %v1947_v48 = vpop.xlane.xlu0 %1946 }
0x125a   :  { %8066 = vrcp.f32 %v1947_v48 }
0x125d   :  { %v1950_v49 = vpop.xlane.xlu0 %1949  ;;  %v1953_v26 = vpop.xlane.xlu1 %1952 }
0x125e   :  { %8068 = vrcp.f32 %v1950_v49 }
0x125f   :  { %8070 = vrcp.f32 %v1953_v26 }
0x1261   :  { %v1963_v59 = vpop.permute.xlu0 %1962  ;;  %v1965_v47 = vpop.permute.xlu1 %1964 }
0x1262   :  { %7411 = vmatprep.subr.bf16.mxu1 %v1963_v59  ;;  %v1974_v55 = vsel %vm872_vm5, %v1965_v47, 0 }
0x1263   :  { %7412 = vmatpush3.bf16.msra.mxu1 %v1963_v59 }
0x1264   :  { %7667 = vmatprep.subr.msk.bf16.mxu1 %vm872_vm5, %v1965_v47  ;;  %v8067_v57 = vpop.eup %8066 }
0x1265   :  { %v2044_v63 = vpop.permute.xlu1 %2043  ;;  %v1955_v4 = vmul.f32 %v8067_v57, %v8061_v39  ;;  %v2040_v19 = vpop.permute.xlu0 %2039 }
0x1266   :  { %v2054_v22 = vsel %vm761_vm1, %v2044_v63, 0 }
0x1267   :  { %7414 = vmatpush3.bf16.msra.mxu1 %v1974_v55 }
0x1268   :  { %v8069_v41 = vpop.eup %8068  ;;  %7668 = vmatprep.subr.msk.bf16.mxu1 %vm761_vm1, %v2044_v63 }
0x1269   :  { %v8071_v9 = vpop.eup %8070  ;;  %v1957_v5 = vmul.f32 %v8069_v41, %v8063_v42  ;;  %v2046_v23 = vpop.permute.xlu1 %2045 }
0x126a   :  { %v1959_v7 = vmul.f32 %v8071_v9, %v8065_v12  ;;  %v2057_v25 = vsel %vm761_vm1, %v2046_v23, 0 }
0x126b   :  { %v1960_v2 = vpack.c.bf16 %v1957_v5, %v1955_v4 }
0x126c   :  { %v1961_v45 = vpack.c.bf16 %v1959_v7, %v1959_v7 }
0x126d   :  { %7415 = vmatprep.mubr.msk.bf16.mxu1 %vm828_vm3, %v1960_v2  ;;  %v2042_v29 = vpop.permute.xlu1 %2041 }
0x126e   :  { %7416 = vmatmul.mubr.msk.bf16.vlgmr.msra.gmra.mrb[44].mxu1 %vm828_vm3, %v1961_v45 }
0x126f   :  { %7423 = vmatprep.mubr.msk.bf16.mxu1 %vm761_vm1, %v2040_v19 }
0x1270   :  { %7420 = vmatpush3.bf16.xpose.msra.mxu1 %v2054_v22 }
0x1271   :  { %7669 = vmatprep.subr.msk.bf16.mxu1 %vm761_vm1, %v2046_v23 }
0x1278   :  { %7422 = vmatpush3.bf16.xpose.msra.mxu1 %v2057_v25 }
0x127f   :  { %7424 = vmatmul.mubr.msk.bf16.vlgmr.msra.gmra.mrb[48].mxu1 %vm761_vm1, %v2042_v29  ;;  %v7756_v29 = vld [vmem:[%s10725_s9] sm:$0xff]  }
0x1280   :  { %2709 = vmatprep.mubr.bf16.mxu1 %v8436_v1 }
0x1341   :  { %v9173_v16 = vpop.f32.mrb[44].mxu1 }
0x1342   :  { %v2010_v30 = vpop.f32.mrb[45].mxu1 }
0x1343   :  { %v7418_v28 = vpop.f32.mrb[46].mxu1 }
0x1344   :  { %v2013_v62 = vpop.f32.mrb[47].mxu1 }
0x1352   :  { %v7425_v44 = vpop.f32.mrb[48].mxu1 }
0x1353   :  { %v2093_v37 = vpop.f32.mrb[49].mxu1  ;;  %v2109_v15 = vmul.f32 0.17677669, %v7425_v44  ;;  %v7757_v44 = vld [vmem:[%s10725_s9 + $0x8] sm:$0xff]  }
0x1354   :  { %v2107_v33 = vmul.f32 0.17677669, %v2093_v37  ;;  %v7426_v27 = vpop.f32.mrb[50].mxu1 }
0x1355   :  { %v2096_v34 = vpop.f32.mrb[51].mxu1  ;;  %v2112_v40 = vadd.f32 %v2109_v15, %v8870_v50 }
0x1356   :  { %v2110_v38 = vadd.f32 %v2107_v33, %v8870_v50  ;;  %v2108_v39 = vmul.f32 0.17677669, %v2096_v34  ;;  %v7758_v33 = vld [vmem:[%s10725_s9 + $0x10] sm:$0xff]  }
0x1357   :  { %v2119_v43 = vsel %vm828_vm3, %v2112_v40, -inf }
0x1358   :  { %v2111_v42 = vadd.f32 %v2108_v39, %v8870_v50  ;;  %v2113_v12 = vsel %vm828_vm3, %v2110_v38, -inf }
0x1359   :  { %2114 = vmax.xlane.f32.xlu0 %v2113_v12 }
0x135a   :  { %v2116_v35 = vsel %vm828_vm3, %v2111_v42, -inf }
0x135b   :  { %2117 = vmax.xlane.f32.xlu1 %v2116_v35  ;;  %v7761_v35 = vld [vmem:[%s10725_s9 + $0x28] sm:$0xff]  }
0x135d   :  { %2120 = vmax.xlane.f32.xlu0 %v2119_v43  ;;  %v7762_v43 = vld [vmem:[%s10725_s9 + $0x30] sm:$0xff]  }
0x13e6   :  { %v2115_v48 = vpop.xlane.xlu0 %2114 }
0x13e7   :  { %v2122_v49 = vsub.f32 %v2110_v38, %v2115_v48  ;;  %v7759_v38 = vld [vmem:[%s10725_s9 + $0x18] sm:$0xff]  }
0x13e8   :  { %v2118_v26 = vpop.xlane.xlu1 %2117  ;;  %v7763_v48 = vld [vmem:[%s10725_s9 + $0x38] sm:$0xff]  }
0x13e9   :  { %v2125_v59 = vmul.f32 1.442695, %v2122_v49  ;;  %v2123_v47 = vsub.f32 %v2111_v42, %v2118_v26  ;;  %v7760_v42 = vld [vmem:[%s10725_s9 + $0x20] sm:$0xff]  }
0x13ea   :  { %v2121_v57 = vpop.xlane.xlu0 %2120 }
0x13eb   :  { %8072 = vpow2.f32 %v2125_v59  ;;  %v2127_v55 = vmul.f32 1.442695, %v2123_v47  ;;  %v2124_v63 = vsub.f32 %v2112_v40, %v2121_v57 }
0x13ed   :  { %8074 = vpow2.f32 %v2127_v55  ;;  %v2129_v41 = vmul.f32 1.442695, %v2124_v63 }
0x13ef   :  { %8076 = vpow2.f32 %v2129_v41  ;;  %v9275_v41 = vld [vmem:[%s10726_s10] ss:$0 sm:$0xff] }
0x13f5   :  { %v8073_v9 = vpop.eup %8072 }
0x13f6   :  { %v2131_v4 = vsel %vm828_vm3, %v8073_v9, 0.0 }
0x13f7   :  { %v8075_v5 = vpop.eup %8074  ;;  %2132 = vadd.xlane.f32.xlu0 %v2131_v4 }
0x13f8   :  { %v2134_v45 = vsel %vm828_vm3, %v8075_v5, 0.0 }
0x13f9   :  { %v8077_v7 = vpop.eup %8076 }
0x13fa   :  { %v2137_v2 = vsel %vm828_vm3, %v8077_v7, 0.0 }
0x13fb   :  { %2138 = vadd.xlane.f32.xlu1 %v2137_v2  ;;  %2135 = vadd.xlane.f32.xlu0 %v2134_v45 }
0x140c   :  { %2150 = vrot.lane.b32.xlu1 %v9019_v24, %s8442_s0 }
0x1410   :  { %1107 = vrot.lane.b32.xlu1 %v8982_v11, %s8442_s0 }
0x1411   :  { %2148 = vrot.lane.b32.xlu0 %v8936_v31, %s8442_s0 }
0x1414   :  { %1109 = vrot.lane.b32.xlu1 %v8984_v21, %s8442_s0 }
0x1415   :  { %1294 = vrot.lane.b32.xlu0 %v9029_v52, %s8441_s30 }
0x1418   :  { %1296 = vrot.lane.b32.xlu1 %v9031_v53, %s8441_s30 }
0x1419   :  { %1481 = vrot.lane.b32.xlu0 %v9072_v18, %s8438_s4 }
0x141c   :  { %1483 = vrot.lane.b32.xlu1 %v9074_v20, %s8438_s4 }
0x141d   :  { %1111 = vrot.lane.b32.xlu0 %v8980_v32, %s8442_s0 }
0x1420   :  { %1841 = vrot.lane.b32.xlu1 %v9137_v36, %s8442_s0 }
0x1421   :  { %1298 = vrot.lane.b32.xlu0 %v9027_v8, %s8441_s30 }
0x1424   :  { %2027 = vrot.lane.b32.xlu1 %v2010_v30, %s8441_s30 }
0x1425   :  { %1485 = vrot.lane.b32.xlu0 %v9070_v13, %s8438_s4 }
0x1429   :  { %1843 = vrot.lane.b32.xlu0 %v9139_v61, %s8442_s0 }
0x142d   :  { %2029 = vrot.lane.b32.xlu0 %v2013_v62, %s8441_s30 }
0x1484   :  { %v2133_v31 = vpop.xlane.xlu0 %2132 }
0x1485   :  { %8078 = vrcp.f32 %v2133_v31 }
0x1488   :  { %v2136_v11 = vpop.xlane.xlu0 %2135  ;;  %v2139_v32 = vpop.xlane.xlu1 %2138 }
0x1489   :  { %8080 = vrcp.f32 %v2136_v11 }
0x148a   :  { %8082 = vrcp.f32 %v2139_v32 }
0x148c   :  { %v2149_v21 = vpop.permute.xlu0 %2148  ;;  %v2151_v24 = vpop.permute.xlu1 %2150 }
0x148d   :  { %7427 = vmatprep.subr.bf16.mxu0 %v2149_v21  ;;  %v2160_v13 = vsel %vm872_vm5, %v2151_v24, 0 }
0x148e   :  { %7428 = vmatpush3.bf16.msra.mxu0 %v2149_v21 }
0x148f   :  { %7670 = vmatprep.subr.msk.bf16.mxu0 %vm872_vm5, %v2151_v24  ;;  %v8079_v53 = vpop.eup %8078 }
0x1490   :  { %v1295_v8 = vpop.permute.xlu0 %1294  ;;  %v1108_v52 = vpop.permute.xlu1 %1107  ;;  %v2141_v19 = vmul.f32 %v8079_v53, %v8073_v9 }
0x1491   :  { %1117 = vst.msk [vmem:[#allocation2] sm:$0xff] %vm1116_vm6, %v1108_v52 }
0x1492   :  { %7430 = vmatpush3.bf16.msra.mxu0 %v2160_v13  ;;  %1304 = vst.msk [vmem:[#allocation2] sm:$0xff] %vm1303_vm7, %v1295_v8 }
0x1493   :  { %v8081_v18 = vpop.eup %8080  ;;  %7435 = vmatprep.subr.bf16.mxu0 %v8437_v58 }
0x1494   :  { %v8083_v20 = vpop.eup %8082  ;;  %v1482_v36 = vpop.permute.xlu0 %1481  ;;  %v2143_v22 = vmul.f32 %v8081_v18, %v8075_v5 }
0x1495   :  { %v1110_v61 = vpop.permute.xlu1 %1109  ;;  %1491 = vst.msk [vmem:[#allocation2] sm:$0xff] %vm1490_vm8, %v1482_v36  ;;  %v2145_v23 = vmul.f32 %v8083_v20, %v8077_v7 }
0x1496   :  { %1118 = vst.msk [vmem:[#allocation2 + $0x8] sm:$0xff] %vm1116_vm6, %v1110_v61  ;;  %v2146_v25 = vpack.c.bf16 %v2143_v22, %v2141_v19  ;;  %v7764_v19 = vld [vmem:[%s10729_s13] ss:$16 sps:$4 sm:$0xff]   ;;  %v7766_v22 = vld [vmem:[%s10729_s13 + $0x4] ss:$16 sps:$4 sm:$0xff]  }
0x1497   :  { %v2147_v30 = vpack.c.bf16 %v2145_v23, %v2145_v23  ;;  %v7767_v23 = vld [vmem:[%s10729_s13 + $0x8] ss:$16 sps:$4 sm:$0xff]   ;;  %2677 = vmatprep.subr.bf16.mxu1 %v7766_v22 }
0x1498   :  { %7431 = vmatprep.mubr.msk.bf16.mxu0 %vm828_vm3, %v2146_v25  ;;  %v1112_v28 = vpop.permute.xlu0 %1111  ;;  %v7769_v25 = vld [vmem:[%s10729_s13 + $0xc] ss:$16 sps:$4 sm:$0xff]   ;;  %2678 = vmatpush1.bf16.msra.mxu1 %v7764_v19 }
0x1499   :  { %v1297_v62 = vpop.permute.xlu1 %1296  ;;  %1119 = vst.msk [vmem:[#allocation2 + $0x10] sm:$0xff] %vm1116_vm6, %v1112_v28  ;;  %7432 = vmatmul.mubr.msk.bf16.vlgmr.msra.gmra.mrb[44].mxu0 %vm828_vm3, %v2147_v30 }
0x149a   :  { %1305 = vst.msk [vmem:[#allocation2 + $0x8] sm:$0xff] %vm1303_vm7, %v1297_v62  ;;  %7436 = vmatpush3.bf16.msra.mxu0 %v7756_v29  ;;  %7451 = vmatprep.mubr.msk.bf16.mxu0 %vm8440_vm4, %v8437_v58 }
0x149b   :  { %7437 = vmatprep.subr.bf16.mxu0 %v8437_v58 }
0x149c   :  { %v1299_v37 = vpop.permute.xlu0 %1298  ;;  %v2225_v26 = vld [vmem:[#allocation2] sm:$0xff] }
0x149d   :  { %v1484_v15 = vpop.permute.xlu1 %1483  ;;  %1306 = vst.msk [vmem:[#allocation2 + $0x10] sm:$0xff] %vm1303_vm7, %v1299_v37 }
0x149e   :  { %1492 = vst.msk [vmem:[#allocation2 + $0x8] sm:$0xff] %vm1490_vm8, %v1484_v15  ;;  %7438 = vmatpush3.bf16.msra.mxu0 %v7757_v44 }
0x149f   :  { %7439 = vmatprep.subr.bf16.mxu0 %v8437_v58 }
0x14a0   :  { %v1486_v27 = vpop.permute.xlu0 %1485 }
0x14a1   :  { %v1842_v34 = vpop.permute.xlu1 %1841  ;;  %1493 = vst.msk [vmem:[#allocation2 + $0x10] sm:$0xff] %vm1490_vm8, %v1486_v27 }
0x14a2   :  { %1850 = vst.msk [vmem:[#allocation2 + $0x18] sm:$0xff] %vm1116_vm6, %v1842_v34  ;;  %7440 = vmatpush3.bf16.msra.mxu0 %v7758_v33 }
0x14a3   :  { %7441 = vmatprep.subr.bf16.mxu0 %v8437_v58 }
0x14a4   :  { %v1844_v39 = vpop.permute.xlu0 %1843 }
0x14a5   :  { %v2028_v40 = vpop.permute.xlu1 %2027  ;;  %1851 = vst.msk [vmem:[#allocation2 + $0x20] sm:$0xff] %vm1116_vm6, %v1844_v39  ;;  %v2226_v49 = vld [vmem:[#allocation2 + $0x8] sm:$0xff] }
0x14a6   :  { %2036 = vst.msk [vmem:[#allocation2 + $0x18] sm:$0xff] %vm1303_vm7, %v2028_v40  ;;  %7442 = vmatpush3.bf16.msra.mxu0 %v7759_v38  ;;  %v2248_v59 = vpack.c.bf16 %v2226_v49, %v2225_v26  ;;  %v7776_v49 = vld [vmem:[%s10729_s13 + $0x40] ss:$16 sps:$4 sm:$0xff]   ;;  %v7778_v26 = vld [vmem:[%s10729_s13 + $0x44] ss:$16 sps:$4 sm:$0xff]  }
0x14a7   :  { %7443 = vmatprep.subr.bf16.mxu0 %v8437_v58 }
0x14a8   :  { %v2030_v12 = vpop.permute.xlu0 %2029  ;;  %v2227_v21 = vld [vmem:[#allocation2 + $0x10] sm:$0xff] }
0x14a9   :  { %2037 = vst.msk [vmem:[#allocation2 + $0x20] sm:$0xff] %vm1303_vm7, %v2030_v12 }
0x14aa   :  { %7444 = vmatpush3.bf16.msra.mxu0 %v7760_v42 }
0x14ab   :  { %7445 = vmatprep.subr.bf16.mxu0 %v8437_v58 }
0x14ae   :  { %7446 = vmatpush3.bf16.msra.mxu0 %v7761_v35  ;;  %v7770_v35 = vld [vmem:[%s10729_s13 + $0x20] ss:$16 sps:$4 sm:$0xff]  }
0x14af   :  { %7447 = vmatprep.subr.bf16.mxu0 %v8437_v58 }
0x14b2   :  { %7448 = vmatpush3.bf16.msra.mxu0 %v7762_v43  ;;  %v7773_v43 = vld [vmem:[%s10729_s13 + $0x28] ss:$16 sps:$4 sm:$0xff]  }
0x14b3   :  { %7449 = vmatprep.subr.bf16.mxu0 %v8437_v58 }
0x14b6   :  { %7450 = vmatpush3.bf16.msra.mxu0 %v7763_v48  ;;  %v7775_v48 = vld [vmem:[%s10729_s13 + $0x2c] ss:$16 sps:$4 sm:$0xff]  }
0x14b7   :  { %2740 = vmatprep.subr.bf16.mxu0 %v7769_v25 }
0x14b9   :  { %7452 = vmatmul.mubr.bf16.vlgmr.msra.gmra.mrb[48].mxu0 %v2248_v59  ;;  %v7779_v59 = vld [vmem:[%s10729_s13 + $0x48] ss:$16 sps:$4 sm:$0xff]  }
0x14ba   :  { %7455 = vmatprep.mubr.msk.bf16.mxu0 %vm8440_vm4, %v8437_v58  ;;  %2741 = vmatpush1.bf16.msra.mxu0 %v7767_v23 }
0x14bb   :  { %2742 = vmatprep.subr.bf16.mxu0 %v7775_v48 }
0x14be   :  { %2743 = vmatpush1.bf16.msra.mxu0 %v7773_v43 }
0x156c   :  { %v7433_v47 = vpop.f32.mrb[44].mxu0 }
0x156d   :  { %v2196_v57 = vpop.f32.mrb[45].mxu0 }
0x156e   :  { %2213 = vrot.lane.b32.xlu1 %v2196_v57, %s8438_s4  ;;  %v7434_v55 = vpop.f32.mrb[46].mxu0  ;;  %v7784_v57 = vld [vmem:[%s10729_s13 + $0x64] ss:$16 sps:$4 sm:$0xff]  }
0x156f   :  { %v2199_v63 = vpop.f32.mrb[47].mxu0  ;;  %v7787_v55 = vld [vmem:[%s10729_s13 + $0x6c] ss:$16 sps:$4 sm:$0xff]  }
0x1570   :  { %2215 = vrot.lane.b32.xlu0 %v2199_v63, %s8438_s4  ;;  %v7782_v63 = vld [vmem:[%s10729_s13 + $0x60] ss:$16 sps:$4 sm:$0xff]  }
0x1572   :  { %1845 = vrot.lane.b32.xlu1 %v9135_v0, %s8442_s0 }
0x1576   :  { %2031 = vrot.lane.b32.xlu1 %v9173_v16, %s8441_s30 }
0x157a   :  { %2217 = vrot.lane.b32.xlu1 %v7433_v47, %s8438_s4  ;;  %v7781_v47 = vld [vmem:[%s10729_s13 + $0x4c] ss:$16 sps:$4 sm:$0xff]  }
0x157b   :  { %2744 = vmatprep.subr.bf16.mxu0 %v7781_v47 }
0x157c   :  { %2745 = vmatpush1.bf16.msra.mxu0 %v7779_v59 }
0x157d   :  { %2746 = vmatprep.subr.bf16.mxu0 %v7787_v55 }
0x158c   :  { %v2339_v9 = vpop.f32.mrb[48].mxu0 }
0x158d   :  { %v2340_v4 = vadd.f32 %v9275_v41, %v2339_v9  ;;  %v7453_v5 = vpop.f32.mrb[49].mxu0  ;;  %v7785_v9 = vld [vmem:[%s10729_s13 + $0x68] ss:$16 sps:$4 sm:$0xff]  }
0x158e   :  { %v2342_v7 = vpop.f32.mrb[50].mxu0  ;;  %2747 = vmatpush1.bf16.msra.mxu0 %v7785_v9  ;;  %v7790_v5 = vld [vmem:[%s10729_s13 + $0x84] ss:$16 sps:$4 sm:$0xff]  }
0x158f   :  { %v9279_v2 = vadd.f32 %v2340_v4, %v8643_v6  ;;  %v7454_v45 = vpop.f32.mrb[51].mxu0  ;;  %v2343_v0 = vadd.f32 %v9275_v41, %v2342_v7  ;;  %v7788_v4 = vld [vmem:[%s10729_s13 + $0x80] ss:$16 sps:$4 sm:$0xff]   ;;  %v7791_v7 = vld [vmem:[%s10729_s13 + $0x88] ss:$16 sps:$4 sm:$0xff]  }
0x1590   :  { %v7793_v45 = vld [vmem:[%s10729_s13 + $0x8c] ss:$16 sps:$4 sm:$0xff]  }
0x1591   :  { %2370 = vadd.xlane.f32.xlu0 %v9279_v2  ;;  %v9284_v16 = vadd.f32 %v2343_v0, %v8648_v10  ;;  %v7796_v0 = vld [vmem:[%s10729_s13 + $0xa4] ss:$16 sps:$4 sm:$0xff]   ;;  %2748 = vmatprep.subr.bf16.mxu0 %v7793_v45 }
0x1592   :  { %2749 = vmatpush1.bf16.msra.mxu0 %v7791_v7 }
0x159e   :  { %2372 = vadd.xlane.f32.xlu1 %v9284_v16 }
0x15e0   :  { %v2214_v31 = vpop.permute.xlu1 %2213 }
0x15e1   :  { %2222 = vst.msk [vmem:[#allocation2 + $0x18] sm:$0xff] %vm1490_vm8, %v2214_v31  ;;  %v7799_v31 = vld [vmem:[%s10729_s13 + $0xac] ss:$16 sps:$4 sm:$0xff]  }
0x15e2   :  { %v2216_v11 = vpop.permute.xlu0 %2215  ;;  %2750 = vmatprep.subr.bf16.mxu0 %v7799_v31 }
0x15e3   :  { %2223 = vst.msk [vmem:[#allocation2 + $0x20] sm:$0xff] %vm1490_vm8, %v2216_v11  ;;  %v7794_v11 = vld [vmem:[%s10729_s13 + $0xa0] ss:$16 sps:$4 sm:$0xff]  }
0x15e4   :  { %v1846_v32 = vpop.permute.xlu1 %1845 }
0x15e5   :  { %1852 = vst.msk [vmem:[#allocation2 + $0x28] sm:$0xff] %vm1116_vm6, %v1846_v32  ;;  %v7797_v32 = vld [vmem:[%s10729_s13 + $0xa8] ss:$16 sps:$4 sm:$0xff]  }
0x15e6   :  { %2751 = vmatpush1.bf16.msra.mxu0 %v7797_v32 }
0x15e8   :  { %v2032_v6 = vpop.permute.xlu1 %2031  ;;  %v2228_v24 = vld [vmem:[#allocation2 + $0x18] sm:$0xff] }
0x15e9   :  { %2038 = vst.msk [vmem:[#allocation2 + $0x28] sm:$0xff] %vm1303_vm7, %v2032_v6  ;;  %v2249_v8 = vpack.c.bf16 %v2228_v24, %v2227_v21  ;;  %v7802_v6 = vld [vmem:[%s10729_s13 + $0xc4] ss:$16 sps:$4 sm:$0xff]   ;;  %v7805_v21 = vld [vmem:[%s10729_s13 + $0xcc] ss:$16 sps:$4 sm:$0xff]  }
0x15ea   :  { %v2229_v52 = vld [vmem:[#allocation2 + $0x20] sm:$0xff]  ;;  %2752 = vmatprep.subr.bf16.mxu0 %v7805_v21 }
0x15eb   :  { %7456 = vmatmul.mubr.bf16.gmra.mrb[52].mxu0 %v2249_v8  ;;  %v7800_v24 = vld [vmem:[%s10729_s13 + $0xc0] ss:$16 sps:$4 sm:$0xff]   ;;  %v7803_v8 = vld [vmem:[%s10729_s13 + $0xc8] ss:$16 sps:$4 sm:$0xff]  }
0x15ec   :  { %v2218_v10 = vpop.permute.xlu1 %2217  ;;  %7459 = vmatprep.mubr.msk.bf16.mxu0 %vm8440_vm4, %v8437_v58  ;;  %2753 = vmatpush1.bf16.msra.mxu0 %v7803_v8 }
0x15ed   :  { %2224 = vst.msk [vmem:[#allocation2 + $0x28] sm:$0xff] %vm1490_vm8, %v2218_v10  ;;  %v7808_v10 = vld [vmem:[%s10729_s13 + $0xe4] ss:$16 sps:$4 sm:$0xff]  }
0x15f4   :  { %v2230_v53 = vld [vmem:[#allocation2 + $0x28] sm:$0xff] }
0x15f5   :  { %v2250_v13 = vpack.c.bf16 %v2230_v53, %v2229_v52  ;;  %v7811_v52 = vld [vmem:[%s10729_s13 + $0xec] ss:$16 sps:$4 sm:$0xff]   ;;  %v7806_v53 = vld [vmem:[%s10729_s13 + $0xe0] ss:$16 sps:$4 sm:$0xff]  }
0x15f6   :  { %2754 = vmatprep.subr.bf16.mxu0 %v7811_v52 }
0x15f7   :  { %7460 = vmatmul.mubr.bf16.gmra.mrb[56].mxu0 %v2250_v13  ;;  %v7809_v13 = vld [vmem:[%s10729_s13 + $0xe8] ss:$16 sps:$4 sm:$0xff]  }
0x15f8   :  { %2772 = vmatprep.mubr.bf16.mxu0 %v8436_v1  ;;  %2755 = vmatpush1.bf16.msra.mxu0 %v7809_v13  ;;  %v7812_v13 = vld [vmem:[%s10731_s15 + $0x40] sm:$0xff]  }
0x161e   :  { %v2371_v29 = vpop.xlane.xlu0 %2370 }
0x161f   :  { %v2382_v37 = vmul.f32 0.0078125, %v2371_v29 }
0x1621   :  { %v9319_v34 = vsub.f32 %v9279_v2, %v2382_v37 }
0x1623   :  { %v2394_v39 = vmul.f32 %v9319_v34, %v9319_v34 }
0x162b   :  { %v2373_v18 = vpop.xlane.xlu1 %2372 }
0x162c   :  { %v2383_v20 = vmul.f32 0.0078125, %v2373_v18 }
0x162e   :  { %v9296_v36 = vsub.f32 %v9284_v16, %v2383_v20 }
0x1630   :  { %v2395_v61 = vmul.f32 %v9296_v36, %v9296_v36 }
0x1632   :  { %2402 = vadd.xlane.f32.xlu1 %v2395_v61 }
0x16be   :  { %v2347_v30 = vpop.f32.mrb[52].mxu0 }
0x16bf   :  { %v2348_v28 = vadd.f32 %v9275_v41, %v2347_v30  ;;  %v7457_v62 = vpop.f32.mrb[53].mxu0  ;;  %v2403_v18 = vpop.xlane.xlu1 %2402 }
0x16c0   :  { %v2350_v44 = vpop.f32.mrb[54].mxu0  ;;  %v2413_v20 = vmul.f32 0.0078125, %v2403_v18  ;;  %v7813_v18 = vld [vmem:[%s10731_s15 + $0xc0] sm:$0xff]  }
0x16c1   :  { %v9314_v15 = vadd.f32 %v2348_v28, %v8653_v14  ;;  %v2351_v33 = vadd.f32 %v9275_v41, %v2350_v44  ;;  %v7458_v27 = vpop.f32.mrb[55].mxu0  ;;  %7091 = vmatprep.subr.bf16.mxu0 %v7813_v18 }
0x16c2   :  { %v2419_v22 = vadd.f32 1e-05, %v2413_v20  ;;  %v7814_v20 = vld [vmem:[%s10731_s15] sm:$0xff]  }
0x16c3   :  { %2374 = vadd.xlane.f32.xlu0 %v9314_v15  ;;  %v9322_v38 = vadd.f32 %v2351_v33, %v8658_v17  ;;  %v7772_v17 = vld [vmem:[%s10729_s13 + $0x24] ss:$16 sps:$4 sm:$0xff]  }
0x16c4   :  { %2679 = vmatprep.subr.bf16.mxu1 %v7772_v17  ;;  %8084 = vrsqrt.f32 %v2419_v22  ;;  %v7817_v22 = vld [vmem:[%s10731_s15 + $0xc8] sm:$0xff]  }
0x16c5   :  { %2680 = vmatpush1.bf16.msra.mxu1 %v7770_v35 }
0x16c6   :  { %2681 = vmatprep.subr.bf16.mxu1 %v7778_v26 }
0x16c7   :  { %2376 = vadd.xlane.f32.xlu0 %v9322_v38 }
0x16c9   :  { %2682 = vmatpush1.bf16.msra.mxu1 %v7776_v49 }
0x16ca   :  { %v9327_v40 = vpop.f32.mrb[56].mxu0  ;;  %2683 = vmatprep.subr.bf16.mxu1 %v7784_v57 }
0x16cb   :  { %2400 = vadd.xlane.f32.xlu0 %v2394_v39  ;;  %v7461_v14 = vpop.f32.mrb[57].mxu0  ;;  %v2356_v29 = vadd.f32 %v9275_v41, %v9327_v40 }
0x16cc   :  { %v9329_v42 = vpop.f32.mrb[58].mxu0 }
0x16cd   :  { %v7462_v12 = vpop.f32.mrb[59].mxu0  ;;  %2684 = vmatpush1.bf16.msra.mxu1 %v7782_v63  ;;  %v9420_v37 = vadd.f32 %v2356_v29, %v8767_v51  ;;  %v2359_v33 = vadd.f32 %v9275_v41, %v9329_v42  ;;  %v9433_v51 = vld [vmem:[%s10727_s11] ss:$0 sm:$0xff]  ;;  %v7820_v29 = vld [vmem:[%s10731_s15 + $0x50] sm:$0xff]  }
0x16ce   :  { %2685 = vmatprep.subr.bf16.mxu1 %v7790_v5  ;;  %v8085_v12 = vpop.eup %8084 }
0x16cf   :  { %v9426_v40 = vadd.f32 %v2359_v33, %v8772_v54  ;;  %v2431_v35 = vmul.f32 %v8085_v12, %v9296_v36  ;;  %v9440_v54 = vld [vmem:[%s10728_s12] ss:$0 sm:$0xff]  ;;  %v7825_v33 = vld [vmem:[%s10731_s15 + $0xd8] sm:$0xff]  }
0x16d0   :  { %v7829_v12 = vld [vmem:[%s10731_s15 + $0xe0] sm:$0xff]  }
0x16d1   :  { %2686 = vmatpush1.bf16.msra.mxu1 %v7788_v4  ;;  %v2443_v17 = vmul.f32 %v9433_v51, %v2431_v35  ;;  %v7830_v35 = vld [vmem:[%s10731_s15 + $0x20] sm:$0xff]  }
0x16d2   :  { %2687 = vmatprep.subr.bf16.mxu1 %v7796_v0 }
0x16d3   :  { %v2455_v36 = vadd.f32 %v9440_v54, %v2443_v17  ;;  %v7833_v17 = vld [vmem:[%s10731_s15 + $0xe8] sm:$0xff]  }
0x16d5   :  { %2688 = vmatpush1.bf16.msra.mxu1 %v7794_v11 }
0x16d6   :  { %2689 = vmatprep.subr.bf16.mxu1 %v7802_v6 }
0x16d9   :  { %2690 = vmatpush1.bf16.msra.mxu1 %v7800_v24 }
0x16da   :  { %2691 = vmatprep.subr.bf16.mxu1 %v7808_v10 }
0x16dd   :  { %2692 = vmatpush1.bf16.msra.mxu1 %v7806_v53 }
0x16de   :  { %7057 = vmatprep.subr.bf16.mxu1 %v7812_v13 }
0x1750   :  { %v2375_v61 = vpop.xlane.xlu0 %2374 }
0x1751   :  { %v2384_v19 = vmul.f32 0.0078125, %v2375_v61  ;;  %v7815_v61 = vld [vmem:[%s10731_s15 + $0x80] sm:$0xff]  }
0x1753   :  { %v2390_v23 = vsub.f32 %v9314_v15, %v2384_v19  ;;  %v7816_v19 = vld [vmem:[%s10731_s15 + $0x48] sm:$0xff]  }
0x1754   :  { %v2377_v25 = vpop.xlane.xlu0 %2376 }
0x1755   :  { %v2385_v30 = vmul.f32 0.0078125, %v2377_v25  ;;  %v2396_v28 = vmul.f32 %v2390_v23, %v2390_v23  ;;  %v7819_v25 = vld [vmem:[%s10731_s15 + $0x88] sm:$0xff]  }
0x1757   :  { %v2391_v62 = vsub.f32 %v9322_v38, %v2385_v30  ;;  %2404 = vadd.xlane.f32.xlu0 %v2396_v28  ;;  %v7821_v30 = vld [vmem:[%s10731_s15 + $0xd0] sm:$0xff]  }
0x1758   :  { %v2401_v44 = vpop.xlane.xlu0 %2400  ;;  %v7822_v28 = vld [vmem:[%s10731_s15 + $0x10] sm:$0xff]  }
0x1759   :  { %v2412_v27 = vmul.f32 0.0078125, %v2401_v44  ;;  %v2397_v39 = vmul.f32 %v2391_v62, %v2391_v62  ;;  %v7824_v44 = vld [vmem:[%s10731_s15 + $0x58] sm:$0xff]  }
0x175b   :  { %v2418_v14 = vadd.f32 1e-05, %v2412_v27  ;;  %2378 = vadd.xlane.f32.xlu0 %v9420_v37  ;;  %2406 = vadd.xlane.f32.xlu1 %v2397_v39  ;;  %v7826_v27 = vld [vmem:[%s10731_s15 + $0x18] sm:$0xff]  }
0x175c   :  { %v7827_v39 = vld [vmem:[%s10731_s15 + $0x98] sm:$0xff]  }
0x175d   :  { %8086 = vrsqrt.f32 %v2418_v14  ;;  %v7828_v14 = vld [vmem:[%s10731_s15 + $0x60] sm:$0xff]  }
0x175f   :  { %2380 = vadd.xlane.f32.xlu1 %v9426_v40 }
0x1767   :  { %v8087_v41 = vpop.eup %8086 }
0x1768   :  { %v2430_v42 = vmul.f32 %v8087_v41, %v9319_v34  ;;  %v7831_v41 = vld [vmem:[%s10731_s15 + $0xa0] sm:$0xff]  }
0x176a   :  { %v2442_v43 = vmul.f32 %v9433_v51, %v2430_v42  ;;  %v7832_v42 = vld [vmem:[%s10731_s15 + $0x68] sm:$0xff]  }
0x176c   :  { %v2454_v48 = vadd.f32 %v9440_v54, %v2442_v43  ;;  %v7834_v43 = vld [vmem:[%s10731_s15 + $0x28] sm:$0xff]  }
0x176e   :  { %v2493_v49 = vpack.c.bf16 %v2455_v36, %v2454_v48  ;;  %v7835_v48 = vld [vmem:[%s10731_s15 + $0xa8] sm:$0xff]   ;;  %v7836_v36 = vld [vmem:[%s10731_s15 + $0x70] sm:$0xff]  }
0x1770   :  { %2710 = vmatmul.mubr.bf16.vlgmr.msra.gmra.mrb[52].mxu1 %v2493_v49  ;;  %2773 = vmatmul.mubr.bf16.vlgmr.msra.gmra.mrb[60].mxu0 %v2493_v49  ;;  %v7837_v49 = vld [vmem:[%s10731_s15 + $0xf0] sm:$0xff]  }
0x1771   :  { %2719 = vmatprep.mubr.bf16.mxu1 %v8436_v1  ;;  %2782 = vmatprep.mubr.bf16.mxu0 %v8436_v1 }
0x1772   :  { %7058 = vmatpush3.bf16.msra.mxu1 %v7814_v20  ;;  %7092 = vmatpush3.bf16.msra.mxu0 %v7815_v61 }
0x1773   :  { %7059 = vmatprep.subr.bf16.mxu1 %v7816_v19  ;;  %7093 = vmatprep.subr.bf16.mxu0 %v7817_v22 }
0x1776   :  { %7094 = vmatpush3.bf16.msra.mxu0 %v7819_v25 }
0x1777   :  { %7095 = vmatprep.subr.bf16.mxu0 %v7821_v30 }
0x17e4   :  { %v2405_v34 = vpop.xlane.xlu0 %2404 }
0x17e5   :  { %v2414_v26 = vmul.f32 0.0078125, %v2405_v34  ;;  %v7838_v34 = vld [vmem:[%s10731_s15 + $0x30] sm:$0xff]  }
0x17e7   :  { %v2420_v59 = vadd.f32 1e-05, %v2414_v26  ;;  %v7839_v26 = vld [vmem:[%s10731_s15 + $0xb0] sm:$0xff]  }
0x17e8   :  { %v2379_v47 = vpop.xlane.xlu0 %2378  ;;  %v2407_v57 = vpop.xlane.xlu1 %2406 }
0x17e9   :  { %8088 = vrsqrt.f32 %v2420_v59  ;;  %v2386_v55 = vmul.f32 0.0078125, %v2379_v47  ;;  %v2415_v63 = vmul.f32 0.0078125, %v2407_v57  ;;  %v7840_v59 = vld [vmem:[%s10731_s15 + $0x78] sm:$0xff]  }
0x17ea   :  { %v7841_v47 = vld [vmem:[%s10731_s15 + $0xf8] sm:$0xff]  }
0x17eb   :  { %v9448_v9 = vsub.f32 %v9420_v37, %v2386_v55  ;;  %v2421_v4 = vadd.f32 1e-05, %v2415_v63  ;;  %v7842_v57 = vld [vmem:[%s10731_s15 + $0x38] sm:$0xff]   ;;  %v2492_v63 = vld [vmem:[%s10730_s14] sm:$0xf] }
0x17ec   :  { %v2381_v5 = vpop.xlane.xlu1 %2380  ;;  %v7843_v55 = vld [vmem:[%s10731_s15 + $0xb8] sm:$0xff]  }
0x17ed   :  { %8090 = vrsqrt.f32 %v2421_v4  ;;  %v2387_v7 = vmul.f32 0.0078125, %v2381_v5  ;;  %v2398_v45 = vmul.f32 %v9448_v9, %v9448_v9  ;;  %v2511_v4 = vsub.s32 3, %v8776_v56 }
0x17ee   :  { %v9565_v5 = vrot.slane %v2492_v63, %v8786_v3 }
0x17ef   :  { %v9453_v0 = vsub.f32 %v9426_v40, %v2387_v7  ;;  %2408 = vadd.xlane.f32.xlu0 %v2398_v45  ;;  %v9568_v7 = vrot.slane %v2492_v63, %v8918_v46  ;;  %v9571_v45 = vrot.slane %v2492_v63, %v8795_v60 }
0x17f1   :  { %v2399_v31 = vmul.f32 %v9453_v0, %v9453_v0 }
0x17f3   :  { %v8089_v11 = vpop.eup %8088  ;;  %2410 = vadd.xlane.f32.xlu1 %v2399_v31  ;;  %v9575_v31 = vrot.slane %v2492_v63, %v2511_v4 }
0x17f4   :  { %v2432_v32 = vmul.f32 %v8089_v11, %v2390_v23  ;;  %v7818_v23 = vld [vmem:[%s10731_s15 + $0x8] sm:$0xff]  }
0x17f5   :  { %7060 = vmatpush3.bf16.msra.mxu1 %v7818_v23 }
0x17f6   :  { %v2444_v24 = vmul.f32 %v9433_v51, %v2432_v32  ;;  %7061 = vmatprep.subr.bf16.mxu1 %v7820_v29 }
0x17f7   :  { %v8091_v6 = vpop.eup %8090 }
0x17f8   :  { %v2433_v21 = vmul.f32 %v8091_v6, %v2391_v62  ;;  %v2456_v10 = vadd.f32 %v9440_v54, %v2444_v24  ;;  %v7823_v62 = vld [vmem:[%s10731_s15 + $0x90] sm:$0xff]  }
0x17f9   :  { %7062 = vmatpush3.bf16.msra.mxu1 %v7822_v28  ;;  %7096 = vmatpush3.bf16.msra.mxu0 %v7823_v62 }
0x17fa   :  { %v2445_v8 = vmul.f32 %v9433_v51, %v2433_v21  ;;  %7063 = vmatprep.subr.bf16.mxu1 %v7824_v44  ;;  %7097 = vmatprep.subr.bf16.mxu0 %v7825_v33 }
0x17fc   :  { %v2457_v52 = vadd.f32 %v9440_v54, %v2445_v8 }
0x17fd   :  { %7064 = vmatpush3.bf16.msra.mxu1 %v7826_v27  ;;  %7098 = vmatpush3.bf16.msra.mxu0 %v7827_v39 }
0x17fe   :  { %v2494_v53 = vpack.c.bf16 %v2457_v52, %v2456_v10  ;;  %7065 = vmatprep.subr.bf16.mxu1 %v7828_v14  ;;  %7099 = vmatprep.subr.bf16.mxu0 %v7829_v12 }
0x1800   :  { %2720 = vmatmul.mubr.bf16.gmra.mrb[56].mxu1 %v2494_v53  ;;  %2783 = vmatmul.mubr.bf16.gmra.mrb[64].mxu0 %v2494_v53 }
0x1801   :  { %2729 = vmatprep.mubr.bf16.mxu1 %v8436_v1  ;;  %2792 = vmatprep.mubr.bf16.mxu0 %v8436_v1 }
0x1802   :  { %7066 = vmatpush3.bf16.msra.mxu1 %v7830_v35  ;;  %7100 = vmatpush3.bf16.msra.mxu0 %v7831_v41 }
0x1803   :  { %7067 = vmatprep.subr.bf16.mxu1 %v7832_v42  ;;  %7101 = vmatprep.subr.bf16.mxu0 %v7833_v17 }
0x1806   :  { %7068 = vmatpush3.bf16.msra.mxu1 %v7834_v43  ;;  %7102 = vmatpush3.bf16.msra.mxu0 %v7835_v48 }
0x1807   :  { %7069 = vmatprep.subr.bf16.mxu1 %v7836_v36  ;;  %7103 = vmatprep.subr.bf16.mxu0 %v7837_v49 }
0x180a   :  { %7070 = vmatpush3.bf16.msra.mxu1 %v7838_v34  ;;  %7104 = vmatpush3.bf16.msra.mxu0 %v7839_v26 }
0x180b   :  { %7071 = vmatprep.subr.bf16.mxu1 %v7840_v59  ;;  %7105 = vmatprep.subr.bf16.mxu0 %v7841_v47 }
0x180e   :  { %7072 = vmatpush3.bf16.msra.mxu1 %v7842_v57  ;;  %7106 = vmatpush3.bf16.msra.mxu0 %v7843_v55 }
0x180f   :  { %7463 = vmatprep.subr.bf16.mxu0 %v8437_v58 }
0x1843   :  { %v2711_v11 = vpop.f32.mrb[52].mxu1  ;;  %v2774_v32 = vpop.f32.mrb[60].mxu0 }
0x1844   :  { %v9578_v6 = vadd.f32 %v2711_v11, %v9565_v5  ;;  %v9581_v21 = vadd.f32 %v2774_v32, %v9568_v7  ;;  %v2713_v24 = vpop.f32.mrb[53].mxu1  ;;  %v2776_v8 = vpop.f32.mrb[61].mxu0 }
0x1845   :  { %v9584_v10 = vadd.f32 %v2713_v24, %v9571_v45  ;;  %v9587_v52 = vadd.f32 %v2776_v8, %v9575_v31  ;;  %v2715_v53 = vpop.f32.mrb[54].mxu1  ;;  %v2778_v13 = vpop.f32.mrb[62].mxu0 }
0x1846   :  { %v6604_v18 = vmul.f32 -1.702, %v9578_v6  ;;  %v6606_v20 = vmul.f32 -1.702, %v9581_v21  ;;  %v2716_v61 = vadd.f32 %v2715_v53, %v9565_v5  ;;  %v2779_v19 = vadd.f32 %v2778_v13, %v9568_v7  ;;  %v2717_v22 = vpop.f32.mrb[55].mxu1  ;;  %v2780_v23 = vpop.f32.mrb[63].mxu0 }
0x1847   :  { %v6605_v25 = vmul.f32 -1.702, %v9584_v10  ;;  %v6607_v29 = vmul.f32 -1.702, %v9587_v52  ;;  %v2718_v30 = vadd.f32 %v2717_v22, %v9571_v45  ;;  %v2781_v28 = vadd.f32 %v2780_v23, %v9575_v31 }
0x1848   :  { %v2851_v62 = vmul.f32 1.442695, %v6604_v18  ;;  %v2855_v44 = vmul.f32 1.442695, %v6606_v20  ;;  %v6608_v33 = vmul.f32 -1.702, %v2716_v61 }
0x1849   :  { %v2853_v27 = vmul.f32 1.442695, %v6605_v25  ;;  %v2857_v39 = vmul.f32 1.442695, %v6607_v29  ;;  %v6610_v14 = vmul.f32 -1.702, %v2779_v19 }
0x184a   :  { %8092 = vpow2.f32 %v2851_v62  ;;  %v2859_v12 = vmul.f32 1.442695, %v6608_v33  ;;  %v6609_v35 = vmul.f32 -1.702, %v2718_v30  ;;  %v6611_v41 = vmul.f32 -1.702, %v2781_v28 }
0x184b   :  { %8094 = vpow2.f32 %v2855_v44  ;;  %v2863_v42 = vmul.f32 1.442695, %v6610_v14 }
0x184c   :  { %8096 = vpow2.f32 %v2853_v27  ;;  %v2861_v17 = vmul.f32 1.442695, %v6609_v35  ;;  %v2865_v43 = vmul.f32 1.442695, %v6611_v41 }
0x184d   :  { %8098 = vpow2.f32 %v2857_v39 }
0x184e   :  { %8100 = vpow2.f32 %v2859_v12 }
0x184f   :  { %8102 = vpow2.f32 %v2863_v42 }
0x1850   :  { %8104 = vpow2.f32 %v2861_v17 }
0x1851   :  { %8106 = vpow2.f32 %v2865_v43 }
0x1854   :  { %v8093_v48 = vpop.eup %8092 }
0x1855   :  { %v8095_v36 = vpop.eup %8094  ;;  %v2899_v49 = vadd.f32 1.0, %v8093_v48 }
0x1856   :  { %v8097_v34 = vpop.eup %8096  ;;  %v2901_v26 = vadd.f32 1.0, %v8095_v36 }
0x1857   :  { %v8099_v59 = vpop.eup %8098  ;;  %8108 = vrcp.f32 %v2899_v49  ;;  %v2900_v47 = vadd.f32 1.0, %v8097_v34 }
0x1858   :  { %v8101_v57 = vpop.eup %8100  ;;  %8110 = vrcp.f32 %v2901_v26  ;;  %v2902_v55 = vadd.f32 1.0, %v8099_v59 }
0x1859   :  { %v8103_v63 = vpop.eup %8102  ;;  %8112 = vrcp.f32 %v2900_v47  ;;  %v2903_v11 = vadd.f32 1.0, %v8101_v57 }
0x185a   :  { %v8105_v32 = vpop.eup %8104  ;;  %8114 = vrcp.f32 %v2902_v55  ;;  %v2905_v24 = vadd.f32 1.0, %v8103_v63 }
0x185b   :  { %v8107_v8 = vpop.eup %8106  ;;  %8116 = vrcp.f32 %v2903_v11  ;;  %v2904_v53 = vadd.f32 1.0, %v8105_v32 }
0x185c   :  { %8118 = vrcp.f32 %v2905_v24  ;;  %v2906_v13 = vadd.f32 1.0, %v8107_v8 }
0x185d   :  { %8120 = vrcp.f32 %v2904_v53 }
0x185e   :  { %8122 = vrcp.f32 %v2906_v13 }
0x1861   :  { %v8109_v18 = vpop.eup %8108 }
0x1862   :  { %v8111_v20 = vpop.eup %8110  ;;  %v2971_v62 = vmul.f32 %v8109_v18, %v9578_v6 }
0x1863   :  { %v8113_v22 = vpop.eup %8112  ;;  %v2973_v27 = vmul.f32 %v8111_v20, %v9581_v21 }
0x1864   :  { %v8115_v23 = vpop.eup %8114  ;;  %v2972_v12 = vmul.f32 %v8113_v22, %v9584_v10 }
0x1865   :  { %v8117_v25 = vpop.eup %8116  ;;  %v2974_v42 = vmul.f32 %v8115_v23, %v9587_v52 }
0x1866   :  { %v8119_v29 = vpop.eup %8118  ;;  %v2975_v44 = vmul.f32 %v8117_v25, %v2716_v61 }
0x1867   :  { %v8121_v33 = vpop.eup %8120  ;;  %v2977_v39 = vmul.f32 %v8119_v29, %v2779_v19 }
0x1868   :  { %v8123_v14 = vpop.eup %8122  ;;  %v3060_v35 = vpack.c.bf16 %v2975_v44, %v2971_v62  ;;  %v2976_v41 = vmul.f32 %v8121_v33, %v2718_v30 }
0x1869   :  { %v3062_v17 = vpack.c.bf16 %v2977_v39, %v2973_v27  ;;  %v2978_v43 = vmul.f32 %v8123_v14, %v2781_v28 }
0x186a   :  { %v3061_v48 = vpack.c.bf16 %v2976_v41, %v2972_v12 }
0x186b   :  { %v3063_v36 = vpack.c.bf16 %v2978_v43, %v2974_v42 }
0x187c   :  { %v2409_v49 = vpop.xlane.xlu0 %2408 }
0x187d   :  { %v2416_v34 = vmul.f32 0.0078125, %v2409_v49 }
0x187f   :  { %v2422_v26 = vadd.f32 1e-05, %v2416_v34 }
0x1880   :  { %v2411_v6 = vpop.xlane.xlu1 %2410 }
0x1881   :  { %8124 = vrsqrt.f32 %v2422_v26  ;;  %v2417_v61 = vmul.f32 0.0078125, %v2411_v6 }
0x1883   :  { %v2423_v59 = vadd.f32 1e-05, %v2417_v61 }
0x1885   :  { %8126 = vrsqrt.f32 %v2423_v59 }
0x188b   :  { %v8125_v21 = vpop.eup %8124 }
0x188c   :  { %v2434_v19 = vmul.f32 %v8125_v21, %v9448_v9 }
0x188e   :  { %v2446_v52 = vmul.f32 %v9433_v51, %v2434_v19 }
0x188f   :  { %v8127_v10 = vpop.eup %8126 }
0x1890   :  { %v2435_v30 = vmul.f32 %v8127_v10, %v9453_v0  ;;  %v2458_v47 = vadd.f32 %v9440_v54, %v2446_v52 }
0x1892   :  { %v2447_v28 = vmul.f32 %v9433_v51, %v2435_v30 }
0x1894   :  { %v2459_v57 = vadd.f32 %v9440_v54, %v2447_v28 }
0x1896   :  { %v2495_v55 = vpack.c.bf16 %v2459_v57, %v2458_v47 }
0x1898   :  { %2730 = vmatmul.mubr.bf16.gmra.mrb[60].mxu1 %v2495_v55  ;;  %2793 = vmatmul.mubr.bf16.gmra.mrb[68].mxu0 %v2495_v55 }
0x1899   :  { %3302 = vmatprep.mubr.bf16.mxu1 %v3061_v48  ;;  %3359 = vmatprep.mubr.bf16.mxu0 %v3063_v36 }
0x18a0   :  { %3303 = vmatmul.mubr.bf16.vlgmr.msra.gmra.mrb[64].mxu1 %v3060_v35  ;;  %3360 = vmatmul.mubr.bf16.vlgmr.msra.gmra.mrb[72].mxu0 %v3062_v17 }
0x18d3   :  { %v2721_v63 = vpop.f32.mrb[56].mxu1  ;;  %v2784_v9 = vpop.f32.mrb[64].mxu0 }
0x18d4   :  { %v9608_v11 = vadd.f32 %v2721_v63, %v9565_v5  ;;  %v9611_v0 = vadd.f32 %v2784_v9, %v9568_v7  ;;  %v2723_v51 = vpop.f32.mrb[57].mxu1  ;;  %v2786_v32 = vpop.f32.mrb[65].mxu0 }
0x18d5   :  { %v9614_v24 = vadd.f32 %v2723_v51, %v9571_v45  ;;  %v9617_v54 = vadd.f32 %v2786_v32, %v9575_v31  ;;  %v2725_v8 = vpop.f32.mrb[58].mxu1  ;;  %v2788_v53 = vpop.f32.mrb[66].mxu0 }
0x18d6   :  { %v6612_v13 = vmul.f32 -1.702, %v9608_v11  ;;  %v6614_v18 = vmul.f32 -1.702, %v9611_v0  ;;  %v2726_v20 = vadd.f32 %v2725_v8, %v9565_v5  ;;  %v2789_v22 = vadd.f32 %v2788_v53, %v9568_v7  ;;  %v2727_v23 = vpop.f32.mrb[59].mxu1  ;;  %v2790_v25 = vpop.f32.mrb[67].mxu0 }
0x18d7   :  { %v6613_v29 = vmul.f32 -1.702, %v9614_v24  ;;  %v6615_v62 = vmul.f32 -1.702, %v9617_v54  ;;  %v2728_v44 = vadd.f32 %v2727_v23, %v9571_v45  ;;  %v2791_v33 = vadd.f32 %v2790_v25, %v9575_v31 }
0x18d8   :  { %v2867_v27 = vmul.f32 1.442695, %v6612_v13  ;;  %v2871_v39 = vmul.f32 1.442695, %v6614_v18  ;;  %v6616_v14 = vmul.f32 -1.702, %v2726_v20 }
0x18d9   :  { %v2869_v12 = vmul.f32 1.442695, %v6613_v29  ;;  %v2873_v35 = vmul.f32 1.442695, %v6615_v62  ;;  %v6618_v41 = vmul.f32 -1.702, %v2789_v22 }
0x18da   :  { %8128 = vpow2.f32 %v2867_v27  ;;  %v2875_v42 = vmul.f32 1.442695, %v6616_v14  ;;  %v6617_v17 = vmul.f32 -1.702, %v2728_v44  ;;  %v6619_v43 = vmul.f32 -1.702, %v2791_v33 }
0x18db   :  { %8130 = vpow2.f32 %v2871_v39  ;;  %v2879_v48 = vmul.f32 1.442695, %v6618_v41 }
0x18dc   :  { %8132 = vpow2.f32 %v2869_v12  ;;  %v2877_v36 = vmul.f32 1.442695, %v6617_v17  ;;  %v2881_v49 = vmul.f32 1.442695, %v6619_v43 }
0x18dd   :  { %8134 = vpow2.f32 %v2873_v35 }
0x18de   :  { %8136 = vpow2.f32 %v2875_v42 }
0x18df   :  { %8138 = vpow2.f32 %v2879_v48 }
0x18e0   :  { %8140 = vpow2.f32 %v2877_v36 }
0x18e1   :  { %8142 = vpow2.f32 %v2881_v49 }
0x18e4   :  { %v8129_v34 = vpop.eup %8128 }
0x18e5   :  { %v8131_v26 = vpop.eup %8130  ;;  %v2907_v6 = vadd.f32 1.0, %v8129_v34 }
0x18e6   :  { %v8133_v61 = vpop.eup %8132  ;;  %v2909_v59 = vadd.f32 1.0, %v8131_v26 }
0x18e7   :  { %v8135_v21 = vpop.eup %8134  ;;  %8144 = vrcp.f32 %v2907_v6  ;;  %v2908_v19 = vadd.f32 1.0, %v8133_v61 }
0x18e8   :  { %v8137_v10 = vpop.eup %8136  ;;  %8146 = vrcp.f32 %v2909_v59  ;;  %v2910_v30 = vadd.f32 1.0, %v8135_v21 }
0x18e9   :  { %v8139_v52 = vpop.eup %8138  ;;  %8148 = vrcp.f32 %v2908_v19  ;;  %v2911_v28 = vadd.f32 1.0, %v8137_v10 }
0x18ea   :  { %v8141_v47 = vpop.eup %8140  ;;  %8150 = vrcp.f32 %v2910_v30  ;;  %v2913_v57 = vadd.f32 1.0, %v8139_v52 }
0x18eb   :  { %v8143_v55 = vpop.eup %8142  ;;  %8152 = vrcp.f32 %v2911_v28  ;;  %v2912_v63 = vadd.f32 1.0, %v8141_v47 }
0x18ec   :  { %8154 = vrcp.f32 %v2913_v57  ;;  %v2914_v9 = vadd.f32 1.0, %v8143_v55 }
0x18ed   :  { %8156 = vrcp.f32 %v2912_v63 }
0x18ee   :  { %8158 = vrcp.f32 %v2914_v9 }
0x18f1   :  { %v8145_v51 = vpop.eup %8144 }
0x18f2   :  { %v8147_v32 = vpop.eup %8146  ;;  %v2979_v23 = vmul.f32 %v8145_v51, %v9608_v11 }
0x18f3   :  { %v8149_v8 = vpop.eup %8148  ;;  %v2981_v62 = vmul.f32 %v8147_v32, %v9611_v0 }
0x18f4   :  { %v8151_v53 = vpop.eup %8150  ;;  %v2980_v14 = vmul.f32 %v8149_v8, %v9614_v24 }
0x18f5   :  { %v8153_v13 = vpop.eup %8152  ;;  %v2982_v41 = vmul.f32 %v8151_v53, %v9617_v54  ;;  %v9666_v53 = vld [vmem:[%s10732_s16] ss:$0 sm:$0xff] }
0x18f6   :  { %v8155_v18 = vpop.eup %8154  ;;  %v2983_v25 = vmul.f32 %v8153_v13, %v2726_v20 }
0x18f7   :  { %v8157_v29 = vpop.eup %8156  ;;  %v2985_v27 = vmul.f32 %v8155_v18, %v2789_v22 }
0x18f8   :  { %v8159_v39 = vpop.eup %8158  ;;  %v2984_v12 = vmul.f32 %v8157_v29, %v2728_v44  ;;  %v3064_v35 = vpack.c.bf16 %v2983_v25, %v2979_v23 }
0x18f9   :  { %v2986_v42 = vmul.f32 %v8159_v39, %v2791_v33  ;;  %v3066_v17 = vpack.c.bf16 %v2985_v27, %v2981_v62 }
0x18fa   :  { %v3065_v43 = vpack.c.bf16 %v2984_v12, %v2980_v14 }
0x18fb   :  { %v3067_v48 = vpack.c.bf16 %v2986_v42, %v2982_v41 }
0x18fc   :  { %3310 = vmatprep.mubr.bf16.mxu1 %v3065_v43 }
0x18fd   :  { %3367 = vmatprep.mubr.bf16.mxu0 %v3067_v48  ;;  %3311 = vmatmul.mubr.bf16.gmra.mrb[68].mxu1 %v3064_v35 }
0x18fe   :  { %3368 = vmatmul.mubr.bf16.gmra.mrb[76].mxu0 %v3066_v17 }
0x196b   :  { %v2731_v11 = vpop.f32.mrb[60].mxu1  ;;  %v2794_v20 = vpop.f32.mrb[68].mxu0 }
0x196c   :  { %v9632_v0 = vadd.f32 %v2731_v11, %v9565_v5  ;;  %v9635_v22 = vadd.f32 %v2794_v20, %v9568_v7  ;;  %v2733_v24 = vpop.f32.mrb[61].mxu1  ;;  %v2796_v44 = vpop.f32.mrb[69].mxu0 }
0x196d   :  { %v9638_v54 = vadd.f32 %v2733_v24, %v9571_v45  ;;  %v9641_v33 = vadd.f32 %v2796_v44, %v9575_v31  ;;  %v2735_v36 = vpop.f32.mrb[62].mxu1  ;;  %v2798_v49 = vpop.f32.mrb[70].mxu0 }
0x196e   :  { %v6620_v34 = vmul.f32 -1.702, %v9632_v0  ;;  %v6622_v26 = vmul.f32 -1.702, %v9635_v22  ;;  %v9646_v6 = vadd.f32 %v2735_v36, %v9565_v5  ;;  %v9649_v61 = vadd.f32 %v2798_v49, %v9568_v7  ;;  %v2737_v59 = vpop.f32.mrb[63].mxu1  ;;  %v2800_v21 = vpop.f32.mrb[71].mxu0 }
0x196f   :  { %v6621_v19 = vmul.f32 -1.702, %v9638_v54  ;;  %v6623_v10 = vmul.f32 -1.702, %v9641_v33  ;;  %v9654_v30 = vadd.f32 %v2737_v59, %v9571_v45  ;;  %v9657_v52 = vadd.f32 %v2800_v21, %v9575_v31 }
0x1970   :  { %v2883_v28 = vmul.f32 1.442695, %v6620_v34  ;;  %v2887_v47 = vmul.f32 1.442695, %v6622_v26  ;;  %v6624_v5 = vmul.f32 -1.702, %v9646_v6 }
0x1971   :  { %v2885_v57 = vmul.f32 1.442695, %v6621_v19  ;;  %v2889_v55 = vmul.f32 1.442695, %v6623_v10  ;;  %v6626_v7 = vmul.f32 -1.702, %v9649_v61 }
0x1972   :  { %8160 = vpow2.f32 %v2883_v28  ;;  %v2891_v63 = vmul.f32 1.442695, %v6624_v5  ;;  %v6625_v9 = vmul.f32 -1.702, %v9654_v30  ;;  %v6627_v51 = vmul.f32 -1.702, %v9657_v52 }
0x1973   :  { %8162 = vpow2.f32 %v2887_v47  ;;  %v2895_v45 = vmul.f32 1.442695, %v6626_v7  ;;  %v7073_v32 = vpop.f32.mrb[64].mxu1  ;;  %v7107_v8 = vpop.f32.mrb[72].mxu0 }
0x1974   :  { %8164 = vpow2.f32 %v2885_v57  ;;  %v2893_v31 = vmul.f32 1.442695, %v6625_v9  ;;  %v7074_v13 = vpop.f32.mrb[65].mxu1  ;;  %v7108_v18 = vpop.f32.mrb[73].mxu0  ;;  %v2897_v23 = vmul.f32 1.442695, %v6627_v51 }
0x1975   :  { %8166 = vpow2.f32 %v2889_v55  ;;  %v7075_v25 = vadd.f32 %v7074_v13, %v7073_v32  ;;  %v7109_v29 = vadd.f32 %v7108_v18, %v7107_v8  ;;  %v7076_v62 = vpop.f32.mrb[66].mxu1  ;;  %v7110_v27 = vpop.f32.mrb[74].mxu0 }
0x1976   :  { %8168 = vpow2.f32 %v2891_v63  ;;  %v7077_v39 = vpop.f32.mrb[67].mxu1  ;;  %v7111_v14 = vpop.f32.mrb[75].mxu0 }
0x1977   :  { %8170 = vpow2.f32 %v2895_v45  ;;  %v3305_v12 = vadd.f32 %v7075_v25, %v9666_v53  ;;  %v7078_v35 = vadd.f32 %v7077_v39, %v7076_v62  ;;  %v7112_v41 = vadd.f32 %v7111_v14, %v7110_v27 }
0x1978   :  { %8172 = vpow2.f32 %v2893_v31 }
0x1979   :  { %8174 = vpow2.f32 %v2897_v23  ;;  %v3362_v42 = vadd.f32 %v7109_v29, %v3305_v12  ;;  %v3308_v17 = vadd.f32 %v7078_v35, %v9666_v53 }
0x197b   :  { %v3365_v43 = vadd.f32 %v7112_v41, %v3308_v17  ;;  %v9671_v48 = vadd.f32 %v3362_v42, %v9279_v2 }
0x197c   :  { %v8161_v11 = vpop.eup %8160 }
0x197d   :  { %v8163_v20 = vpop.eup %8162  ;;  %v2915_v24 = vadd.f32 1.0, %v8161_v11  ;;  %3394 = vadd.xlane.f32.xlu0 %v9671_v48  ;;  %v9675_v44 = vadd.f32 %v3365_v43, %v9284_v16 }
0x197e   :  { %v8165_v36 = vpop.eup %8164  ;;  %v2917_v49 = vadd.f32 1.0, %v8163_v20 }
0x197f   :  { %v8167_v34 = vpop.eup %8166  ;;  %8176 = vrcp.f32 %v2915_v24  ;;  %v2916_v26 = vadd.f32 1.0, %v8165_v36  ;;  %3396 = vadd.xlane.f32.xlu1 %v9675_v44 }
0x1980   :  { %v8169_v59 = vpop.eup %8168  ;;  %8178 = vrcp.f32 %v2917_v49  ;;  %v2918_v21 = vadd.f32 1.0, %v8167_v34  ;;  %v7844_v34 = vld [vmem:[%s10723_s7 + $0xc0] ss:$12 sps:$4 sm:$0xff]  }
0x1981   :  { %v8171_v2 = vpop.eup %8170  ;;  %8180 = vrcp.f32 %v2916_v26  ;;  %v2919_v19 = vadd.f32 1.0, %v8169_v59  ;;  %v7846_v26 = vld [vmem:[%s10723_s7 + $0xc4] ss:$12 sps:$4 sm:$0xff]   ;;  %v7850_v59 = vld [vmem:[%s10723_s7 + $0xdc] ss:$12 sps:$4 sm:$0xff]  }
0x1982   :  { %v8173_v10 = vpop.eup %8172  ;;  %8182 = vrcp.f32 %v2918_v21  ;;  %v2921_v28 = vadd.f32 1.0, %v8171_v2  ;;  %3666 = vmatprep.subr.bf16.mxu1 %v7846_v26  ;;  %v7848_v21 = vld [vmem:[%s10723_s7 + $0xd8] ss:$12 sps:$4 sm:$0xff]  }
0x1983   :  { %v8175_v47 = vpop.eup %8174  ;;  %8184 = vrcp.f32 %v2919_v19  ;;  %v2920_v16 = vadd.f32 1.0, %v8173_v10  ;;  %3667 = vmatpush1.bf16.msra.mxu1 %v7844_v34 }
0x1984   :  { %8186 = vrcp.f32 %v2921_v28  ;;  %v2922_v5 = vadd.f32 1.0, %v8175_v47  ;;  %3668 = vmatprep.subr.bf16.mxu1 %v7850_v59 }
0x1985   :  { %8188 = vrcp.f32 %v2920_v16 }
0x1986   :  { %8190 = vrcp.f32 %v2922_v5 }
0x1987   :  { %3669 = vmatpush1.bf16.msra.mxu1 %v7848_v21 }
0x1989   :  { %v8177_v57 = vpop.eup %8176 }
0x198a   :  { %v8179_v55 = vpop.eup %8178  ;;  %v2987_v45 = vmul.f32 %v8177_v57, %v9632_v0 }
0x198b   :  { %v8181_v7 = vpop.eup %8180  ;;  %v2989_v31 = vmul.f32 %v8179_v55, %v9635_v22  ;;  %v7854_v55 = vld [vmem:[%s10723_s7 + $0xf4] ss:$12 sps:$4 sm:$0xff]  }
0x198c   :  { %v8183_v63 = vpop.eup %8182  ;;  %v2988_v23 = vmul.f32 %v8181_v7, %v9638_v54  ;;  %v7852_v7 = vld [vmem:[%s10723_s7 + $0xf0] ss:$12 sps:$4 sm:$0xff]   ;;  %3670 = vmatprep.subr.bf16.mxu1 %v7854_v55 }
0x198d   :  { %v8185_v9 = vpop.eup %8184  ;;  %v2990_v62 = vmul.f32 %v8183_v63, %v9641_v33  ;;  %v7855_v63 = vld [vmem:[%s10723_s7 + $0xf8] ss:$12 sps:$4 sm:$0xff]   ;;  %3671 = vmatpush1.bf16.msra.mxu1 %v7852_v7 }
0x198e   :  { %v8187_v51 = vpop.eup %8186  ;;  %v2991_v32 = vmul.f32 %v8185_v9, %v9646_v6  ;;  %v7858_v9 = vld [vmem:[%s10723_s7 + $0x10c] ss:$12 sps:$4 sm:$0xff]  }
0x198f   :  { %v8189_v8 = vpop.eup %8188  ;;  %v2993_v13 = vmul.f32 %v8187_v51, %v9649_v61  ;;  %v7856_v51 = vld [vmem:[%s10723_s7 + $0x108] ss:$12 sps:$4 sm:$0xff]   ;;  %3672 = vmatprep.subr.bf16.mxu1 %v7858_v9 }
0x1990   :  { %v8191_v18 = vpop.eup %8190  ;;  %v2992_v25 = vmul.f32 %v8189_v8, %v9654_v30  ;;  %v3068_v29 = vpack.c.bf16 %v2991_v32, %v2987_v45  ;;  %v7859_v45 = vld [vmem:[%s10723_s7 + $0x110] ss:$12 sps:$4 sm:$0xff]   ;;  %v7860_v8 = vld [vmem:[%s10723_s7 + $0x120] ss:$12 sps:$4 sm:$0xff]  }
0x1991   :  { %v2994_v27 = vmul.f32 %v8191_v18, %v9657_v52  ;;  %v3070_v39 = vpack.c.bf16 %v2993_v13, %v2989_v31  ;;  %3673 = vmatpush1.bf16.msra.mxu1 %v7856_v51  ;;  %v7862_v32 = vld [vmem:[%s10723_s7 + $0x124] ss:$12 sps:$4 sm:$0xff]   ;;  %v7863_v31 = vld [vmem:[%s10723_s7 + $0x128] ss:$12 sps:$4 sm:$0xff]  }
0x1992   :  { %v3069_v14 = vpack.c.bf16 %v2992_v25, %v2988_v23  ;;  %3674 = vmatprep.subr.bf16.mxu1 %v7862_v32  ;;  %v7866_v13 = vld [vmem:[%s10723_s7 + $0x13c] ss:$12 sps:$4 sm:$0xff]   ;;  %v7864_v18 = vld [vmem:[%s10723_s7 + $0x138] ss:$12 sps:$4 sm:$0xff]   ;;  %v7867_v23 = vld [vmem:[%s10723_s7 + $0x140] ss:$12 sps:$4 sm:$0xff]  }
0x1993   :  { %v3071_v0 = vpack.c.bf16 %v2994_v27, %v2990_v62  ;;  %v7868_v25 = vld [vmem:[%s10723_s7 + $0x150] ss:$12 sps:$4 sm:$0xff]   ;;  %v7871_v62 = vld [vmem:[%s10723_s7 + $0x158] ss:$12 sps:$4 sm:$0xff]   ;;  %v9815_v32 = vld [vmem:[%s10722_s6 + $0x1] ss:$0 sm:$0xff] }
0x1994   :  { %3318 = vmatprep.mubr.bf16.mxu1 %v3069_v14  ;;  %v7874_v27 = vld [vmem:[%s10723_s7 + $0x16c] ss:$12 sps:$4 sm:$0xff]   ;;  %v7875_v14 = vld [vmem:[%s10723_s7 + $0x170] ss:$12 sps:$4 sm:$0xff]  }
0x1995   :  { %3375 = vmatprep.mubr.bf16.mxu0 %v3071_v0  ;;  %3319 = vmatmul.mubr.bf16.gmra.mrb[72].mxu1 %v3068_v29  ;;  %v7870_v29 = vld [vmem:[%s10723_s7 + $0x154] ss:$12 sps:$4 sm:$0xff]  }
0x1996   :  { %3376 = vmatmul.mubr.bf16.gmra.mrb[80].mxu0 %v3070_v39  ;;  %3698 = vmatprep.mubr.bf16.mxu1 %v8436_v1  ;;  %v7872_v39 = vld [vmem:[%s10723_s7 + $0x168] ss:$12 sps:$4 sm:$0xff]  }
0x1997   :  { %7479 = vmatprep.mubr.msk.bf16.mxu0 %vm8440_vm4, %v8437_v58  ;;  %3675 = vmatpush1.bf16.msra.mxu1 %v7860_v8 }
0x1998   :  { %3676 = vmatprep.subr.bf16.mxu1 %v7866_v13 }
0x199b   :  { %3677 = vmatpush1.bf16.msra.mxu1 %v7864_v18 }
0x199c   :  { %3678 = vmatprep.subr.bf16.mxu1 %v7870_v29 }
0x199f   :  { %3679 = vmatpush1.bf16.msra.mxu1 %v7868_v25 }
0x19a0   :  { %3680 = vmatprep.subr.bf16.mxu1 %v7874_v27 }
0x19a3   :  { %3681 = vmatpush1.bf16.msra.mxu1 %v7872_v39 }
0x19d0   :  { %v7079_v22 = vpop.f32.mrb[68].mxu1 }
0x19d1   :  { %v7113_v54 = vpop.f32.mrb[76].mxu0  ;;  %v7080_v6 = vpop.f32.mrb[69].mxu1 }
0x19d2   :  { %v7081_v61 = vadd.f32 %v7080_v6, %v7079_v22  ;;  %v7114_v30 = vpop.f32.mrb[77].mxu0  ;;  %v7082_v33 = vpop.f32.mrb[70].mxu1 }
0x19d3   :  { %v7115_v12 = vadd.f32 %v7114_v30, %v7113_v54  ;;  %v7116_v52 = vpop.f32.mrb[78].mxu0  ;;  %v7083_v35 = vpop.f32.mrb[71].mxu1 }
0x19d4   :  { %v3313_v41 = vadd.f32 %v7081_v61, %v9666_v53  ;;  %v7084_v42 = vadd.f32 %v7083_v35, %v7082_v33  ;;  %v7117_v17 = vpop.f32.mrb[79].mxu0 }
0x19d5   :  { %v7118_v43 = vadd.f32 %v7117_v17, %v7116_v52 }
0x19d6   :  { %v3370_v11 = vadd.f32 %v7115_v12, %v3313_v41  ;;  %v3316_v20 = vadd.f32 %v7084_v42, %v9666_v53 }
0x19d8   :  { %v3373_v24 = vadd.f32 %v7118_v43, %v3316_v20  ;;  %v9692_v36 = vadd.f32 %v3370_v11, %v9314_v15  ;;  %v7847_v15 = vld [vmem:[%s10723_s7 + $0xc8] ss:$12 sps:$4 sm:$0xff]  }
0x19d9   :  { %7464 = vmatpush3.bf16.msra.mxu0 %v7847_v15 }
0x19da   :  { %3398 = vadd.xlane.f32.xlu0 %v9692_v36  ;;  %v9696_v49 = vadd.f32 %v3373_v24, %v9322_v38  ;;  %v7851_v38 = vld [vmem:[%s10723_s7 + $0xe0] ss:$12 sps:$4 sm:$0xff]   ;;  %7465 = vmatprep.subr.bf16.mxu0 %v8437_v58 }
0x19dc   :  { %3400 = vadd.xlane.f32.xlu1 %v9696_v49 }
0x19dd   :  { %7466 = vmatpush3.bf16.msra.mxu0 %v7851_v38 }
0x19de   :  { %7467 = vmatprep.subr.bf16.mxu0 %v8437_v58 }
0x19e1   :  { %7468 = vmatpush3.bf16.msra.mxu0 %v7855_v63 }
0x19e2   :  { %7469 = vmatprep.subr.bf16.mxu0 %v8437_v58 }
0x19e5   :  { %7470 = vmatpush3.bf16.msra.mxu0 %v7859_v45 }
0x19e6   :  { %7471 = vmatprep.subr.bf16.mxu0 %v8437_v58 }
0x19e9   :  { %7472 = vmatpush3.bf16.msra.mxu0 %v7863_v31 }
0x19ea   :  { %7473 = vmatprep.subr.bf16.mxu0 %v8437_v58 }
0x19ed   :  { %7474 = vmatpush3.bf16.msra.mxu0 %v7867_v23 }
0x19ee   :  { %7475 = vmatprep.subr.bf16.mxu0 %v8437_v58 }
0x19f1   :  { %7476 = vmatpush3.bf16.msra.mxu0 %v7871_v62 }
0x19f2   :  { %7477 = vmatprep.subr.bf16.mxu0 %v8437_v58 }
0x19f5   :  { %7478 = vmatpush3.bf16.msra.mxu0 %v7875_v14 }
0x1a0a   :  { %v3395_v2 = vpop.xlane.xlu0 %3394 }
0x1a0b   :  { %v3406_v19 = vmul.f32 0.0078125, %v3395_v2 }
0x1a0c   :  { %v3397_v10 = vpop.xlane.xlu1 %3396 }
0x1a0d   :  { %v9720_v28 = vsub.f32 %v9671_v48, %v3406_v19  ;;  %v3407_v47 = vmul.f32 0.0078125, %v3397_v10 }
0x1a0f   :  { %v9723_v16 = vsub.f32 %v9675_v44, %v3407_v47  ;;  %v3418_v5 = vmul.f32 %v9720_v28, %v9720_v28 }
0x1a11   :  { %3424 = vadd.xlane.f32.xlu0 %v3418_v5  ;;  %v3419_v57 = vmul.f32 %v9723_v16, %v9723_v16 }
0x1a13   :  { %3426 = vadd.xlane.f32.xlu1 %v3419_v57 }
0x1a67   :  { %v3399_v0 = vpop.xlane.xlu0 %3398 }
0x1a68   :  { %v3408_v22 = vmul.f32 0.0078125, %v3399_v0  ;;  %v7085_v54 = vpop.f32.mrb[72].mxu1 }
0x1a69   :  { %v7119_v6 = vpop.f32.mrb[80].mxu0  ;;  %v3401_v61 = vpop.xlane.xlu1 %3400 }
0x1a6a   :  { %v9789_v30 = vsub.f32 %v9692_v36, %v3408_v22  ;;  %v7120_v33 = vpop.f32.mrb[81].mxu0  ;;  %v3409_v12 = vmul.f32 0.0078125, %v3401_v61  ;;  %v7086_v52 = vpop.f32.mrb[73].mxu1 }
0x1a6b   :  { %v7121_v35 = vadd.f32 %v7120_v33, %v7119_v6  ;;  %v7087_v41 = vadd.f32 %v7086_v52, %v7085_v54  ;;  %v7088_v42 = vpop.f32.mrb[74].mxu1  ;;  %v7122_v17 = vpop.f32.mrb[82].mxu0 }
0x1a6c   :  { %v3415_v43 = vsub.f32 %v9696_v49, %v3409_v12  ;;  %v7089_v11 = vpop.f32.mrb[75].mxu1  ;;  %v7123_v20 = vpop.f32.mrb[83].mxu0  ;;  %v3420_v24 = vmul.f32 %v9789_v30, %v9789_v30 }
0x1a6d   :  { %v3321_v34 = vadd.f32 %v7087_v41, %v9666_v53  ;;  %v7090_v26 = vadd.f32 %v7089_v11, %v7088_v42  ;;  %v7124_v15 = vadd.f32 %v7123_v20, %v7122_v17 }
0x1a6e   :  { %3428 = vadd.xlane.f32.xlu0 %v3420_v24  ;;  %v3421_v59 = vmul.f32 %v3415_v43, %v3415_v43 }
0x1a6f   :  { %v3378_v38 = vadd.f32 %v7121_v35, %v3321_v34  ;;  %v3324_v21 = vadd.f32 %v7090_v26, %v9666_v53 }
0x1a70   :  { %3430 = vadd.xlane.f32.xlu1 %v3421_v59 }
0x1a71   :  { %v3381_v2 = vadd.f32 %v7124_v15, %v3324_v21  ;;  %v9797_v19 = vadd.f32 %v3378_v38, %v9420_v37  ;;  %v9807_v37 = vld [vmem:[%s10721_s5 + $0x1] ss:$0 sm:$0xff] }
0x1a73   :  { %3402 = vadd.xlane.f32.xlu0 %v9797_v19  ;;  %v9801_v10 = vadd.f32 %v3381_v2, %v9426_v40 }
0x1a75   :  { %3404 = vadd.xlane.f32.xlu1 %v9801_v10 }
0x1a9e   :  { %v3425_v47 = vpop.xlane.xlu0 %3424 }
0x1a9f   :  { %v3436_v5 = vmul.f32 0.0078125, %v3425_v47 }
0x1aa0   :  { %v3427_v57 = vpop.xlane.xlu1 %3426 }
0x1aa1   :  { %v3442_v55 = vadd.f32 1e-05, %v3436_v5  ;;  %v3437_v7 = vmul.f32 0.0078125, %v3427_v57 }
0x1aa3   :  { %8192 = vrsqrt.f32 %v3442_v55  ;;  %v3443_v63 = vadd.f32 1e-05, %v3437_v7 }
0x1aa5   :  { %8194 = vrsqrt.f32 %v3443_v63 }
0x1aad   :  { %v8193_v53 = vpop.eup %8192 }
0x1aae   :  { %v3454_v9 = vmul.f32 %v8193_v53, %v9720_v28 }
0x1aaf   :  { %v8195_v40 = vpop.eup %8194 }
0x1ab0   :  { %v3466_v51 = vmul.f32 %v9807_v37, %v3454_v9  ;;  %v3455_v45 = vmul.f32 %v8195_v40, %v9723_v16 }
0x1ab2   :  { %v3467_v8 = vmul.f32 %v9807_v37, %v3455_v45  ;;  %v3478_v31 = vadd.f32 %v9815_v32, %v3466_v51 }
0x1ab4   :  { %v3479_v13 = vadd.f32 %v9815_v32, %v3467_v8 }
0x1ab6   :  { %v3519_v18 = vpack.c.bf16 %v3479_v13, %v3478_v31 }
0x1ab8   :  { %3699 = vmatmul.mubr.bf16.vlgmr.msra.gmra.mrb[76].mxu1 %v3519_v18  ;;  %7480 = vmatmul.mubr.bf16.vlgmr.msra.gmra.mrb[84].mxu0 %v3519_v18 }
0x1ab9   :  { %3708 = vmatprep.mubr.bf16.mxu1 %v8436_v1  ;;  %7483 = vmatprep.mubr.msk.bf16.mxu0 %vm8440_vm4, %v8437_v58 }
0x1afb   :  { %v3429_v28 = vpop.xlane.xlu0 %3428 }
0x1afc   :  { %v3438_v16 = vmul.f32 0.0078125, %v3429_v28 }
0x1afd   :  { %v3431_v23 = vpop.xlane.xlu1 %3430 }
0x1afe   :  { %v3444_v25 = vadd.f32 1e-05, %v3438_v16  ;;  %v3439_v29 = vmul.f32 0.0078125, %v3431_v23 }
0x1b00   :  { %8196 = vrsqrt.f32 %v3444_v25  ;;  %v3445_v62 = vadd.f32 1e-05, %v3439_v29  ;;  %v3403_v27 = vpop.xlane.xlu0 %3402 }
0x1b01   :  { %v3410_v39 = vmul.f32 0.0078125, %v3403_v27 }
0x1b02   :  { %8198 = vrsqrt.f32 %v3445_v62  ;;  %v3405_v14 = vpop.xlane.xlu1 %3404 }
0x1b03   :  { %v3416_v0 = vsub.f32 %v9797_v19, %v3410_v39  ;;  %v3411_v22 = vmul.f32 0.0078125, %v3405_v14 }
0x1b05   :  { %v3417_v54 = vsub.f32 %v9801_v10, %v3411_v22  ;;  %v3422_v6 = vmul.f32 %v3416_v0, %v3416_v0 }
0x1b07   :  { %3432 = vadd.xlane.f32.xlu0 %v3422_v6  ;;  %v3423_v61 = vmul.f32 %v3417_v54, %v3417_v54 }
0x1b09   :  { %3434 = vadd.xlane.f32.xlu1 %v3423_v61 }
0x1b0a   :  { %v8197_v33 = vpop.eup %8196 }
0x1b0b   :  { %v3456_v12 = vmul.f32 %v8197_v33, %v9789_v30  ;;  %v6697_v30 = vld [vmem:[%s10724_s8 + $0x3] sm:$0x7] }
0x1b0c   :  { %v8199_v52 = vpop.eup %8198  ;;  %v9840_v24 = vrot.slane %v6697_v30, %v8918_v46  ;;  %v9843_v15 = vrot.slane %v6697_v30, %v8795_v60 }
0x1b0d   :  { %v3457_v35 = vmul.f32 %v8199_v52, %v3415_v43  ;;  %v3468_v41 = vmul.f32 %v9807_v37, %v3456_v12  ;;  %v9837_v43 = vrot.slane %v6697_v30, %v8786_v3 }
0x1b0f   :  { %v3469_v42 = vmul.f32 %v9807_v37, %v3457_v35  ;;  %v3480_v17 = vadd.f32 %v9815_v32, %v3468_v41 }
0x1b11   :  { %v3481_v11 = vadd.f32 %v9815_v32, %v3469_v42 }
0x1b13   :  { %v3520_v20 = vpack.c.bf16 %v3481_v11, %v3480_v17 }
0x1b15   :  { %3709 = vmatmul.mubr.bf16.gmra.mrb[80].mxu1 %v3520_v20  ;;  %7484 = vmatmul.mubr.bf16.gmra.mrb[88].mxu0 %v3520_v20 }
0x1b16   :  { %3718 = vmatprep.mubr.bf16.mxu1 %v8436_v1  ;;  %7487 = vmatprep.mubr.msk.bf16.mxu0 %vm8440_vm4, %v8437_v58 }
0x1b8b   :  { %v3700_v34 = vpop.f32.mrb[76].mxu1  ;;  %v3763_v26 = vpop.f32.mrb[84].mxu0 }
0x1b8c   :  { %v3702_v59 = vpop.f32.mrb[77].mxu1  ;;  %v7481_v38 = vpop.f32.mrb[85].mxu0  ;;  %v3701_v47 = vadd.f32 %v3700_v34, %v9837_v43  ;;  %v3764_v5 = vadd.f32 %v3763_v26, %v9840_v24 }
0x1b8d   :  { %v3704_v21 = vpop.f32.mrb[78].mxu1  ;;  %v3766_v2 = vpop.f32.mrb[86].mxu0  ;;  %v3703_v53 = vadd.f32 %v3702_v59, %v9843_v15 }
0x1b8e   :  { %v3705_v57 = vadd.f32 %v3704_v21, %v9837_v43  ;;  %v3767_v55 = vadd.f32 %v3766_v2, %v9840_v24  ;;  %v3706_v7 = vpop.f32.mrb[79].mxu1  ;;  %v7482_v63 = vpop.f32.mrb[87].mxu0 }
0x1b8f   :  { %v3707_v9 = vadd.f32 %v3706_v7, %v9843_v15 }
0x1b90   :  { %v9851_v40 = vpack.c.bf16 %v3705_v57, %v3701_v47  ;;  %v9853_v51 = vpack.c.bf16 %v3767_v55, %v3764_v5 }
0x1b91   :  { %v9855_v45 = vpack.c.bf16 %v3707_v9, %v3703_v53 }
0x1b93   :  { %7671 = vmatprep.subr.msk.bf16.mxu1 %vm761_vm1, %v9855_v45  ;;  %v3797_v8 = vsel %vm761_vm1, %v9855_v45, 0 }
0x1b94   :  { %v3433_v31 = vpop.xlane.xlu0 %3432  ;;  %7492 = vmatpush3.bf16.xpose.msra.mxu1 %v3797_v8 }
0x1b95   :  { %v3440_v13 = vmul.f32 0.0078125, %v3433_v31 }
0x1b96   :  { %v3435_v18 = vpop.xlane.xlu1 %3434 }
0x1b97   :  { %v3446_v28 = vadd.f32 1e-05, %v3440_v13  ;;  %v3441_v16 = vmul.f32 0.0078125, %v3435_v18 }
0x1b99   :  { %8200 = vrsqrt.f32 %v3446_v28  ;;  %v3447_v23 = vadd.f32 1e-05, %v3441_v16 }
0x1b9b   :  { %8202 = vrsqrt.f32 %v3447_v23 }
0x1ba3   :  { %v8201_v25 = vpop.eup %8200 }
0x1ba4   :  { %v3458_v29 = vmul.f32 %v8201_v25, %v3416_v0 }
0x1ba5   :  { %v8203_v62 = vpop.eup %8202 }
0x1ba6   :  { %v3459_v27 = vmul.f32 %v8203_v62, %v3417_v54  ;;  %v3470_v39 = vmul.f32 %v9807_v37, %v3458_v29 }
0x1ba8   :  { %v3471_v14 = vmul.f32 %v9807_v37, %v3459_v27  ;;  %v3482_v22 = vadd.f32 %v9815_v32, %v3470_v39 }
0x1baa   :  { %v3483_v6 = vadd.f32 %v9815_v32, %v3471_v14 }
0x1bac   :  { %v3521_v61 = vpack.c.bf16 %v3483_v6, %v3482_v22 }
0x1bae   :  { %3719 = vmatmul.mubr.bf16.gmra.mrb[84].mxu1 %v3521_v61  ;;  %7488 = vmatmul.mubr.bf16.gmra.mrb[92].mxu0 %v3521_v61 }
0x1baf   :  { %7495 = vmatprep.mubr.msk.bf16.mxu1 %vm761_vm1, %v9851_v40 }
0x1be8   :  { %v3710_v33 = vpop.f32.mrb[80].mxu1  ;;  %v3771_v12 = vpop.f32.mrb[88].mxu0 }
0x1be9   :  { %v3712_v52 = vpop.f32.mrb[81].mxu1  ;;  %v7485_v0 = vpop.f32.mrb[89].mxu0  ;;  %v3711_v11 = vadd.f32 %v3710_v33, %v9837_v43  ;;  %v3772_v20 = vadd.f32 %v3771_v12, %v9840_v24 }
0x1bea   :  { %v3713_v54 = vadd.f32 %v3712_v52, %v9843_v15  ;;  %v3714_v35 = vpop.f32.mrb[82].mxu1  ;;  %v3774_v41 = vpop.f32.mrb[90].mxu0 }
0x1beb   :  { %v3716_v42 = vpop.f32.mrb[83].mxu1  ;;  %v7486_v37 = vpop.f32.mrb[91].mxu0  ;;  %v9877_v30 = vpack.c.bf16 %v3711_v11, %v3711_v11  ;;  %v9879_v34 = vpack.c.bf16 %v3772_v20, %v3772_v20  ;;  %v3715_v21 = vadd.f32 %v3714_v35, %v9837_v43  ;;  %v3775_v2 = vadd.f32 %v3774_v41, %v9840_v24 }
0x1bec   :  { %v9868_v17 = vpack.c.bf16 %v3713_v54, %v3713_v54  ;;  %v3717_v7 = vadd.f32 %v3716_v42, %v9843_v15 }
0x1bed   :  { %v3900_v26 = vsel %vm872_vm5, %v9879_v34, 0 }
0x1bee   :  { %7672 = vmatprep.subr.msk.bf16.mxu1 %vm761_vm1, %v9868_v17  ;;  %v3800_v32 = vsel %vm761_vm1, %v9868_v17, 0 }
0x1bef   :  { %7494 = vmatpush3.bf16.xpose.msra.mxu1 %v3800_v32 }
0x1bf0   :  { %7499 = vmatprep.subr.bf16.mxu1 %v9853_v51 }
0x1bf6   :  { %7496 = vmatmul.mubr.msk.bf16.vlgmr.msra.gmra.mrb[88].mxu1 %vm761_vm1, %v9877_v30 }
0x1bf7   :  { %7500 = vmatpush3.bf16.msra.mxu1 %v9853_v51 }
0x1bf8   :  { %7673 = vmatprep.subr.msk.bf16.mxu1 %vm872_vm5, %v9879_v34 }
0x1bfb   :  { %7502 = vmatpush3.bf16.msra.mxu1 %v3900_v26 }
0x1c81   :  { %v3720_v59 = vpop.f32.mrb[84].mxu1  ;;  %v3779_v38 = vpop.f32.mrb[92].mxu0 }
0x1c82   :  { %v3721_v47 = vadd.f32 %v3720_v59, %v9837_v43  ;;  %v3780_v5 = vadd.f32 %v3779_v38, %v9840_v24  ;;  %v3722_v57 = vpop.f32.mrb[85].mxu1  ;;  %v7489_v55 = vpop.f32.mrb[93].mxu0 }
0x1c83   :  { %v3723_v63 = vadd.f32 %v3722_v57, %v9843_v15  ;;  %v9894_v53 = vpop.f32.mrb[86].mxu1  ;;  %v9896_v9 = vpop.f32.mrb[94].mxu0 }
0x1c84   :  { %v9898_v8 = vpack.c.bf16 %v3721_v47, %v3715_v21  ;;  %v9900_v31 = vpack.c.bf16 %v3780_v5, %v3775_v2  ;;  %v9902_v13 = vpop.f32.mrb[87].mxu1  ;;  %v7490_v18 = vpop.f32.mrb[95].mxu0 }
0x1c85   :  { %v9904_v28 = vpack.c.bf16 %v3723_v63, %v3717_v7 }
0x1cc9   :  { %v7497_v16 = vpop.f32.mrb[88].mxu1 }
0x1cca   :  { %v3836_v23 = vpop.f32.mrb[89].mxu1  ;;  %v3852_v25 = vmul.f32 0.17677669, %v7497_v16 }
0x1ccb   :  { %v3850_v29 = vmul.f32 0.17677669, %v3836_v23  ;;  %v7498_v62 = vpop.f32.mrb[90].mxu1 }
0x1ccc   :  { %v3839_v27 = vpop.f32.mrb[91].mxu1  ;;  %v3855_v22 = vadd.f32 %v3852_v25, %v8870_v50 }
0x1ccd   :  { %v3853_v39 = vadd.f32 %v3850_v29, %v8870_v50  ;;  %v3851_v14 = vmul.f32 0.17677669, %v3839_v27 }
0x1cce   :  { %v3862_v12 = vsel %vm828_vm3, %v3855_v22, -inf }
0x1ccf   :  { %v3854_v6 = vadd.f32 %v3851_v14, %v8870_v50  ;;  %v3856_v61 = vsel %vm828_vm3, %v3853_v39, -inf }
0x1cd0   :  { %3857 = vmax.xlane.f32.xlu0 %v3856_v61 }
0x1cd1   :  { %v3859_v33 = vsel %vm828_vm3, %v3854_v6, -inf }
0x1cd2   :  { %3860 = vmax.xlane.f32.xlu1 %v3859_v33 }
0x1cd4   :  { %3863 = vmax.xlane.f32.xlu0 %v3862_v12 }
0x1d5d   :  { %v3858_v52 = vpop.xlane.xlu0 %3857 }
0x1d5e   :  { %v3865_v54 = vsub.f32 %v3853_v39, %v3858_v52 }
0x1d5f   :  { %v3861_v0 = vpop.xlane.xlu1 %3860 }
0x1d60   :  { %v3866_v35 = vsub.f32 %v3854_v6, %v3861_v0  ;;  %v3868_v32 = vmul.f32 1.442695, %v3865_v54 }
0x1d61   :  { %v3864_v41 = vpop.xlane.xlu0 %3863 }
0x1d62   :  { %v3870_v42 = vmul.f32 1.442695, %v3866_v35  ;;  %v3867_v37 = vsub.f32 %v3855_v22, %v3864_v41 }
0x1d64   :  { %8204 = vpow2.f32 %v3870_v42  ;;  %v3872_v11 = vmul.f32 1.442695, %v3867_v37 }
0x1d66   :  { %8206 = vpow2.f32 %v3872_v11 }
0x1d67   :  { %8208 = vpow2.f32 %v3868_v32 }
0x1d6e   :  { %v8205_v20 = vpop.eup %8204 }
0x1d6f   :  { %v3877_v26 = vsel %vm828_vm3, %v8205_v20, 0.0 }
0x1d70   :  { %v8207_v59 = vpop.eup %8206  ;;  %3878 = vadd.xlane.f32.xlu0 %v3877_v26 }
0x1d71   :  { %v3880_v38 = vsel %vm828_vm3, %v8207_v59, 0.0  ;;  %v8209_v21 = vpop.eup %8208 }
0x1d72   :  { %3881 = vadd.xlane.f32.xlu1 %v3880_v38  ;;  %v3874_v2 = vsel %vm828_vm3, %v8209_v21, 0.0 }
0x1d76   :  { %3875 = vadd.xlane.f32.xlu1 %v3874_v2 }
0x1d86   :  { %3961 = vrot.lane.b32.xlu0 %v9855_v45, %s8438_s4 }
0x1d87   :  { %3963 = vrot.lane.b32.xlu1 %v9868_v17, %s8438_s4 }
0x1d8a   :  { %3957 = vrot.lane.b32.xlu0 %v9877_v30, %s8438_s4 }
0x1d8b   :  { %4149 = vrot.lane.b32.xlu1 %v9855_v45, %s8441_s30 }
0x1d8e   :  { %4145 = vrot.lane.b32.xlu0 %v9851_v40, %s8441_s30 }
0x1d8f   :  { %3955 = vrot.lane.b32.xlu1 %v9851_v40, %s8438_s4 }
0x1d93   :  { %4151 = vrot.lane.b32.xlu1 %v9868_v17, %s8441_s30 }
0x1d97   :  { %4147 = vrot.lane.b32.xlu1 %v9877_v30, %s8441_s30 }
0x1dfd   :  { %v3879_v47 = vpop.xlane.xlu0 %3878 }
0x1dff   :  { %v3882_v5 = vpop.xlane.xlu1 %3881 }
0x1e00   :  { %8210 = vrcp.f32 %v3882_v5 }
0x1e01   :  { %v3962_v57 = vpop.permute.xlu0 %3961  ;;  %8212 = vrcp.f32 %v3879_v47 }
0x1e02   :  { %7674 = vmatprep.subr.msk.bf16.mxu0 %vm761_vm1, %v3962_v57  ;;  %v3972_v55 = vsel %vm761_vm1, %v3962_v57, 0 }
0x1e03   :  { %7508 = vmatpush3.bf16.xpose.msra.mxu0 %v3972_v55  ;;  %v3876_v7 = vpop.xlane.xlu1 %3875 }
0x1e04   :  { %8214 = vrcp.f32 %v3876_v7 }
0x1e05   :  { %v3958_v62 = vpop.permute.xlu0 %3957 }
0x1e07   :  { %v3964_v63 = vpop.permute.xlu1 %3963 }
0x1e08   :  { %7675 = vmatprep.subr.msk.bf16.mxu0 %vm761_vm1, %v3964_v63  ;;  %v3975_v18 = vsel %vm761_vm1, %v3964_v63, 0 }
0x1e09   :  { %v4146_v12 = vpop.permute.xlu0 %4145 }
0x1e0a   :  { %v8211_v16 = vpop.eup %8210 }
0x1e0b   :  { %7510 = vmatpush3.bf16.xpose.msra.mxu0 %v3975_v18  ;;  %v4150_v23 = vpop.permute.xlu1 %4149  ;;  %v8213_v25 = vpop.eup %8212  ;;  %v3888_v27 = vmul.f32 %v8211_v16, %v8207_v59 }
0x1e0c   :  { %7677 = vmatprep.subr.msk.bf16.mxu1 %vm761_vm1, %v4150_v23  ;;  %v3886_v22 = vmul.f32 %v8213_v25, %v8205_v20  ;;  %v4160_v52 = vsel %vm761_vm1, %v4150_v23, 0 }
0x1e0d   :  { %v3890_v61 = vpack.c.bf16 %v3888_v27, %v3888_v27 }
0x1e0e   :  { %v8215_v29 = vpop.eup %8214 }
0x1e0f   :  { %v3956_v39 = vpop.permute.xlu1 %3955  ;;  %v3884_v14 = vmul.f32 %v8215_v29, %v8209_v21 }
0x1e10   :  { %7511 = vmatprep.mubr.msk.bf16.mxu0 %vm761_vm1, %v3956_v39 }
0x1e11   :  { %v3889_v6 = vpack.c.bf16 %v3886_v22, %v3884_v14 }
0x1e12   :  { %7512 = vmatmul.mubr.msk.bf16.vlgmr.msra.gmra.mrb[96].mxu0 %vm761_vm1, %v3958_v62 }
0x1e13   :  { %7503 = vmatprep.mubr.msk.bf16.mxu1 %vm828_vm3, %v3889_v6  ;;  %v4152_v33 = vpop.permute.xlu1 %4151 }
0x1e14   :  { %7504 = vmatmul.mubr.msk.bf16.vlgmr.msra.gmra.mrb[92].mxu1 %vm828_vm3, %v3890_v61  ;;  %v4163_v0 = vsel %vm761_vm1, %v4152_v33, 0 }
0x1e15   :  { %7524 = vmatpush3.bf16.xpose.msra.mxu1 %v4160_v52  ;;  %7527 = vmatprep.mubr.msk.bf16.mxu1 %vm761_vm1, %v4146_v12 }
0x1e16   :  { %7678 = vmatprep.subr.msk.bf16.mxu1 %vm761_vm1, %v4152_v33 }
0x1e17   :  { %v4148_v54 = vpop.permute.xlu1 %4147 }
0x1e1d   :  { %7526 = vmatpush3.bf16.xpose.msra.mxu1 %v4163_v0 }
0x1e24   :  { %7528 = vmatmul.mubr.msk.bf16.vlgmr.msra.gmra.mrb[96].mxu1 %vm761_vm1, %v4148_v54 }
0x1ee5   :  { %v7513_v35 = vpop.f32.mrb[96].mxu0 }
0x1ee6   :  { %v4011_v41 = vpop.f32.mrb[97].mxu0  ;;  %v4027_v42 = vmul.f32 0.17677669, %v7513_v35 }
0x1ee7   :  { %v4025_v37 = vmul.f32 0.17677669, %v4011_v41  ;;  %v7505_v32 = vpop.f32.mrb[92].mxu1  ;;  %v7514_v11 = vpop.f32.mrb[98].mxu0 }
0x1ee8   :  { %3952 = vst.msk [vmem:[#allocation2 + $0x10] sm:$0xff] %vm761_vm1, %v7505_v32  ;;  %v3936_v20 = vpop.f32.mrb[93].mxu1  ;;  %v4014_v26 = vpop.f32.mrb[99].mxu0  ;;  %v4030_v47 = vadd.f32 %v4027_v42, %v8870_v50 }
0x1ee9   :  { %v4028_v59 = vadd.f32 %v4025_v37, %v8870_v50  ;;  %3950 = vst.msk [vmem:[#allocation2] sm:$0xff] %vm761_vm1, %v3936_v20  ;;  %v4026_v38 = vmul.f32 0.17677669, %v4014_v26  ;;  %v7506_v21 = vpop.f32.mrb[94].mxu1 }
0x1eea   :  { %v3939_v2 = vpop.f32.mrb[95].mxu1  ;;  %v4037_v7 = vsel %vm828_vm3, %v4030_v47, -inf }
0x1eeb   :  { %v4029_v5 = vadd.f32 %v4026_v38, %v8870_v50  ;;  %3951 = vst.msk [vmem:[#allocation2 + $0x8] sm:$0xff] %vm761_vm1, %v3939_v2  ;;  %v4031_v57 = vsel %vm828_vm3, %v4028_v59, -inf }
0x1eec   :  { %4032 = vmax.xlane.f32.xlu0 %v4031_v57 }
0x1eed   :  { %v4034_v55 = vsel %vm828_vm3, %v4029_v5, -inf }
0x1eee   :  { %4035 = vmax.xlane.f32.xlu1 %v4034_v55 }
0x1ef0   :  { %4038 = vmax.xlane.f32.xlu0 %v4037_v7 }
0x1ef7   :  { %v7529_v63 = vpop.f32.mrb[96].mxu1 }
0x1ef8   :  { %v4215_v18 = vmul.f32 0.17677669, %v7529_v63  ;;  %v4199_v16 = vpop.f32.mrb[97].mxu1 }
0x1ef9   :  { %v4213_v23 = vmul.f32 0.17677669, %v4199_v16  ;;  %v7530_v25 = vpop.f32.mrb[98].mxu1 }
0x1efa   :  { %v4218_v29 = vadd.f32 %v4215_v18, %v8870_v50  ;;  %v4202_v62 = vpop.f32.mrb[99].mxu1 }
0x1efb   :  { %v4216_v27 = vadd.f32 %v4213_v23, %v8870_v50  ;;  %v4214_v39 = vmul.f32 0.17677669, %v4202_v62 }
0x1efc   :  { %v4225_v14 = vsel %vm828_vm3, %v4218_v29, -inf }
0x1efd   :  { %v4217_v22 = vadd.f32 %v4214_v39, %v8870_v50  ;;  %4226 = vmax.xlane.f32.xlu1 %v4225_v14  ;;  %v4219_v6 = vsel %vm828_vm3, %v4216_v27, -inf }
0x1efe   :  { %4220 = vmax.xlane.f32.xlu0 %v4219_v6 }
0x1eff   :  { %v4222_v61 = vsel %vm828_vm3, %v4217_v22, -inf }
0x1f02   :  { %4223 = vmax.xlane.f32.xlu0 %v4222_v61 }
0x1f79   :  { %v4033_v33 = vpop.xlane.xlu0 %4032 }
0x1f7a   :  { %v4040_v12 = vsub.f32 %v4028_v59, %v4033_v33 }
0x1f7b   :  { %v4036_v52 = vpop.xlane.xlu1 %4035 }
0x1f7c   :  { %v4043_v0 = vmul.f32 1.442695, %v4040_v12  ;;  %v4041_v54 = vsub.f32 %v4029_v5, %v4036_v52 }
0x1f7d   :  { %v4039_v35 = vpop.xlane.xlu0 %4038 }
0x1f7e   :  { %8216 = vpow2.f32 %v4043_v0  ;;  %v4045_v41 = vmul.f32 1.442695, %v4041_v54  ;;  %v4042_v42 = vsub.f32 %v4030_v47, %v4039_v35 }
0x1f80   :  { %8218 = vpow2.f32 %v4045_v41  ;;  %v4047_v37 = vmul.f32 1.442695, %v4042_v42 }
0x1f82   :  { %8220 = vpow2.f32 %v4047_v37 }
0x1f88   :  { %v8217_v32 = vpop.eup %8216 }
0x1f89   :  { %v4049_v11 = vsel %vm828_vm3, %v8217_v32, 0.0 }
0x1f8a   :  { %v8219_v20 = vpop.eup %8218  ;;  %4050 = vadd.xlane.f32.xlu0 %v4049_v11  ;;  %v4227_v47 = vpop.xlane.xlu1 %4226 }
0x1f8b   :  { %v4052_v26 = vsel %vm828_vm3, %v8219_v20, 0.0  ;;  %v4221_v21 = vpop.xlane.xlu0 %4220  ;;  %v4230_v57 = vsub.f32 %v4218_v29, %v4227_v47 }
0x1f8c   :  { %v8221_v38 = vpop.eup %8220  ;;  %4053 = vadd.xlane.f32.xlu1 %v4052_v26  ;;  %v4228_v63 = vsub.f32 %v4216_v27, %v4221_v21 }
0x1f8d   :  { %v4055_v59 = vsel %vm828_vm3, %v8221_v38, 0.0  ;;  %v4235_v7 = vmul.f32 1.442695, %v4230_v57 }
0x1f8e   :  { %4056 = vadd.xlane.f32.xlu0 %v4055_v59  ;;  %v4231_v18 = vmul.f32 1.442695, %v4228_v63 }
0x1f8f   :  { %v4224_v2 = vpop.xlane.xlu0 %4223 }
0x1f90   :  { %v4229_v5 = vsub.f32 %v4217_v22, %v4224_v2 }
0x1f92   :  { %v4233_v55 = vmul.f32 1.442695, %v4229_v5 }
0x1f94   :  { %8222 = vpow2.f32 %v4233_v55 }
0x1f95   :  { %8224 = vpow2.f32 %v4235_v7 }
0x1f96   :  { %8226 = vpow2.f32 %v4231_v18 }
0x1f9d   :  { %4070 = vrot.lane.b32.xlu1 %v9879_v34, %s8438_s4 }
0x1f9e   :  { %v8223_v16 = vpop.eup %8222 }
0x1f9f   :  { %v8225_v23 = vpop.eup %8224  ;;  %v4240_v25 = vsel %vm828_vm3, %v8223_v16, 0.0 }
0x1fa0   :  { %v4243_v62 = vsel %vm828_vm3, %v8225_v23, 0.0  ;;  %v8227_v39 = vpop.eup %8226 }
0x1fa1   :  { %4254 = vrot.lane.b32.xlu1 %v9853_v51, %s8441_s30  ;;  %v4237_v14 = vsel %vm828_vm3, %v8227_v39, 0.0 }
0x1fa4   :  { %4068 = vrot.lane.b32.xlu0 %v9853_v51, %s8438_s4 }
0x1fc3   :  { %4241 = vadd.xlane.f32.xlu0 %v4240_v25 }
0x1fc5   :  { %4244 = vadd.xlane.f32.xlu1 %v4243_v62 }
0x1fc9   :  { %4238 = vadd.xlane.f32.xlu1 %v4237_v14 }
0x1fd9   :  { %4335 = vrot.lane.b32.xlu0 %v9855_v45, %s8442_s0 }
0x1fda   :  { %4256 = vrot.lane.b32.xlu1 %v9879_v34, %s8441_s30 }
0x1fdd   :  { %4331 = vrot.lane.b32.xlu0 %v9851_v40, %s8442_s0 }
0x1fde   :  { %4337 = vrot.lane.b32.xlu1 %v9868_v17, %s8442_s0 }
0x1fe2   :  { %4333 = vrot.lane.b32.xlu1 %v9877_v30, %s8442_s0 }
0x2017   :  { %v4051_v29 = vpop.xlane.xlu0 %4050 }
0x2018   :  { %8228 = vrcp.f32 %v4051_v29 }
0x2019   :  { %v4054_v27 = vpop.xlane.xlu1 %4053 }
0x201a   :  { %8230 = vrcp.f32 %v4054_v27 }
0x201b   :  { %v4057_v22 = vpop.xlane.xlu0 %4056 }
0x201c   :  { %8232 = vrcp.f32 %v4057_v22 }
0x201d   :  { %v4071_v6 = vpop.permute.xlu1 %4070 }
0x201e   :  { %v4080_v33 = vsel %vm872_vm5, %v4071_v6, 0 }
0x201f   :  { %v4069_v45 = vpop.permute.xlu0 %4068 }
0x2020   :  { %7515 = vmatprep.subr.bf16.mxu0 %v4069_v45 }
0x2021   :  { %7516 = vmatpush3.bf16.msra.mxu0 %v4069_v45  ;;  %v4255_v17 = vpop.permute.xlu1 %4254 }
0x2022   :  { %v8229_v61 = vpop.eup %8228  ;;  %7676 = vmatprep.subr.msk.bf16.mxu0 %vm872_vm5, %v4071_v6 }
0x2023   :  { %v4059_v12 = vmul.f32 %v8229_v61, %v8217_v32 }
0x2024   :  { %v8231_v40 = vpop.eup %8230 }
0x2025   :  { %7518 = vmatpush3.bf16.msra.mxu0 %v4080_v33  ;;  %v4061_v30 = vmul.f32 %v8231_v40, %v8219_v20 }
0x2026   :  { %v8233_v52 = vpop.eup %8232  ;;  %7531 = vmatprep.subr.bf16.mxu0 %v4255_v17 }
0x2027   :  { %v4063_v0 = vmul.f32 %v8233_v52, %v8221_v38  ;;  %v4064_v54 = vpack.c.bf16 %v4061_v30, %v4059_v12 }
0x2029   :  { %7519 = vmatprep.mubr.msk.bf16.mxu0 %vm828_vm3, %v4064_v54  ;;  %v4065_v35 = vpack.c.bf16 %v4063_v0, %v4063_v0 }
0x202b   :  { %7520 = vmatmul.mubr.msk.bf16.vlgmr.msra.gmra.mrb[100].mxu0 %vm828_vm3, %v4065_v35 }
0x202c   :  { %7532 = vmatpush3.bf16.msra.mxu0 %v4255_v17 }
0x2050   :  { %v4242_v41 = vpop.xlane.xlu0 %4241 }
0x2052   :  { %v4245_v42 = vpop.xlane.xlu1 %4244 }
0x2053   :  { %8234 = vrcp.f32 %v4245_v42 }
0x2054   :  { %8236 = vrcp.f32 %v4242_v41  ;;  %v4336_v20 = vpop.permute.xlu0 %4335 }
0x2055   :  { %v4346_v55 = vsel %vm761_vm1, %v4336_v20, 0 }
0x2056   :  { %v4239_v37 = vpop.xlane.xlu1 %4238 }
0x2057   :  { %8238 = vrcp.f32 %v4239_v37 }
0x2058   :  { %v4332_v7 = vpop.permute.xlu0 %4331 }
0x205a   :  { %v4257_v11 = vpop.permute.xlu1 %4256 }
0x205b   :  { %v4266_v32 = vsel %vm872_vm5, %v4257_v11, 0  ;;  %7679 = vmatprep.subr.msk.bf16.mxu0 %vm872_vm5, %v4257_v11 }
0x205c   :  { %7534 = vmatpush3.bf16.msra.mxu0 %v4266_v32 }
0x205d   :  { %7680 = vmatprep.subr.msk.bf16.mxu0 %vm761_vm1, %v4336_v20  ;;  %v8235_v26 = vpop.eup %8234 }
0x205e   :  { %v8237_v38 = vpop.eup %8236  ;;  %v4251_v21 = vmul.f32 %v8235_v26, %v8225_v23  ;;  %v4338_v63 = vpop.permute.xlu1 %4337 }
0x205f   :  { %v4249_v47 = vmul.f32 %v8237_v38, %v8223_v16  ;;  %v4349_v18 = vsel %vm761_vm1, %v4338_v63, 0  ;;  %v3783_v16 = vadd.f32 %v9896_v9, %v9840_v24 }
0x2060   :  { %v4253_v57 = vpack.c.bf16 %v4251_v21, %v4251_v21 }
0x2061   :  { %v8239_v59 = vpop.eup %8238  ;;  %v9998_v25 = vpack.c.bf16 %v3783_v16, %v3783_v16 }
0x2062   :  { %v4247_v2 = vmul.f32 %v8239_v59, %v8227_v39  ;;  %v4334_v23 = vpop.permute.xlu1 %4333 }
0x2063   :  { %v4631_v62 = vsel %vm872_vm5, %v9998_v25, 0 }
0x2064   :  { %v4252_v5 = vpack.c.bf16 %v4249_v47, %v4247_v2 }
0x2066   :  { %7535 = vmatprep.mubr.msk.bf16.mxu0 %vm828_vm3, %v4252_v5 }
0x2067   :  { %7536 = vmatmul.mubr.msk.bf16.vlgmr.msra.gmra.mrb[104].mxu0 %vm828_vm3, %v4253_v57 }
0x2068   :  { %7540 = vmatpush3.bf16.xpose.msra.mxu0 %v4346_v55  ;;  %7543 = vmatprep.mubr.msk.bf16.mxu0 %vm761_vm1, %v4332_v7 }
0x2069   :  { %7681 = vmatprep.subr.msk.bf16.mxu0 %vm761_vm1, %v4338_v63 }
0x2070   :  { %7542 = vmatpush3.bf16.xpose.msra.mxu0 %v4349_v18 }
0x2071   :  { %7563 = vmatprep.subr.bf16.mxu0 %v9900_v31 }
0x2077   :  { %7544 = vmatmul.mubr.msk.bf16.vlgmr.msra.gmra.mrb[108].mxu0 %vm761_vm1, %v4334_v23 }
0x2078   :  { %7564 = vmatpush3.bf16.msra.mxu0 %v9900_v31 }
0x2079   :  { %7685 = vmatprep.subr.msk.bf16.mxu0 %vm872_vm5, %v9998_v25 }
0x207c   :  { %7566 = vmatpush3.bf16.msra.mxu0 %v4631_v62 }
0x20fe   :  { %v10006_v39 = vpop.f32.mrb[100].mxu0 }
0x20ff   :  { %v10008_v14 = vpop.f32.mrb[101].mxu0 }
0x2100   :  { %v7522_v29 = vpop.f32.mrb[102].mxu0 }
0x2101   :  { %v10010_v24 = vpop.f32.mrb[103].mxu0 }
0x213a   :  { %v10012_v9 = vpop.f32.mrb[104].mxu0 }
0x213b   :  { %v10014_v27 = vpop.f32.mrb[105].mxu0 }
0x213c   :  { %v7538_v22 = vpop.f32.mrb[106].mxu0 }
0x213d   :  { %v10016_v6 = vpop.f32.mrb[107].mxu0 }
0x214a   :  { %v7545_v45 = vpop.f32.mrb[108].mxu0 }
0x214b   :  { %v4385_v61 = vpop.f32.mrb[109].mxu0  ;;  %v4401_v40 = vmul.f32 0.17677669, %v7545_v45 }
0x214c   :  { %v4399_v33 = vmul.f32 0.17677669, %v4385_v61  ;;  %v7546_v17 = vpop.f32.mrb[110].mxu0 }
0x214d   :  { %v4388_v12 = vpop.f32.mrb[111].mxu0  ;;  %v4404_v0 = vadd.f32 %v4401_v40, %v8870_v50  ;;  %v3727_v17 = vadd.f32 %v9902_v13, %v9843_v15  ;;  %v3725_v13 = vadd.f32 %v9894_v53, %v9837_v43 }
0x214e   :  { %v4402_v30 = vadd.f32 %v4399_v33, %v8870_v50  ;;  %v4400_v52 = vmul.f32 0.17677669, %v4388_v12 }
0x214f   :  { %v4411_v42 = vsel %vm828_vm3, %v4404_v0, -inf }
0x2150   :  { %v4403_v54 = vadd.f32 %v4400_v52, %v8870_v50  ;;  %v4405_v35 = vsel %vm828_vm3, %v4402_v30, -inf  ;;  %v10039_v52 = vpack.c.bf16 %v3727_v17, %v3727_v17 }
0x2151   :  { %4406 = vmax.xlane.f32.xlu0 %v4405_v35 }
0x2152   :  { %v4408_v41 = vsel %vm828_vm3, %v4403_v54, -inf  ;;  %v4531_v15 = vsel %vm761_vm1, %v10039_v52, 0 }
0x2153   :  { %4409 = vmax.xlane.f32.xlu1 %v4408_v41 }
0x2155   :  { %4412 = vmax.xlane.f32.xlu0 %v4411_v42 }
0x21de   :  { %v4407_v37 = vpop.xlane.xlu0 %4406 }
0x21df   :  { %v4414_v11 = vsub.f32 %v4402_v30, %v4407_v37 }
0x21e0   :  { %v4410_v32 = vpop.xlane.xlu1 %4409 }
0x21e1   :  { %v4417_v20 = vmul.f32 1.442695, %v4414_v11  ;;  %v4415_v26 = vsub.f32 %v4403_v54, %v4410_v32  ;;  %v10051_v54 = vpack.c.bf16 %v3725_v13, %v3725_v13 }
0x21e2   :  { %v4413_v38 = vpop.xlane.xlu0 %4412 }
0x21e3   :  { %8240 = vpow2.f32 %v4417_v20  ;;  %v4419_v59 = vmul.f32 1.442695, %v4415_v26  ;;  %v4416_v21 = vsub.f32 %v4404_v0, %v4413_v38  ;;  %v4528_v0 = vsel %vm761_vm1, %v9904_v28, 0 }
0x21e5   :  { %8242 = vpow2.f32 %v4419_v59  ;;  %v4421_v2 = vmul.f32 1.442695, %v4416_v21 }
0x21e7   :  { %8244 = vpow2.f32 %v4421_v2 }
0x21ed   :  { %v8241_v47 = vpop.eup %8240 }
0x21ee   :  { %v4423_v5 = vsel %vm828_vm3, %v8241_v47, 0.0 }
0x21ef   :  { %v8243_v57 = vpop.eup %8242  ;;  %4424 = vadd.xlane.f32.xlu0 %v4423_v5 }
0x21f0   :  { %v4426_v63 = vsel %vm828_vm3, %v8243_v57, 0.0 }
0x21f1   :  { %v8245_v55 = vpop.eup %8244 }
0x21f2   :  { %v4429_v7 = vsel %vm828_vm3, %v8245_v55, 0.0 }
0x21f3   :  { %4430 = vadd.xlane.f32.xlu1 %v4429_v7  ;;  %4427 = vadd.xlane.f32.xlu0 %v4426_v63 }
0x2204   :  { %4442 = vrot.lane.b32.xlu1 %v9879_v34, %s8442_s0 }
0x2209   :  { %4440 = vrot.lane.b32.xlu0 %v9853_v51, %s8442_s0 }
0x227c   :  { %v4425_v18 = vpop.xlane.xlu0 %4424 }
0x227d   :  { %8246 = vrcp.f32 %v4425_v18 }
0x2280   :  { %v4428_v16 = vpop.xlane.xlu0 %4427  ;;  %v4431_v23 = vpop.xlane.xlu1 %4430 }
0x2281   :  { %8248 = vrcp.f32 %v4428_v16 }
0x2282   :  { %8250 = vrcp.f32 %v4431_v23 }
0x2284   :  { %v4441_v62 = vpop.permute.xlu0 %4440  ;;  %v4443_v29 = vpop.permute.xlu1 %4442 }
0x2285   :  { %7547 = vmatprep.subr.bf16.mxu1 %v4441_v62  ;;  %v4452_v45 = vsel %vm872_vm5, %v4443_v29, 0 }
0x2286   :  { %7548 = vmatpush3.bf16.msra.mxu1 %v4441_v62 }
0x2287   :  { %7682 = vmatprep.subr.msk.bf16.mxu1 %vm872_vm5, %v4443_v29  ;;  %v8247_v22 = vpop.eup %8246 }
0x2288   :  { %v4433_v61 = vmul.f32 %v8247_v22, %v8241_v47 }
0x228a   :  { %7550 = vmatpush3.bf16.msra.mxu1 %v4452_v45 }
0x228b   :  { %v8249_v34 = vpop.eup %8248  ;;  %7683 = vmatprep.subr.msk.bf16.mxu1 %vm761_vm1, %v9904_v28 }
0x228c   :  { %v8251_v51 = vpop.eup %8250  ;;  %v4435_v40 = vmul.f32 %v8249_v34, %v8243_v57 }
0x228d   :  { %v4437_v33 = vmul.f32 %v8251_v51, %v8245_v55 }
0x228e   :  { %v4438_v12 = vpack.c.bf16 %v4435_v40, %v4433_v61 }
0x228f   :  { %v4439_v30 = vpack.c.bf16 %v4437_v33, %v4437_v33 }
0x2290   :  { %7551 = vmatprep.mubr.msk.bf16.mxu1 %vm828_vm3, %v4438_v12 }
0x2291   :  { %7552 = vmatmul.mubr.msk.bf16.vlgmr.msra.gmra.mrb[100].mxu1 %vm828_vm3, %v4439_v30 }
0x2292   :  { %7559 = vmatprep.mubr.msk.bf16.mxu1 %vm761_vm1, %v9898_v8 }
0x2293   :  { %7556 = vmatpush3.bf16.xpose.msra.mxu1 %v4528_v0 }
0x2294   :  { %7684 = vmatprep.subr.msk.bf16.mxu1 %vm761_vm1, %v10039_v52 }
0x229b   :  { %7558 = vmatpush3.bf16.xpose.msra.mxu1 %v4531_v15 }
0x22a2   :  { %7560 = vmatmul.mubr.msk.bf16.vlgmr.msra.gmra.mrb[104].mxu1 %vm761_vm1, %v10051_v54 }
0x2364   :  { %v10055_v35 = vpop.f32.mrb[100].mxu1 }
0x2365   :  { %v10057_v41 = vpop.f32.mrb[101].mxu1 }
0x2366   :  { %v7554_v42 = vpop.f32.mrb[102].mxu1 }
0x2367   :  { %v10059_v37 = vpop.f32.mrb[103].mxu1 }
0x2375   :  { %v7561_v11 = vpop.f32.mrb[104].mxu1 }
0x2376   :  { %v4567_v32 = vpop.f32.mrb[105].mxu1  ;;  %v4583_v59 = vmul.f32 0.17677669, %v7561_v11 }
0x2377   :  { %v4581_v20 = vmul.f32 0.17677669, %v4567_v32  ;;  %v7562_v26 = vpop.f32.mrb[106].mxu1 }
0x2378   :  { %v4570_v38 = vpop.f32.mrb[107].mxu1  ;;  %v4586_v47 = vadd.f32 %v4583_v59, %v8870_v50 }
0x2379   :  { %v4584_v43 = vadd.f32 %v4581_v20, %v8870_v50  ;;  %v4582_v53 = vmul.f32 0.17677669, %v4570_v38 }
0x237a   :  { %v4593_v57 = vsel %vm828_vm3, %v4586_v47, -inf }
0x237b   :  { %v4585_v21 = vadd.f32 %v4582_v53, %v8870_v50  ;;  %v4587_v2 = vsel %vm828_vm3, %v4584_v43, -inf }
0x237c   :  { %4588 = vmax.xlane.f32.xlu1 %v4587_v2 }
0x237d   :  { %v4590_v5 = vsel %vm828_vm3, %v4585_v21, -inf }
0x237e   :  { %4591 = vmax.xlane.f32.xlu0 %v4590_v5 }
0x2382   :  { %4594 = vmax.xlane.f32.xlu0 %v4593_v57 }
0x2409   :  { %v4589_v55 = vpop.xlane.xlu1 %4588 }
0x240a   :  { %v4596_v7 = vsub.f32 %v4584_v43, %v4589_v55 }
0x240b   :  { %v4592_v63 = vpop.xlane.xlu0 %4591 }
0x240c   :  { %v4599_v18 = vmul.f32 1.442695, %v4596_v7  ;;  %v4597_v16 = vsub.f32 %v4585_v21, %v4592_v63 }
0x240e   :  { %8252 = vpow2.f32 %v4599_v18  ;;  %v4601_v23 = vmul.f32 1.442695, %v4597_v16 }
0x240f   :  { %v4595_v62 = vpop.xlane.xlu0 %4594 }
0x2410   :  { %8254 = vpow2.f32 %v4601_v23  ;;  %v4598_v29 = vsub.f32 %v4586_v47, %v4595_v62 }
0x2412   :  { %v4603_v22 = vmul.f32 1.442695, %v4598_v29 }
0x2414   :  { %8256 = vpow2.f32 %v4603_v22 }
0x2418   :  { %v8253_v45 = vpop.eup %8252 }
0x2419   :  { %v4605_v34 = vsel %vm828_vm3, %v8253_v45, 0.0 }
0x241a   :  { %v8255_v51 = vpop.eup %8254  ;;  %4606 = vadd.xlane.f32.xlu1 %v4605_v34 }
0x241b   :  { %v4608_v61 = vsel %vm828_vm3, %v8255_v51, 0.0 }
0x241c   :  { %4609 = vadd.xlane.f32.xlu0 %v4608_v61 }
0x241e   :  { %v8257_v40 = vpop.eup %8256 }
0x241f   :  { %v4611_v33 = vsel %vm828_vm3, %v8257_v40, 0.0 }
0x2420   :  { %4612 = vadd.xlane.f32.xlu1 %v4611_v33 }
0x2431   :  { %4694 = vrot.lane.b32.xlu1 %v10039_v52, %s8438_s4 }
0x2432   :  { %4692 = vrot.lane.b32.xlu0 %v9904_v28, %s8438_s4 }
0x2435   :  { %4686 = vrot.lane.b32.xlu1 %v9898_v8, %s8438_s4 }
0x2439   :  { %4688 = vrot.lane.b32.xlu1 %v10051_v54, %s8438_s4 }
0x24a7   :  { %v4607_v17 = vpop.xlane.xlu1 %4606 }
0x24a8   :  { %8258 = vrcp.f32 %v4607_v17 }
0x24a9   :  { %v4610_v12 = vpop.xlane.xlu0 %4609 }
0x24aa   :  { %8260 = vrcp.f32 %v4610_v12 }
0x24ad   :  { %v4613_v30 = vpop.xlane.xlu1 %4612  ;;  %v4693_v0 = vpop.permute.xlu0 %4692 }
0x24ae   :  { %8262 = vrcp.f32 %v4613_v30  ;;  %7686 = vmatprep.subr.msk.bf16.mxu0 %vm761_vm1, %v4693_v0  ;;  %v4703_v43 = vsel %vm761_vm1, %v4693_v0, 0 }
0x24b1   :  { %v4695_v32 = vpop.permute.xlu1 %4694 }
0x24b2   :  { %v8259_v15 = vpop.eup %8258  ;;  %v4706_v21 = vsel %vm761_vm1, %v4695_v32, 0 }
0x24b3   :  { %v4615_v42 = vmul.f32 %v8259_v15, %v8253_v45 }
0x24b4   :  { %v8261_v13 = vpop.eup %8260 }
0x24b5   :  { %v4617_v11 = vmul.f32 %v8261_v13, %v8255_v51  ;;  %v4687_v53 = vpop.permute.xlu1 %4686 }
0x24b7   :  { %v4620_v20 = vpack.c.bf16 %v4617_v11, %v4615_v42 }
0x24b8   :  { %v8263_v26 = vpop.eup %8262 }
0x24b9   :  { %v4619_v38 = vmul.f32 %v8263_v26, %v8257_v40  ;;  %7567 = vmatprep.mubr.msk.bf16.mxu0 %vm828_vm3, %v4620_v20  ;;  %v4689_v2 = vpop.permute.xlu1 %4688 }
0x24bb   :  { %v4621_v59 = vpack.c.bf16 %v4619_v38, %v4619_v38 }
0x24bd   :  { %7568 = vmatmul.mubr.msk.bf16.vlgmr.msra.gmra.mrb[112].mxu0 %vm828_vm3, %v4621_v59 }
0x24be   :  { %7572 = vmatpush3.bf16.xpose.msra.mxu0 %v4703_v43  ;;  %7575 = vmatprep.mubr.msk.bf16.mxu0 %vm761_vm1, %v4687_v53 }
0x24bf   :  { %7687 = vmatprep.subr.msk.bf16.mxu0 %vm761_vm1, %v4695_v32 }
0x24c6   :  { %7574 = vmatpush3.bf16.xpose.msra.mxu0 %v4706_v21 }
0x24cd   :  { %7576 = vmatmul.mubr.msk.bf16.vlgmr.msra.gmra.mrb[116].mxu0 %vm761_vm1, %v4689_v2 }
0x2590   :  { %v7569_v47 = vpop.f32.mrb[112].mxu0 }
0x2591   :  { %4683 = vst.msk [vmem:[#allocation2 + $0x28] sm:$0xff] %vm761_vm1, %v7569_v47  ;;  %v4667_v5 = vpop.f32.mrb[113].mxu0 }
0x2592   :  { %4681 = vst.msk [vmem:[#allocation2 + $0x18] sm:$0xff] %vm761_vm1, %v4667_v5  ;;  %v7570_v57 = vpop.f32.mrb[114].mxu0 }
0x2593   :  { %v4670_v55 = vpop.f32.mrb[115].mxu0 }
0x2594   :  { %4682 = vst.msk [vmem:[#allocation2 + $0x20] sm:$0xff] %vm761_vm1, %v4670_v55 }
0x25a0   :  { %v7577_v7 = vpop.f32.mrb[116].mxu0 }
0x25a1   :  { %v4742_v63 = vpop.f32.mrb[117].mxu0  ;;  %v4758_v18 = vmul.f32 0.17677669, %v7577_v7 }
0x25a2   :  { %v4756_v16 = vmul.f32 0.17677669, %v4742_v63  ;;  %v7578_v23 = vpop.f32.mrb[118].mxu0 }
0x25a3   :  { %v4745_v62 = vpop.f32.mrb[119].mxu0  ;;  %v4761_v45 = vadd.f32 %v4758_v18, %v8870_v50 }
0x25a4   :  { %v4759_v29 = vadd.f32 %v4756_v16, %v8870_v50  ;;  %v4757_v22 = vmul.f32 0.17677669, %v4745_v62 }
0x25a5   :  { %v4768_v40 = vsel %vm828_vm3, %v4761_v45, -inf }
0x25a6   :  { %v4760_v34 = vadd.f32 %v4757_v22, %v8870_v50  ;;  %v4762_v51 = vsel %vm828_vm3, %v4759_v29, -inf }
0x25a7   :  { %4763 = vmax.xlane.f32.xlu0 %v4762_v51 }
0x25a8   :  { %v4765_v61 = vsel %vm828_vm3, %v4760_v34, -inf }
0x25a9   :  { %4766 = vmax.xlane.f32.xlu1 %v4765_v61 }
0x25ab   :  { %4769 = vmax.xlane.f32.xlu0 %v4768_v40 }
0x2634   :  { %v4764_v33 = vpop.xlane.xlu0 %4763 }
0x2635   :  { %v4771_v17 = vsub.f32 %v4759_v29, %v4764_v33 }
0x2636   :  { %v4767_v12 = vpop.xlane.xlu1 %4766 }
0x2637   :  { %v4774_v30 = vmul.f32 1.442695, %v4771_v17  ;;  %v4772_v0 = vsub.f32 %v4760_v34, %v4767_v12 }
0x2638   :  { %v4770_v15 = vpop.xlane.xlu0 %4769 }
0x2639   :  { %8264 = vpow2.f32 %v4774_v30  ;;  %v4776_v13 = vmul.f32 1.442695, %v4772_v0  ;;  %v4773_v42 = vsub.f32 %v4761_v45, %v4770_v15 }
0x263b   :  { %8266 = vpow2.f32 %v4776_v13  ;;  %v4778_v11 = vmul.f32 1.442695, %v4773_v42 }
0x263d   :  { %8268 = vpow2.f32 %v4778_v11 }
0x2643   :  { %v8265_v32 = vpop.eup %8264 }
0x2644   :  { %v4780_v20 = vsel %vm828_vm3, %v8265_v32, 0.0 }
0x2645   :  { %v8267_v26 = vpop.eup %8266  ;;  %4781 = vadd.xlane.f32.xlu0 %v4780_v20 }
0x2646   :  { %v4783_v43 = vsel %vm828_vm3, %v8267_v26, 0.0 }
0x2647   :  { %v8269_v38 = vpop.eup %8268 }
0x2648   :  { %v4786_v59 = vsel %vm828_vm3, %v8269_v38, 0.0 }
0x2649   :  { %4787 = vadd.xlane.f32.xlu1 %v4786_v59  ;;  %4784 = vadd.xlane.f32.xlu0 %v4783_v43 }
0x265a   :  { %4801 = vrot.lane.b32.xlu1 %v9998_v25, %s8438_s4 }
0x265e   :  { %4880 = vrot.lane.b32.xlu1 %v9904_v28, %s8441_s30 }
0x265f   :  { %4799 = vrot.lane.b32.xlu0 %v9900_v31, %s8438_s4 }
0x2662   :  { %4882 = vrot.lane.b32.xlu1 %v10039_v52, %s8441_s30 }
0x2663   :  { %4876 = vrot.lane.b32.xlu0 %v9898_v8, %s8441_s30 }
0x2666   :  { %4878 = vrot.lane.b32.xlu1 %v10051_v54, %s8441_s30 }
0x26d2   :  { %v4782_v53 = vpop.xlane.xlu0 %4781 }
0x26d3   :  { %8270 = vrcp.f32 %v4782_v53 }
0x26d6   :  { %v4785_v21 = vpop.xlane.xlu0 %4784  ;;  %v4788_v2 = vpop.xlane.xlu1 %4787 }
0x26d7   :  { %8272 = vrcp.f32 %v4785_v21 }
0x26d8   :  { %8274 = vrcp.f32 %v4788_v2 }
0x26da   :  { %v4800_v47 = vpop.permute.xlu0 %4799  ;;  %v4802_v5 = vpop.permute.xlu1 %4801 }
0x26db   :  { %7579 = vmatprep.subr.bf16.mxu1 %v4800_v47  ;;  %v4811_v55 = vsel %vm872_vm5, %v4802_v5, 0 }
0x26dc   :  { %7580 = vmatpush3.bf16.msra.mxu1 %v4800_v47 }
0x26dd   :  { %7688 = vmatprep.subr.msk.bf16.mxu1 %vm872_vm5, %v4802_v5  ;;  %v8271_v57 = vpop.eup %8270 }
0x26de   :  { %v4881_v7 = vpop.permute.xlu1 %4880  ;;  %v4790_v16 = vmul.f32 %v8271_v57, %v8265_v32  ;;  %v4877_v45 = vpop.permute.xlu0 %4876 }
0x26df   :  { %v4891_v34 = vsel %vm761_vm1, %v4881_v7, 0 }
0x26e0   :  { %7582 = vmatpush3.bf16.msra.mxu1 %v4811_v55 }
0x26e1   :  { %v8273_v63 = vpop.eup %8272  ;;  %7689 = vmatprep.subr.msk.bf16.mxu1 %vm761_vm1, %v4881_v7 }
0x26e2   :  { %v8275_v18 = vpop.eup %8274  ;;  %v4792_v23 = vmul.f32 %v8273_v63, %v8267_v26  ;;  %v4883_v51 = vpop.permute.xlu1 %4882 }
0x26e3   :  { %v4794_v62 = vmul.f32 %v8275_v18, %v8269_v38  ;;  %v4894_v61 = vsel %vm761_vm1, %v4883_v51, 0 }
0x26e4   :  { %v4795_v29 = vpack.c.bf16 %v4792_v23, %v4790_v16 }
0x26e5   :  { %v4796_v22 = vpack.c.bf16 %v4794_v62, %v4794_v62 }
0x26e6   :  { %7583 = vmatprep.mubr.msk.bf16.mxu1 %vm828_vm3, %v4795_v29  ;;  %v4879_v40 = vpop.permute.xlu1 %4878 }
0x26e7   :  { %7584 = vmatmul.mubr.msk.bf16.vlgmr.msra.gmra.mrb[108].mxu1 %vm828_vm3, %v4796_v22 }
0x26e8   :  { %7591 = vmatprep.mubr.msk.bf16.mxu1 %vm761_vm1, %v4877_v45 }
0x26e9   :  { %7588 = vmatpush3.bf16.xpose.msra.mxu1 %v4891_v34 }
0x26ea   :  { %7690 = vmatprep.subr.msk.bf16.mxu1 %vm761_vm1, %v4883_v51 }
0x26f1   :  { %7590 = vmatpush3.bf16.xpose.msra.mxu1 %v4894_v61 }
0x26f8   :  { %7592 = vmatmul.mubr.msk.bf16.vlgmr.msra.gmra.mrb[112].mxu1 %vm761_vm1, %v4879_v40 }
0x27ba   :  { %v10120_v33 = vpop.f32.mrb[108].mxu1 }
0x27bb   :  { %v10122_v17 = vpop.f32.mrb[109].mxu1 }
0x27bc   :  { %v7586_v12 = vpop.f32.mrb[110].mxu1 }
0x27bd   :  { %v10124_v30 = vpop.f32.mrb[111].mxu1 }
0x27cb   :  { %v7593_v0 = vpop.f32.mrb[112].mxu1 }
0x27cc   :  { %v4930_v15 = vpop.f32.mrb[113].mxu1  ;;  %v4946_v13 = vmul.f32 0.17677669, %v7593_v0 }
0x27cd   :  { %v4944_v42 = vmul.f32 0.17677669, %v4930_v15  ;;  %v7594_v11 = vpop.f32.mrb[114].mxu1 }
0x27ce   :  { %v4933_v32 = vpop.f32.mrb[115].mxu1  ;;  %v4949_v38 = vadd.f32 %v4946_v13, %v8870_v50 }
0x27cf   :  { %v4947_v20 = vadd.f32 %v4944_v42, %v8870_v50  ;;  %v4945_v26 = vmul.f32 0.17677669, %v4933_v32 }
0x27d0   :  { %v4956_v21 = vsel %vm828_vm3, %v4949_v38, -inf }
0x27d1   :  { %v4948_v59 = vadd.f32 %v4945_v26, %v8870_v50  ;;  %v4950_v43 = vsel %vm828_vm3, %v4947_v20, -inf }
0x27d2   :  { %4951 = vmax.xlane.f32.xlu0 %v4950_v43 }
0x27d3   :  { %v4953_v53 = vsel %vm828_vm3, %v4948_v59, -inf }
0x27d4   :  { %4954 = vmax.xlane.f32.xlu1 %v4953_v53 }
0x27d6   :  { %4957 = vmax.xlane.f32.xlu0 %v4956_v21 }
0x285f   :  { %v4952_v2 = vpop.xlane.xlu0 %4951 }
0x2860   :  { %v4959_v47 = vsub.f32 %v4947_v20, %v4952_v2 }
0x2861   :  { %v4955_v5 = vpop.xlane.xlu1 %4954 }
0x2862   :  { %v4962_v57 = vmul.f32 1.442695, %v4959_v47  ;;  %v4960_v55 = vsub.f32 %v4948_v59, %v4955_v5 }
0x2863   :  { %v4958_v7 = vpop.xlane.xlu0 %4957 }
0x2864   :  { %8276 = vpow2.f32 %v4962_v57  ;;  %v4964_v63 = vmul.f32 1.442695, %v4960_v55  ;;  %v4961_v18 = vsub.f32 %v4949_v38, %v4958_v7 }
0x2866   :  { %8278 = vpow2.f32 %v4964_v63  ;;  %v4966_v16 = vmul.f32 1.442695, %v4961_v18 }
0x2868   :  { %8280 = vpow2.f32 %v4966_v16 }
0x286e   :  { %v8277_v23 = vpop.eup %8276 }
0x286f   :  { %v4968_v62 = vsel %vm828_vm3, %v8277_v23, 0.0 }
0x2870   :  { %v8279_v29 = vpop.eup %8278  ;;  %4969 = vadd.xlane.f32.xlu0 %v4968_v62 }
0x2871   :  { %v4971_v34 = vsel %vm828_vm3, %v8279_v29, 0.0 }
0x2872   :  { %v8281_v22 = vpop.eup %8280 }
0x2873   :  { %v4974_v45 = vsel %vm828_vm3, %v8281_v22, 0.0 }
0x2874   :  { %4975 = vadd.xlane.f32.xlu1 %v4974_v45  ;;  %4972 = vadd.xlane.f32.xlu0 %v4971_v34 }
0x2885   :  { %4987 = vrot.lane.b32.xlu1 %v9998_v25, %s8441_s30 }
0x2889   :  { %5066 = vrot.lane.b32.xlu1 %v9904_v28, %s8442_s0 }
0x288a   :  { %4985 = vrot.lane.b32.xlu0 %v9900_v31, %s8441_s30 }
0x288d   :  { %5068 = vrot.lane.b32.xlu1 %v10039_v52, %s8442_s0 }
0x288e   :  { %5062 = vrot.lane.b32.xlu0 %v9898_v8, %s8442_s0 }
0x2891   :  { %5064 = vrot.lane.b32.xlu1 %v10051_v54, %s8442_s0 }
0x28fd   :  { %v4970_v51 = vpop.xlane.xlu0 %4969 }
0x28fe   :  { %8282 = vrcp.f32 %v4970_v51 }
0x2901   :  { %v4973_v61 = vpop.xlane.xlu0 %4972  ;;  %v4976_v40 = vpop.xlane.xlu1 %4975 }
0x2902   :  { %8284 = vrcp.f32 %v4973_v61 }
0x2903   :  { %8286 = vrcp.f32 %v4976_v40 }
0x2905   :  { %v4986_v12 = vpop.permute.xlu0 %4985  ;;  %v4988_v28 = vpop.permute.xlu1 %4987 }
0x2906   :  { %7595 = vmatprep.subr.bf16.mxu0 %v4986_v12  ;;  %v4997_v52 = vsel %vm872_vm5, %v4988_v28, 0 }
0x2907   :  { %7596 = vmatpush3.bf16.msra.mxu0 %v4986_v12 }
0x2908   :  { %7691 = vmatprep.subr.msk.bf16.mxu0 %vm872_vm5, %v4988_v28  ;;  %v8283_v0 = vpop.eup %8282 }
0x2909   :  { %v5067_v15 = vpop.permute.xlu1 %5066  ;;  %v4978_v13 = vmul.f32 %v8283_v0, %v8277_v23  ;;  %v5063_v26 = vpop.permute.xlu0 %5062 }
0x290a   :  { %v5077_v38 = vsel %vm761_vm1, %v5067_v15, 0 }
0x290b   :  { %7598 = vmatpush3.bf16.msra.mxu0 %v4997_v52 }
0x290c   :  { %v8285_v8 = vpop.eup %8284  ;;  %7692 = vmatprep.subr.msk.bf16.mxu0 %vm761_vm1, %v5067_v15 }
0x290d   :  { %v8287_v54 = vpop.eup %8286  ;;  %v4980_v42 = vmul.f32 %v8285_v8, %v8279_v29  ;;  %v5069_v59 = vpop.permute.xlu1 %5068 }
0x290e   :  { %v4982_v11 = vmul.f32 %v8287_v54, %v8281_v22  ;;  %v5080_v43 = vsel %vm761_vm1, %v5069_v59, 0 }
0x290f   :  { %v4983_v32 = vpack.c.bf16 %v4980_v42, %v4978_v13 }
0x2910   :  { %v4984_v20 = vpack.c.bf16 %v4982_v11, %v4982_v11 }
0x2911   :  { %7599 = vmatprep.mubr.msk.bf16.mxu0 %vm828_vm3, %v4983_v32  ;;  %v5065_v53 = vpop.permute.xlu1 %5064 }
0x2912   :  { %7600 = vmatmul.mubr.msk.bf16.vlgmr.msra.gmra.mrb[120].mxu0 %vm828_vm3, %v4984_v20 }
0x2913   :  { %7607 = vmatprep.mubr.msk.bf16.mxu0 %vm761_vm1, %v5063_v26 }
0x2914   :  { %7604 = vmatpush3.bf16.xpose.msra.mxu0 %v5077_v38 }
0x2915   :  { %7693 = vmatprep.subr.msk.bf16.mxu0 %vm761_vm1, %v5069_v59 }
0x291c   :  { %7606 = vmatpush3.bf16.xpose.msra.mxu0 %v5080_v43 }
0x2923   :  { %7608 = vmatmul.mubr.msk.bf16.vlgmr.msra.gmra.mrb[124].mxu0 %vm761_vm1, %v5065_v53  ;;  %v7876_v53 = vld [vmem:[%s10725_s9 + $0x40] sm:$0xff]  }
0x2924   :  { %5738 = vmatprep.mubr.bf16.mxu0 %v8436_v1 }
0x29e5   :  { %v10158_v21 = vpop.f32.mrb[120].mxu0 }
0x29e6   :  { %v5033_v2 = vpop.f32.mrb[121].mxu0 }
0x29e7   :  { %v7602_v47 = vpop.f32.mrb[122].mxu0 }
0x29e8   :  { %v5036_v5 = vpop.f32.mrb[123].mxu0 }
0x29f6   :  { %v7609_v57 = vpop.f32.mrb[124].mxu0 }
0x29f7   :  { %v5116_v55 = vpop.f32.mrb[125].mxu0  ;;  %v5132_v7 = vmul.f32 0.17677669, %v7609_v57  ;;  %v7877_v57 = vld [vmem:[%s10725_s9 + $0x48] sm:$0xff]  }
0x29f8   :  { %v5130_v63 = vmul.f32 0.17677669, %v5116_v55  ;;  %v7610_v18 = vpop.f32.mrb[126].mxu0 }
0x29f9   :  { %v5119_v16 = vpop.f32.mrb[127].mxu0  ;;  %v5135_v29 = vadd.f32 %v5132_v7, %v8870_v50 }
0x29fa   :  { %v5133_v23 = vadd.f32 %v5130_v63, %v8870_v50  ;;  %v5131_v62 = vmul.f32 0.17677669, %v5119_v16  ;;  %v7878_v63 = vld [vmem:[%s10725_s9 + $0x50] sm:$0xff]  }
0x29fb   :  { %v5142_v51 = vsel %vm828_vm3, %v5135_v29, -inf }
0x29fc   :  { %v5134_v22 = vadd.f32 %v5131_v62, %v8870_v50  ;;  %v5136_v45 = vsel %vm828_vm3, %v5133_v23, -inf }
0x29fd   :  { %5137 = vmax.xlane.f32.xlu0 %v5136_v45 }
0x29fe   :  { %v5139_v34 = vsel %vm828_vm3, %v5134_v22, -inf }
0x29ff   :  { %5140 = vmax.xlane.f32.xlu1 %v5139_v34  ;;  %v7881_v34 = vld [vmem:[%s10725_s9 + $0x68] sm:$0xff]  }
0x2a01   :  { %5143 = vmax.xlane.f32.xlu0 %v5142_v51  ;;  %v7882_v51 = vld [vmem:[%s10725_s9 + $0x70] sm:$0xff]  }
0x2a8a   :  { %v5138_v61 = vpop.xlane.xlu0 %5137 }
0x2a8b   :  { %v5145_v40 = vsub.f32 %v5133_v23, %v5138_v61  ;;  %v7879_v23 = vld [vmem:[%s10725_s9 + $0x58] sm:$0xff]  }
0x2a8c   :  { %v5141_v12 = vpop.xlane.xlu1 %5140  ;;  %v7883_v61 = vld [vmem:[%s10725_s9 + $0x78] sm:$0xff]  }
0x2a8d   :  { %v5148_v28 = vmul.f32 1.442695, %v5145_v40  ;;  %v5146_v0 = vsub.f32 %v5134_v22, %v5141_v12  ;;  %v7880_v22 = vld [vmem:[%s10725_s9 + $0x60] sm:$0xff]  }
0x2a8e   :  { %v5144_v52 = vpop.xlane.xlu0 %5143 }
0x2a8f   :  { %8288 = vpow2.f32 %v5148_v28  ;;  %v5150_v15 = vmul.f32 1.442695, %v5146_v0  ;;  %v5147_v8 = vsub.f32 %v5135_v29, %v5144_v52 }
0x2a91   :  { %8290 = vpow2.f32 %v5150_v15  ;;  %v5152_v50 = vmul.f32 1.442695, %v5147_v8 }
0x2a93   :  { %8292 = vpow2.f32 %v5152_v50  ;;  %v10260_v50 = vld [vmem:[%s10726_s10 + $0x1] ss:$0 sm:$0xff] }
0x2a99   :  { %v8289_v54 = vpop.eup %8288 }
0x2a9a   :  { %v5154_v13 = vsel %vm828_vm3, %v8289_v54, 0.0 }
0x2a9b   :  { %v8291_v42 = vpop.eup %8290  ;;  %5155 = vadd.xlane.f32.xlu0 %v5154_v13 }
0x2a9c   :  { %v5157_v20 = vsel %vm828_vm3, %v8291_v42, 0.0 }
0x2a9d   :  { %v8293_v11 = vpop.eup %8292 }
0x2a9e   :  { %v5160_v32 = vsel %vm828_vm3, %v8293_v11, 0.0 }
0x2a9f   :  { %5161 = vadd.xlane.f32.xlu1 %v5160_v32  ;;  %5158 = vadd.xlane.f32.xlu0 %v5157_v20 }
0x2ab0   :  { %5173 = vrot.lane.b32.xlu1 %v9998_v25, %s8442_s0 }
0x2ab4   :  { %4133 = vrot.lane.b32.xlu1 %v10008_v14, %s8442_s0 }
0x2ab5   :  { %5171 = vrot.lane.b32.xlu0 %v9900_v31, %s8442_s0 }
0x2ab8   :  { %4135 = vrot.lane.b32.xlu1 %v10010_v24, %s8442_s0 }
0x2ab9   :  { %4319 = vrot.lane.b32.xlu0 %v10014_v27, %s8441_s30 }
0x2abc   :  { %4321 = vrot.lane.b32.xlu1 %v10016_v6, %s8441_s30 }
0x2abd   :  { %4505 = vrot.lane.b32.xlu0 %v10057_v41, %s8438_s4 }
0x2ac0   :  { %4507 = vrot.lane.b32.xlu1 %v10059_v37, %s8438_s4 }
0x2ac1   :  { %4137 = vrot.lane.b32.xlu0 %v10006_v39, %s8442_s0 }
0x2ac4   :  { %4864 = vrot.lane.b32.xlu1 %v10122_v17, %s8442_s0 }
0x2ac5   :  { %4323 = vrot.lane.b32.xlu0 %v10012_v9, %s8441_s30 }
0x2ac8   :  { %5050 = vrot.lane.b32.xlu1 %v5033_v2, %s8441_s30 }
0x2ac9   :  { %4509 = vrot.lane.b32.xlu0 %v10055_v35, %s8438_s4 }
0x2acd   :  { %4866 = vrot.lane.b32.xlu0 %v10124_v30, %s8442_s0 }
0x2ad1   :  { %5052 = vrot.lane.b32.xlu0 %v5036_v5, %s8441_s30 }
0x2b28   :  { %v5156_v31 = vpop.xlane.xlu0 %5155 }
0x2b29   :  { %8294 = vrcp.f32 %v5156_v31 }
0x2b2c   :  { %v5159_v25 = vpop.xlane.xlu0 %5158  ;;  %v5162_v39 = vpop.xlane.xlu1 %5161 }
0x2b2d   :  { %8296 = vrcp.f32 %v5159_v25 }
0x2b2e   :  { %8298 = vrcp.f32 %v5162_v39 }
0x2b30   :  { %v5172_v14 = vpop.permute.xlu0 %5171  ;;  %v5174_v24 = vpop.permute.xlu1 %5173 }
0x2b31   :  { %7611 = vmatprep.subr.bf16.mxu1 %v5172_v14  ;;  %v5183_v35 = vsel %vm872_vm5, %v5174_v24, 0 }
0x2b32   :  { %7612 = vmatpush3.bf16.msra.mxu1 %v5172_v14 }
0x2b33   :  { %7694 = vmatprep.subr.msk.bf16.mxu1 %vm872_vm5, %v5174_v24  ;;  %v8295_v6 = vpop.eup %8294 }
0x2b34   :  { %v4320_v9 = vpop.permute.xlu0 %4319  ;;  %v4134_v27 = vpop.permute.xlu1 %4133  ;;  %v5164_v26 = vmul.f32 %v8295_v6, %v8289_v54 }
0x2b35   :  { %4142 = vst.msk [vmem:[#allocation2] sm:$0xff] %vm1116_vm6, %v4134_v27 }
0x2b36   :  { %4328 = vst.msk [vmem:[#allocation2] sm:$0xff] %vm1303_vm7, %v4320_v9  ;;  %7614 = vmatpush3.bf16.msra.mxu1 %v5183_v35 }
0x2b37   :  { %v8297_v41 = vpop.eup %8296  ;;  %7619 = vmatprep.subr.bf16.mxu1 %v8437_v58 }
0x2b38   :  { %v8299_v37 = vpop.eup %8298  ;;  %v4506_v17 = vpop.permute.xlu0 %4505  ;;  %v5166_v38 = vmul.f32 %v8297_v41, %v8291_v42 }
0x2b39   :  { %v4136_v30 = vpop.permute.xlu1 %4135  ;;  %v5168_v59 = vmul.f32 %v8299_v37, %v8293_v11  ;;  %4514 = vst.msk [vmem:[#allocation2] sm:$0xff] %vm1490_vm8, %v4506_v17 }
0x2b3a   :  { %4143 = vst.msk [vmem:[#allocation2 + $0x8] sm:$0xff] %vm1116_vm6, %v4136_v30  ;;  %v5169_v43 = vpack.c.bf16 %v5166_v38, %v5164_v26  ;;  %v7886_v26 = vld [vmem:[%s10729_s13 + $0x104] ss:$16 sps:$4 sm:$0xff]   ;;  %v7887_v38 = vld [vmem:[%s10729_s13 + $0x108] ss:$16 sps:$4 sm:$0xff]  }
0x2b3b   :  { %v5170_v2 = vpack.c.bf16 %v5168_v59, %v5168_v59  ;;  %v7889_v59 = vld [vmem:[%s10729_s13 + $0x10c] ss:$16 sps:$4 sm:$0xff]   ;;  %5706 = vmatprep.subr.bf16.mxu0 %v7886_v26 }
0x2b3c   :  { %7615 = vmatprep.mubr.msk.bf16.mxu1 %vm828_vm3, %v5169_v43  ;;  %v4138_v47 = vpop.permute.xlu0 %4137 }
0x2b3d   :  { %v4322_v5 = vpop.permute.xlu1 %4321  ;;  %4144 = vst.msk [vmem:[#allocation2 + $0x10] sm:$0xff] %vm1116_vm6, %v4138_v47  ;;  %7616 = vmatmul.mubr.msk.bf16.vlgmr.msra.gmra.mrb[116].mxu1 %vm828_vm3, %v5170_v2 }
0x2b3e   :  { %4329 = vst.msk [vmem:[#allocation2 + $0x8] sm:$0xff] %vm1303_vm7, %v4322_v5  ;;  %7620 = vmatpush3.bf16.msra.mxu1 %v7876_v53  ;;  %7635 = vmatprep.mubr.msk.bf16.mxu1 %vm8440_vm4, %v8437_v58 }
0x2b3f   :  { %7621 = vmatprep.subr.bf16.mxu1 %v8437_v58 }
0x2b40   :  { %v4324_v55 = vpop.permute.xlu0 %4323  ;;  %v5248_v12 = vld [vmem:[#allocation2] sm:$0xff] }
0x2b41   :  { %v4508_v7 = vpop.permute.xlu1 %4507  ;;  %4330 = vst.msk [vmem:[#allocation2 + $0x10] sm:$0xff] %vm1303_vm7, %v4324_v55 }
0x2b42   :  { %4515 = vst.msk [vmem:[#allocation2 + $0x8] sm:$0xff] %vm1490_vm8, %v4508_v7  ;;  %7622 = vmatpush3.bf16.msra.mxu1 %v7877_v57 }
0x2b43   :  { %7623 = vmatprep.subr.bf16.mxu1 %v8437_v58 }
0x2b44   :  { %v4510_v18 = vpop.permute.xlu0 %4509 }
0x2b45   :  { %v4865_v16 = vpop.permute.xlu1 %4864  ;;  %4516 = vst.msk [vmem:[#allocation2 + $0x10] sm:$0xff] %vm1490_vm8, %v4510_v18 }
0x2b46   :  { %4873 = vst.msk [vmem:[#allocation2 + $0x18] sm:$0xff] %vm1116_vm6, %v4865_v16  ;;  %7624 = vmatpush3.bf16.msra.mxu1 %v7878_v63 }
0x2b47   :  { %7625 = vmatprep.subr.bf16.mxu1 %v8437_v58 }
0x2b48   :  { %v4867_v62 = vpop.permute.xlu0 %4866 }
0x2b49   :  { %v5051_v29 = vpop.permute.xlu1 %5050  ;;  %4874 = vst.msk [vmem:[#allocation2 + $0x20] sm:$0xff] %vm1116_vm6, %v4867_v62  ;;  %v5249_v40 = vld [vmem:[#allocation2 + $0x8] sm:$0xff] }
0x2b4a   :  { %5059 = vst.msk [vmem:[#allocation2 + $0x18] sm:$0xff] %vm1303_vm7, %v5051_v29  ;;  %7626 = vmatpush3.bf16.msra.mxu1 %v7879_v23  ;;  %v5273_v28 = vpack.c.bf16 %v5249_v40, %v5248_v12  ;;  %v7898_v40 = vld [vmem:[%s10729_s13 + $0x144] ss:$16 sps:$4 sm:$0xff]   ;;  %v7899_v12 = vld [vmem:[%s10729_s13 + $0x148] ss:$16 sps:$4 sm:$0xff]  }
0x2b4b   :  { %7627 = vmatprep.subr.bf16.mxu1 %v8437_v58 }
0x2b4c   :  { %v5053_v45 = vpop.permute.xlu0 %5052  ;;  %v5250_v14 = vld [vmem:[#allocation2 + $0x10] sm:$0xff] }
0x2b4d   :  { %5060 = vst.msk [vmem:[#allocation2 + $0x20] sm:$0xff] %vm1303_vm7, %v5053_v45  ;;  %v7890_v45 = vld [vmem:[%s10729_s13 + $0x120] ss:$16 sps:$4 sm:$0xff]  }
0x2b4e   :  { %7628 = vmatpush3.bf16.msra.mxu1 %v7880_v22 }
0x2b4f   :  { %7629 = vmatprep.subr.bf16.mxu1 %v8437_v58 }
0x2b52   :  { %7630 = vmatpush3.bf16.msra.mxu1 %v7881_v34  ;;  %v7893_v34 = vld [vmem:[%s10729_s13 + $0x128] ss:$16 sps:$4 sm:$0xff]  }
0x2b53   :  { %7631 = vmatprep.subr.bf16.mxu1 %v8437_v58 }
0x2b56   :  { %7632 = vmatpush3.bf16.msra.mxu1 %v7882_v51  ;;  %v7895_v51 = vld [vmem:[%s10729_s13 + $0x12c] ss:$16 sps:$4 sm:$0xff]  }
0x2b57   :  { %7633 = vmatprep.subr.bf16.mxu1 %v8437_v58 }
0x2b5a   :  { %7634 = vmatpush3.bf16.msra.mxu1 %v7883_v61  ;;  %v7896_v61 = vld [vmem:[%s10729_s13 + $0x140] ss:$16 sps:$4 sm:$0xff]  }
0x2b5b   :  { %5769 = vmatprep.subr.bf16.mxu1 %v7889_v59 }
0x2b5d   :  { %7636 = vmatmul.mubr.bf16.vlgmr.msra.gmra.mrb[120].mxu1 %v5273_v28  ;;  %v7901_v28 = vld [vmem:[%s10729_s13 + $0x14c] ss:$16 sps:$4 sm:$0xff]  }
0x2b5e   :  { %7639 = vmatprep.mubr.msk.bf16.mxu1 %vm8440_vm4, %v8437_v58  ;;  %5770 = vmatpush1.bf16.msra.mxu1 %v7887_v38 }
0x2b5f   :  { %5771 = vmatprep.subr.bf16.mxu1 %v7895_v51 }
0x2b62   :  { %5772 = vmatpush1.bf16.msra.mxu1 %v7893_v34 }
0x2b63   :  { %5773 = vmatprep.subr.bf16.mxu1 %v7901_v28 }
0x2b66   :  { %5774 = vmatpush1.bf16.msra.mxu1 %v7899_v12 }
0x2c10   :  { %v7617_v0 = vpop.f32.mrb[116].mxu1 }
0x2c11   :  { %v5219_v52 = vpop.f32.mrb[117].mxu1 }
0x2c12   :  { %5236 = vrot.lane.b32.xlu1 %v5219_v52, %s8438_s4  ;;  %v7618_v15 = vpop.f32.mrb[118].mxu1  ;;  %v7907_v52 = vld [vmem:[%s10729_s13 + $0x16c] ss:$16 sps:$4 sm:$0xff]  }
0x2c13   :  { %v5222_v8 = vpop.f32.mrb[119].mxu1  ;;  %v7902_v15 = vld [vmem:[%s10729_s13 + $0x160] ss:$16 sps:$4 sm:$0xff]   ;;  %5775 = vmatprep.subr.bf16.mxu1 %v7907_v52 }
0x2c14   :  { %5238 = vrot.lane.b32.xlu0 %v5222_v8, %s8438_s4  ;;  %v7905_v8 = vld [vmem:[%s10729_s13 + $0x168] ss:$16 sps:$4 sm:$0xff]  }
0x2c15   :  { %5776 = vmatpush1.bf16.msra.mxu1 %v7905_v8 }
0x2c16   :  { %4868 = vrot.lane.b32.xlu1 %v10120_v33, %s8442_s0 }
0x2c1a   :  { %5054 = vrot.lane.b32.xlu1 %v10158_v21, %s8441_s30 }
0x2c1e   :  { %5240 = vrot.lane.b32.xlu1 %v7617_v0, %s8438_s4  ;;  %v7904_v0 = vld [vmem:[%s10729_s13 + $0x164] ss:$16 sps:$4 sm:$0xff]  }
0x2c30   :  { %v5364_v54 = vpop.f32.mrb[120].mxu1 }
0x2c31   :  { %v5365_v13 = vadd.f32 %v10260_v50, %v5364_v54  ;;  %v7637_v42 = vpop.f32.mrb[121].mxu1  ;;  %v7910_v54 = vld [vmem:[%s10729_s13 + $0x184] ss:$16 sps:$4 sm:$0xff]  }
0x2c32   :  { %v5367_v11 = vpop.f32.mrb[122].mxu1  ;;  %v7908_v42 = vld [vmem:[%s10729_s13 + $0x180] ss:$16 sps:$4 sm:$0xff]  }
0x2c33   :  { %v10264_v32 = vadd.f32 %v5365_v13, %v9671_v48  ;;  %v7638_v20 = vpop.f32.mrb[123].mxu1  ;;  %v5368_v33 = vadd.f32 %v10260_v50, %v5367_v11  ;;  %v7913_v13 = vld [vmem:[%s10729_s13 + $0x18c] ss:$16 sps:$4 sm:$0xff]   ;;  %v7911_v11 = vld [vmem:[%s10729_s13 + $0x188] ss:$16 sps:$4 sm:$0xff]  }
0x2c34   :  { %5777 = vmatprep.subr.bf16.mxu1 %v7913_v13  ;;  %v7916_v20 = vld [vmem:[%s10729_s13 + $0x1a4] ss:$16 sps:$4 sm:$0xff]  }
0x2c35   :  { %5397 = vadd.xlane.f32.xlu0 %v10264_v32  ;;  %v10269_v21 = vadd.f32 %v5368_v33, %v9675_v44  ;;  %5778 = vmatpush1.bf16.msra.mxu1 %v7911_v11  ;;  %v7919_v33 = vld [vmem:[%s10729_s13 + $0x1ac] ss:$16 sps:$4 sm:$0xff]  }
0x2c36   :  { %5779 = vmatprep.subr.bf16.mxu1 %v7919_v33 }
0x2c42   :  { %5399 = vadd.xlane.f32.xlu1 %v10269_v21 }
0x2c84   :  { %v5237_v31 = vpop.permute.xlu1 %5236 }
0x2c85   :  { %5245 = vst.msk [vmem:[#allocation2 + $0x18] sm:$0xff] %vm1490_vm8, %v5237_v31  ;;  %v7914_v31 = vld [vmem:[%s10729_s13 + $0x1a0] ss:$16 sps:$4 sm:$0xff]  }
0x2c86   :  { %v5239_v25 = vpop.permute.xlu0 %5238 }
0x2c87   :  { %5246 = vst.msk [vmem:[#allocation2 + $0x20] sm:$0xff] %vm1490_vm8, %v5239_v25  ;;  %v7917_v25 = vld [vmem:[%s10729_s13 + $0x1a8] ss:$16 sps:$4 sm:$0xff]  }
0x2c88   :  { %v4869_v39 = vpop.permute.xlu1 %4868  ;;  %5780 = vmatpush1.bf16.msra.mxu1 %v7917_v25 }
0x2c89   :  { %4875 = vst.msk [vmem:[#allocation2 + $0x28] sm:$0xff] %vm1116_vm6, %v4869_v39  ;;  %v7922_v39 = vld [vmem:[%s10729_s13 + $0x1c4] ss:$16 sps:$4 sm:$0xff]  }
0x2c8c   :  { %v5055_v48 = vpop.permute.xlu1 %5054  ;;  %v5251_v24 = vld [vmem:[#allocation2 + $0x18] sm:$0xff] }
0x2c8d   :  { %5061 = vst.msk [vmem:[#allocation2 + $0x28] sm:$0xff] %vm1303_vm7, %v5055_v48  ;;  %v5274_v9 = vpack.c.bf16 %v5251_v24, %v5250_v14  ;;  %v7925_v48 = vld [vmem:[%s10729_s13 + $0x1cc] ss:$16 sps:$4 sm:$0xff]   ;;  %v7920_v14 = vld [vmem:[%s10729_s13 + $0x1c0] ss:$16 sps:$4 sm:$0xff]  }
0x2c8e   :  { %v5252_v27 = vld [vmem:[#allocation2 + $0x20] sm:$0xff]  ;;  %v7923_v24 = vld [vmem:[%s10729_s13 + $0x1c8] ss:$16 sps:$4 sm:$0xff]   ;;  %5781 = vmatprep.subr.bf16.mxu1 %v7925_v48 }
0x2c8f   :  { %7640 = vmatmul.mubr.bf16.gmra.mrb[124].mxu1 %v5274_v9  ;;  %v7928_v9 = vld [vmem:[%s10729_s13 + $0x1e4] ss:$16 sps:$4 sm:$0xff]  }
0x2c90   :  { %v5241_v44 = vpop.permute.xlu1 %5240  ;;  %7643 = vmatprep.mubr.msk.bf16.mxu1 %vm8440_vm4, %v8437_v58  ;;  %v7884_v58 = vld [vmem:[%s10729_s13 + $0x100] ss:$16 sps:$4 sm:$0xff]   ;;  %5782 = vmatpush1.bf16.msra.mxu1 %v7923_v24 }
0x2c91   :  { %5247 = vst.msk [vmem:[#allocation2 + $0x28] sm:$0xff] %vm1490_vm8, %v5241_v44  ;;  %5707 = vmatpush1.bf16.msra.mxu0 %v7884_v58  ;;  %v7931_v44 = vld [vmem:[%s10729_s13 + $0x1ec] ss:$16 sps:$4 sm:$0xff]  }
0x2c92   :  { %5783 = vmatprep.subr.bf16.mxu1 %v7931_v44 }
0x2c98   :  { %v5253_v6 = vld [vmem:[#allocation2 + $0x28] sm:$0xff] }
0x2c99   :  { %v5275_v35 = vpack.c.bf16 %v5253_v6, %v5252_v27  ;;  %v7926_v27 = vld [vmem:[%s10729_s13 + $0x1e0] ss:$16 sps:$4 sm:$0xff]   ;;  %v7929_v6 = vld [vmem:[%s10729_s13 + $0x1e8] ss:$16 sps:$4 sm:$0xff]  }
0x2c9a   :  { %5784 = vmatpush1.bf16.msra.mxu1 %v7929_v6  ;;  %v7933_v6 = vld [vmem:[%s10731_s15 + $0x1c0] sm:$0xff]  }
0x2c9b   :  { %7644 = vmatmul.mubr.bf16.gmra.mrb[128].mxu1 %v5275_v35  ;;  %7245 = vmatprep.subr.bf16.mxu1 %v7933_v6 }
0x2c9c   :  { %5801 = vmatprep.mubr.bf16.mxu1 %v8436_v1 }
0x2cc2   :  { %v5398_v43 = vpop.xlane.xlu0 %5397 }
0x2cc3   :  { %v5409_v57 = vmul.f32 0.0078125, %v5398_v43 }
0x2cc5   :  { %v10304_v18 = vsub.f32 %v10264_v32, %v5409_v57 }
0x2cc7   :  { %v5421_v23 = vmul.f32 %v10304_v18, %v10304_v18 }
0x2ccf   :  { %v5400_v41 = vpop.xlane.xlu1 %5399 }
0x2cd0   :  { %v5410_v37 = vmul.f32 0.0078125, %v5400_v41 }
0x2cd2   :  { %v10281_v17 = vsub.f32 %v10269_v21, %v5410_v37 }
0x2cd4   :  { %v5422_v30 = vmul.f32 %v10281_v17, %v10281_v17 }
0x2cd6   :  { %5429 = vadd.xlane.f32.xlu1 %v5422_v30 }
0x2d62   :  { %v5372_v53 = vpop.f32.mrb[124].mxu1 }
0x2d63   :  { %v5373_v2 = vadd.f32 %v10260_v50, %v5372_v53  ;;  %v7641_v47 = vpop.f32.mrb[125].mxu1  ;;  %v5430_v35 = vpop.xlane.xlu1 %5429 }
0x2d64   :  { %v5375_v5 = vpop.f32.mrb[126].mxu1  ;;  %v5440_v41 = vmul.f32 0.0078125, %v5430_v35  ;;  %v7934_v35 = vld [vmem:[%s10731_s15 + $0x100] sm:$0xff]  }
0x2d65   :  { %v10299_v55 = vadd.f32 %v5373_v2, %v9692_v36  ;;  %v5376_v7 = vadd.f32 %v10260_v50, %v5375_v5  ;;  %v7642_v63 = vpop.f32.mrb[127].mxu1 }
0x2d66   :  { %v5446_v58 = vadd.f32 1e-05, %v5440_v41  ;;  %v7935_v41 = vld [vmem:[%s10731_s15 + $0x180] sm:$0xff]  }
0x2d67   :  { %5401 = vadd.xlane.f32.xlu0 %v10299_v55  ;;  %v10307_v16 = vadd.f32 %v5376_v7, %v9696_v49  ;;  %v7892_v49 = vld [vmem:[%s10729_s13 + $0x124] ss:$16 sps:$4 sm:$0xff]  }
0x2d68   :  { %5708 = vmatprep.subr.bf16.mxu0 %v7892_v49  ;;  %8300 = vrsqrt.f32 %v5446_v58  ;;  %v7939_v58 = vld [vmem:[%s10731_s15 + $0x188] sm:$0xff]  }
0x2d69   :  { %5709 = vmatpush1.bf16.msra.mxu0 %v7890_v45 }
0x2d6a   :  { %5710 = vmatprep.subr.bf16.mxu0 %v7898_v40 }
0x2d6b   :  { %5403 = vadd.xlane.f32.xlu0 %v10307_v16 }
0x2d6d   :  { %5711 = vmatpush1.bf16.msra.mxu0 %v7896_v61 }
0x2d6e   :  { %v10312_v62 = vpop.f32.mrb[128].mxu1  ;;  %5712 = vmatprep.subr.bf16.mxu0 %v7904_v0 }
0x2d6f   :  { %5427 = vadd.xlane.f32.xlu0 %v5421_v23  ;;  %v7645_v36 = vpop.f32.mrb[129].mxu1  ;;  %v5381_v59 = vadd.f32 %v10260_v50, %v10312_v62 }
0x2d70   :  { %v10314_v29 = vpop.f32.mrb[130].mxu1 }
0x2d71   :  { %v7646_v22 = vpop.f32.mrb[131].mxu1  ;;  %5713 = vmatpush1.bf16.msra.mxu0 %v7902_v15  ;;  %v10405_v5 = vadd.f32 %v5381_v59, %v9797_v19  ;;  %v5384_v57 = vadd.f32 %v10260_v50, %v10314_v29  ;;  %v10418_v19 = vld [vmem:[%s10727_s11 + $0x1] ss:$0 sm:$0xff]  ;;  %v7942_v59 = vld [vmem:[%s10731_s15 + $0x110] sm:$0xff]  }
0x2d72   :  { %5714 = vmatprep.subr.bf16.mxu0 %v7910_v54  ;;  %v8301_v36 = vpop.eup %8300 }
0x2d73   :  { %v10411_v62 = vadd.f32 %v5384_v57, %v9801_v10  ;;  %v5458_v22 = vmul.f32 %v8301_v36, %v10281_v17  ;;  %v10425_v10 = vld [vmem:[%s10728_s12 + $0x1] ss:$0 sm:$0xff]  ;;  %v7947_v57 = vld [vmem:[%s10731_s15 + $0x198] sm:$0xff]  }
0x2d74   :  { %v7951_v36 = vld [vmem:[%s10731_s15 + $0x1a0] sm:$0xff]  }
0x2d75   :  { %5715 = vmatpush1.bf16.msra.mxu0 %v7908_v42  ;;  %v5470_v45 = vmul.f32 %v10418_v19, %v5458_v22  ;;  %v7952_v22 = vld [vmem:[%s10731_s15 + $0x168] sm:$0xff]  }
0x2d76   :  { %5716 = vmatprep.subr.bf16.mxu0 %v7916_v20 }
0x2d77   :  { %v5482_v17 = vadd.f32 %v10425_v10, %v5470_v45  ;;  %v7955_v45 = vld [vmem:[%s10731_s15 + $0x1a8] sm:$0xff]  }
0x2d79   :  { %5717 = vmatpush1.bf16.msra.mxu0 %v7914_v31 }
0x2d7a   :  { %5718 = vmatprep.subr.bf16.mxu0 %v7922_v39 }
0x2d7d   :  { %5719 = vmatpush1.bf16.msra.mxu0 %v7920_v14 }
0x2d7e   :  { %5720 = vmatprep.subr.bf16.mxu0 %v7928_v9 }
0x2d81   :  { %5721 = vmatpush1.bf16.msra.mxu0 %v7926_v27  ;;  %v7932_v27 = vld [vmem:[%s10731_s15 + $0x140] sm:$0xff]  }
0x2d82   :  { %7211 = vmatprep.subr.bf16.mxu0 %v7932_v27 }
0x2df4   :  { %v5402_v37 = vpop.xlane.xlu0 %5401 }
0x2df5   :  { %v5411_v30 = vmul.f32 0.0078125, %v5402_v37  ;;  %v7936_v37 = vld [vmem:[%s10731_s15 + $0x148] sm:$0xff]  }
0x2df7   :  { %v5417_v26 = vsub.f32 %v10299_v55, %v5411_v30  ;;  %v7938_v30 = vld [vmem:[%s10731_s15 + $0x108] sm:$0xff]  }
0x2df8   :  { %v5404_v38 = vpop.xlane.xlu0 %5403 }
0x2df9   :  { %v5412_v43 = vmul.f32 0.0078125, %v5404_v38  ;;  %v5423_v53 = vmul.f32 %v5417_v26, %v5417_v26  ;;  %v7941_v38 = vld [vmem:[%s10731_s15 + $0x1d0] sm:$0xff]  }
0x2dfb   :  { %v5418_v2 = vsub.f32 %v10307_v16, %v5412_v43  ;;  %5431 = vadd.xlane.f32.xlu0 %v5423_v53  ;;  %v7943_v43 = vld [vmem:[%s10731_s15 + $0x190] sm:$0xff]   ;;  %v7944_v53 = vld [vmem:[%s10731_s15 + $0x158] sm:$0xff]  }
0x2dfc   :  { %v5428_v47 = vpop.xlane.xlu0 %5427 }
0x2dfd   :  { %v5439_v7 = vmul.f32 0.0078125, %v5428_v47  ;;  %v5424_v63 = vmul.f32 %v5418_v2, %v5418_v2  ;;  %v7946_v47 = vld [vmem:[%s10731_s15 + $0x118] sm:$0xff]  }
0x2dff   :  { %v5445_v23 = vadd.f32 1e-05, %v5439_v7  ;;  %5405 = vadd.xlane.f32.xlu0 %v10405_v5  ;;  %5433 = vadd.xlane.f32.xlu1 %v5424_v63  ;;  %v7948_v7 = vld [vmem:[%s10731_s15 + $0x160] sm:$0xff]  }
0x2e00   :  { %v7949_v63 = vld [vmem:[%s10731_s15 + $0x1e0] sm:$0xff]  }
0x2e01   :  { %8302 = vrsqrt.f32 %v5445_v23  ;;  %v7950_v23 = vld [vmem:[%s10731_s15 + $0x120] sm:$0xff]  }
0x2e03   :  { %5407 = vadd.xlane.f32.xlu1 %v10411_v62 }
0x2e0b   :  { %v8303_v50 = vpop.eup %8302 }
0x2e0c   :  { %v5457_v29 = vmul.f32 %v8303_v50, %v10304_v18  ;;  %v7953_v50 = vld [vmem:[%s10731_s15 + $0x1e8] sm:$0xff]  }
0x2e0e   :  { %v5469_v49 = vmul.f32 %v10418_v19, %v5457_v29  ;;  %v7954_v29 = vld [vmem:[%s10731_s15 + $0x128] sm:$0xff]  }
0x2e10   :  { %v5481_v34 = vadd.f32 %v10425_v10, %v5469_v49  ;;  %v7956_v49 = vld [vmem:[%s10731_s15 + $0x170] sm:$0xff]  }
0x2e12   :  { %v5522_v51 = vpack.c.bf16 %v5482_v17, %v5481_v34  ;;  %v7957_v34 = vld [vmem:[%s10731_s15 + $0x1f0] sm:$0xff]  }
0x2e13   :  { %v7958_v17 = vld [vmem:[%s10731_s15 + $0x130] sm:$0xff]  }
0x2e14   :  { %5739 = vmatmul.mubr.bf16.vlgmr.msra.gmra.mrb[128].mxu0 %v5522_v51  ;;  %5802 = vmatmul.mubr.bf16.vlgmr.msra.gmra.mrb[132].mxu1 %v5522_v51  ;;  %v7959_v51 = vld [vmem:[%s10731_s15 + $0x1b0] sm:$0xff]  }
0x2e15   :  { %5748 = vmatprep.mubr.bf16.mxu0 %v8436_v1  ;;  %5811 = vmatprep.mubr.bf16.mxu1 %v8436_v1 }
0x2e16   :  { %7212 = vmatpush3.bf16.msra.mxu0 %v7934_v35  ;;  %7246 = vmatpush3.bf16.msra.mxu1 %v7935_v41 }
0x2e17   :  { %7213 = vmatprep.subr.bf16.mxu0 %v7936_v37 }
0x2e1a   :  { %7214 = vmatpush3.bf16.msra.mxu0 %v7938_v30 }
0x2e88   :  { %v5432_v18 = vpop.xlane.xlu0 %5431 }
0x2e89   :  { %v5441_v61 = vmul.f32 0.0078125, %v5432_v18  ;;  %v7960_v18 = vld [vmem:[%s10731_s15 + $0x178] sm:$0xff]  }
0x2e8b   :  { %v5447_v40 = vadd.f32 1e-05, %v5441_v61  ;;  %v7961_v61 = vld [vmem:[%s10731_s15 + $0x1f8] sm:$0xff]  }
0x2e8c   :  { %v5406_v12 = vpop.xlane.xlu0 %5405  ;;  %v5434_v28 = vpop.xlane.xlu1 %5433 }
0x2e8d   :  { %8304 = vrsqrt.f32 %v5447_v40  ;;  %v5413_v0 = vmul.f32 0.0078125, %v5406_v12  ;;  %v5442_v52 = vmul.f32 0.0078125, %v5434_v28  ;;  %v7962_v40 = vld [vmem:[%s10731_s15 + $0x138] sm:$0xff]   ;;  %v6816_v28 = vld [vmem:[%s10730_s14 + $0x4] sm:$0xf] }
0x2e8e   :  { %v7963_v12 = vld [vmem:[%s10731_s15 + $0x1b8] sm:$0xff]  }
0x2e8f   :  { %v10433_v15 = vsub.f32 %v10405_v5, %v5413_v0  ;;  %v5448_v8 = vadd.f32 1e-05, %v5442_v52  ;;  %v10548_v0 = vrot.slane %v6816_v28, %v8786_v3  ;;  %v10551_v52 = vrot.slane %v6816_v28, %v8918_v46 }
0x2e90   :  { %v5408_v54 = vpop.xlane.xlu1 %5407 }
0x2e91   :  { %8306 = vrsqrt.f32 %v5448_v8  ;;  %v5414_v13 = vmul.f32 0.0078125, %v5408_v54  ;;  %v5425_v42 = vmul.f32 %v10433_v15, %v10433_v15  ;;  %v10554_v8 = vrot.slane %v6816_v28, %v8795_v60 }
0x2e92   :  { %v10558_v54 = vrot.slane %v6816_v28, %v2511_v4 }
0x2e93   :  { %v10438_v11 = vsub.f32 %v10411_v62, %v5414_v13  ;;  %5435 = vadd.xlane.f32.xlu0 %v5425_v42 }
0x2e95   :  { %v5426_v20 = vmul.f32 %v10438_v11, %v10438_v11 }
0x2e97   :  { %v8305_v33 = vpop.eup %8304  ;;  %5437 = vadd.xlane.f32.xlu1 %v5426_v20 }
0x2e98   :  { %v5459_v31 = vmul.f32 %v8305_v33, %v5417_v26  ;;  %v7940_v26 = vld [vmem:[%s10731_s15 + $0x150] sm:$0xff]  }
0x2e99   :  { %7215 = vmatprep.subr.bf16.mxu0 %v7940_v26 }
0x2e9a   :  { %v5471_v48 = vmul.f32 %v10418_v19, %v5459_v31  ;;  %7216 = vmatpush3.bf16.msra.mxu0 %v7942_v59 }
0x2e9b   :  { %v8307_v25 = vpop.eup %8306  ;;  %7217 = vmatprep.subr.bf16.mxu0 %v7944_v53 }
0x2e9c   :  { %v5460_v39 = vmul.f32 %v8307_v25, %v5418_v2  ;;  %v5483_v24 = vadd.f32 %v10425_v10, %v5471_v48  ;;  %v7945_v2 = vld [vmem:[%s10731_s15 + $0x1d8] sm:$0xff]  }
0x2e9e   :  { %v5472_v14 = vmul.f32 %v10418_v19, %v5460_v39  ;;  %7218 = vmatpush3.bf16.msra.mxu0 %v7946_v47 }
0x2e9f   :  { %7219 = vmatprep.subr.bf16.mxu0 %v7948_v7 }
0x2ea0   :  { %v5484_v9 = vadd.f32 %v10425_v10, %v5472_v14 }
0x2ea2   :  { %v5523_v44 = vpack.c.bf16 %v5484_v9, %v5483_v24  ;;  %7220 = vmatpush3.bf16.msra.mxu0 %v7950_v23 }
0x2ea3   :  { %7221 = vmatprep.subr.bf16.mxu0 %v7952_v22 }
0x2ea4   :  { %5749 = vmatmul.mubr.bf16.gmra.mrb[132].mxu0 %v5523_v44  ;;  %5812 = vmatmul.mubr.bf16.gmra.mrb[136].mxu1 %v5523_v44 }
0x2ea5   :  { %5758 = vmatprep.mubr.bf16.mxu0 %v8436_v1  ;;  %5821 = vmatprep.mubr.bf16.mxu1 %v8436_v1  ;;  %v7937_v1 = vld [vmem:[%s10731_s15 + $0x1c8] sm:$0xff]  }
0x2ea6   :  { %7247 = vmatprep.subr.bf16.mxu1 %v7937_v1  ;;  %7222 = vmatpush3.bf16.msra.mxu0 %v7954_v29 }
0x2ea7   :  { %7248 = vmatpush3.bf16.msra.mxu1 %v7939_v58  ;;  %7223 = vmatprep.subr.bf16.mxu0 %v7956_v49 }
0x2ea8   :  { %7249 = vmatprep.subr.bf16.mxu1 %v7941_v38 }
0x2eaa   :  { %7224 = vmatpush3.bf16.msra.mxu0 %v7958_v17 }
0x2eab   :  { %7250 = vmatpush3.bf16.msra.mxu1 %v7943_v43  ;;  %7225 = vmatprep.subr.bf16.mxu0 %v7960_v18 }
0x2eac   :  { %7251 = vmatprep.subr.bf16.mxu1 %v7945_v2 }
0x2eae   :  { %7226 = vmatpush3.bf16.msra.mxu0 %v7962_v40 }
0x2eaf   :  { %7252 = vmatpush3.bf16.msra.mxu1 %v7947_v57 }
0x2eb0   :  { %7253 = vmatprep.subr.bf16.mxu1 %v7949_v63 }
0x2eb3   :  { %7254 = vmatpush3.bf16.msra.mxu1 %v7951_v36 }
0x2eb4   :  { %7255 = vmatprep.subr.bf16.mxu1 %v7953_v50 }
0x2eb7   :  { %7256 = vmatpush3.bf16.msra.mxu1 %v7955_v45 }
0x2eb8   :  { %7257 = vmatprep.subr.bf16.mxu1 %v7957_v34 }
0x2ebb   :  { %7258 = vmatpush3.bf16.msra.mxu1 %v7959_v51 }
0x2ebc   :  { %7259 = vmatprep.subr.bf16.mxu1 %v7961_v61 }
0x2ebf   :  { %7260 = vmatpush3.bf16.msra.mxu1 %v7963_v12 }
0x2ee7   :  { %v5740_v13 = vpop.f32.mrb[128].mxu0  ;;  %v5803_v42 = vpop.f32.mrb[132].mxu1 }
0x2ee8   :  { %v10561_v20 = vadd.f32 %v5740_v13, %v10548_v0  ;;  %v10564_v33 = vadd.f32 %v5803_v42, %v10551_v52  ;;  %v5742_v3 = vpop.f32.mrb[129].mxu0  ;;  %v5805_v31 = vpop.f32.mrb[133].mxu1 }
0x2ee9   :  { %v10567_v46 = vadd.f32 %v5742_v3, %v10554_v8  ;;  %v10570_v60 = vadd.f32 %v5805_v31, %v10558_v54  ;;  %v5744_v25 = vpop.f32.mrb[130].mxu0  ;;  %v5807_v56 = vpop.f32.mrb[134].mxu1 }
0x2eea   :  { %v6849_v4 = vmul.f32 -1.702, %v10561_v20  ;;  %v6851_v39 = vmul.f32 -1.702, %v10564_v33  ;;  %v5745_v48 = vadd.f32 %v5744_v25, %v10548_v0  ;;  %v5808_v14 = vadd.f32 %v5807_v56, %v10551_v52  ;;  %v5746_v24 = vpop.f32.mrb[131].mxu0  ;;  %v5809_v9 = vpop.f32.mrb[135].mxu1 }
0x2eeb   :  { %v6850_v44 = vmul.f32 -1.702, %v10567_v46  ;;  %v6852_v27 = vmul.f32 -1.702, %v10570_v60  ;;  %v5747_v6 = vadd.f32 %v5746_v24, %v10554_v8  ;;  %v5810_v35 = vadd.f32 %v5809_v9, %v10558_v54 }
0x2eec   :  { %v5880_v41 = vmul.f32 1.442695, %v6849_v4  ;;  %v5884_v37 = vmul.f32 1.442695, %v6851_v39  ;;  %v6853_v1 = vmul.f32 -1.702, %v5745_v48 }
0x2eed   :  { %v5882_v30 = vmul.f32 1.442695, %v6850_v44  ;;  %v5886_v58 = vmul.f32 1.442695, %v6852_v27  ;;  %v6855_v26 = vmul.f32 -1.702, %v5808_v14 }
0x2eee   :  { %8308 = vpow2.f32 %v5880_v41  ;;  %v5888_v38 = vmul.f32 1.442695, %v6853_v1  ;;  %v6854_v59 = vmul.f32 -1.702, %v5747_v6  ;;  %v6856_v43 = vmul.f32 -1.702, %v5810_v35 }
0x2eef   :  { %8310 = vpow2.f32 %v5884_v37  ;;  %v5892_v53 = vmul.f32 1.442695, %v6855_v26 }
0x2ef0   :  { %8312 = vpow2.f32 %v5882_v30  ;;  %v5890_v2 = vmul.f32 1.442695, %v6854_v59  ;;  %v5894_v47 = vmul.f32 1.442695, %v6856_v43 }
0x2ef1   :  { %8314 = vpow2.f32 %v5886_v58 }
0x2ef2   :  { %8316 = vpow2.f32 %v5888_v38 }
0x2ef3   :  { %8318 = vpow2.f32 %v5892_v53 }
0x2ef4   :  { %8320 = vpow2.f32 %v5890_v2 }
0x2ef5   :  { %8322 = vpow2.f32 %v5894_v47 }
0x2ef8   :  { %v8309_v57 = vpop.eup %8308 }
0x2ef9   :  { %v8311_v7 = vpop.eup %8310  ;;  %v5928_v63 = vadd.f32 1.0, %v8309_v57 }
0x2efa   :  { %v8313_v23 = vpop.eup %8312  ;;  %v5930_v36 = vadd.f32 1.0, %v8311_v7 }
0x2efb   :  { %v8315_v22 = vpop.eup %8314  ;;  %8324 = vrcp.f32 %v5928_v63  ;;  %v5929_v50 = vadd.f32 1.0, %v8313_v23 }
0x2efc   :  { %v8317_v29 = vpop.eup %8316  ;;  %8326 = vrcp.f32 %v5930_v36  ;;  %v5931_v45 = vadd.f32 1.0, %v8315_v22 }
0x2efd   :  { %v8319_v49 = vpop.eup %8318  ;;  %8328 = vrcp.f32 %v5929_v50  ;;  %v5932_v34 = vadd.f32 1.0, %v8317_v29 }
0x2efe   :  { %v8321_v17 = vpop.eup %8320  ;;  %8330 = vrcp.f32 %v5931_v45  ;;  %v5934_v51 = vadd.f32 1.0, %v8319_v49 }
0x2eff   :  { %v8323_v18 = vpop.eup %8322  ;;  %8332 = vrcp.f32 %v5932_v34  ;;  %v5933_v61 = vadd.f32 1.0, %v8321_v17 }
0x2f00   :  { %8334 = vrcp.f32 %v5934_v51  ;;  %v5935_v40 = vadd.f32 1.0, %v8323_v18 }
0x2f01   :  { %8336 = vrcp.f32 %v5933_v61 }
0x2f02   :  { %8338 = vrcp.f32 %v5935_v40 }
0x2f05   :  { %v8325_v12 = vpop.eup %8324 }
0x2f06   :  { %v8327_v28 = vpop.eup %8326  ;;  %v6000_v25 = vmul.f32 %v8325_v12, %v10561_v20 }
0x2f07   :  { %v8329_v13 = vpop.eup %8328  ;;  %v6002_v39 = vmul.f32 %v8327_v28, %v10564_v33 }
0x2f08   :  { %v8331_v42 = vpop.eup %8330  ;;  %v6001_v44 = vmul.f32 %v8329_v13, %v10567_v46 }
0x2f09   :  { %v8333_v3 = vpop.eup %8332  ;;  %v6003_v37 = vmul.f32 %v8331_v42, %v10570_v60 }
0x2f0a   :  { %v8335_v31 = vpop.eup %8334  ;;  %v6004_v56 = vmul.f32 %v8333_v3, %v5745_v48 }
0x2f0b   :  { %v8337_v4 = vpop.eup %8336  ;;  %v6006_v24 = vmul.f32 %v8335_v31, %v5808_v14 }
0x2f0c   :  { %v8339_v9 = vpop.eup %8338  ;;  %v6091_v27 = vpack.c.bf16 %v6004_v56, %v6000_v25  ;;  %v6005_v41 = vmul.f32 %v8337_v4, %v5747_v6 }
0x2f0d   :  { %v6093_v1 = vpack.c.bf16 %v6006_v24, %v6002_v39  ;;  %v6007_v30 = vmul.f32 %v8339_v9, %v5810_v35 }
0x2f0e   :  { %v6092_v58 = vpack.c.bf16 %v6005_v41, %v6001_v44 }
0x2f0f   :  { %v6094_v26 = vpack.c.bf16 %v6007_v30, %v6003_v37 }
0x2f20   :  { %v5436_v38 = vpop.xlane.xlu0 %5435 }
0x2f21   :  { %v5443_v59 = vmul.f32 0.0078125, %v5436_v38 }
0x2f23   :  { %v5449_v43 = vadd.f32 1e-05, %v5443_v59 }
0x2f24   :  { %v5438_v20 = vpop.xlane.xlu1 %5437 }
0x2f25   :  { %8340 = vrsqrt.f32 %v5449_v43  ;;  %v5444_v48 = vmul.f32 0.0078125, %v5438_v20 }
0x2f27   :  { %v5450_v53 = vadd.f32 1e-05, %v5444_v48 }
0x2f29   :  { %8342 = vrsqrt.f32 %v5450_v53 }
0x2f2f   :  { %v8341_v33 = vpop.eup %8340 }
0x2f30   :  { %v5461_v14 = vmul.f32 %v8341_v33, %v10433_v15 }
0x2f32   :  { %v5473_v60 = vmul.f32 %v10418_v19, %v5461_v14 }
0x2f33   :  { %v8343_v46 = vpop.eup %8342 }
0x2f34   :  { %v5462_v6 = vmul.f32 %v8343_v46, %v10438_v11  ;;  %v5485_v2 = vadd.f32 %v10425_v10, %v5473_v60 }
0x2f36   :  { %v5474_v35 = vmul.f32 %v10418_v19, %v5462_v6 }
0x2f38   :  { %v5486_v47 = vadd.f32 %v10425_v10, %v5474_v35 }
0x2f3a   :  { %v5524_v57 = vpack.c.bf16 %v5486_v47, %v5485_v2 }
0x2f3c   :  { %5759 = vmatmul.mubr.bf16.gmra.mrb[136].mxu0 %v5524_v57  ;;  %5822 = vmatmul.mubr.bf16.gmra.mrb[140].mxu1 %v5524_v57 }
0x2f3d   :  { %6333 = vmatprep.mubr.bf16.mxu0 %v6092_v58  ;;  %6390 = vmatprep.mubr.bf16.mxu1 %v6094_v26 }
0x2f44   :  { %6334 = vmatmul.mubr.bf16.vlgmr.msra.gmra.mrb[140].mxu0 %v6091_v27  ;;  %6391 = vmatmul.mubr.bf16.vlgmr.msra.gmra.mrb[144].mxu1 %v6093_v1 }
0x2f77   :  { %v5750_v7 = vpop.f32.mrb[132].mxu0  ;;  %v5813_v15 = vpop.f32.mrb[136].mxu1 }
0x2f78   :  { %v10591_v63 = vadd.f32 %v5750_v7, %v10548_v0  ;;  %v10594_v11 = vadd.f32 %v5813_v15, %v10551_v52  ;;  %v5752_v19 = vpop.f32.mrb[133].mxu0  ;;  %v5815_v23 = vpop.f32.mrb[137].mxu1 }
0x2f79   :  { %v10597_v36 = vadd.f32 %v5752_v19, %v10554_v8  ;;  %v10600_v10 = vadd.f32 %v5815_v23, %v10558_v54  ;;  %v5754_v22 = vpop.f32.mrb[134].mxu0  ;;  %v5817_v50 = vpop.f32.mrb[138].mxu1 }
0x2f7a   :  { %v6857_v29 = vmul.f32 -1.702, %v10591_v63  ;;  %v6859_v45 = vmul.f32 -1.702, %v10594_v11  ;;  %v5755_v49 = vadd.f32 %v5754_v22, %v10548_v0  ;;  %v5818_v34 = vadd.f32 %v5817_v50, %v10551_v52  ;;  %v5756_v17 = vpop.f32.mrb[135].mxu0  ;;  %v5819_v51 = vpop.f32.mrb[139].mxu1 }
0x2f7b   :  { %v6858_v18 = vmul.f32 -1.702, %v10597_v36  ;;  %v6860_v61 = vmul.f32 -1.702, %v10600_v10  ;;  %v5757_v40 = vadd.f32 %v5756_v17, %v10554_v8  ;;  %v5820_v12 = vadd.f32 %v5819_v51, %v10558_v54 }
0x2f7c   :  { %v5896_v28 = vmul.f32 1.442695, %v6857_v29  ;;  %v5900_v13 = vmul.f32 1.442695, %v6859_v45  ;;  %v6861_v42 = vmul.f32 -1.702, %v5755_v49 }
0x2f7d   :  { %v5898_v3 = vmul.f32 1.442695, %v6858_v18  ;;  %v5902_v31 = vmul.f32 1.442695, %v6860_v61  ;;  %v6863_v25 = vmul.f32 -1.702, %v5818_v34 }
0x2f7e   :  { %8344 = vpow2.f32 %v5896_v28  ;;  %v5904_v56 = vmul.f32 1.442695, %v6861_v42  ;;  %v6862_v4 = vmul.f32 -1.702, %v5757_v40  ;;  %v6864_v39 = vmul.f32 -1.702, %v5820_v12 }
0x2f7f   :  { %8346 = vpow2.f32 %v5900_v13  ;;  %v5908_v24 = vmul.f32 1.442695, %v6863_v25 }
0x2f80   :  { %8348 = vpow2.f32 %v5898_v3  ;;  %v5906_v9 = vmul.f32 1.442695, %v6862_v4  ;;  %v5910_v44 = vmul.f32 1.442695, %v6864_v39 }
0x2f81   :  { %8350 = vpow2.f32 %v5902_v31 }
0x2f82   :  { %8352 = vpow2.f32 %v5904_v56 }
0x2f83   :  { %8354 = vpow2.f32 %v5908_v24 }
0x2f84   :  { %8356 = vpow2.f32 %v5906_v9 }
0x2f85   :  { %8358 = vpow2.f32 %v5910_v44 }
0x2f88   :  { %v8345_v27 = vpop.eup %8344 }
0x2f89   :  { %v8347_v41 = vpop.eup %8346  ;;  %v5936_v37 = vadd.f32 1.0, %v8345_v27 }
0x2f8a   :  { %v8349_v1 = vpop.eup %8348  ;;  %v5938_v30 = vadd.f32 1.0, %v8347_v41 }
0x2f8b   :  { %v8351_v58 = vpop.eup %8350  ;;  %8360 = vrcp.f32 %v5936_v37  ;;  %v5937_v26 = vadd.f32 1.0, %v8349_v1 }
0x2f8c   :  { %v8353_v38 = vpop.eup %8352  ;;  %8362 = vrcp.f32 %v5938_v30  ;;  %v5939_v59 = vadd.f32 1.0, %v8351_v58 }
0x2f8d   :  { %v8355_v43 = vpop.eup %8354  ;;  %8364 = vrcp.f32 %v5937_v26  ;;  %v5940_v20 = vadd.f32 1.0, %v8353_v38 }
0x2f8e   :  { %v8357_v48 = vpop.eup %8356  ;;  %8366 = vrcp.f32 %v5939_v59  ;;  %v5942_v53 = vadd.f32 1.0, %v8355_v43 }
0x2f8f   :  { %v8359_v33 = vpop.eup %8358  ;;  %8368 = vrcp.f32 %v5940_v20  ;;  %v5941_v14 = vadd.f32 1.0, %v8357_v48  ;;  %v10649_v48 = vld [vmem:[%s10732_s16 + $0x1] ss:$0 sm:$0xff] }
0x2f90   :  { %8370 = vrcp.f32 %v5942_v53  ;;  %v5943_v46 = vadd.f32 1.0, %v8359_v33 }
0x2f91   :  { %8372 = vrcp.f32 %v5941_v14 }
0x2f92   :  { %8374 = vrcp.f32 %v5943_v46 }
0x2f95   :  { %v8361_v6 = vpop.eup %8360 }
0x2f96   :  { %v8363_v60 = vpop.eup %8362  ;;  %v6008_v7 = vmul.f32 %v8361_v6, %v10591_v63 }
0x2f97   :  { %v8365_v35 = vpop.eup %8364  ;;  %v6010_v23 = vmul.f32 %v8363_v60, %v10594_v11 }
0x2f98   :  { %v8367_v2 = vpop.eup %8366  ;;  %v6009_v29 = vmul.f32 %v8365_v35, %v10597_v36 }
0x2f99   :  { %v8369_v47 = vpop.eup %8368  ;;  %v6011_v51 = vmul.f32 %v8367_v2, %v10600_v10 }
0x2f9a   :  { %v8371_v57 = vpop.eup %8370  ;;  %v6012_v15 = vmul.f32 %v8369_v47, %v5755_v49 }
0x2f9b   :  { %v8373_v19 = vpop.eup %8372  ;;  %v6014_v22 = vmul.f32 %v8371_v57, %v5818_v34 }
0x2f9c   :  { %v8375_v50 = vpop.eup %8374  ;;  %v6013_v45 = vmul.f32 %v8373_v19, %v5757_v40  ;;  %v6095_v17 = vpack.c.bf16 %v6012_v15, %v6008_v7 }
0x2f9d   :  { %v6015_v18 = vmul.f32 %v8375_v50, %v5820_v12  ;;  %v6097_v61 = vpack.c.bf16 %v6014_v22, %v6010_v23 }
0x2f9e   :  { %v6096_v28 = vpack.c.bf16 %v6013_v45, %v6009_v29 }
0x2f9f   :  { %v6098_v13 = vpack.c.bf16 %v6015_v18, %v6011_v51 }
0x2fa0   :  { %6341 = vmatprep.mubr.bf16.mxu0 %v6096_v28 }
0x2fa1   :  { %6398 = vmatprep.mubr.bf16.mxu1 %v6098_v13  ;;  %6342 = vmatmul.mubr.bf16.gmra.mrb[144].mxu0 %v6095_v17 }
0x2fa2   :  { %6399 = vmatmul.mubr.bf16.gmra.mrb[148].mxu1 %v6097_v61 }
0x300f   :  { %v5760_v63 = vpop.f32.mrb[136].mxu0  ;;  %v5823_v49 = vpop.f32.mrb[140].mxu1 }
0x3010   :  { %v10615_v11 = vadd.f32 %v5760_v63, %v10548_v0  ;;  %v10618_v34 = vadd.f32 %v5823_v49, %v10551_v52  ;;  %v5762_v36 = vpop.f32.mrb[137].mxu0  ;;  %v5825_v40 = vpop.f32.mrb[141].mxu1 }
0x3011   :  { %v10621_v10 = vadd.f32 %v5762_v36, %v10554_v8  ;;  %v10624_v12 = vadd.f32 %v5825_v40, %v10558_v54  ;;  %v5764_v42 = vpop.f32.mrb[138].mxu0  ;;  %v5827_v3 = vpop.f32.mrb[142].mxu1 }
0x3012   :  { %v6865_v31 = vmul.f32 -1.702, %v10615_v11  ;;  %v6867_v25 = vmul.f32 -1.702, %v10618_v34  ;;  %v10629_v56 = vadd.f32 %v5764_v42, %v10548_v0  ;;  %v10632_v4 = vadd.f32 %v5827_v3, %v10551_v52  ;;  %v5766_v39 = vpop.f32.mrb[139].mxu0  ;;  %v5829_v24 = vpop.f32.mrb[143].mxu1 }
0x3013   :  { %v6866_v9 = vmul.f32 -1.702, %v10621_v10  ;;  %v6868_v44 = vmul.f32 -1.702, %v10624_v12  ;;  %v10637_v27 = vadd.f32 %v5766_v39, %v10554_v8  ;;  %v10640_v41 = vadd.f32 %v5829_v24, %v10558_v54 }
0x3014   :  { %v5912_v37 = vmul.f32 1.442695, %v6865_v31  ;;  %v5916_v1 = vmul.f32 1.442695, %v6867_v25  ;;  %v6869_v0 = vmul.f32 -1.702, %v10629_v56 }
0x3015   :  { %v5914_v30 = vmul.f32 1.442695, %v6866_v9  ;;  %v5918_v58 = vmul.f32 1.442695, %v6868_v44  ;;  %v6871_v52 = vmul.f32 -1.702, %v10632_v4 }
0x3016   :  { %8376 = vpow2.f32 %v5912_v37  ;;  %v5920_v26 = vmul.f32 1.442695, %v6869_v0  ;;  %v6870_v38 = vmul.f32 -1.702, %v10637_v27  ;;  %v6872_v59 = vmul.f32 -1.702, %v10640_v41 }
0x3017   :  { %8378 = vpow2.f32 %v5916_v1  ;;  %v5924_v8 = vmul.f32 1.442695, %v6871_v52  ;;  %v7227_v43 = vpop.f32.mrb[140].mxu0  ;;  %v7261_v20 = vpop.f32.mrb[144].mxu1 }
0x3018   :  { %8380 = vpow2.f32 %v5914_v30  ;;  %v5922_v54 = vmul.f32 1.442695, %v6870_v38  ;;  %v7228_v53 = vpop.f32.mrb[141].mxu0  ;;  %v7262_v33 = vpop.f32.mrb[145].mxu1  ;;  %v5926_v14 = vmul.f32 1.442695, %v6872_v59 }
0x3019   :  { %8382 = vpow2.f32 %v5918_v58  ;;  %v7229_v46 = vadd.f32 %v7228_v53, %v7227_v43  ;;  %v7263_v6 = vadd.f32 %v7262_v33, %v7261_v20  ;;  %v7230_v60 = vpop.f32.mrb[142].mxu0  ;;  %v7264_v35 = vpop.f32.mrb[146].mxu1 }
0x301a   :  { %8384 = vpow2.f32 %v5920_v26  ;;  %v7231_v2 = vpop.f32.mrb[143].mxu0  ;;  %v7265_v47 = vpop.f32.mrb[147].mxu1 }
0x301b   :  { %8386 = vpow2.f32 %v5924_v8  ;;  %v6336_v57 = vadd.f32 %v7229_v46, %v10649_v48  ;;  %v7232_v7 = vadd.f32 %v7231_v2, %v7230_v60  ;;  %v7266_v15 = vadd.f32 %v7265_v47, %v7264_v35 }
0x301c   :  { %8388 = vpow2.f32 %v5922_v54 }
0x301d   :  { %8390 = vpow2.f32 %v5926_v14  ;;  %v6393_v19 = vadd.f32 %v7263_v6, %v6336_v57  ;;  %v6339_v23 = vadd.f32 %v7232_v7, %v10649_v48 }
0x301f   :  { %v10654_v22 = vadd.f32 %v6393_v19, %v10264_v32  ;;  %v6396_v50 = vadd.f32 %v7266_v15, %v6339_v23 }
0x3020   :  { %v8377_v29 = vpop.eup %8376 }
0x3021   :  { %v8379_v45 = vpop.eup %8378  ;;  %v5944_v17 = vadd.f32 1.0, %v8377_v29  ;;  %6421 = vst [vmem:[%s10735_s19] sm:$0xff] %v10654_v22  ;;  %v6416_v51 = vadd.f32 %v6396_v50, %v10269_v21  ;;  %v6430_v18 = vsel %vm6429_vm9, %v10654_v22, 0.0 }
0x3022   :  { %v8381_v61 = vpop.eup %8380  ;;  %v5946_v28 = vadd.f32 1.0, %v8379_v45  ;;  %6431 = vadd.xlane.f32.xlu0 %v6430_v18 }
0x3023   :  { %v8383_v13 = vpop.eup %8382  ;;  %8392 = vrcp.f32 %v5944_v17  ;;  %v5945_v32 = vadd.f32 1.0, %v8381_v61  ;;  %6422 = vst [vmem:[%s10735_s19 + $0x8] sm:$0xff] %v6416_v51 }
0x3024   :  { %v8385_v63 = vpop.eup %8384  ;;  %8394 = vrcp.f32 %v5946_v28  ;;  %v5947_v49 = vadd.f32 1.0, %v8383_v13 }
0x3025   :  { %v8387_v36 = vpop.eup %8386  ;;  %8396 = vrcp.f32 %v5945_v32  ;;  %v5948_v40 = vadd.f32 1.0, %v8385_v63 }
0x3026   :  { %v8389_v21 = vpop.eup %8388  ;;  %8398 = vrcp.f32 %v5947_v49  ;;  %v5950_v42 = vadd.f32 1.0, %v8387_v36 }
0x3027   :  { %v8391_v3 = vpop.eup %8390  ;;  %8400 = vrcp.f32 %v5948_v40  ;;  %v5949_v31 = vadd.f32 1.0, %v8389_v21 }
0x3028   :  { %8402 = vrcp.f32 %v5950_v42  ;;  %v5951_v25 = vadd.f32 1.0, %v8391_v3 }
0x3029   :  { %8404 = vrcp.f32 %v5949_v31 }
0x302a   :  { %8406 = vrcp.f32 %v5951_v25 }
0x302d   :  { %v8393_v39 = vpop.eup %8392 }
0x302e   :  { %v8395_v24 = vpop.eup %8394  ;;  %v6016_v0 = vmul.f32 %v8393_v39, %v10615_v11 }
0x302f   :  { %v8397_v9 = vpop.eup %8396  ;;  %v6018_v52 = vmul.f32 %v8395_v24, %v10618_v34 }
0x3030   :  { %v8399_v44 = vpop.eup %8398  ;;  %v6017_v59 = vmul.f32 %v8397_v9, %v10621_v10 }
0x3031   :  { %v8401_v37 = vpop.eup %8400  ;;  %v6019_v20 = vmul.f32 %v8399_v44, %v10624_v12 }
0x3032   :  { %v8403_v1 = vpop.eup %8402  ;;  %v6020_v30 = vmul.f32 %v8401_v37, %v10629_v56 }
0x3033   :  { %v8405_v58 = vpop.eup %8404  ;;  %v6022_v26 = vmul.f32 %v8403_v1, %v10632_v4 }
0x3034   :  { %v8407_v38 = vpop.eup %8406  ;;  %v6021_v8 = vmul.f32 %v8405_v58, %v10637_v27  ;;  %v6099_v43 = vpack.c.bf16 %v6020_v30, %v6016_v0 }
0x3035   :  { %v6023_v54 = vmul.f32 %v8407_v38, %v10640_v41  ;;  %v6101_v53 = vpack.c.bf16 %v6022_v26, %v6018_v52  ;;  %v6428_v26 = vld [vmem:[%s10734_s18] sm:$0x1] }
0x3036   :  { %v6100_v33 = vpack.c.bf16 %v6021_v8, %v6017_v59 }
0x3037   :  { %v6102_v11 = vpack.c.bf16 %v6023_v54, %v6019_v20 }
0x3038   :  { %6349 = vmatprep.mubr.bf16.mxu0 %v6100_v33 }
0x3039   :  { %6406 = vmatprep.mubr.bf16.mxu1 %v6102_v11  ;;  %6350 = vmatmul.mubr.bf16.gmra.mrb[148].mxu0 %v6099_v43 }
0x303a   :  { %6407 = vmatmul.mubr.bf16.gmra.mrb[152].mxu1 %v6101_v53 }
0x3074   :  { %v7233_v34 = vpop.f32.mrb[144].mxu0 }
0x3075   :  { %v7267_v56 = vpop.f32.mrb[148].mxu1  ;;  %v7234_v4 = vpop.f32.mrb[145].mxu0 }
0x3076   :  { %v7235_v14 = vadd.f32 %v7234_v4, %v7233_v34  ;;  %v7268_v46 = vpop.f32.mrb[149].mxu1  ;;  %v7236_v10 = vpop.f32.mrb[146].mxu0 }
0x3077   :  { %v7269_v6 = vadd.f32 %v7268_v46, %v7267_v56  ;;  %v7270_v27 = vpop.f32.mrb[150].mxu1  ;;  %v7237_v60 = vpop.f32.mrb[147].mxu0 }
0x3078   :  { %v6344_v12 = vadd.f32 %v7235_v14, %v10649_v48  ;;  %v7238_v35 = vadd.f32 %v7237_v60, %v7236_v10  ;;  %v7271_v41 = vpop.f32.mrb[151].mxu1 }
0x3079   :  { %v7272_v2 = vadd.f32 %v7271_v41, %v7270_v27 }
0x307a   :  { %v6401_v47 = vadd.f32 %v7269_v6, %v6344_v12  ;;  %v6347_v57 = vadd.f32 %v7238_v35, %v10649_v48 }
0x307c   :  { %v6417_v7 = vadd.f32 %v6401_v47, %v10299_v55  ;;  %v6404_v15 = vadd.f32 %v7272_v2, %v6347_v57 }
0x307e   :  { %6423 = vst [vmem:[%s10735_s19 + $0x10] sm:$0xff] %v6417_v7  ;;  %v6418_v19 = vadd.f32 %v6404_v15, %v10307_v16 }
0x3080   :  { %6424 = vst [vmem:[%s10735_s19 + $0x18] sm:$0xff] %v6418_v19  ;;  %v6446_v23 = vsel %vm6429_vm9, %v6418_v19, 0.0 }
0x3081   :  { %6447 = vadd.xlane.f32.xlu1 %v6446_v23 }
0x30af   :  { %v6432_v50 = vpop.xlane.xlu0 %6431 }
0x30b0   :  { %v6433_v29 = vmul.f32 0.0078125, %v6432_v50 }
0x30b2   :  { %v6434_v45 = vsub.f32 %v10654_v22, %v6433_v29 }
0x30b4   :  { %v6435_v17 = vmul.f32 %v6434_v45, %v6434_v45 }
0x30b6   :  { %v6436_v55 = vsel %vm6429_vm9, %v6435_v17, 0.0 }
0x30b7   :  { %6437 = vadd.xlane.f32.xlu0 %v6436_v55 }
0x310c   :  { %v7239_v51 = vpop.f32.mrb[148].mxu0 }
0x310d   :  { %v7273_v18 = vpop.f32.mrb[152].mxu1  ;;  %v7240_v61 = vpop.f32.mrb[149].mxu0 }
0x310e   :  { %v7241_v28 = vadd.f32 %v7240_v61, %v7239_v51  ;;  %v7274_v16 = vpop.f32.mrb[153].mxu1  ;;  %v6448_v13 = vpop.xlane.xlu1 %6447 }
0x310f   :  { %v7275_v32 = vadd.f32 %v7274_v16, %v7273_v18  ;;  %v7276_v63 = vpop.f32.mrb[154].mxu1  ;;  %v6449_v49 = vmul.f32 0.0078125, %v6448_v13  ;;  %v7242_v36 = vpop.f32.mrb[150].mxu0 }
0x3110   :  { %v6352_v40 = vadd.f32 %v7241_v28, %v10649_v48  ;;  %v7243_v21 = vpop.f32.mrb[151].mxu0  ;;  %v7277_v42 = vpop.f32.mrb[155].mxu1 }
0x3111   :  { %v6450_v3 = vsub.f32 %v6418_v19, %v6449_v49  ;;  %v7244_v22 = vadd.f32 %v7243_v21, %v7242_v36  ;;  %v7278_v31 = vadd.f32 %v7277_v42, %v7276_v63 }
0x3112   :  { %v6409_v25 = vadd.f32 %v7275_v32, %v6352_v40 }
0x3113   :  { %v6355_v39 = vadd.f32 %v7244_v22, %v10649_v48  ;;  %v6451_v24 = vmul.f32 %v6450_v3, %v6450_v3 }
0x3114   :  { %v6419_v9 = vadd.f32 %v6409_v25, %v10405_v5  ;;  %v6427_v5 = vld [vmem:[%s10733_s17] sm:$0x1] }
0x3115   :  { %v6412_v44 = vadd.f32 %v7278_v31, %v6355_v39  ;;  %v6452_v37 = vsel %vm6429_vm9, %v6451_v24, 0.0 }
0x3116   :  { %6425 = vst [vmem:[%s10735_s19 + $0x20] sm:$0xff] %v6419_v9  ;;  %6453 = vadd.xlane.f32.xlu1 %v6452_v37 }
0x3117   :  { %v6420_v1 = vadd.f32 %v6412_v44, %v10411_v62 }
0x3119   :  { %6426 = vst [vmem:[%s10735_s19 + $0x28] sm:$0xff] %v6420_v1  ;;  %s8443_s19 = smov [#allocation3]  }
0x311a   :  { %s6470_s3 = sshll.u32 %s8443_s19, 4  ;;  %s6471_s3 = int_to_ptr.vmem [resolvable:$true] %s6470_s3 }
0x311b   :  { %s8412_s17 = scalar_lea.vmem %s6471_s3, 32  ;;  %p8417_p1 = scmp.lt.s32.totalorder %s6471_s3, %s6471_s3 }
0x311c   :  { %p8413_p0 = scmp.ne.s32.totalorder %s6471_s3, %s8412_s17  ;;  %p8418_p2 = scmp.lt.s32.totalorder %s8412_s17, %s8412_s17 }
0x311e   :  { %p8419_p3 = por %p8418_p2, %p8417_p1 }
0x3120   :  { %p8420_p4 = pnand %p8419_p3, %p8413_p0 }
0x3144   :  { %v6438_v0 = vpop.xlane.xlu0 %6437 }
0x3145   :  { %v6439_v30 = vmul.f32 0.0078125, %v6438_v0 }
0x3147   :  { %v6440_v48 = vadd.f32 1e-05, %v6439_v30 }
0x3149   :  { %8408 = vrsqrt.f32 %v6440_v48 }
0x3153   :  { %v8409_v58 = vpop.eup %8408 }
0x3154   :  { %v6442_v52 = vmul.f32 %v8409_v58, %v6434_v45 }
0x3156   :  { %v6443_v38 = vmul.f32 %v6442_v52, %v6427_v5 }
0x3158   :  { %v6444_v62 = vadd.f32 %v6443_v38, %v6428_v26 }
0x315a   :  { %6445 = vst [vmem:[#allocation3] sm:$0x1] %v6444_v62 }
0x31a3   :  { %v6454_v59 = vpop.xlane.xlu1 %6453 }
0x31a4   :  { %v6455_v8 = vmul.f32 0.0078125, %v6454_v59 }
0x31a6   :  { %v6456_v43 = vadd.f32 1e-05, %v6455_v8 }
0x31a8   :  { %8410 = vrsqrt.f32 %v6456_v43 }
0x31b2   :  { %v8411_v20 = vpop.eup %8410 }
0x31b3   :  { %v6458_v54 = vmul.f32 %v8411_v20, %v6450_v3 }
0x31b5   :  { %v6459_v53 = vmul.f32 %v6458_v54, %v6427_v5 }
0x31b7   :  { %v6460_v33 = vadd.f32 %v6459_v53, %v6428_v26 }
0x31b9   :  { %6461 = vst [vmem:[#allocation3 + $0x1] sm:$0x1] %v6460_v33 }
0x31ba   :  { %8423 = shalt.err (!%p8420_p4)
}
0x31bb   :  { %s8424_s7 = scalar_lea.hbm %s10736_s20, 32 }
0x31bc   :  { %p8425_p5 = scmp.ne.s32.totalorder %s10736_s20, %s8424_s7  ;;  %p8428_p6 = scmp.lt.u32.totalorder %s8424_s7, %s10736_s20 }
0x31be   :  { %p8430_p7 = pnand %p8428_p6, %p8425_p5 }
0x31c0   :  { %8433 = shalt.err (!%p8430_p7)
}
0x31c1   :  { %6473 = dma.vmem_to_hbm [thread:$0]  %s6471_s3, 32, %s10736_s20, [#allocation4]  }
0x31c2   :  { %8434 = dma.done.wait [#allocation4], 32  }
0x31c3   :  { %8435 = vsyncadd [#allocation4], 4294967264 }
0x31c4   :  { %6479 = vsyncpa [#allocation4], 1 }

</bundles_post_ra>
